<compile_context>
chip_gen: v7x
topology: tpu7x:2x2x1
jax: 0.10.0
libtpu: 0.0.40
codegen_flags: <defaults>
</compile_context>

<pallas_src>
import functools

import jax
import jax.numpy as jnp
from jax import lax
from jax.experimental import pallas as pl
from jax.experimental.pallas import tpu as pltpu

EPS = 1e-3  # BatchNorm eps used by the pl_bolts YOLO Conv blocks


def _silu(v):
    # divide -> EUP approximate reciprocal (free VLIW slot next to the exp)
    return v * pl.reciprocal(1.0 + jnp.exp(-v), approx=True)


def _silu_ref(v):
    return v * jax.nn.sigmoid(v)


# ----------------------------------------------------------------------------- kernel
def _bottleneck_kernel(x_ref, w1_ref, b1_ref, w2_ref, b2_ref, o_ref,
                       yp_ref, slab_ref, *, shortcut):
    """Fused 1x1 conv -> SiLU -> 3x3 conv -> SiLU (+ residual) for Nb images."""
    Nb, H, W, Cin = x_ref.shape
    Ch = w1_ref.shape[1]
    Cout = w2_ref.shape[1]
    HW = H * W

    # ---- zero ONLY the 1-pixel halo of the padded bf16 activation scratch --------
    # (interior is fully overwritten below; never gate this on program_id: with
    #  ("parallel",) each TensorCore owns its scratch and may never see step 0)
    zrow = jnp.zeros((Nb, 1, W + 2, Ch), jnp.bfloat16)
    zcol = jnp.zeros((Nb, H, 1, Ch), jnp.bfloat16)
    yp_ref[:, 0:1, :, :] = zrow
    yp_ref[:, H + 1:H + 2, :, :] = zrow
    yp_ref[:, 1:H + 1, 0:1, :] = zcol
    yp_ref[:, 1:H + 1, W + 1:W + 2, :] = zcol

    # ---- 1x1 conv (+ folded BN) + SiLU: one bf16 matmul over all Nb*H*W pixels ----
    x2 = x_ref[...].reshape(Nb * HW, Cin).astype(jnp.bfloat16)
    s1 = jnp.dot(x2, w1_ref[...], preferred_element_type=jnp.float32)     # (M, Ch)
    y1 = _silu(s1 + b1_ref[...])
    # single f32 -> bf16 cast; hidden activation never leaves VMEM
    yp_ref[:, 1:H + 1, 1:W + 1, :] = y1.astype(jnp.bfloat16).reshape(Nb, H, W, Ch)

    # ---- in-kernel im2col: 9 shifted copies into the lane-dense bf16 slab ---------
    # slab column block t*Ch..(t+1)*Ch matches w2f.reshape(9*Ch, Cout) tap ordering
    # (t = ky*3 + kx).
    for t in range(9):
        ky, kx = divmod(t, 3)
        win = yp_ref[:, ky:ky + H, kx:kx + W, :]                          # (Nb,H,W,Ch)
        slab_ref[:, t * Ch:(t + 1) * Ch] = win.reshape(Nb * HW, Ch)

    # ---- 3x3 conv as ONE deep-K (K = 9*Ch) MXU matmul; per-image epilogue ---------
    for b in range(Nb):
        s2 = jnp.dot(slab_ref[b * HW:(b + 1) * HW, :], w2_ref[...],
                     preferred_element_type=jnp.float32)                  # (HW, Cout)
        y2 = _silu(s2 + b2_ref[...])
        if shortcut:
            y2 = y2 + x_ref[b].reshape(HW, Cin)          # residual add in f32
        o_ref[b] = y2.reshape(H, W, Cout).astype(o_ref.dtype)


# ----------------------------------------------------------------------------- wrapper
def bottleneck_forward(x_nhwc, folded, *, shortcut, images_per_step=2,
                       vmem_limit_bytes=48 * 1024 * 1024):
    """x_nhwc: (N,H,W,Cin) f32.  folded: (w1f, b1, w2f, b2) with BN folded in."""
    w1f, b1, w2f, b2 = folded
    N, H, W, Cin = x_nhwc.shape
    Ch = w1f.shape[1]
    Cout = w2f.shape[1]
    if shortcut:
        assert Cin == Cout

    # images per grid step (amortizes the ~0.35us per-step overhead); keep N % Nb == 0
    Nb = max(1, min(images_per_step, N))
    while N % Nb:
        Nb -= 1

    kernel = functools.partial(_bottleneck_kernel, shortcut=shortcut)
    return pl.pallas_call(
        kernel,
        out_shape=jax.ShapeDtypeStruct((N, H, W, Cout), jnp.float32),
        grid=(N // Nb,),   # keep >= 2 steps so both v7x TensorCores are used
        in_specs=[
            pl.BlockSpec((Nb, H, W, Cin), lambda n: (n, 0, 0, 0)),   # x (f32)
            pl.BlockSpec((Cin, Ch), lambda n: (0, 0)),               # w1 folded (bf16)
            pl.BlockSpec((1, Ch), lambda n: (0, 0)),                 # bias1 (f32)
            pl.BlockSpec((9 * Ch, Cout), lambda n: (0, 0)),          # w2 folded (bf16)
            pl.BlockSpec((1, Cout), lambda n: (0, 0)),               # bias2 (f32)
        ],
        out_specs=pl.BlockSpec((Nb, H, W, Cout), lambda n: (n, 0, 0, 0)),
        scratch_shapes=[
            pltpu.VMEM((Nb, H + 2, W + 2, Ch), jnp.bfloat16),        # padded activation
            pltpu.VMEM((Nb * H * W, 9 * Ch), jnp.bfloat16),          # im2col slab
        ],
        compiler_params=pltpu.CompilerParams(
            dimension_semantics=("parallel",),
            vmem_limit_bytes=vmem_limit_bytes,   # headroom under v7x's 64 MiB physical
        ),
    )(x_nhwc, w1f, b1, w2f, b2)


# ----------------------------------------------------------------------------- params
def init_params(key, cin, cout, hidden):
    k1, k2, k3, k4 = jax.random.split(key, 4)

    def bn_init(k, c):
        ka, kb, kc, kd = jax.random.split(k, 4)
        gamma = 1.0 + 0.1 * jax.random.normal(ka, (c,), jnp.float32)
        beta = 0.1 * jax.random.normal(kb, (c,), jnp.float32)
        mean = 0.1 * jax.random.normal(kc, (c,), jnp.float32)
        var = jnp.abs(1.0 + 0.1 * jax.random.normal(kd, (c,), jnp.float32))
        return gamma, beta, mean, var

    w1 = jax.random.normal(k1, (1, 1, cin, hidden), jnp.float32) / jnp.sqrt(float(cin))
    w2 = jax.random.normal(k2, (3, 3, hidden, cout), jnp.float32) / jnp.sqrt(float(9 * hidden))
    return {"w1": w1, "bn1": bn_init(k3, hidden), "w2": w2, "bn2": bn_init(k4, cout)}


def fold_params(raw):
    """Fold inference-mode BatchNorm scale into the conv weights; cast to bf16."""
    def fold(w, bn):
        g, b, m, v = bn
        s = g * lax.rsqrt(v + EPS)
        wf = (w * s).astype(jnp.bfloat16)                         # scale over Cout (last dim)
        bias = (b - m * s).reshape(1, -1).astype(jnp.float32)
        return wf, bias

    w1f, b1 = fold(raw["w1"], raw["bn1"])
    w2f, b2 = fold(raw["w2"], raw["bn2"])
    cin, ch = w1f.shape[2], w1f.shape[3]
    cout = w2f.shape[3]
    # tap order (ky, kx, Ch) of this reshape matches the kernel's slab column blocks
    return (w1f.reshape(cin, ch), b1, w2f.reshape(9 * ch, cout), b2)


# ----------------------------------------------------------------------------- reference
def reference_forward(x_nhwc, raw, *, shortcut):
    """Pure-JAX/XLA reference (unfolded conv + BN + SiLU), f32 HIGHEST precision."""
    dn = ("NHWC", "HWIO", "NHWC")

    def conv_bn_silu(x, w, bn, pad):
        y = lax.conv_general_dilated(x, w, (1, 1), [(pad, pad), (pad, pad)],
                                     dimension_numbers=dn,
                                     precision=lax.Precision.HIGHEST)
        g, b, m, v = bn
        y = (y - m) * (g * lax.rsqrt(v + EPS)) + b
        return _silu_ref(y)

    y = conv_bn_silu(x_nhwc, raw["w1"], raw["bn1"], 0)   # 1x1, pad 0
    y = conv_bn_silu(y, raw["w2"], raw["bn2"], 1)        # 3x3, pad 1
    return x_nhwc + y if shortcut else y


# ----------------------------------------------------------------------------- main
if __name__ == "__main__":
    key = jax.random.PRNGKey(0)
    k_param, k_in = jax.random.split(key)

    N, H, W = 4, 16, 16
    CIN = COUT = 128       # shortcut requires in == out; 128 keeps stores lane-dense
    CHID = 64              # bottleneck hidden width
    NB = 2                 # images per grid step (N // NB = 2 grid steps)

    raw = init_params(k_param, CIN, COUT, CHID)
    folded = fold_params(raw)
    shortcut = CIN == COUT

    x_nchw = jax.random.normal(k_in, (N, CIN, H, W), jnp.float32)
    x_nhwc = jnp.transpose(x_nchw, (0, 2, 3, 1))         # NCHW -> NHWC

    fwd = jax.jit(functools.partial(bottleneck_forward, shortcut=shortcut,
                                    images_per_step=NB))
    out_nhwc = fwd(x_nhwc, folded)
    out_nchw = jnp.transpose(out_nhwc, (0, 3, 1, 2))     # back to NCHW
    jax.block_until_ready(out_nchw)

    ref_nchw = jnp.transpose(
        reference_forward(x_nhwc, raw, shortcut=shortcut), (0, 3, 1, 2))
    err = float(jnp.max(jnp.abs(out_nchw - ref_nchw)))

    assert out_nchw.shape == (N, COUT, H, W)
    assert bool(jnp.isfinite(out_nchw).all())
    assert err < 0.1, f"max abs error vs reference too large: {err}"
    print("KERNEL_OK")
</pallas_src>

<mosaic_0001>
module attributes {stable_mosaic.version = 11 : i64} {
  func.func @_bottleneck_kernel(%arg0: i32, %arg1: memref<2x16x16x128xf32, #tpu.memory_space<vmem>>, %arg2: memref<128x64xbf16, #tpu.memory_space<vmem>>, %arg3: memref<1x64xf32, #tpu.memory_space<vmem>>, %arg4: memref<576x128xbf16, #tpu.memory_space<vmem>>, %arg5: memref<1x128xf32, #tpu.memory_space<vmem>>, %arg6: memref<2x16x16x128xf32, #tpu.memory_space<vmem>>, %arg7: memref<2x18x18x64xbf16, #tpu.memory_space<vmem>>, %arg8: memref<512x576xbf16, #tpu.memory_space<vmem>>) attributes {dimension_semantics = [#tpu.dimension_semantics<parallel>], iteration_bounds = array<i64: 2>, scalar_prefetch = 0 : i64, scratch_operands = 2 : i64, tpu.core_type = #tpu.core_type<tc>, window_params = [{transform_indices = @transform_0, window_bounds = array<i64: 2, 16, 16, 128>}, {pipeline_mode = #tpu.pipeline_mode<synchronous>, transform_indices = @transform_1, window_bounds = array<i64: 128, 64>}, {pipeline_mode = #tpu.pipeline_mode<synchronous>, transform_indices = @transform_2, window_bounds = array<i64: 1, 64>}, {pipeline_mode = #tpu.pipeline_mode<synchronous>, transform_indices = @transform_3, window_bounds = array<i64: 576, 128>}, {pipeline_mode = #tpu.pipeline_mode<synchronous>, transform_indices = @transform_4, window_bounds = array<i64: 1, 128>}, {transform_indices = @transform_5, window_bounds = array<i64: 2, 16, 16, 128>}]} {
    %cst = arith.constant 0.000000e+00 : bf16
    %0 = vector.broadcast %cst : bf16 to vector<2x1x18x64xbf16>
    %cst_0 = arith.constant 0.000000e+00 : bf16
    %1 = vector.broadcast %cst_0 : bf16 to vector<2x16x1x64xbf16>
    %c0 = arith.constant 0 : index
    %c0_1 = arith.constant 0 : index
    %c0_2 = arith.constant 0 : index
    %c0_3 = arith.constant 0 : index
    %2 = vector.load %arg7[%c0, %c0_1, %c0_2, %c0_3] : memref<2x18x18x64xbf16, #tpu.memory_space<vmem>>, vector<2x1x18x64xbf16>
    tpu.vector_store %arg7[%c0, %c0_1, %c0_2, %c0_3], %0 {strides = array<i32>} : memref<2x18x18x64xbf16, #tpu.memory_space<vmem>>, vector<2x1x18x64xbf16>,
    %c0_4 = arith.constant 0 : index
    %c17 = arith.constant 17 : index
    %c0_5 = arith.constant 0 : index
    %c0_6 = arith.constant 0 : index
    %3 = vector.load %arg7[%c0_4, %c17, %c0_5, %c0_6] : memref<2x18x18x64xbf16, #tpu.memory_space<vmem>>, vector<2x1x18x64xbf16>
    tpu.vector_store %arg7[%c0_4, %c17, %c0_5, %c0_6], %0 {strides = array<i32>} : memref<2x18x18x64xbf16, #tpu.memory_space<vmem>>, vector<2x1x18x64xbf16>,
    %c0_7 = arith.constant 0 : index
    %c1 = arith.constant 1 : index
    %c0_8 = arith.constant 0 : index
    %c0_9 = arith.constant 0 : index
    %4 = vector.load %arg7[%c0_7, %c1, %c0_8, %c0_9] : memref<2x18x18x64xbf16, #tpu.memory_space<vmem>>, vector<2x16x1x64xbf16>
    tpu.vector_store %arg7[%c0_7, %c1, %c0_8, %c0_9], %1 {strides = array<i32>} : memref<2x18x18x64xbf16, #tpu.memory_space<vmem>>, vector<2x16x1x64xbf16>,
    %c0_10 = arith.constant 0 : index
    %c1_11 = arith.constant 1 : index
    %c17_12 = arith.constant 17 : index
    %c0_13 = arith.constant 0 : index
    %5 = vector.load %arg7[%c0_10, %c1_11, %c17_12, %c0_13] : memref<2x18x18x64xbf16, #tpu.memory_space<vmem>>, vector<2x16x1x64xbf16>
    tpu.vector_store %arg7[%c0_10, %c1_11, %c17_12, %c0_13], %1 {strides = array<i32>} : memref<2x18x18x64xbf16, #tpu.memory_space<vmem>>, vector<2x16x1x64xbf16>,
    %c0_14 = arith.constant 0 : index
    %c0_15 = arith.constant 0 : index
    %c0_16 = arith.constant 0 : index
    %c0_17 = arith.constant 0 : index
    %6 = vector.load %arg1[%c0_14, %c0_15, %c0_16, %c0_17] : memref<2x16x16x128xf32, #tpu.memory_space<vmem>>, vector<2x16x16x128xf32>
    %7 = vector.shape_cast %6 : vector<2x16x16x128xf32> to vector<512x128xf32>
    %8 = arith.truncf %7 : vector<512x128xf32> to vector<512x128xbf16>
    %c0_18 = arith.constant 0 : index
    %c0_19 = arith.constant 0 : index
    %9 = vector.load %arg2[%c0_18, %c0_19] : memref<128x64xbf16, #tpu.memory_space<vmem>>, vector<128x64xbf16>
    %cst_20 = arith.constant dense<0.000000e+00> : vector<512x64xf32>
    %10 = tpu.matmul %8, %9, %cst_20 {dimension_numbers = #tpu.dot_dimension_numbers<[1], [0], [0], [1], [0, 0, 1, 1], [], []>} : vector<512x128xbf16>, vector<128x64xbf16>, vector<512x64xf32> -> vector<512x64xf32>
    %c0_21 = arith.constant 0 : index
    %c0_22 = arith.constant 0 : index
    %11 = vector.load %arg3[%c0_21, %c0_22] : memref<1x64xf32, #tpu.memory_space<vmem>>, vector<1x64xf32>
    %12 = vector.broadcast %11 : vector<1x64xf32> to vector<512x64xf32>
    %13 = arith.addf %10, %12 : vector<512x64xf32>
    %cst_23 = arith.constant 0.000000e+00 : f32
    %14 = vector.broadcast %cst_23 : f32 to vector<512x64xf32>
    %15 = arith.subf %14, %13 : vector<512x64xf32>
    %16 = math.exp %15 : vector<512x64xf32>
    %cst_24 = arith.constant 1.000000e+00 : f32
    %17 = vector.broadcast %cst_24 : f32 to vector<512x64xf32>
    %18 = arith.addf %17, %16 : vector<512x64xf32>
    %19 = tpu.reciprocal %18 {approx = true} : vector<512x64xf32> -> vector<512x64xf32>
    %20 = arith.mulf %13, %19 : vector<512x64xf32>
    %21 = arith.truncf %20 : vector<512x64xf32> to vector<512x64xbf16>
    %22 = vector.shape_cast %21 : vector<512x64xbf16> to vector<2x16x16x64xbf16>
    %c0_25 = arith.constant 0 : index
    %c1_26 = arith.constant 1 : index
    %c1_27 = arith.constant 1 : index
    %c0_28 = arith.constant 0 : index
    %23 = vector.load %arg7[%c0_25, %c1_26, %c1_27, %c0_28] : memref<2x18x18x64xbf16, #tpu.memory_space<vmem>>, vector<2x16x16x64xbf16>
    tpu.vector_store %arg7[%c0_25, %c1_26, %c1_27, %c0_28], %22 {strides = array<i32>} : memref<2x18x18x64xbf16, #tpu.memory_space<vmem>>, vector<2x16x16x64xbf16>,
    %c0_29 = arith.constant 0 : index
    %c0_30 = arith.constant 0 : index
    %c0_31 = arith.constant 0 : index
    %c0_32 = arith.constant 0 : index
    %24 = vector.load %arg7[%c0_29, %c0_30, %c0_31, %c0_32] : memref<2x18x18x64xbf16, #tpu.memory_space<vmem>>, vector<2x16x16x64xbf16>
    %25 = vector.shape_cast %24 : vector<2x16x16x64xbf16> to vector<512x64xbf16>
    %c0_33 = arith.constant 0 : index
    %c0_34 = arith.constant 0 : index
    %26 = vector.load %arg8[%c0_33, %c0_34] : memref<512x576xbf16, #tpu.memory_space<vmem>>, vector<512x64xbf16>
    tpu.vector_store %arg8[%c0_33, %c0_34], %25 {strides = array<i32>} : memref<512x576xbf16, #tpu.memory_space<vmem>>, vector<512x64xbf16>,
    %c0_35 = arith.constant 0 : index
    %c0_36 = arith.constant 0 : index
    %c1_37 = arith.constant 1 : index
    %c0_38 = arith.constant 0 : index
    %27 = vector.load %arg7[%c0_35, %c0_36, %c1_37, %c0_38] : memref<2x18x18x64xbf16, #tpu.memory_space<vmem>>, vector<2x16x16x64xbf16>
    %28 = vector.shape_cast %27 : vector<2x16x16x64xbf16> to vector<512x64xbf16>
    %c0_39 = arith.constant 0 : index
    %c64 = arith.constant 64 : index
    %29 = vector.load %arg8[%c0_39, %c64] : memref<512x576xbf16, #tpu.memory_space<vmem>>, vector<512x64xbf16>
    tpu.vector_store %arg8[%c0_39, %c64], %28 {strides = array<i32>} : memref<512x576xbf16, #tpu.memory_space<vmem>>, vector<512x64xbf16>,
    %c0_40 = arith.constant 0 : index
    %c0_41 = arith.constant 0 : index
    %c2 = arith.constant 2 : index
    %c0_42 = arith.constant 0 : index
    %30 = vector.load %arg7[%c0_40, %c0_41, %c2, %c0_42] : memref<2x18x18x64xbf16, #tpu.memory_space<vmem>>, vector<2x16x16x64xbf16>
    %31 = vector.shape_cast %30 : vector<2x16x16x64xbf16> to vector<512x64xbf16>
    %c0_43 = arith.constant 0 : index
    %c128 = arith.constant 128 : index
    %32 = vector.load %arg8[%c0_43, %c128] : memref<512x576xbf16, #tpu.memory_space<vmem>>, vector<512x64xbf16>
    tpu.vector_store %arg8[%c0_43, %c128], %31 {strides = array<i32>} : memref<512x576xbf16, #tpu.memory_space<vmem>>, vector<512x64xbf16>,
    %c0_44 = arith.constant 0 : index
    %c1_45 = arith.constant 1 : index
    %c0_46 = arith.constant 0 : index
    %c0_47 = arith.constant 0 : index
    %33 = vector.load %arg7[%c0_44, %c1_45, %c0_46, %c0_47] : memref<2x18x18x64xbf16, #tpu.memory_space<vmem>>, vector<2x16x16x64xbf16>
    %34 = vector.shape_cast %33 : vector<2x16x16x64xbf16> to vector<512x64xbf16>
    %c0_48 = arith.constant 0 : index
    %c192 = arith.constant 192 : index
    %35 = vector.load %arg8[%c0_48, %c192] : memref<512x576xbf16, #tpu.memory_space<vmem>>, vector<512x64xbf16>
    tpu.vector_store %arg8[%c0_48, %c192], %34 {strides = array<i32>} : memref<512x576xbf16, #tpu.memory_space<vmem>>, vector<512x64xbf16>,
    %c0_49 = arith.constant 0 : index
    %c1_50 = arith.constant 1 : index
    %c1_51 = arith.constant 1 : index
    %c0_52 = arith.constant 0 : index
    %36 = vector.load %arg7[%c0_49, %c1_50, %c1_51, %c0_52] : memref<2x18x18x64xbf16, #tpu.memory_space<vmem>>, vector<2x16x16x64xbf16>
    %37 = vector.shape_cast %36 : vector<2x16x16x64xbf16> to vector<512x64xbf16>
    %c0_53 = arith.constant 0 : index
    %c256 = arith.constant 256 : index
    %38 = vector.load %arg8[%c0_53, %c256] : memref<512x576xbf16, #tpu.memory_space<vmem>>, vector<512x64xbf16>
    tpu.vector_store %arg8[%c0_53, %c256], %37 {strides = array<i32>} : memref<512x576xbf16, #tpu.memory_space<vmem>>, vector<512x64xbf16>,
    %c0_54 = arith.constant 0 : index
    %c1_55 = arith.constant 1 : index
    %c2_56 = arith.constant 2 : index
    %c0_57 = arith.constant 0 : index
    %39 = vector.load %arg7[%c0_54, %c1_55, %c2_56, %c0_57] : memref<2x18x18x64xbf16, #tpu.memory_space<vmem>>, vector<2x16x16x64xbf16>
    %40 = vector.shape_cast %39 : vector<2x16x16x64xbf16> to vector<512x64xbf16>
    %c0_58 = arith.constant 0 : index
    %c320 = arith.constant 320 : index
    %41 = vector.load %arg8[%c0_58, %c320] : memref<512x576xbf16, #tpu.memory_space<vmem>>, vector<512x64xbf16>
    tpu.vector_store %arg8[%c0_58, %c320], %40 {strides = array<i32>} : memref<512x576xbf16, #tpu.memory_space<vmem>>, vector<512x64xbf16>,
    %c0_59 = arith.constant 0 : index
    %c2_60 = arith.constant 2 : index
    %c0_61 = arith.constant 0 : index
    %c0_62 = arith.constant 0 : index
    %42 = vector.load %arg7[%c0_59, %c2_60, %c0_61, %c0_62] : memref<2x18x18x64xbf16, #tpu.memory_space<vmem>>, vector<2x16x16x64xbf16>
    %43 = vector.shape_cast %42 : vector<2x16x16x64xbf16> to vector<512x64xbf16>
    %c0_63 = arith.constant 0 : index
    %c384 = arith.constant 384 : index
    %44 = vector.load %arg8[%c0_63, %c384] : memref<512x576xbf16, #tpu.memory_space<vmem>>, vector<512x64xbf16>
    tpu.vector_store %arg8[%c0_63, %c384], %43 {strides = array<i32>} : memref<512x576xbf16, #tpu.memory_space<vmem>>, vector<512x64xbf16>,
    %c0_64 = arith.constant 0 : index
    %c2_65 = arith.constant 2 : index
    %c1_66 = arith.constant 1 : index
    %c0_67 = arith.constant 0 : index
    %45 = vector.load %arg7[%c0_64, %c2_65, %c1_66, %c0_67] : memref<2x18x18x64xbf16, #tpu.memory_space<vmem>>, vector<2x16x16x64xbf16>
    %46 = vector.shape_cast %45 : vector<2x16x16x64xbf16> to vector<512x64xbf16>
    %c0_68 = arith.constant 0 : index
    %c448 = arith.constant 448 : index
    %47 = vector.load %arg8[%c0_68, %c448] : memref<512x576xbf16, #tpu.memory_space<vmem>>, vector<512x64xbf16>
    tpu.vector_store %arg8[%c0_68, %c448], %46 {strides = array<i32>} : memref<512x576xbf16, #tpu.memory_space<vmem>>, vector<512x64xbf16>,
    %c0_69 = arith.constant 0 : index
    %c2_70 = arith.constant 2 : index
    %c2_71 = arith.constant 2 : index
    %c0_72 = arith.constant 0 : index
    %48 = vector.load %arg7[%c0_69, %c2_70, %c2_71, %c0_72] : memref<2x18x18x64xbf16, #tpu.memory_space<vmem>>, vector<2x16x16x64xbf16>
    %49 = vector.shape_cast %48 : vector<2x16x16x64xbf16> to vector<512x64xbf16>
    %c0_73 = arith.constant 0 : index
    %c512 = arith.constant 512 : index
    %50 = vector.load %arg8[%c0_73, %c512] : memref<512x576xbf16, #tpu.memory_space<vmem>>, vector<512x64xbf16>
    tpu.vector_store %arg8[%c0_73, %c512], %49 {strides = array<i32>} : memref<512x576xbf16, #tpu.memory_space<vmem>>, vector<512x64xbf16>,
    %c0_74 = arith.constant 0 : index
    %c0_75 = arith.constant 0 : index
    %51 = vector.load %arg8[%c0_74, %c0_75] : memref<512x576xbf16, #tpu.memory_space<vmem>>, vector<256x576xbf16>
    %c0_76 = arith.constant 0 : index
    %c0_77 = arith.constant 0 : index
    %52 = vector.load %arg4[%c0_76, %c0_77] : memref<576x128xbf16, #tpu.memory_space<vmem>>, vector<576x128xbf16>
    %cst_78 = arith.constant dense<0.000000e+00> : vector<256x128xf32>
    %53 = tpu.matmul %51, %52, %cst_78 {dimension_numbers = #tpu.dot_dimension_numbers<[1], [0], [0], [1], [0, 0, 1, 1], [], []>} : vector<256x576xbf16>, vector<576x128xbf16>, vector<256x128xf32> -> vector<256x128xf32>
    %c0_79 = arith.constant 0 : index
    %c0_80 = arith.constant 0 : index
    %54 = vector.load %arg5[%c0_79, %c0_80] : memref<1x128xf32, #tpu.memory_space<vmem>>, vector<1x128xf32>
    %55 = vector.broadcast %54 : vector<1x128xf32> to vector<256x128xf32>
    %56 = arith.addf %53, %55 : vector<256x128xf32>
    %cst_81 = arith.constant 0.000000e+00 : f32
    %57 = vector.broadcast %cst_81 : f32 to vector<256x128xf32>
    %58 = arith.subf %57, %56 : vector<256x128xf32>
    %59 = math.exp %58 : vector<256x128xf32>
    %cst_82 = arith.constant 1.000000e+00 : f32
    %60 = vector.broadcast %cst_82 : f32 to vector<256x128xf32>
    %61 = arith.addf %60, %59 : vector<256x128xf32>
    %62 = tpu.reciprocal %61 {approx = true} : vector<256x128xf32> -> vector<256x128xf32>
    %63 = arith.mulf %56, %62 : vector<256x128xf32>
    %c0_83 = arith.constant 0 : index
    %c0_84 = arith.constant 0 : index
    %c0_85 = arith.constant 0 : index
    %c0_86 = arith.constant 0 : index
    %64 = vector.load %arg1[%c0_83, %c0_84, %c0_85, %c0_86] : memref<2x16x16x128xf32, #tpu.memory_space<vmem>>, vector<1x16x16x128xf32>
    %65 = vector.shape_cast %64 : vector<1x16x16x128xf32> to vector<16x16x128xf32>
    %66 = vector.shape_cast %65 : vector<16x16x128xf32> to vector<256x128xf32>
    %67 = arith.addf %63, %66 : vector<256x128xf32>
    %68 = vector.shape_cast %67 : vector<256x128xf32> to vector<16x16x128xf32>
    %c0_87 = arith.constant 0 : index
    %c0_88 = arith.constant 0 : index
    %c0_89 = arith.constant 0 : index
    %c0_90 = arith.constant 0 : index
    %69 = vector.load %arg6[%c0_87, %c0_88, %c0_89, %c0_90] : memref<2x16x16x128xf32, #tpu.memory_space<vmem>>, vector<1x16x16x128xf32>
    %70 = vector.shape_cast %69 : vector<1x16x16x128xf32> to vector<16x16x128xf32>
    %71 = vector.shape_cast %68 : vector<16x16x128xf32> to vector<1x16x16x128xf32>
    tpu.vector_store %arg6[%c0_87, %c0_88, %c0_89, %c0_90], %71 {strides = array<i32>} : memref<2x16x16x128xf32, #tpu.memory_space<vmem>>, vector<1x16x16x128xf32>,
    %c256_91 = arith.constant 256 : index
    %c0_92 = arith.constant 0 : index
    %72 = vector.load %arg8[%c256_91, %c0_92] : memref<512x576xbf16, #tpu.memory_space<vmem>>, vector<256x576xbf16>
    %c0_93 = arith.constant 0 : index
    %c0_94 = arith.constant 0 : index
    %73 = vector.load %arg4[%c0_93, %c0_94] : memref<576x128xbf16, #tpu.memory_space<vmem>>, vector<576x128xbf16>
    %cst_95 = arith.constant dense<0.000000e+00> : vector<256x128xf32>
    %74 = tpu.matmul %72, %73, %cst_95 {dimension_numbers = #tpu.dot_dimension_numbers<[1], [0], [0], [1], [0, 0, 1, 1], [], []>} : vector<256x576xbf16>, vector<576x128xbf16>, vector<256x128xf32> -> vector<256x128xf32>
    %c0_96 = arith.constant 0 : index
    %c0_97 = arith.constant 0 : index
    %75 = vector.load %arg5[%c0_96, %c0_97] : memref<1x128xf32, #tpu.memory_space<vmem>>, vector<1x128xf32>
    %76 = vector.broadcast %75 : vector<1x128xf32> to vector<256x128xf32>
    %77 = arith.addf %74, %76 : vector<256x128xf32>
    %cst_98 = arith.constant 0.000000e+00 : f32
    %78 = vector.broadcast %cst_98 : f32 to vector<256x128xf32>
    %79 = arith.subf %78, %77 : vector<256x128xf32>
    %80 = math.exp %79 : vector<256x128xf32>
    %cst_99 = arith.constant 1.000000e+00 : f32
    %81 = vector.broadcast %cst_99 : f32 to vector<256x128xf32>
    %82 = arith.addf %81, %80 : vector<256x128xf32>
    %83 = tpu.reciprocal %82 {approx = true} : vector<256x128xf32> -> vector<256x128xf32>
    %84 = arith.mulf %77, %83 : vector<256x128xf32>
    %c1_100 = arith.constant 1 : index
    %c0_101 = arith.constant 0 : index
    %c0_102 = arith.constant 0 : index
    %c0_103 = arith.constant 0 : index
    %85 = vector.load %arg1[%c1_100, %c0_101, %c0_102, %c0_103] : memref<2x16x16x128xf32, #tpu.memory_space<vmem>>, vector<1x16x16x128xf32>
    %86 = vector.shape_cast %85 : vector<1x16x16x128xf32> to vector<16x16x128xf32>
    %87 = vector.shape_cast %86 : vector<16x16x128xf32> to vector<256x128xf32>
    %88 = arith.addf %84, %87 : vector<256x128xf32>
    %89 = vector.shape_cast %88 : vector<256x128xf32> to vector<16x16x128xf32>
    %c1_104 = arith.constant 1 : index
    %c0_105 = arith.constant 0 : index
    %c0_106 = arith.constant 0 : index
    %c0_107 = arith.constant 0 : index
    %90 = vector.load %arg6[%c1_104, %c0_105, %c0_106, %c0_107] : memref<2x16x16x128xf32, #tpu.memory_space<vmem>>, vector<1x16x16x128xf32>
    %91 = vector.shape_cast %90 : vector<1x16x16x128xf32> to vector<16x16x128xf32>
    %92 = vector.shape_cast %89 : vector<16x16x128xf32> to vector<1x16x16x128xf32>
    tpu.vector_store %arg6[%c1_104, %c0_105, %c0_106, %c0_107], %92 {strides = array<i32>} : memref<2x16x16x128xf32, #tpu.memory_space<vmem>>, vector<1x16x16x128xf32>,
    return
  }
  func.func @transform_0(%arg0: i32) -> (i32, i32, i32, i32) {
    %c0_i32 = arith.constant 0 : i32
    %c0_i32_0 = arith.constant 0 : i32
    %c0_i32_1 = arith.constant 0 : i32
    %c0_i32_2 = arith.constant 0 : i32
    return %arg0, %c0_i32, %c0_i32_0, %c0_i32_1 : i32, i32, i32, i32
  }
  func.func @transform_1(%arg0: i32) -> (i32, i32) {
    %c0_i32 = arith.constant 0 : i32
    %c0_i32_0 = arith.constant 0 : i32
    %c0_i32_1 = arith.constant 0 : i32
    return %c0_i32, %c0_i32_0 : i32, i32
  }
  func.func @transform_2(%arg0: i32) -> (i32, i32) {
    %c0_i32 = arith.constant 0 : i32
    %c0_i32_0 = arith.constant 0 : i32
    %c0_i32_1 = arith.constant 0 : i32
    return %c0_i32, %c0_i32_0 : i32, i32
  }
  func.func @transform_3(%arg0: i32) -> (i32, i32) {
    %c0_i32 = arith.constant 0 : i32
    %c0_i32_0 = arith.constant 0 : i32
    %c0_i32_1 = arith.constant 0 : i32
    return %c0_i32, %c0_i32_0 : i32, i32
  }
  func.func @transform_4(%arg0: i32) -> (i32, i32) {
    %c0_i32 = arith.constant 0 : i32
    %c0_i32_0 = arith.constant 0 : i32
    %c0_i32_1 = arith.constant 0 : i32
    return %c0_i32, %c0_i32_0 : i32, i32
  }
  func.func @transform_5(%arg0: i32) -> (i32, i32, i32, i32) {
    %c0_i32 = arith.constant 0 : i32
    %c0_i32_0 = arith.constant 0 : i32
    %c0_i32_1 = arith.constant 0 : i32
    %c0_i32_2 = arith.constant 0 : i32
    return %arg0, %c0_i32, %c0_i32_0, %c0_i32_1 : i32, i32, i32, i32
  }
}

</mosaic_0001>

<bundles_post_ra>
// kernel: bottleneck_forward.1
= control target key start
LH: loop header
LB: loop body
LE: loop exit
PB: predicated region body
PF: predicated region fallthrough
CT: control target
= control target key end

     0   :  { %10 = vsyncpa [#allocation5], 0  ;;  %s17229_s0 = inlined_call_operand.hbm [shape: f32[4,16,16,128], index: 0, kind: input, shape index: {}]   ;;  %s17230_s1 = inlined_call_operand.vmem [shape: bf16[128,64], index: 1, kind: input, shape index: {}]   ;;  %s17231_s2 = inlined_call_operand.vmem [shape: f32[1,64], index: 2, kind: input, shape index: {}]   ;;  %s17232_s3 = inlined_call_operand.hbm [shape: bf16[576,128], index: 3, kind: input, shape index: {}]   ;;  %s17233_s4 = inlined_call_operand.vmem [shape: f32[1,128], index: 4, kind: input, shape index: {}]   ;;  %s17234_s5 = inlined_call_operand.hbm [shape: f32[4,16,16,128], index: 5, kind: output, shape index: {}]  }
   0x1   :  { %12 = vsyncpa [#allocation5 + $0x1], 0 }
   0x2   :  { %13 = vsyncpa [#allocation8], 0 }
   0x3   :  { %14 = vsyncpa [#allocation6], 0 }
   0x4   :  { %16 = vsyncpa [#allocation6 + $0x1], 0  ;;  %s13123_s18 = smov 0   ;;  %s13125_s19 = smov 0  }
   0x5   :  { %s13127_s20 = smov 0   ;;  %s13129_s21 = smov 0  }
   0x6 LB: > { %s13144_s22 = sadd.s32 4294967295, %s13080_s21   ;;  %s10792_s23 = sadd.s32 4294967294, %s13080_s21   ;;  %s13080_s21 = sphi %s13129_s21, %s17419_s21   ;;  %s13076_s20 = sphi %s13127_s20, %s17418_s20   ;;  %s13072_s19 = sphi %s13125_s19, %s17417_s19   ;;  %s13068_s18 = sphi %s13123_s18, %s17416_s18  }
   0x7   : > { %p42_p0 = scmp.ne.s32.totalorder %s13072_s19, %s13068_s18  ;;  %p17235_p1 = scmp.eq.s32.totalorder %s13144_s22, 0 }
   0x8   : > { %p156_p3 = scmp.eq.s32.totalorder %s10792_s23, 1  ;;  %p10793_p5 = scmp.ge.s32.totalorder %s13080_s21, 1 }
   0x9   : > { %p13153_p4 = por %p17235_p1, %p42_p0  ;;  %p163_p7 = scmp.lt.s32.totalorder %s13080_s21, 3 }
   0xa   : > { %p13158_p6 = por %p156_p3, %p42_p0  ;;  %s13082_s27 = smov [#allocation7]  }
   0xb   : > { %s17244_s24 = scalar_select %p13153_p4, 1, 0 }
   0xc   : > { %s17245_s25 = scalar_select %p13158_p6, 1, 0 }
   0xd   : > { %p13163_p8 = pnand %p10793_p5, %p163_p7  ;;  %s181_s28 = sshll.u32 %s13082_s27, 4  ;;  %s13167_s28 = int_to_ptr.vmem [resolvable:$true] %s181_s28 }
   0xe   : > { %s13179_s30 = sadd.s32 1, %s13080_s21   ;;  %s29_s6 = sadd.s32 1, %s13076_s20 }
   0xf   : > { %s17246_s26 = scalar_select %p13163_p8, 1, 0 }
  0x10   : > { %p12201_p9 = pneg %p13163_p8  ;;  %s26_s7 = ssub.s32 %s13080_s21, %s13179_s30 }
  0x11   : > { %s12952_s10 = scalar_lea.hbm %s17232_s3, 4608 }
  0x12   : > { %p13174_p11 = pnand %p12201_p9, %p17235_p1  ;;  %p12953_p12 = scmp.ne.s32.totalorder %s17232_s3, %s12952_s10 }
  0x13   : > { %p12959_p5 = scmp.lt.u32.totalorder %s12952_s10, %s17232_s3 }
  0x14   : > { %p12954_p13 = pneg %p13174_p11 }
  0x16   : > { %p12955_p0 = pnand %p12954_p13, %p12953_p12 }
  0x18   : > { %p12956_p3 = pneg %p12955_p0 }
  0x1a   : > { %p12961_p7 = pnand %p12959_p5, %p12956_p3 }
  0x1c   : > { %12964 = shalt.err (!%p12961_p7)
}
  0x1d   : > { %s12965_s15 = scalar_lea.vmem %s13167_s28, 4608  ;;  %p12973_p2 = scmp.lt.s32.totalorder %s13167_s28, %s13167_s28 }
  0x1e   : > { %p12966_p9 = scmp.ne.s32.totalorder %s13167_s28, %s12965_s15  ;;  %p12974_p6 = scmp.lt.s32.totalorder %s12965_s15, %s12965_s15 }
  0x20   : > { %p12968_p10 = pnand %p12966_p9, %p12954_p13  ;;  %p12975_p4 = por %p12974_p6, %p12973_p2 }
  0x22   : > { %p12969_p1 = pneg %p12968_p10 }
  0x24   : > { %p12976_p8 = pnand %p12975_p4, %p12969_p1 }
  0x26   : > { %12979 = shalt.err (!%p12976_p8)
}
  0x27   : > { %s13083_s16 = smov 64   ;;  %s13084_s17 = smov 4  }
  0x28   : > { %12204 = dma.hbm_to_vmem [thread:$0]  (!%p13174_p11), %s17232_s3, 4608, %s13167_s28, [#allocation8], %s13083_s16, %s13083_s16, %s13084_s17  }
  0x29   : > { %p27_p2 = scmp.eq.s32.totalorder %s26_s7, 0  ;;  %p36_p1 = scmp.ne.s32.totalorder %s13076_s20, %s13072_s19 }
  0x2a   : > { %p37_p4 = scmp.eq.s32.totalorder %s13080_s21, 0  ;;  %p12214_p6 = scmp.lt.s32.totalorder %s13080_s21, 2 }
  0x2b   : > { %s13210_s8 = scalar_select %p27_p2, %s13076_s20, %s29_s6  }
  0x2c   : > { %p38_p8 = por %p37_p4, %p36_p1  ;;  %p17248_p10 = scmp.eq.s32.totalorder %s13144_s22, 1 }
  0x2d   : > { %s198_s10 = sand.u32 1, %s13076_s20   ;;  %s11438_s11 = sshll.u32 %s13080_s21, 13 }
  0x2e   : > { %p13214_p12 = por %p17248_p10, %p36_p1  ;;  %s10796_s12 = sshll.u32 %s198_s10, 9 }
  0x2f   : > { %s13223_s14 = scalar_lea.hbm %s17229_s0, %s11438_s11  ;;  %s202_s28 = scalar_lea.vmem [#allocation4], %s10796_s12 }
  0x30   : > { %s210_s6 = sshll.u32 %s202_s28, 4  ;;  %p13225_p11 = pnand %p12214_p6, %p38_p8  ;;  %s13229_s6 = int_to_ptr.vmem [resolvable:$true] %s210_s6 }
  0x31   : > { %s13231_s15 = scalar_lea.sflag [#allocation5], %s198_s10  ;;  %s12980_s16 = scalar_lea.hbm %s13223_s14, 8192 }
  0x32   : > { %p12981_p13 = scmp.ne.s32.totalorder %s13223_s14, %s12980_s16  ;;  %p12982_p0 = pneg %p13225_p11 }
  0x33   : > { %s12985_s27 = scalar_lea.hbm %s17229_s0, 16384  ;;  %p12986_p7 = scmp.lt.u32.totalorder %s13223_s14, %s17229_s0 }
  0x34   : > { %p12983_p3 = pnand %p12982_p0, %p12981_p13  ;;  %p12987_p9 = scmp.lt.u32.totalorder %s12985_s27, %s12980_s16 }
  0x35   : > { %p12989_p1 = scmp.lt.u32.totalorder %s12980_s16, %s13223_s14 }
  0x36   : > { %p12984_p5 = pneg %p12983_p3  ;;  %p12988_p2 = por %p12987_p9, %p12986_p7 }
  0x38   : > { %p12990_p4 = por %p12989_p1, %p12988_p2 }
  0x3a   : > { %p12991_p6 = pnand %p12990_p4, %p12984_p5 }
  0x3c   : > { %12994 = shalt.err (!%p12991_p6)
}
  0x3d   : > { %s12995_s10 = scalar_lea.vmem %s13229_s6, 8192  ;;  %s13085_s29 = smov [#allocation4]  }
  0x3e   : > { %p12996_p8 = scmp.ne.s32.totalorder %s13229_s6, %s12995_s10  ;;  %s13000_s13 = sshll.u32 %s13085_s29, 4  ;;  %s13001_s13 = int_to_ptr.vmem [resolvable:$false] %s13000_s13 }
  0x3f   : > { %s13002_s28 = scalar_lea.vmem %s13001_s13, 16384  ;;  %p13003_p3 = scmp.lt.s32.totalorder %s13229_s6, %s13001_s13 }
  0x40   : > { %p12998_p10 = pnand %p12996_p8, %p12982_p0  ;;  %p13004_p7 = scmp.lt.s32.totalorder %s13002_s28, %s12995_s10 }
  0x42   : > { %p12999_p13 = pneg %p12998_p10  ;;  %p13005_p9 = por %p13004_p7, %p13003_p3 }
  0x44   : > { %p13006_p2 = pnand %p13005_p9, %p12999_p13 }
  0x46   : > { %13009 = shalt.err (!%p13006_p2)
}
  0x47   : > { %s13086_s16 = smov 128   ;;  %s13087_s17 = smov 8  }
  0x48   : > { %12208 = dma.hbm_to_vmem [thread:$0]  (!%p13225_p11), %s13223_s14, 8192, %s13229_s6, %s13231_s15, %s13086_s16, %s13086_s16, %s13087_s17  }
  0x49   : > { %p17251_p0 = scmp.ne.s32.totalorder %s17246_s26, 0 }
  0x4b   : > { %222 = sbr.rel (%p17251_p0) target bundleno = 1575 (0x627), region = 40 }
  0x52   : > { %s13262_s23 = sand.u32 1, %s13072_s19   ;;  %p17252_p5 = scmp.ne.s32.totalorder %s17244_s24, 0 }
  0x53   : > { %s10801_s27 = sshll.u32 %s13262_s23, 9  ;;  %s225_s11 = scalar_lea.sflag [#allocation5], %s13262_s23 }
  0x54   : > { %s13268_s12 = scalar_lea.vmem [#allocation4], %s10801_s27 }
  0x55   : > { %13055 = dma.done.wait (%p17252_p5), %s225_s11, 8192  }
  0x56   : > { %13057 = vsyncadd (%p17252_p5), %s225_s11, 4294959104  ;;  %p17253_p11 = scmp.eq.s32.totalorder %s13144_s22, 0 }
  0x58   : > { %13059 = dma.done.wait (%p17253_p11), [#allocation8], 4608   ;;  %p17254_p1 = pmov %p17253_p11 }
  0x59   : > { %v12258_v0 = vld [vmem:[%s17230_s1] sm:$0xff]   ;;  %v12259_v1 = vld [vmem:[%s17230_s1 + $0x8] sm:$0xff]   ;;  %v12260_v2 = vld [vmem:[%s17230_s1 + $0x10] sm:$0xff]   ;;  %vm265_vm0 = vcmask 516096   ;;  %vm279_vm1 = vsmask.f32 256 }
  0x5a   : > { %13061 = vsyncadd (%p17254_p1), [#allocation8], 4294962688  ;;  %12033 = vmatprep.subr.bf16.mxu0 %v12258_v0  ;;  %v12261_v3 = vld [vmem:[%s17230_s1 + $0x18] sm:$0xff]   ;;  %v475_v4 = vld [vmem:[%s13268_s12] sm:$0xff]  ;;  %vm377_vm3 = vsmask.f32 7938 }
  0x5b   : > { %12034 = vmatpush3.bf16.msra.mxu0 %v12258_v0  ;;  %v476_v5 = vld [vmem:[%s13268_s12 + $0x8] sm:$0xff]  ;;  %v12262_v7 = vld [vmem:[%s17230_s1 + $0x20] sm:$0xff]   ;;  %v12263_v8 = vld [vmem:[%s17230_s1 + $0x28] sm:$0xff]   ;;  %vm262_vm5 = vcmask 519168   ;;  %vm2760_vm6 = vsmask.f32 3328 }
  0x5c   : > { %12035 = vmatprep.subr.bf16.mxu0 %v12259_v1  ;;  %v539_v6 = vpack.c.bf16 %v476_v5, %v475_v4  ;;  %v12264_v9 = vld [vmem:[%s17230_s1 + $0x30] sm:$0xff]   ;;  %v12265_v10 = vld [vmem:[%s17230_s1 + $0x38] sm:$0xff]   ;;  %v477_v11 = vld [vmem:[%s13268_s12 + $0x10] sm:$0xff]  ;;  %vm2761_vm7 = vsmask.f32 7440  ;;  %s13089_s15 = smov 64  }
  0x5d   : > { %v478_v12 = vld [vmem:[%s13268_s12 + $0x18] sm:$0xff]  ;;  %v479_v13 = vld [vmem:[%s13268_s12 + $0x20] sm:$0xff]  ;;  %v480_v14 = vld [vmem:[%s13268_s12 + $0x28] sm:$0xff]  ;;  %vm1507_vm9 = vsmask.f32 4368  ;;  %vm3948_vm12 = vcmask 1042432  }
  0x5e   : > { %12049 = vmatprep.mubr.bf16.mxu0 %v539_v6  ;;  %vm13310_vm2 = vmand %vm265_vm0, %vm279_vm1  ;;  %v284_v16 = vld [vmem:[#allocation2 + $0x18] sm:$0x1]  ;;  %v540_v18 = vpack.c.bf16 %v478_v12, %v477_v11  ;;  %v541_v19 = vpack.c.bf16 %v480_v14, %v479_v13  ;;  %v481_v20 = vld [vmem:[%s13268_s12 + $0x30] sm:$0xff]  ;;  %vm3949_vm13 = vcmask 1046532   ;;  %vm2631_vm15 = vcmask 523264   ;;  %s16586_s7 = scalar_lea.vmem [#allocation9], %s10801_s27 }
  0x5f   : > { %12036 = vmatpush3.bf16.msra.mxu0 %v12259_v1  ;;  %v285_v17 = vsel %vm13310_vm2, 0, %v284_v16  ;;  %v482_v21 = vld [vmem:[%s13268_s12 + $0x38] sm:$0xff]  ;;  %v483_v22 = vld [vmem:[%s13268_s12 + $0x40] sm:$0xff]  ;;  %v484_v23 = vld [vmem:[%s13268_s12 + $0x48] sm:$0xff]  ;;  %s10709_s10 = sshll.u32 %s16586_s7, 4  ;;  %s13090_s16 = smov [#allocation9]   ;;  %s17182_s10 = int_to_ptr.vmem [resolvable:$true] %s10709_s10 }
  0x60   : > { %12037 = vmatprep.subr.bf16.mxu0 %v12260_v2  ;;  %286 = vst [vmem:[#allocation2 + $0x18] sm:$0x1] %v285_v17  ;;  %v542_v24 = vpack.c.bf16 %v482_v21, %v481_v20  ;;  %v543_v25 = vpack.c.bf16 %v484_v23, %v483_v22  ;;  %v485_v26 = vld [vmem:[%s13268_s12 + $0x50] sm:$0xff]  ;;  %v486_v27 = vld [vmem:[%s13268_s12 + $0x58] sm:$0xff]  ;;  %v487_v28 = vld [vmem:[%s13268_s12 + $0x60] sm:$0xff]  ;;  %s13014_s17 = sshll.u32 %s13090_s16, 4  ;;  %s13015_s17 = int_to_ptr.vmem [resolvable:$false] %s13014_s17 }
  0x61   : > { %v488_v29 = vld [vmem:[%s13268_s12 + $0x68] sm:$0xff]  ;;  %v544_v30 = vpack.c.bf16 %v486_v27, %v485_v26  ;;  %v489_v32 = vld [vmem:[%s13268_s12 + $0x70] sm:$0xff]  ;;  %v490_v33 = vld [vmem:[%s13268_s12 + $0x78] sm:$0xff]  ;;  %s13016_s11 = scalar_lea.vmem %s13015_s17, 16384  ;;  %p13017_p10 = scmp.lt.s32.totalorder %s17182_s10, %s13015_s17 }
  0x62   : > { %v545_v31 = vpack.c.bf16 %v488_v29, %v487_v28  ;;  %v491_v34 = vld [vmem:[%s13268_s12 + $0x80] sm:$0xff]  ;;  %v492_v35 = vld [vmem:[%s13268_s12 + $0x88] sm:$0xff]  ;;  %v546_v36 = vpack.c.bf16 %v490_v33, %v489_v32  ;;  %v493_v38 = vld [vmem:[%s13268_s12 + $0x90] sm:$0xff] }
  0x63   : > { %12038 = vmatpush3.bf16.msra.mxu0 %v12260_v2  ;;  %v547_v37 = vpack.c.bf16 %v492_v35, %v491_v34  ;;  %v494_v39 = vld [vmem:[%s13268_s12 + $0x98] sm:$0xff]  ;;  %v495_v40 = vld [vmem:[%s13268_s12 + $0xa0] sm:$0xff]  ;;  %v496_v41 = vld [vmem:[%s13268_s12 + $0xa8] sm:$0xff] }
  0x64   : > { %12039 = vmatprep.subr.bf16.mxu0 %v12261_v3  ;;  %v548_v42 = vpack.c.bf16 %v494_v39, %v493_v38  ;;  %v549_v43 = vpack.c.bf16 %v496_v41, %v495_v40  ;;  %v497_v44 = vld [vmem:[%s13268_s12 + $0xb0] sm:$0xff]  ;;  %v498_v45 = vld [vmem:[%s13268_s12 + $0xb8] sm:$0xff]  ;;  %v499_v46 = vld [vmem:[%s13268_s12 + $0xc0] sm:$0xff] }
  0x65   : > { %v500_v47 = vld [vmem:[%s13268_s12 + $0xc8] sm:$0xff]  ;;  %v550_v48 = vpack.c.bf16 %v498_v45, %v497_v44  ;;  %v501_v50 = vld [vmem:[%s13268_s12 + $0xd0] sm:$0xff]  ;;  %v502_v51 = vld [vmem:[%s13268_s12 + $0xd8] sm:$0xff] }
  0x66   : > { %v551_v49 = vpack.c.bf16 %v500_v47, %v499_v46  ;;  %v503_v52 = vld [vmem:[%s13268_s12 + $0xe0] sm:$0xff]  ;;  %v504_v53 = vld [vmem:[%s13268_s12 + $0xe8] sm:$0xff]  ;;  %v552_v54 = vpack.c.bf16 %v502_v51, %v501_v50  ;;  %v505_v56 = vld [vmem:[%s13268_s12 + $0xf0] sm:$0xff] }
  0x67   : > { %12040 = vmatpush3.bf16.msra.mxu0 %v12261_v3  ;;  %v553_v55 = vpack.c.bf16 %v504_v53, %v503_v52  ;;  %v506_v57 = vld [vmem:[%s13268_s12 + $0xf8] sm:$0xff]  ;;  %v507_v58 = vld [vmem:[%s13268_s12 + $0x100] sm:$0xff]  ;;  %v508_v59 = vld [vmem:[%s13268_s12 + $0x108] sm:$0xff] }
  0x68   : > { %12041 = vmatprep.subr.bf16.mxu0 %v12262_v7  ;;  %v554_v60 = vpack.c.bf16 %v506_v57, %v505_v56  ;;  %v555_v61 = vpack.c.bf16 %v508_v59, %v507_v58  ;;  %v509_v62 = vld [vmem:[%s13268_s12 + $0x110] sm:$0xff]  ;;  %v510_v63 = vld [vmem:[%s13268_s12 + $0x118] sm:$0xff]  ;;  %v511_v0 = vld [vmem:[%s13268_s12 + $0x120] sm:$0xff] }
  0x69   : > { %v512_v1 = vld [vmem:[%s13268_s12 + $0x128] sm:$0xff]  ;;  %v556_v2 = vpack.c.bf16 %v510_v63, %v509_v62  ;;  %v513_v4 = vld [vmem:[%s13268_s12 + $0x130] sm:$0xff]  ;;  %v514_v5 = vld [vmem:[%s13268_s12 + $0x138] sm:$0xff] }
  0x6a   : > { %v557_v3 = vpack.c.bf16 %v512_v1, %v511_v0  ;;  %v515_v6 = vld [vmem:[%s13268_s12 + $0x140] sm:$0xff]  ;;  %v518_v11 = vld [vmem:[%s13268_s12 + $0x158] sm:$0xff]  ;;  %v520_v13 = vld [vmem:[%s13268_s12 + $0x168] sm:$0xff] }
  0x6b   : > { %12042 = vmatpush3.bf16.msra.mxu0 %v12262_v7  ;;  %v516_v7 = vld [vmem:[%s13268_s12 + $0x148] sm:$0xff]  ;;  %v519_v12 = vld [vmem:[%s13268_s12 + $0x160] sm:$0xff]  ;;  %v521_v17 = vld [vmem:[%s13268_s12 + $0x170] sm:$0xff] }
  0x6c   : > { %12043 = vmatprep.subr.bf16.mxu0 %v12263_v8  ;;  %v561_v16 = vpack.c.bf16 %v520_v13, %v519_v12  ;;  %v524_v20 = vld [vmem:[%s13268_s12 + $0x188] sm:$0xff]  ;;  %v525_v23 = vld [vmem:[%s13268_s12 + $0x190] sm:$0xff]  ;;  %vm13378_vm4 = vmand %vm265_vm0, %vm377_vm3 }
  0x6d   : > { %v528_v26 = vld [vmem:[%s13268_s12 + $0x1a8] sm:$0xff]  ;;  %v529_v29 = vld [vmem:[%s13268_s12 + $0x1b0] sm:$0xff]  ;;  %v290_v51 = vld [vmem:[#allocation2 + $0x30] sm:$0x1] }
  0x6e   : > { %v532_v32 = vld [vmem:[%s13268_s12 + $0x1c8] sm:$0xff]  ;;  %v533_v35 = vld [vmem:[%s13268_s12 + $0x1d0] sm:$0xff]  ;;  %v291_v52 = vsel %vm13310_vm2, 0, %v290_v51  ;;  %v385_v57 = vld [vmem:[#allocation2 + $0x2c] sm:$0x1] }
  0x6f   : > { %12044 = vmatpush3.bf16.msra.mxu0 %v12263_v8  ;;  %v558_v8 = vpack.c.bf16 %v514_v5, %v513_v4  ;;  %v536_v38 = vld [vmem:[%s13268_s12 + $0x1e8] sm:$0xff]  ;;  %v537_v41 = vld [vmem:[%s13268_s12 + $0x1f0] sm:$0xff]  ;;  %292 = vst [vmem:[#allocation2 + $0x30] sm:$0x1] %v291_v52  ;;  %v386_v58 = vsel %vm13378_vm4, 0, %v385_v57  ;;  %vm13514_vm8 = vmor %vm2760_vm6, %vm2761_vm7 }
  0x70   : > { %12045 = vmatprep.subr.bf16.mxu0 %v12264_v9  ;;  %v382_v46 = vld [vmem:[#allocation2 + $0x20] sm:$0x1]  ;;  %v287_v53 = vld [vmem:[#allocation2 + $0x24] sm:$0x1]  ;;  %387 = vst [vmem:[#allocation2 + $0x2c] sm:$0x1] %v386_v58  ;;  %vm13562_vm10 = vmand %vm262_vm5, %vm377_vm3 }
  0x71   : > { %v296_v59 = vld [vmem:[#allocation2 + $0x48] sm:$0x1]  ;;  %v394_v63 = vld [vmem:[#allocation2 + $0x50] sm:$0x1]  ;;  %v391_v1 = vld [vmem:[#allocation2 + $0x44] sm:$0x1] }
  0x72   : > { %v395_v0 = vsel %vm13378_vm4, 0, %v394_v63  ;;  %v299_v5 = vld [vmem:[#allocation2 + $0x54] sm:$0x1]  ;;  %v308_v12 = vld [vmem:[#allocation2 + $0x78] sm:$0x1]  ;;  %vm13569_vm11 = vmor %vm279_vm1, %vm1507_vm9 }
  0x73   : > { %12046 = vmatpush3.bf16.msra.mxu0 %v12264_v9  ;;  %v559_v9 = vpack.c.bf16 %v516_v7, %v515_v6  ;;  %396 = vst [vmem:[#allocation2 + $0x50] sm:$0x1] %v395_v0  ;;  %v300_v6 = vsel %vm13310_vm2, 0, %v299_v5  ;;  %v400_v7 = vld [vmem:[#allocation2 + $0x68] sm:$0x1]  ;;  %v309_v13 = vsel %vm13310_vm2, 0, %v308_v12  ;;  %vm14117_vm14 = vmor %vm3948_vm12, %vm3949_vm13 }
  0x74   : > { %12047 = vmatprep.subr.bf16.mxu0 %v12265_v10  ;;  %301 = vst [vmem:[#allocation2 + $0x54] sm:$0x1] %v300_v6  ;;  %310 = vst [vmem:[#allocation2 + $0x78] sm:$0x1] %v309_v13 }
  0x77   : > { %12048 = vmatpush3.bf16.msra.mxu0 %v12265_v10  ;;  %v517_v10 = vld [vmem:[%s13268_s12 + $0x150] sm:$0xff] }
  0x78   : > { %v560_v14 = vpack.c.bf16 %v518_v11, %v517_v10  ;;  %v13088_v11 = vmov 0  }
  0x79   : > { %263 = vst.msk [vmem:[#allocation2] sm:$0xf] %vm262_vm5, %v13088_v11  ;;  %264 = vst.msk [vmem:[#allocation2 + $0x4] sm:$0xf] %vm262_vm5, %v13088_v11 }
  0x7a   : > { %12050 = vmatmul.mubr.bf16.vlgmr.msra.gmra.mrb[0].mxu0 %v540_v18  ;;  %v522_v18 = vld [vmem:[%s13268_s12 + $0x178] sm:$0xff]  ;;  %266 = vst.msk [vmem:[#allocation2 + $0x8] sm:$0x1] %vm265_vm0, %v13088_v11  ;;  %269 = vst.msk [vmem:[#allocation2 + $0xe0] sm:$0x1] %vm265_vm0, %v13088_v11 }
  0x7b   : > { %12053 = vmatprep.mubr.bf16.mxu0 %v541_v19  ;;  %v523_v19 = vld [vmem:[%s13268_s12 + $0x180] sm:$0xff]  ;;  %v562_v21 = vpack.c.bf16 %v522_v18, %v521_v17  ;;  %267 = vst.msk [vmem:[#allocation2 + $0xd8] sm:$0xf] %vm262_vm5, %v13088_v11  ;;  %268 = vst.msk [vmem:[#allocation2 + $0xdc] sm:$0xf] %vm262_vm5, %v13088_v11 }
  0x7c   : > { %v563_v22 = vpack.c.bf16 %v524_v20, %v523_v19  ;;  %271 = vst.msk [vmem:[#allocation2 + $0xcc] sm:$0xf] %vm262_vm5, %v13088_v11  ;;  %272 = vst.msk [vmem:[#allocation2 + $0xd0] sm:$0xf] %vm262_vm5, %v13088_v11  ;;  %v406_v17 = vld [vmem:[#allocation2 + $0x80] sm:$0x1] }
  0x7d   : > { %273 = vst.msk [vmem:[#allocation2 + $0xd4] sm:$0x1] %vm265_vm0, %v13088_v11  ;;  %276 = vst.msk [vmem:[#allocation2 + $0x1ac] sm:$0x1] %vm265_vm0, %v13088_v11  ;;  %v407_v18 = vsel %vm13378_vm4, 0, %v406_v17  ;;  %vm3723_vm0 = vcmask 1048064  }
  0x7e   : > { %274 = vst.msk [vmem:[#allocation2 + $0x1a4] sm:$0xf] %vm262_vm5, %v13088_v11  ;;  %275 = vst.msk [vmem:[#allocation2 + $0x1a8] sm:$0xf] %vm262_vm5, %v13088_v11  ;;  %v403_v19 = vld [vmem:[#allocation2 + $0x74] sm:$0x1] }
  0x7f   : > { %408 = vst [vmem:[#allocation2 + $0x80] sm:$0x1] %v407_v18  ;;  %v404_v20 = vsel %vm13378_vm4, 0, %v403_v19 }
  0x80   : > { %405 = vst [vmem:[#allocation2 + $0x74] sm:$0x1] %v404_v20 }
  0x81   : > { %v2666_v20 = vld [vmem:[#allocation2 + $0x8] sm:$0x1] }
  0x82   : > { %12054 = vmatmul.mubr.bf16.gmra.mrb[4].mxu0 %v542_v24  ;;  %v526_v24 = vld [vmem:[%s13268_s12 + $0x198] sm:$0xff] }
  0x83   : > { %12057 = vmatprep.mubr.bf16.mxu0 %v543_v25  ;;  %v527_v25 = vld [vmem:[%s13268_s12 + $0x1a0] sm:$0xff]  ;;  %v564_v27 = vpack.c.bf16 %v526_v24, %v525_v23 }
  0x84   : > { %v565_v28 = vpack.c.bf16 %v528_v26, %v527_v25  ;;  %v314_v23 = vld [vmem:[#allocation2 + $0x90] sm:$0x1]  ;;  %v409_v25 = vld [vmem:[#allocation2 + $0x8c] sm:$0x1] }
  0x85   : > { %v315_v24 = vsel %vm13310_vm2, 0, %v314_v23  ;;  %v410_v26 = vsel %vm13378_vm4, 0, %v409_v25 }
  0x86   : > { %316 = vst [vmem:[#allocation2 + $0x90] sm:$0x1] %v315_v24  ;;  %411 = vst [vmem:[#allocation2 + $0x8c] sm:$0x1] %v410_v26 }
  0x8a   : > { %12058 = vmatmul.mubr.bf16.gmra.mrb[8].mxu0 %v544_v30  ;;  %v530_v30 = vld [vmem:[%s13268_s12 + $0x1b8] sm:$0xff] }
  0x8b   : > { %12061 = vmatprep.mubr.bf16.mxu0 %v545_v31  ;;  %v531_v31 = vld [vmem:[%s13268_s12 + $0x1c0] sm:$0xff]  ;;  %v566_v33 = vpack.c.bf16 %v530_v30, %v529_v29  ;;  %v317_v29 = vld [vmem:[#allocation2 + $0x9c] sm:$0x1] }
  0x8c   : > { %v567_v34 = vpack.c.bf16 %v532_v32, %v531_v31  ;;  %v318_v30 = vsel %vm13310_vm2, 0, %v317_v29  ;;  %v320_v31 = vld [vmem:[#allocation2 + $0xa8] sm:$0x1]  ;;  %v2783_v29 = vshll.u32 %v2666_v20, 16 }
  0x8d   : > { %319 = vst [vmem:[#allocation2 + $0x9c] sm:$0x1] %v318_v30  ;;  %v321_v32 = vsel %vm13310_vm2, 0, %v320_v31 }
  0x8e   : > { %322 = vst [vmem:[#allocation2 + $0xa8] sm:$0x1] %v321_v32 }
  0x92   : > { %12062 = vmatmul.mubr.bf16.gmra.mrb[12].mxu0 %v546_v36  ;;  %v534_v36 = vld [vmem:[%s13268_s12 + $0x1d8] sm:$0xff] }
  0x93   : > { %12065 = vmatprep.mubr.bf16.mxu0 %v547_v37  ;;  %v535_v37 = vld [vmem:[%s13268_s12 + $0x1e0] sm:$0xff]  ;;  %v568_v39 = vpack.c.bf16 %v534_v36, %v533_v35 }
  0x94   : > { %v569_v40 = vpack.c.bf16 %v536_v38, %v535_v37  ;;  %v418_v35 = vld [vmem:[#allocation2 + $0xb0] sm:$0x1]  ;;  %v13449_v37 = vld [vmem:[%s17231_s2] ss:$0 sm:$0xff]  ;;  %v323_v38 = vld [vmem:[#allocation2 + $0xb4] sm:$0x1] }
  0x95   : > { %v419_v36 = vsel %vm13378_vm4, 0, %v418_v35 }
  0x96   : > { %420 = vst [vmem:[#allocation2 + $0xb0] sm:$0x1] %v419_v36 }
  0x9a   : > { %12066 = vmatmul.mubr.bf16.gmra.mrb[16].mxu0 %v548_v42  ;;  %v538_v42 = vld [vmem:[%s13268_s12 + $0x1f8] sm:$0xff] }
  0x9b   : > { %12069 = vmatprep.mubr.bf16.mxu0 %v549_v43  ;;  %v281_v43 = vld [vmem:[#allocation2 + $0xc] sm:$0x1]  ;;  %v570_v47 = vpack.c.bf16 %v538_v42, %v537_v41 }
  0x9c   : > { %v282_v44 = vsel %vm13310_vm2, 0, %v281_v43 }
  0x9d   : > { %283 = vst [vmem:[#allocation2 + $0xc] sm:$0x1] %v282_v44 }
  0xa2   : > { %12070 = vmatmul.mubr.bf16.gmra.mrb[20].mxu0 %v550_v48  ;;  %v383_v48 = vsel %vm13378_vm4, 0, %v382_v46  ;;  %v326_v46 = vld [vmem:[#allocation2 + $0xc0] sm:$0x1] }
  0xa3   : > { %12073 = vmatprep.mubr.bf16.mxu0 %v551_v49  ;;  %v379_v49 = vld [vmem:[#allocation2 + $0x14] sm:$0x1]  ;;  %384 = vst [vmem:[#allocation2 + $0x20] sm:$0x1] %v383_v48  ;;  %v327_v51 = vsel %vm13310_vm2, 0, %v326_v46 }
  0xa4   : > { %v380_v50 = vsel %vm13378_vm4, 0, %v379_v49  ;;  %328 = vst [vmem:[#allocation2 + $0xc0] sm:$0x1] %v327_v51 }
  0xa5   : > { %381 = vst [vmem:[#allocation2 + $0x14] sm:$0x1] %v380_v50 }
  0xaa   : > { %12074 = vmatmul.mubr.bf16.gmra.mrb[24].mxu0 %v552_v54  ;;  %v288_v54 = vsel %vm13310_vm2, 0, %v287_v53 }
  0xab   : > { %12077 = vmatprep.mubr.bf16.mxu0 %v553_v55  ;;  %289 = vst [vmem:[#allocation2 + $0x24] sm:$0x1] %v288_v54  ;;  %v388_v55 = vld [vmem:[#allocation2 + $0x38] sm:$0x1]  ;;  %v2665_v54 = vld [vmem:[#allocation2 + $0x4] sm:$0xf] }
  0xac   : > { %v389_v56 = vsel %vm13378_vm4, 0, %v388_v55  ;;  %v2777_v63 = vshrl.u32 %v2665_v54, 16 }
  0xad   : > { %390 = vst [vmem:[#allocation2 + $0x38] sm:$0x1] %v389_v56 }
  0xb2   : > { %12078 = vmatmul.mubr.bf16.gmra.mrb[28].mxu0 %v554_v60  ;;  %v297_v60 = vsel %vm13310_vm2, 0, %v296_v59 }
  0xb3   : > { %12081 = vmatprep.mubr.bf16.mxu0 %v555_v61  ;;  %v293_v61 = vld [vmem:[#allocation2 + $0x3c] sm:$0x1]  ;;  %298 = vst [vmem:[#allocation2 + $0x48] sm:$0x1] %v297_v60 }
  0xb4   : > { %v294_v62 = vsel %vm13310_vm2, 0, %v293_v61 }
  0xb5   : > { %295 = vst [vmem:[#allocation2 + $0x3c] sm:$0x1] %v294_v62  ;;  %v2773_v62 = vshll.u32 %v2665_v54, 16 }
  0xb7   : > { %v13483_v13 = vrot.slane %v2773_v62, 5 }
  0xba   : > { %12082 = vmatmul.mubr.bf16.gmra.mrb[32].mxu0 %v556_v2  ;;  %v392_v2 = vsel %vm13378_vm4, 0, %v391_v1 }
  0xbb   : > { %12085 = vmatprep.mubr.bf16.mxu0 %v557_v3  ;;  %393 = vst [vmem:[#allocation2 + $0x44] sm:$0x1] %v392_v2  ;;  %v302_v3 = vld [vmem:[#allocation2 + $0x60] sm:$0x1] }
  0xbc   : > { %v303_v4 = vsel %vm13310_vm2, 0, %v302_v3 }
  0xbd   : > { %304 = vst [vmem:[#allocation2 + $0x60] sm:$0x1] %v303_v4  ;;  %v421_v4 = vld [vmem:[#allocation2 + $0xbc] sm:$0x1] }
  0xc2   : > { %12086 = vmatmul.mubr.bf16.gmra.mrb[36].mxu0 %v558_v8  ;;  %v401_v8 = vsel %vm13378_vm4, 0, %v400_v7 }
  0xc3   : > { %12089 = vmatprep.mubr.bf16.mxu0 %v559_v9  ;;  %v397_v9 = vld [vmem:[#allocation2 + $0x5c] sm:$0x1]  ;;  %402 = vst [vmem:[#allocation2 + $0x68] sm:$0x1] %v401_v8  ;;  %v422_v8 = vsel %vm13378_vm4, 0, %v421_v4 }
  0xc4   : > { %v398_v10 = vsel %vm13378_vm4, 0, %v397_v9  ;;  %423 = vst [vmem:[#allocation2 + $0xbc] sm:$0x1] %v422_v8 }
  0xc5   : > { %399 = vst [vmem:[#allocation2 + $0x5c] sm:$0x1] %v398_v10 }
  0xca   : > { %12090 = vmatmul.mubr.bf16.gmra.mrb[40].mxu0 %v560_v14  ;;  %v305_v14 = vld [vmem:[#allocation2 + $0x6c] sm:$0x1] }
  0xcb   : > { %12093 = vmatprep.mubr.bf16.mxu0 %v561_v16  ;;  %v306_v16 = vsel %vm13310_vm2, 0, %v305_v14  ;;  %v2779_v14 = vrot.slane %v2777_v63, 4 }
  0xcc   : > { %307 = vst [vmem:[#allocation2 + $0x6c] sm:$0x1] %v306_v16 }
  0xcd   : > { %v2780_v25 = vor.u32 %v2779_v14, %v13483_v13 }
  0xd2   : > { %12094 = vmatmul.mubr.bf16.gmra.mrb[44].mxu0 %v562_v21  ;;  %v311_v21 = vld [vmem:[#allocation2 + $0x84] sm:$0x1] }
  0xd3   : > { %12097 = vmatprep.mubr.bf16.mxu0 %v563_v22  ;;  %v312_v22 = vsel %vm13310_vm2, 0, %v311_v21 }
  0xd4   : > { %313 = vst [vmem:[#allocation2 + $0x84] sm:$0x1] %v312_v22 }
  0xda   : > { %12098 = vmatmul.mubr.bf16.gmra.mrb[48].mxu0 %v564_v27  ;;  %v412_v27 = vld [vmem:[#allocation2 + $0x98] sm:$0x1] }
  0xdb   : > { %12101 = vmatprep.mubr.bf16.mxu0 %v565_v28  ;;  %v413_v28 = vsel %vm13378_vm4, 0, %v412_v27 }
  0xdc   : > { %414 = vst [vmem:[#allocation2 + $0x98] sm:$0x1] %v413_v28  ;;  %v424_v28 = vld [vmem:[#allocation2 + $0xc8] sm:$0x1] }
  0xe2   : > { %12102 = vmatmul.mubr.bf16.gmra.mrb[52].mxu0 %v566_v33  ;;  %v415_v33 = vld [vmem:[#allocation2 + $0xa4] sm:$0x1] }
  0xe3   : > { %12105 = vmatprep.mubr.bf16.mxu0 %v567_v34  ;;  %v416_v34 = vsel %vm13378_vm4, 0, %v415_v33  ;;  %v425_v33 = vsel %vm13378_vm4, 0, %v424_v28 }
  0xe4   : > { %417 = vst [vmem:[#allocation2 + $0xa4] sm:$0x1] %v416_v34  ;;  %426 = vst [vmem:[#allocation2 + $0xc8] sm:$0x1] %v425_v33 }
  0xea   : > { %12106 = vmatmul.mubr.bf16.gmra.mrb[56].mxu0 %v568_v39 }
  0xeb   : > { %12109 = vmatprep.mubr.bf16.mxu0 %v569_v40  ;;  %v324_v40 = vsel %vm13310_vm2, 0, %v323_v38 }
  0xec   : > { %325 = vst [vmem:[#allocation2 + $0xb4] sm:$0x1] %v324_v40 }
  0xf2   : > { %12110 = vmatmul.mubr.bf16.gmra.mrb[60].mxu0 %v570_v47  ;;  %v2664_v47 = vld [vmem:[#allocation2] sm:$0xf] }
  0xf3   : > { %v2764_v57 = vshrl.u32 %v2664_v47, 16  ;;  %v2767_v60 = vshll.u32 %v2664_v47, 16 }
  0xf5   : > { %v2766_v5 = vrot.slane %v2764_v57, 4  ;;  %v2769_v9 = vrot.slane %v2767_v60, 5 }
  0xf7   : > { %v2770_v23 = vor.u32 %v2769_v9, %v2766_v5 }
 0x14d   : > { %v12051_v39 = vpop.f32.mrb[0].mxu0 }
 0x14e   : > { %v13454_v41 = vadd.f32 %v12051_v39, %v13449_v37  ;;  %v676_v42 = vpop.f32.mrb[1].mxu0  ;;  %v13500_v39 = vrot.slane %v2770_v23, 4 }
 0x14f   : > { %v13457_v43 = vadd.f32 %v13449_v37, %v676_v42  ;;  %v12052_v44 = vpop.f32.mrb[2].mxu0 }
 0x150   : > { %v933_v48 = vsub.f32 0.0, %v13454_v41  ;;  %v13461_v49 = vadd.f32 %v12052_v44, %v13449_v37  ;;  %v679_v50 = vpop.f32.mrb[3].mxu0  ;;  %v2776_v5 = vsel %vm13514_vm8, %v13500_v39, %v13483_v13 }
 0x151   : > { %v931_v52 = vsub.f32 0.0, %v13457_v43  ;;  %v13467_v53 = vadd.f32 %v13449_v37, %v679_v50 }
 0x152   : > { %v999_v55 = vmul.f32 1.442695, %v933_v48  ;;  %v934_v56 = vsub.f32 0.0, %v13461_v49  ;;  %v2781_v48 = vrot.slane %v2780_v25, 4 }
 0x153   : > { %v995_v58 = vmul.f32 1.442695, %v931_v52  ;;  %v932_v59 = vsub.f32 0.0, %v13467_v53 }
 0x154   : > { %12434 = vpow2.f32 %v999_v55  ;;  %v1001_v61 = vmul.f32 1.442695, %v934_v56 }
 0x155   : > { %12436 = vpow2.f32 %v995_v58  ;;  %v997_v0 = vmul.f32 1.442695, %v932_v59  ;;  %v12055_v1 = vpop.f32.mrb[4].mxu0 }
 0x156   : > { %12438 = vpow2.f32 %v1001_v61  ;;  %v13472_v2 = vadd.f32 %v12055_v1, %v13449_v37  ;;  %v692_v3 = vpop.f32.mrb[5].mxu0  ;;  %v2785_v61 = vrot.slane %v2783_v29, 5 }
 0x157   : > { %12440 = vpow2.f32 %v997_v0  ;;  %v13475_v6 = vadd.f32 %v13449_v37, %v692_v3  ;;  %v12056_v7 = vpop.f32.mrb[6].mxu0 }
 0x158   : > { %v937_v10 = vsub.f32 0.0, %v13472_v2  ;;  %v13481_v11 = vadd.f32 %v12056_v7, %v13449_v37  ;;  %v695_v12 = vpop.f32.mrb[7].mxu0 }
 0x159   : > { %v935_v16 = vsub.f32 0.0, %v13475_v6  ;;  %v13487_v17 = vadd.f32 %v13449_v37, %v695_v12  ;;  %v2786_v12 = vsel %vm13514_vm8, %v2781_v48, %v2785_v61 }
 0x15a   : > { %v1007_v18 = vmul.f32 1.442695, %v937_v10  ;;  %v938_v19 = vsub.f32 0.0, %v13481_v11 }
 0x15b   : > { %v1003_v21 = vmul.f32 1.442695, %v935_v16  ;;  %v936_v22 = vsub.f32 0.0, %v13487_v17 }
 0x15c   : > { %12442 = vpow2.f32 %v1007_v18  ;;  %v1009_v24 = vmul.f32 1.442695, %v938_v19 }
 0x15d   : > { %12444 = vpow2.f32 %v1003_v21  ;;  %v1005_v26 = vmul.f32 1.442695, %v936_v22  ;;  %v12059_v27 = vpop.f32.mrb[8].mxu0 }
 0x15e   : > { %v12435_v30 = vpop.eup %12434  ;;  %12446 = vpow2.f32 %v1009_v24  ;;  %v13493_v31 = vadd.f32 %v12059_v27, %v13449_v37  ;;  %v708_v32 = vpop.f32.mrb[9].mxu0 }
 0x15f   : > { %v12437_v34 = vpop.eup %12436  ;;  %v1125_v35 = vadd.f32 1.0, %v12435_v30  ;;  %12448 = vpow2.f32 %v1005_v26  ;;  %v13498_v36 = vadd.f32 %v13449_v37, %v708_v32  ;;  %v12060_v38 = vpop.f32.mrb[10].mxu0 }
 0x160   : > { %v12439_v40 = vpop.eup %12438  ;;  %v1123_v42 = vadd.f32 1.0, %v12437_v34  ;;  %v941_v44 = vsub.f32 0.0, %v13493_v31  ;;  %v13504_v46 = vadd.f32 %v12060_v38, %v13449_v37  ;;  %v711_v47 = vpop.f32.mrb[11].mxu0 }
 0x161   : > { %v12441_v50 = vpop.eup %12440  ;;  %12450 = vrcp.f32 %v1125_v35  ;;  %v1126_v51 = vadd.f32 1.0, %v12439_v40  ;;  %v939_v52 = vsub.f32 0.0, %v13498_v36  ;;  %v13508_v54 = vadd.f32 %v13449_v37, %v711_v47 }
 0x162   : > { %12452 = vrcp.f32 %v1123_v42  ;;  %v1124_v55 = vadd.f32 1.0, %v12441_v50  ;;  %v1015_v56 = vmul.f32 1.442695, %v941_v44  ;;  %v942_v57 = vsub.f32 0.0, %v13504_v46 }
 0x163   : > { %12454 = vrcp.f32 %v1126_v51  ;;  %v1011_v58 = vmul.f32 1.442695, %v939_v52  ;;  %v940_v59 = vsub.f32 0.0, %v13508_v54  ;;  %v13544_v40 = vcombine.low %v2776_v5, %v2786_v12 }
 0x164   : > { %12456 = vrcp.f32 %v1124_v55  ;;  %v1017_v62 = vmul.f32 1.442695, %v942_v57 }
 0x165   : > { %12458 = vpow2.f32 %v1015_v56  ;;  %v1013_v63 = vmul.f32 1.442695, %v940_v59  ;;  %v12063_v0 = vpop.f32.mrb[12].mxu0 }
 0x166   : > { %v12443_v1 = vpop.eup %12442  ;;  %12460 = vpow2.f32 %v1011_v58  ;;  %v13519_v3 = vadd.f32 %v12063_v0, %v13449_v37  ;;  %v724_v4 = vpop.f32.mrb[13].mxu0 }
 0x167   : > { %v12445_v7 = vpop.eup %12444  ;;  %v1129_v8 = vadd.f32 1.0, %v12443_v1  ;;  %12462 = vpow2.f32 %v1017_v62  ;;  %v13526_v9 = vadd.f32 %v13449_v37, %v724_v4  ;;  %v12064_v10 = vpop.f32.mrb[14].mxu0 }
 0x168   : > { %v12447_v14 = vpop.eup %12446  ;;  %v1127_v16 = vadd.f32 1.0, %v12445_v7  ;;  %12464 = vpow2.f32 %v1013_v63  ;;  %v945_v18 = vsub.f32 0.0, %v13519_v3  ;;  %v13532_v19 = vadd.f32 %v12064_v10, %v13449_v37  ;;  %v727_v20 = vpop.f32.mrb[15].mxu0 }
 0x169   : > { %v12449_v13 = vpop.eup %12448  ;;  %12466 = vrcp.f32 %v1129_v8  ;;  %v1130_v21 = vadd.f32 1.0, %v12447_v14  ;;  %v943_v22 = vsub.f32 0.0, %v13526_v9  ;;  %v13536_v23 = vadd.f32 %v13449_v37, %v727_v20  ;;  %v2158_v14 = vld [vmem:[#allocation2 + $0x18] sm:$0xf] }
 0x16a   : > { %12468 = vrcp.f32 %v1127_v16  ;;  %v1128_v24 = vadd.f32 1.0, %v12449_v13  ;;  %v1023_v25 = vmul.f32 1.442695, %v945_v18  ;;  %v946_v26 = vsub.f32 0.0, %v13532_v19 }
 0x16b   : > { %v12451_v27 = vpop.eup %12450  ;;  %12470 = vrcp.f32 %v1130_v21  ;;  %v1019_v28 = vmul.f32 1.442695, %v943_v22  ;;  %v944_v29 = vsub.f32 0.0, %v13536_v23 }
 0x16c   : > { %v12453_v30 = vpop.eup %12452  ;;  %v1253_v32 = vmul.f32 %v12451_v27, %v13454_v41  ;;  %12472 = vrcp.f32 %v1128_v24  ;;  %v1025_v33 = vmul.f32 1.442695, %v946_v26  ;;  %v2151_v24 = vld [vmem:[#allocation2 + $0xc] sm:$0xf] }
 0x16d   : > { %v12455_v34 = vpop.eup %12454  ;;  %v1251_v35 = vmul.f32 %v12453_v30, %v13457_v43  ;;  %12474 = vpow2.f32 %v1023_v25  ;;  %v13542_v38 = vmul.f32 1.442695, %v944_v29  ;;  %v12067_v39 = vpop.f32.mrb[16].mxu0 }
 0x16e   : > { %v12457_v42 = vpop.eup %12456  ;;  %v11441_v44 = vpack.c.bf16 %v1253_v32, %v1253_v32  ;;  %v1254_v47 = vmul.f32 %v12455_v34, %v13461_v49  ;;  %12476 = vpow2.f32 %v1019_v28  ;;  %v13548_v48 = vadd.f32 %v12067_v39, %v13449_v37  ;;  %v740_v41 = vpop.f32.mrb[17].mxu0  ;;  %v2162_v32 = vld [vmem:[#allocation2 + $0x20] sm:$0x1] }
 0x16f   : > { %v12459_v50 = vpop.eup %12458  ;;  %v11439_v51 = vpack.c.bf16 %v1251_v35, %v1251_v35  ;;  %v1252_v52 = vmul.f32 %v12457_v42, %v13467_v53  ;;  %12478 = vpow2.f32 %v1025_v33  ;;  %v13552_v43 = vadd.f32 %v13449_v37, %v740_v41  ;;  %v13554_v55 = vpop.f32.mrb[18].mxu0 }
 0x170   : > { %v12461_v56 = vpop.eup %12460  ;;  %v1527_v57 = vshrl.u32 %v11441_v44, 16  ;;  %v1530_v58 = vshll.u32 %v11441_v44, 16  ;;  %v11442_v59 = vpack.c.bf16 %v1254_v47, %v1254_v47  ;;  %v1133_v49 = vadd.f32 1.0, %v12459_v50  ;;  %v13556_v61 = vpop.f32.mrb[19].mxu0  ;;  %v2155_v47 = vld [vmem:[#allocation2 + $0x14] sm:$0x1] }
 0x171   : > { %v13558_v62 = vpop.eup %12462  ;;  %v1510_v63 = vshrl.u32 %v11439_v51, 16  ;;  %v1513_v0 = vshll.u32 %v11439_v51, 16  ;;  %v11440_v1 = vpack.c.bf16 %v1252_v52, %v1252_v52  ;;  %v1131_v4 = vadd.f32 1.0, %v12461_v56 }
 0x172   : > { %v12465_v53 = vpop.eup %12464  ;;  %v1529_v5 = vrot.slane %v1527_v57, 7  ;;  %v1535_v7 = vshrl.u32 %v11442_v59, 16  ;;  %v1538_v8 = vshll.u32 %v11442_v59, 16  ;;  %12480 = vrcp.f32 %v1133_v49 }
 0x173   : > { %v12467_v10 = vpop.eup %12466  ;;  %v1512_v16 = vrot.slane %v1510_v63, 7  ;;  %v1518_v18 = vshrl.u32 %v11440_v1, 16  ;;  %v1521_v20 = vshll.u32 %v11440_v1, 16  ;;  %12482 = vrcp.f32 %v1131_v4 }
 0x174   : > { %v12469_v13 = vpop.eup %12468  ;;  %v1532_v21 = vor.u32 %v1530_v58, %v1529_v5  ;;  %v1533_v22 = vrot.slane %v1529_v5, 4  ;;  %v1537_v25 = vrot.slane %v1535_v7, 7  ;;  %v1257_v26 = vmul.f32 %v12467_v10, %v13472_v2 }
 0x175   : > { %v12471_v27 = vpop.eup %12470  ;;  %v1515_v28 = vor.u32 %v1513_v0, %v1512_v16  ;;  %v1516_v29 = vrot.slane %v1512_v16, 4  ;;  %v1520_v33 = vrot.slane %v1518_v18, 7  ;;  %v1255_v34 = vmul.f32 %v12469_v13, %v13475_v6  ;;  %v13574_v35 = vpop.f32.mrb[20].mxu0 }
 0x176   : > { %v12473_v39 = vpop.eup %12472  ;;  %v2159_v42 = vsel %vm13562_vm10, %v1532_v21, %v2158_v14  ;;  %v1540_v2 = vor.u32 %v1538_v8, %v1537_v25  ;;  %v1542_v44 = vrot.slane %v1537_v25, 4  ;;  %v11445_v41 = vpack.c.bf16 %v1257_v26, %v1257_v26  ;;  %v13578_v50 = vpop.f32.mrb[21].mxu0  ;;  %v2172_v21 = vld [vmem:[#allocation2 + $0x30] sm:$0xf] }
 0x177   : > { %v12475_v51 = vpop.eup %12474  ;;  %2160 = vst [vmem:[#allocation2 + $0x18] sm:$0xf] %v2159_v42  ;;  %v2152_v52 = vsel %vm13562_vm10, %v1515_v28, %v2151_v24  ;;  %v1523_v56 = vor.u32 %v1521_v20, %v1520_v33  ;;  %v1525_v57 = vrot.slane %v1520_v33, 4  ;;  %v11443_v6 = vpack.c.bf16 %v1255_v34, %v1255_v34  ;;  %v13582_v58 = vpop.f32.mrb[22].mxu0  ;;  %v2165_v33 = vld [vmem:[#allocation2 + $0x24] sm:$0xf] }
 0x178   : > { %v12477_v59 = vpop.eup %12476  ;;  %2153 = vst [vmem:[#allocation2 + $0xc] sm:$0xf] %v2152_v52  ;;  %v1541_v49 = vsel %vm13569_vm11, %v1533_v22, %v1540_v2  ;;  %v2163_v63 = vsel %vm13310_vm2, %v1542_v44, %v2162_v32  ;;  %v1561_v0 = vshrl.u32 %v11445_v41, 16  ;;  %v1564_v1 = vshll.u32 %v11445_v41, 16  ;;  %v13588_v4 = vpop.f32.mrb[23].mxu0 }
 0x179   : > { %v12479_v5 = vpop.eup %12478  ;;  %2161 = vst.msk [vmem:[#allocation2 + $0x1c] sm:$0xf] %vm262_vm5, %v1541_v49  ;;  %2164 = vst [vmem:[#allocation2 + $0x20] sm:$0x1] %v2163_v63  ;;  %v1524_v7 = vsel %vm13569_vm11, %v1516_v29, %v1523_v56  ;;  %v2156_v8 = vsel %vm13310_vm2, %v1525_v57, %v2155_v47  ;;  %v1544_v10 = vshrl.u32 %v11443_v6, 16  ;;  %v1547_v14 = vshll.u32 %v11443_v6, 16 }
 0x17a   : > { %2154 = vst.msk [vmem:[#allocation2 + $0x10] sm:$0xf] %vm262_vm5, %v1524_v7  ;;  %2157 = vst [vmem:[#allocation2 + $0x14] sm:$0x1] %v2156_v8  ;;  %v1563_v16 = vrot.slane %v1561_v0, 7  ;;  %v1258_v18 = vmul.f32 %v12471_v27, %v13481_v11  ;;  %v1256_v20 = vmul.f32 %v12473_v39, %v13487_v17  ;;  %v1134_v13 = vadd.f32 1.0, %v13558_v62 }
 0x17b   : > { %v1546_v22 = vrot.slane %v1544_v10, 7  ;;  %v1132_v24 = vadd.f32 1.0, %v12465_v53  ;;  %v1137_v25 = vadd.f32 1.0, %v12475_v51  ;;  %v1135_v26 = vadd.f32 1.0, %v12477_v59  ;;  %v2176_v52 = vld [vmem:[#allocation2 + $0x38] sm:$0x1] }
 0x17c   : > { %v12481_v28 = vpop.eup %12480  ;;  %v1566_v29 = vor.u32 %v1564_v1, %v1563_v16  ;;  %v1567_v32 = vrot.slane %v1563_v16, 4  ;;  %v11446_v34 = vpack.c.bf16 %v1258_v18, %v1258_v18  ;;  %v11444_v42 = vpack.c.bf16 %v1256_v20, %v1256_v20  ;;  %v2169_v57 = vld [vmem:[#allocation2 + $0x2c] sm:$0x1] }
 0x17d   : > { %v12483_v2 = vpop.eup %12482  ;;  %v1549_v44 = vor.u32 %v1547_v14, %v1546_v22  ;;  %v1550_v47 = vrot.slane %v1546_v22, 4  ;;  %v1261_v11 = vmul.f32 %v12481_v28, %v13493_v31  ;;  %12484 = vrcp.f32 %v1134_v13  ;;  %v13600_v17 = vpop.f32.mrb[24].mxu0 }
 0x17e   : > { %v2173_v62 = vsel %vm13562_vm10, %v1566_v29, %v2172_v21  ;;  %v1569_v53 = vshrl.u32 %v11446_v34, 16  ;;  %v1572_v27 = vshll.u32 %v11446_v34, 16  ;;  %v1552_v39 = vshrl.u32 %v11444_v42, 16  ;;  %v13604_v41 = vpop.f32.mrb[25].mxu0 }
 0x17f   : > { %2174 = vst [vmem:[#allocation2 + $0x30] sm:$0xf] %v2173_v62  ;;  %v2166_v51 = vsel %vm13562_vm10, %v1549_v44, %v2165_v33  ;;  %v1555_v56 = vshll.u32 %v11444_v42, 16  ;;  %v11449_v6 = vpack.c.bf16 %v1261_v11, %v1261_v11  ;;  %v1259_v31 = vmul.f32 %v12483_v2, %v13498_v36  ;;  %v13609_v59 = vpop.f32.mrb[26].mxu0  ;;  %v2186_v33 = vld [vmem:[#allocation2 + $0x48] sm:$0xf] }
 0x180   : > { %2167 = vst [vmem:[#allocation2 + $0x24] sm:$0xf] %v2166_v51  ;;  %v1571_v49 = vrot.slane %v1569_v53, 7  ;;  %v1554_v63 = vrot.slane %v1552_v39, 7  ;;  %12486 = vrcp.f32 %v1132_v24  ;;  %v1138_v0 = vadd.f32 1.0, %v12479_v5  ;;  %v13611_v1 = vpop.f32.mrb[27].mxu0 }
 0x181   : > { %v1595_v7 = vshrl.u32 %v11449_v6, 16  ;;  %v1598_v8 = vshll.u32 %v11449_v6, 16  ;;  %v11447_v10 = vpack.c.bf16 %v1259_v31, %v1259_v31  ;;  %12488 = vrcp.f32 %v1137_v25  ;;  %v12266_v14 = vld [vmem:[#allocation2 + $0x18] sm:$0xff]   ;;  %v12267_v16 = vld [vmem:[#allocation2 + $0xc] sm:$0xff]  }
 0x182   : > { %v1574_v18 = vor.u32 %v1572_v27, %v1571_v49  ;;  %v1576_v20 = vrot.slane %v1571_v49, 4  ;;  %v1557_v13 = vor.u32 %v1555_v56, %v1554_v63  ;;  %v1559_v21 = vrot.slane %v1554_v63, 4  ;;  %4561 = vrot.lane.b32.xlu1 %v12266_v14, %s13089_s15  ;;  %4559 = vrot.lane.b32.xlu0 %v12267_v16, %s13089_s15  ;;  %v2179_v42 = vld [vmem:[#allocation2 + $0x3c] sm:$0xf] }
 0x183   : > { %v13613_v36 = vrot.slane %v1595_v7, 7  ;;  %v1578_v22 = vshrl.u32 %v11447_v10, 16  ;;  %v1581_v28 = vshll.u32 %v11447_v10, 16  ;;  %12490 = vrcp.f32 %v1135_v26 }
 0x184   : > { %v1575_v5 = vsel %vm13569_vm11, %v1567_v32, %v1574_v18  ;;  %v2177_v24 = vsel %vm13310_vm2, %v1576_v20, %v2176_v52  ;;  %v1558_v25 = vsel %vm13569_vm11, %v1550_v47, %v1557_v13  ;;  %v2170_v29 = vsel %vm13310_vm2, %v1559_v21, %v2169_v57 }
 0x185   : > { %2175 = vst.msk [vmem:[#allocation2 + $0x34] sm:$0xf] %vm262_vm5, %v1575_v5  ;;  %2178 = vst [vmem:[#allocation2 + $0x38] sm:$0x1] %v2177_v24  ;;  %v1600_v26 = vor.u32 %v1598_v8, %v13613_v36  ;;  %v1601_v32 = vrot.slane %v13613_v36, 4  ;;  %v13629_v34 = vrot.slane %v1578_v22, 7  ;;  %12492 = vrcp.f32 %v1138_v0 }
 0x186   : > { %2168 = vst.msk [vmem:[#allocation2 + $0x28] sm:$0xf] %vm262_vm5, %v1558_v25  ;;  %2171 = vst [vmem:[#allocation2 + $0x2c] sm:$0x1] %v2170_v29  ;;  %v13631_v2 = vpop.f32.mrb[28].mxu0  ;;  %12494 = vpow2.f32 %v13542_v38  ;;  %v949_v44 = vsub.f32 0.0, %v13548_v48  ;;  %v13638_v11 = vadd.f32 %v13554_v55, %v13449_v37  ;;  %v13650_v52 = vadd.f32 %v13449_v37, %v13556_v61  ;;  %3627 = vrot.lane.b32.xlu0 %v13544_v40, %s13089_s15 }
 0x187   : > { %v947_v47 = vsub.f32 0.0, %v13552_v43  ;;  %v13640_v62 = vpop.f32.mrb[29].mxu0  ;;  %v12485_v53 = vpop.eup %12484  ;;  %v13642_v27 = vld [vmem:[#allocation2 + $0x24] sm:$0xe]  ;;  %v2187_v39 = vsel %vm13562_vm10, %v1600_v26, %v2186_v33  ;;  %v1583_v51 = vor.u32 %v1581_v28, %v13629_v34  ;;  %v1584_v38 = vrot.slane %v13629_v34, 4 }
 0x188   : > { %17265 = vst [vmem:[#allocation13_spill] sm:$0xff] %v13642_v27  ;;  %v13652_v56 = vpop.f32.mrb[30].mxu0  ;;  %2188 = vst [vmem:[#allocation2 + $0x48] sm:$0xf] %v2187_v39  ;;  %v1262_v57 = vmul.f32 %v12485_v53, %v13504_v46  ;;  %v1031_v6 = vmul.f32 1.442695, %v949_v44  ;;  %v13666_v7 = vadd.f32 %v13574_v35, %v13449_v37  ;;  %v13670_v46 = vadd.f32 %v13449_v37, %v13578_v50 }
 0x189   : > { %v1027_v31 = vmul.f32 1.442695, %v947_v47  ;;  %v13658_v49 = vpop.f32.mrb[31].mxu0  ;;  %v2180_v63 = vsel %vm13562_vm10, %v1583_v51, %v2179_v42  ;;  %v950_v61 = vsub.f32 0.0, %v13638_v11  ;;  %v948_v0 = vsub.f32 0.0, %v13650_v52 }
 0x18a   : > { %v12487_v40 = vpop.eup %12486  ;;  %2181 = vst [vmem:[#allocation2 + $0x3c] sm:$0xf] %v2180_v63  ;;  %v11450_v8 = vpack.c.bf16 %v1262_v57, %v1262_v57  ;;  %12496 = vpow2.f32 %v1031_v6  ;;  %v13674_v10 = vadd.f32 %v13582_v58, %v13449_v37  ;;  %v13682_v50 = vadd.f32 %v13449_v37, %v13588_v4  ;;  %v2190_v29 = vld [vmem:[#allocation2 + $0x50] sm:$0x1]  ;;  %v14377_v27 = vld [vmem:[#allocation2 + $0x14] sm:$0x1] }
 0x18b   : > { %v12489_v14 = vpop.eup %12488  ;;  %v1260_v16 = vmul.f32 %v12487_v40, %v13508_v54  ;;  %12498 = vpow2.f32 %v1027_v31  ;;  %v1033_v18 = vmul.f32 1.442695, %v950_v61  ;;  %v1029_v20 = vmul.f32 1.442695, %v948_v0 }
 0x18c   : > { %v1603_v13 = vshrl.u32 %v11450_v8, 16  ;;  %v1606_v21 = vshll.u32 %v11450_v8, 16  ;;  %v1265_v22 = vmul.f32 %v12489_v14, %v13519_v3  ;;  %v953_v54 = vsub.f32 0.0, %v13666_v7  ;;  %v12269_v63 = vld [vmem:[#allocation2 + $0x30] sm:$0xff]  }
 0x18d   : > { %v13677_v35 = vld [vmem:[#allocation2 + $0x28] sm:$0xf]  ;;  %v12491_v28 = vpop.eup %12490  ;;  %v11448_v5 = vpack.c.bf16 %v1260_v16, %v1260_v16  ;;  %12500 = vpow2.f32 %v1033_v18  ;;  %v13687_v42 = vpop.f32.mrb[32].mxu0 }
 0x18e   : > { %17266 = vst [vmem:[#allocation14_spill] sm:$0xff] %v13677_v35  ;;  %v17239_v58 = vrot.slane %v13677_v35, 5  ;;  %v12268_v24 = vld [vmem:[#allocation2 + $0x24] sm:$0xff]   ;;  %v1605_v25 = vrot.slane %v1603_v13, 7  ;;  %v11453_v33 = vpack.c.bf16 %v1265_v22, %v1265_v22  ;;  %v1263_v26 = vmul.f32 %v12491_v28, %v13526_v9  ;;  %v13694_v39 = vpop.f32.mrb[33].mxu0 }
 0x18f   : > { %12502 = vpow2.f32 %v1029_v20  ;;  %v12493_v3 = vpop.eup %12492  ;;  %v1586_v44 = vshrl.u32 %v11448_v5, 16  ;;  %v1589_v47 = vshll.u32 %v11448_v5, 16  ;;  %v1039_v53 = vmul.f32 1.442695, %v953_v54  ;;  %4563 = vrot.lane.b32.xlu0 %v12268_v24, %s13089_s15  ;;  %v13696_v61 = vpop.f32.mrb[34].mxu0 }
 0x190   : > { %v13691_v4 = vrot.slane %v17239_v58, 4  ;;  %v12495_v51 = vpop.eup %12494  ;;  %v1608_v57 = vor.u32 %v1606_v21, %v1605_v25  ;;  %v1610_v6 = vrot.slane %v1605_v25, 4  ;;  %v1629_v31 = vshrl.u32 %v11453_v33, 16  ;;  %v2183_v20 = vld [vmem:[#allocation2 + $0x44] sm:$0x1]  ;;  %v13705_v21 = vpop.f32.mrb[35].mxu0 }
 0x191   : > { %v1632_v9 = vshll.u32 %v11453_v33, 16  ;;  %v1588_v0 = vrot.slane %v1586_v44, 7  ;;  %v11451_v40 = vpack.c.bf16 %v1263_v26, %v1263_v26  ;;  %v1266_v8 = vmul.f32 %v12493_v3, %v13532_v19  ;;  %v2200_v19 = vld [vmem:[#allocation2 + $0x60] sm:$0xf]  ;;  %v2193_v25 = vld [vmem:[#allocation2 + $0x54] sm:$0xf] }
 0x192   : > { %17267 = vst [vmem:[#allocation15_spill] sm:$0xff] %v13691_v4  ;;  %v1136_v14 = vadd.f32 1.0, %v12495_v51  ;;  %v1609_v16 = vsel %vm13569_vm11, %v1601_v32, %v1608_v57  ;;  %v2191_v18 = vsel %vm13310_vm2, %v1610_v6, %v2190_v29  ;;  %v1631_v13 = vrot.slane %v1629_v31, 7  ;;  %v12307_v58 = vld [vmem:[#allocation2 + $0x18] sm:$0xff]  }
 0x193   : > { %12504 = vpow2.f32 %v1039_v53  ;;  %2189 = vst.msk [vmem:[#allocation2 + $0x4c] sm:$0xf] %vm262_vm5, %v1609_v16  ;;  %2192 = vst [vmem:[#allocation2 + $0x50] sm:$0x1] %v2191_v18  ;;  %v1591_v22 = vor.u32 %v1589_v47, %v1588_v0  ;;  %v1593_v28 = vrot.slane %v1588_v0, 4  ;;  %v1612_v5 = vshrl.u32 %v11451_v40, 16  ;;  %4565 = vrot.lane.b32.xlu0 %v12269_v63, %s13089_s15 }
 0x194   : > { %v1615_v54 = vshll.u32 %v11451_v40, 16  ;;  %v12497_v36 = vpop.eup %12496  ;;  %v1634_v32 = vor.u32 %v1632_v9, %v1631_v13  ;;  %v1635_v24 = vrot.slane %v1631_v13, 4  ;;  %v11454_v29 = vpack.c.bf16 %v1266_v8, %v1266_v8  ;;  %v2204_v9 = vld [vmem:[#allocation2 + $0x68] sm:$0x1]  ;;  %2634 = vst.msk [vmem:[#allocation3 + $0x50] sm:$0xff] %vm2631_vm15, %v12307_v58 }
 0x195   : > { %12506 = vrcp.f32 %v1136_v14  ;;  %v12499_v33 = vpop.eup %12498  ;;  %v1592_v26 = vsel %vm13569_vm11, %v1584_v38, %v1591_v22  ;;  %v2184_v3 = vsel %vm13310_vm2, %v1593_v28, %v2183_v20  ;;  %v13715_v44 = vrot.slane %v1612_v5, 7  ;;  %v13723_v0 = vpop.f32.mrb[36].mxu0 }
 0x196   : > { %v1141_v47 = vadd.f32 1.0, %v12497_v36  ;;  %2182 = vst.msk [vmem:[#allocation2 + $0x40] sm:$0xf] %vm262_vm5, %v1592_v26  ;;  %2185 = vst [vmem:[#allocation2 + $0x44] sm:$0x1] %v2184_v3  ;;  %v2201_v53 = vsel %vm13562_vm10, %v1634_v32, %v2200_v19  ;;  %v1637_v51 = vshrl.u32 %v11454_v29, 16  ;;  %v13731_v36 = vadd.f32 %v13600_v17, %v13449_v37 }
 0x197   : > { %v1640_v57 = vshll.u32 %v11454_v29, 16  ;;  %v1139_v6 = vadd.f32 1.0, %v12499_v33  ;;  %v12501_v31 = vpop.eup %12500  ;;  %2202 = vst [vmem:[#allocation2 + $0x60] sm:$0xf] %v2201_v53  ;;  %v1617_v34 = vor.u32 %v1615_v54, %v13715_v44  ;;  %v1618_v38 = vrot.slane %v13715_v44, 4  ;;  %v13745_v3 = vpop.f32.mrb[37].mxu0 }
 0x198   : > { %12508 = vrcp.f32 %v1141_v47  ;;  %v951_v63 = vsub.f32 0.0, %v13670_v46  ;;  %v1639_v8 = vrot.slane %v1637_v51, 7  ;;  %v1142_v14 = vadd.f32 1.0, %v12501_v31 }
 0x199   : > { %v12503_v40 = vpop.eup %12502  ;;  %12510 = vrcp.f32 %v1139_v6  ;;  %v954_v16 = vsub.f32 0.0, %v13674_v10  ;;  %v2194_v18 = vsel %vm13562_vm10, %v1617_v34, %v2193_v25  ;;  %v952_v22 = vsub.f32 0.0, %v13682_v50  ;;  %v13759_v6 = vpop.f32.mrb[38].mxu0 }
 0x19a   : > { %v1140_v20 = vadd.f32 1.0, %v12503_v40  ;;  %v1035_v13 = vmul.f32 1.442695, %v951_v63  ;;  %2195 = vst [vmem:[#allocation2 + $0x54] sm:$0xf] %v2194_v18  ;;  %v1642_v28 = vor.u32 %v1640_v57, %v1639_v8  ;;  %v1644_v19 = vrot.slane %v1639_v8, 4 }
 0x19b   : > { %12512 = vrcp.f32 %v1142_v14  ;;  %v1041_v5 = vmul.f32 1.442695, %v954_v16  ;;  %v1037_v54 = vmul.f32 1.442695, %v952_v22  ;;  %v13735_v32 = vadd.f32 %v13449_v37, %v13604_v41  ;;  %v12271_v18 = vld [vmem:[#allocation2 + $0x48] sm:$0xff]  }
 0x19c   : > { %12514 = vrcp.f32 %v1140_v20  ;;  %v1643_v29 = vsel %vm13569_vm11, %v1635_v24, %v1642_v28  ;;  %v2205_v33 = vsel %vm13310_vm2, %v1644_v19, %v2204_v9  ;;  %v13743_v26 = vadd.f32 %v13609_v59, %v13449_v37  ;;  %v13777_v20 = vpop.f32.mrb[39].mxu0 }
 0x19d   : > { %v12505_v25 = vpop.eup %12504  ;;  %12516 = vpow2.f32 %v1035_v13  ;;  %2203 = vst.msk [vmem:[#allocation2 + $0x64] sm:$0xf] %vm262_vm5, %v1643_v29  ;;  %2206 = vst [vmem:[#allocation2 + $0x68] sm:$0x1] %v2205_v33  ;;  %v957_v41 = vsub.f32 0.0, %v13731_v36  ;;  %v955_v47 = vsub.f32 0.0, %v13735_v32  ;;  %v13753_v59 = vadd.f32 %v13449_v37, %v13611_v1 }
 0x19e   : > { %v1145_v17 = vadd.f32 1.0, %v12505_v25  ;;  %12518 = vpow2.f32 %v1041_v5  ;;  %v12270_v24 = vld [vmem:[#allocation2 + $0x3c] sm:$0xff]   ;;  %v958_v51 = vsub.f32 0.0, %v13743_v26  ;;  %v13757_v57 = vadd.f32 %v13631_v2, %v13449_v37 }
 0x19f   : > { %v12507_v53 = vpop.eup %12506  ;;  %12520 = vpow2.f32 %v1037_v54  ;;  %v1047_v34 = vmul.f32 1.442695, %v957_v41  ;;  %v1043_v9 = vmul.f32 1.442695, %v955_v47  ;;  %4567 = vrot.lane.b32.xlu0 %v12270_v24, %s13089_s15  ;;  %v956_v40 = vsub.f32 0.0, %v13753_v59 }
 0x1a0   : > { %v1264_v31 = vmul.f32 %v12507_v53, %v13536_v23  ;;  %12522 = vrcp.f32 %v1145_v17  ;;  %v1049_v63 = vmul.f32 1.442695, %v958_v51  ;;  %v961_v8 = vsub.f32 0.0, %v13757_v57  ;;  %v2197_v47 = vld [vmem:[#allocation2 + $0x5c] sm:$0x1] }
 0x1a1   : > { %v13767_v1 = vadd.f32 %v13449_v37, %v13640_v62  ;;  %12524 = vpow2.f32 %v1047_v34  ;;  %v13771_v23 = vadd.f32 %v13652_v56, %v13449_v37  ;;  %v13775_v16 = vadd.f32 %v13449_v37, %v13658_v49 }
 0x1a2   : > { %v12509_v2 = vpop.eup %12508  ;;  %v11452_v14 = vpack.c.bf16 %v1264_v31, %v1264_v31  ;;  %12526 = vpow2.f32 %v1043_v9  ;;  %v1045_v62 = vmul.f32 1.442695, %v956_v40  ;;  %v1055_v28 = vmul.f32 1.442695, %v961_v8 }
 0x1a3   : > { %v12511_v13 = vpop.eup %12510  ;;  %v1269_v22 = vmul.f32 %v12509_v2, %v13548_v48  ;;  %12528 = vpow2.f32 %v1049_v63  ;;  %4569 = vrot.lane.b32.xlu0 %v12271_v18, %s13089_s15  ;;  %v959_v37 = vsub.f32 0.0, %v13767_v1  ;;  %v962_v49 = vsub.f32 0.0, %v13771_v23  ;;  %v2207_v18 = vld [vmem:[#allocation2 + $0x6c] sm:$0xf] }
 0x1a4   : > { %v1620_v19 = vshrl.u32 %v11452_v14, 16  ;;  %v1623_v5 = vshll.u32 %v11452_v14, 16  ;;  %v1267_v54 = vmul.f32 %v12511_v13, %v13552_v43  ;;  %12530 = vpow2.f32 %v1045_v62  ;;  %v2214_v14 = vld [vmem:[#allocation2 + $0x78] sm:$0xf] }
 0x1a5   : > { %v12513_v56 = vpop.eup %12512  ;;  %v11457_v25 = vpack.c.bf16 %v1269_v22, %v1269_v22  ;;  %12532 = vpow2.f32 %v1055_v28  ;;  %v13786_v51 = vmul.f32 1.442695, %v959_v37 }
 0x1a6   : > { %v12515_v29 = vpop.eup %12514  ;;  %v1622_v33 = vrot.slane %v1620_v19, 7  ;;  %v11455_v48 = vpack.c.bf16 %v1267_v54, %v1267_v54  ;;  %v1270_v17 = vmul.f32 %v12513_v56, %v13638_v11 }
 0x1a7   : > { %v12517_v41 = vpop.eup %12516  ;;  %v1663_v24 = vshrl.u32 %v11457_v25, 16  ;;  %v1666_v43 = vshll.u32 %v11457_v25, 16  ;;  %v1268_v53 = vmul.f32 %v12515_v29, %v13650_v52 }
 0x1a8   : > { %v12519_v31 = vpop.eup %12518  ;;  %v1625_v34 = vor.u32 %v1623_v5, %v1622_v33  ;;  %v1627_v9 = vrot.slane %v1622_v33, 4  ;;  %v1646_v63 = vshrl.u32 %v11455_v48, 16  ;;  %v1649_v40 = vshll.u32 %v11455_v48, 16 }
 0x1a9   : > { %v12521_v8 = vpop.eup %12520  ;;  %v1665_v2 = vrot.slane %v1663_v24, 7  ;;  %v11458_v13 = vpack.c.bf16 %v1270_v17, %v1270_v17  ;;  %v11456_v11 = vpack.c.bf16 %v1268_v53, %v1268_v53  ;;  %v1143_v22 = vadd.f32 1.0, %v12517_v41 }
 0x1aa   : > { %v12523_v62 = vpop.eup %12522  ;;  %v1626_v52 = vsel %vm13569_vm11, %v1618_v38, %v1625_v34  ;;  %v2198_v28 = vsel %vm13310_vm2, %v1627_v9, %v2197_v47  ;;  %v1648_v19 = vrot.slane %v1646_v63, 7  ;;  %v1146_v5 = vadd.f32 1.0, %v12519_v31  ;;  %v2218_v31 = vld [vmem:[#allocation2 + $0x80] sm:$0x1] }
 0x1ab   : > { %2196 = vst.msk [vmem:[#allocation2 + $0x58] sm:$0xf] %vm262_vm5, %v1626_v52  ;;  %2199 = vst [vmem:[#allocation2 + $0x5c] sm:$0x1] %v2198_v28  ;;  %v1668_v54 = vor.u32 %v1666_v43, %v1665_v2  ;;  %v1669_v56 = vrot.slane %v1665_v2, 4  ;;  %v1671_v25 = vshrl.u32 %v11458_v13, 16  ;;  %v12525_v29 = vpop.eup %12524  ;;  %v1273_v47 = vmul.f32 %v12523_v62, %v13666_v7 }
 0x1ac   : > { %v1674_v37 = vshll.u32 %v11458_v13, 16  ;;  %v1651_v33 = vor.u32 %v1649_v40, %v1648_v19  ;;  %v1652_v48 = vrot.slane %v1648_v19, 4  ;;  %v1654_v17 = vshrl.u32 %v11456_v11, 16  ;;  %v12527_v41 = vpop.eup %12526  ;;  %v2211_v13 = vld [vmem:[#allocation2 + $0x74] sm:$0x1] }
 0x1ad   : > { %v1657_v44 = vshll.u32 %v11456_v11, 16  ;;  %v2215_v38 = vsel %vm13562_vm10, %v1668_v54, %v2214_v14  ;;  %v1673_v24 = vrot.slane %v1671_v25, 7  ;;  %12534 = vrcp.f32 %v1143_v22  ;;  %v12529_v53 = vpop.eup %12528  ;;  %v2667_v62 = vld [vmem:[#allocation2 + $0xc] sm:$0xf] }
 0x1ae   : > { %2216 = vst [vmem:[#allocation2 + $0x78] sm:$0xf] %v2215_v38  ;;  %v2208_v43 = vsel %vm13562_vm10, %v1651_v33, %v2207_v18  ;;  %v1656_v34 = vrot.slane %v1654_v17, 7  ;;  %12536 = vrcp.f32 %v1146_v5  ;;  %v1144_v9 = vadd.f32 1.0, %v12521_v8  ;;  %v12531_v63 = vpop.eup %12530 }
 0x1af   : > { %2209 = vst [vmem:[#allocation2 + $0x6c] sm:$0xf] %v2208_v43  ;;  %v1676_v40 = vor.u32 %v1674_v37, %v1673_v24  ;;  %v1678_v2 = vrot.slane %v1673_v24, 4  ;;  %v11461_v11 = vpack.c.bf16 %v1273_v47, %v1273_v47  ;;  %v1149_v14 = vadd.f32 1.0, %v12525_v29  ;;  %v12533_v52 = vpop.eup %12532  ;;  %v2228_v37 = vld [vmem:[#allocation2 + $0x90] sm:$0xf] }
 0x1b0   : > { %v1659_v28 = vor.u32 %v1657_v44, %v1656_v34  ;;  %v1661_v7 = vrot.slane %v1656_v34, 4  ;;  %12538 = vrcp.f32 %v1144_v9  ;;  %v1147_v22 = vadd.f32 1.0, %v12527_v41  ;;  %v2668_v41 = vld [vmem:[#allocation2 + $0x10] sm:$0xf]  ;;  %v2669_v24 = vld [vmem:[#allocation2 + $0x14] sm:$0x1] }
 0x1b1   : > { %v1677_v18 = vsel %vm13569_vm11, %v1669_v56, %v1676_v40  ;;  %v2219_v19 = vsel %vm13310_vm2, %v1678_v2, %v2218_v31  ;;  %v1697_v8 = vshrl.u32 %v11461_v11, 16  ;;  %v1700_v5 = vshll.u32 %v11461_v11, 16  ;;  %v12273_v34 = vld [vmem:[#allocation2 + $0x60] sm:$0xff]  }
 0x1b2   : > { %2217 = vst.msk [vmem:[#allocation2 + $0x7c] sm:$0xf] %vm262_vm5, %v1677_v18  ;;  %2220 = vst [vmem:[#allocation2 + $0x80] sm:$0x1] %v2219_v19  ;;  %v1660_v54 = vsel %vm13569_vm11, %v1652_v48, %v1659_v28  ;;  %v2212_v25 = vsel %vm13310_vm2, %v1661_v7, %v2211_v13  ;;  %12540 = vrcp.f32 %v1149_v14  ;;  %v1150_v29 = vadd.f32 1.0, %v12529_v53  ;;  %v12272_v33 = vld [vmem:[#allocation2 + $0x54] sm:$0xff]  }
 0x1b3   : > { %2210 = vst.msk [vmem:[#allocation2 + $0x70] sm:$0xf] %vm262_vm5, %v1660_v54  ;;  %2213 = vst [vmem:[#allocation2 + $0x74] sm:$0x1] %v2212_v25  ;;  %v13810_v56 = vrot.slane %v1697_v8, 7  ;;  %12542 = vrcp.f32 %v1147_v22  ;;  %v1148_v17 = vadd.f32 1.0, %v12531_v63  ;;  %4571 = vrot.lane.b32.xlu0 %v12272_v33, %s13089_s15 }
 0x1b4   : > { %v1153_v44 = vadd.f32 1.0, %v12533_v52  ;;  %12544 = vrcp.f32 %v1150_v29  ;;  %v1057_v48 = vmul.f32 1.442695, %v962_v49  ;;  %v960_v38 = vsub.f32 0.0, %v13775_v16  ;;  %v2670_v14 = vld [vmem:[#allocation2 + $0x18] sm:$0xf] }
 0x1b5   : > { %v2788_v47 = vshrl.u32 %v2667_v62, 16  ;;  %v1702_v53 = vor.u32 %v1700_v5, %v13810_v56  ;;  %v1703_v43 = vrot.slane %v13810_v56, 4  ;;  %12546 = vrcp.f32 %v1148_v17 }
 0x1b6   : > { %v2791_v31 = vshll.u32 %v2667_v62, 16  ;;  %12548 = vrcp.f32 %v1153_v44  ;;  %v1053_v9 = vmul.f32 1.442695, %v960_v38  ;;  %v2797_v40 = vshll.u32 %v2668_v41, 16 }
 0x1b7   : > { %v2790_v63 = vrot.slane %v2788_v47, 4  ;;  %v12535_v2 = vpop.eup %12534  ;;  %v2229_v49 = vsel %vm13562_vm10, %v1702_v53, %v2228_v37  ;;  %12550 = vpow2.f32 %v13786_v51  ;;  %v2801_v11 = vshrl.u32 %v2668_v41, 16  ;;  %4573 = vrot.lane.b32.xlu0 %v12273_v34, %s13089_s15  ;;  %v2221_v53 = vld [vmem:[#allocation2 + $0x84] sm:$0xf] }
 0x1b8   : > { %v2793_v13 = vrot.slane %v2791_v31, 5  ;;  %v12537_v52 = vpop.eup %12536  ;;  %2230 = vst [vmem:[#allocation2 + $0x90] sm:$0xf] %v2229_v49  ;;  %v1271_v28 = vmul.f32 %v12535_v2, %v13670_v46  ;;  %12552 = vpow2.f32 %v1057_v48  ;;  %v13822_v7 = vrot.slane %v2797_v40, 5 }
 0x1b9   : > { %v2807_v22 = vshll.u32 %v2669_v24, 16  ;;  %v1274_v62 = vmul.f32 %v12537_v52, %v13674_v10  ;;  %12554 = vpow2.f32 %v1053_v9  ;;  %v2803_v19 = vrot.slane %v2801_v11, 4  ;;  %v12275_v24 = vld [vmem:[#allocation2 + $0x78] sm:$0xff]  }
 0x1ba   : > { %v2794_v18 = vor.u32 %v2793_v13, %v2790_v63  ;;  %v12539_v8 = vpop.eup %12538  ;;  %v11459_v51 = vpack.c.bf16 %v1271_v28, %v1271_v28  ;;  %v2812_v54 = vshrl.u32 %v2670_v14, 16  ;;  %v2815_v25 = vshll.u32 %v2670_v14, 16  ;;  %v12274_v37 = vld [vmem:[#allocation2 + $0x6c] sm:$0xff]  }
 0x1bb   : > { %v13826_v5 = vrot.slane %v2807_v22, 5  ;;  %v11462_v29 = vpack.c.bf16 %v1274_v62, %v1274_v62  ;;  %v1272_v46 = vmul.f32 %v12539_v8, %v13682_v50  ;;  %v2804_v17 = vor.u32 %v2803_v19, %v13822_v7  ;;  %4575 = vrot.lane.b32.xlu0 %v12274_v37, %s13089_s15  ;;  %v2225_v8 = vld [vmem:[#allocation2 + $0x8c] sm:$0x1] }
 0x1bc   : > { %v13829_v33 = vrot.slane %v2794_v18, 4  ;;  %v12541_v44 = vpop.eup %12540  ;;  %v1680_v41 = vshrl.u32 %v11459_v51, 16  ;;  %v1683_v10 = vshll.u32 %v11459_v51, 16  ;;  %v13832_v48 = vrot.slane %v2812_v54, 4 }
 0x1bd   : > { %v13834_v38 = vrot.slane %v2815_v25, 5  ;;  %v12543_v47 = vpop.eup %12542  ;;  %v1705_v31 = vshrl.u32 %v11462_v29, 16  ;;  %v1708_v34 = vshll.u32 %v11462_v29, 16  ;;  %v11460_v9 = vpack.c.bf16 %v1272_v46, %v1272_v46 }
 0x1be   : > { %v1277_v50 = vmul.f32 %v12541_v44, %v13731_v36  ;;  %v12545_v63 = vpop.eup %12544  ;;  %v1682_v40 = vrot.slane %v1680_v41, 7  ;;  %v1275_v2 = vmul.f32 %v12543_v47, %v13735_v32  ;;  %v2800_v49 = vsel %vm13514_vm8, %v13829_v33, %v13822_v7  ;;  %v2232_v36 = vld [vmem:[#allocation2 + $0x98] sm:$0x1] }
 0x1bf   : > { %v13843_v13 = vrot.slane %v2804_v17, 4  ;;  %v12547_v11 = vpop.eup %12546  ;;  %v1707_v14 = vrot.slane %v1705_v31, 7  ;;  %v1688_v52 = vshrl.u32 %v11460_v9, 16  ;;  %v1691_v28 = vshll.u32 %v11460_v9, 16  ;;  %4577 = vrot.lane.b32.xlu0 %v12275_v24, %s13089_s15 }
 0x1c0   : > { %v11465_v22 = vpack.c.bf16 %v1277_v50, %v1277_v50  ;;  %v12549_v62 = vpop.eup %12548  ;;  %v1685_v18 = vor.u32 %v1683_v10, %v1682_v40  ;;  %v1686_v19 = vrot.slane %v1682_v40, 4  ;;  %v11463_v51 = vpack.c.bf16 %v1275_v2, %v1275_v2  ;;  %v2242_v2 = vld [vmem:[#allocation2 + $0xa8] sm:$0xf] }
 0x1c1   : > { %v1278_v32 = vmul.f32 %v12545_v63, %v13743_v26  ;;  %v12551_v54 = vpop.eup %12550  ;;  %v1710_v25 = vor.u32 %v1708_v34, %v1707_v14  ;;  %v1712_v37 = vrot.slane %v1707_v14, 4  ;;  %v1690_v29 = vrot.slane %v1688_v52, 7  ;;  %v2235_v14 = vld [vmem:[#allocation2 + $0x9c] sm:$0xf] }
 0x1c2   : > { %v1731_v46 = vshrl.u32 %v11465_v22, 16  ;;  %v12553_v17 = vpop.eup %12552  ;;  %v2222_v44 = vsel %vm13562_vm10, %v1685_v18, %v2221_v53  ;;  %v1734_v41 = vshll.u32 %v11465_v22, 16  ;;  %v1714_v47 = vshrl.u32 %v11463_v51, 16 }
 0x1c3   : > { %v1717_v10 = vshll.u32 %v11463_v51, 16  ;;  %v12555_v31 = vpop.eup %12554  ;;  %2223 = vst [vmem:[#allocation2 + $0x84] sm:$0xf] %v2222_v44  ;;  %v1711_v26 = vsel %vm13569_vm11, %v1703_v43, %v1710_v25  ;;  %v2233_v24 = vsel %vm13310_vm2, %v1712_v37, %v2232_v36  ;;  %v1693_v34 = vor.u32 %v1691_v28, %v1690_v29  ;;  %v2246_v44 = vld [vmem:[#allocation2 + $0xb0] sm:$0x1] }
 0x1c4   : > { %v1695_v9 = vrot.slane %v1690_v29, 4  ;;  %2231 = vst.msk [vmem:[#allocation2 + $0x94] sm:$0xf] %vm262_vm5, %v1711_v26  ;;  %2234 = vst [vmem:[#allocation2 + $0x98] sm:$0x1] %v2233_v24  ;;  %v1733_v50 = vrot.slane %v1731_v46, 7  ;;  %v11466_v63 = vpack.c.bf16 %v1278_v32, %v1278_v32  ;;  %v1276_v40 = vmul.f32 %v12547_v11, %v13753_v59 }
 0x1c5   : > { %v13856_v53 = vrot.slane %v1714_v47, 7  ;;  %v1694_v56 = vsel %vm13569_vm11, %v1686_v19, %v1693_v34  ;;  %v1281_v52 = vmul.f32 %v12549_v62, %v13757_v57  ;;  %v1151_v28 = vadd.f32 1.0, %v12551_v54  ;;  %v2671_v46 = vld [vmem:[#allocation2 + $0x1c] sm:$0xf] }
 0x1c6   : > { %v2226_v43 = vsel %vm13310_vm2, %v1695_v9, %v2225_v8  ;;  %2224 = vst.msk [vmem:[#allocation2 + $0x88] sm:$0xf] %vm262_vm5, %v1694_v56  ;;  %v1736_v22 = vor.u32 %v1734_v41, %v1733_v50  ;;  %v1737_v18 = vrot.slane %v1733_v50, 4  ;;  %v1739_v11 = vshrl.u32 %v11466_v63, 16  ;;  %v2239_v41 = vld [vmem:[#allocation2 + $0xa4] sm:$0x1] }
 0x1c7   : > { %2227 = vst [vmem:[#allocation2 + $0x8c] sm:$0x1] %v2226_v43  ;;  %v1719_v36 = vor.u32 %v1717_v10, %v13856_v53  ;;  %v1720_v59 = vrot.slane %v13856_v53, 4  ;;  %v1742_v51 = vshll.u32 %v11466_v63, 16  ;;  %v11464_v19 = vpack.c.bf16 %v1276_v40, %v1276_v40  ;;  %v2256_v50 = vld [vmem:[#allocation2 + $0xc0] sm:$0xf] }
 0x1c8   : > { %v11469_v32 = vpack.c.bf16 %v1281_v52, %v1281_v52  ;;  %v2243_v8 = vsel %vm13562_vm10, %v1736_v22, %v2242_v2  ;;  %12556 = vrcp.f32 %v1151_v28  ;;  %v1154_v62 = vadd.f32 1.0, %v12553_v17  ;;  %v2672_v63 = vld [vmem:[#allocation2 + $0x20] sm:$0x1]  ;;  %v2673_v56 = vld [vmem:[#allocation2 + $0x24] sm:$0xf] }
 0x1c9   : > { %v2236_v57 = vsel %vm13562_vm10, %v1719_v36, %v2235_v14  ;;  %2244 = vst [vmem:[#allocation2 + $0xa8] sm:$0xf] %v2243_v8  ;;  %v1741_v54 = vrot.slane %v1739_v11, 7  ;;  %v1722_v25 = vshrl.u32 %v11464_v19, 16  ;;  %v1725_v37 = vshll.u32 %v11464_v19, 16 }
 0x1ca   : > { %2237 = vst [vmem:[#allocation2 + $0x9c] sm:$0xf] %v2236_v57  ;;  %v1765_v29 = vshrl.u32 %v11469_v32, 16  ;;  %v1768_v47 = vshll.u32 %v11469_v32, 16  ;;  %12558 = vrcp.f32 %v1154_v62  ;;  %v1152_v10 = vadd.f32 1.0, %v12555_v31 }
 0x1cb   : > { %v2810_v26 = vsel %vm13514_vm8, %v13843_v13, %v13826_v5  ;;  %v1744_v24 = vor.u32 %v1742_v51, %v1741_v54  ;;  %v1746_v34 = vrot.slane %v1741_v54, 4  ;;  %v1724_v17 = vrot.slane %v1722_v25, 7  ;;  %v13884_v5 = vpop.f32.mrb[40].mxu0  ;;  %v2676_v52 = vld [vmem:[#allocation2 + $0x30] sm:$0xf] }
 0x1cc   : > { %v13875_v9 = vrot.slane %v1765_v29, 7  ;;  %12560 = vrcp.f32 %v1152_v10  ;;  %v10910_v53 = vcombine.low %v2800_v49, %v2810_v26  ;;  %v2818_v31 = vor.u32 %v13834_v38, %v13832_v48  ;;  %v2674_v49 = vld [vmem:[#allocation2 + $0x28] sm:$0xf]  ;;  %v2675_v51 = vld [vmem:[#allocation2 + $0x2c] sm:$0x1]  ;;  %v12277_v19 = vld [vmem:[#allocation2 + $0x90] sm:$0xff]  }
 0x1cd   : > { %v2821_v40 = vshll.u32 %v2671_v46, 16  ;;  %v1745_v13 = vsel %vm13569_vm11, %v1737_v18, %v1744_v24  ;;  %v2247_v43 = vsel %vm13310_vm2, %v1746_v34, %v2246_v44  ;;  %v1727_v2 = vor.u32 %v1725_v37, %v1724_v17  ;;  %v12276_v28 = vld [vmem:[#allocation2 + $0x84] sm:$0xff]  }
 0x1ce   : > { %v1729_v14 = vrot.slane %v1724_v17, 4  ;;  %2245 = vst.msk [vmem:[#allocation2 + $0xac] sm:$0xf] %vm262_vm5, %v1745_v13  ;;  %2248 = vst [vmem:[#allocation2 + $0xb0] sm:$0x1] %v2247_v43  ;;  %v1770_v7 = vor.u32 %v1768_v47, %v13875_v9  ;;  %v1771_v33 = vrot.slane %v13875_v9, 4  ;;  %3629 = vrot.lane.b32.xlu1 %v10910_v53, %s13089_s15  ;;  %4579 = vrot.lane.b32.xlu0 %v12276_v28, %s13089_s15 }
 0x1cf   : > { %v13894_v48 = vrot.slane %v2818_v31, 4  ;;  %v2823_v38 = vrot.slane %v2821_v40, 5  ;;  %v1728_v22 = vsel %vm13569_vm11, %v1720_v59, %v1727_v2  ;;  %v2825_v36 = vshrl.u32 %v2671_v46, 16  ;;  %v2677_v17 = vld [vmem:[#allocation2 + $0x34] sm:$0xf] }
 0x1d0   : > { %v2240_v18 = vsel %vm13310_vm2, %v1729_v14, %v2239_v41  ;;  %v2831_v11 = vshll.u32 %v2672_v63, 16  ;;  %2238 = vst.msk [vmem:[#allocation2 + $0xa0] sm:$0xf] %vm262_vm5, %v1728_v22  ;;  %v2257_v32 = vsel %vm13562_vm10, %v1770_v7, %v2256_v50  ;;  %v2836_v59 = vshrl.u32 %v2673_v56, 16 }
 0x1d1   : > { %2241 = vst [vmem:[#allocation2 + $0xa4] sm:$0x1] %v2240_v18  ;;  %v2824_v8 = vsel %vm13514_vm8, %v13894_v48, %v2823_v38  ;;  %v2839_v57 = vshll.u32 %v2673_v56, 16  ;;  %2258 = vst [vmem:[#allocation2 + $0xc0] sm:$0xf] %v2257_v32  ;;  %v2827_v62 = vrot.slane %v2825_v36, 4 }
 0x1d2   : > { %v2833_v54 = vrot.slane %v2831_v11, 5  ;;  %v2845_v25 = vshll.u32 %v2674_v49, 16  ;;  %v2849_v37 = vshrl.u32 %v2674_v49, 16  ;;  %v12557_v29 = vpop.eup %12556  ;;  %v2838_v46 = vrot.slane %v2836_v59, 4  ;;  %4581 = vrot.lane.b32.xlu0 %v12277_v19, %s13089_s15 }
 0x1d3   : > { %v2841_v44 = vrot.slane %v2839_v57, 5  ;;  %v2855_v41 = vshll.u32 %v2675_v51, 16  ;;  %v2860_v47 = vshrl.u32 %v2676_v52, 16  ;;  %v1279_v10 = vmul.f32 %v12557_v29, %v13767_v1  ;;  %v2678_v29 = vld [vmem:[#allocation2 + $0x38] sm:$0x1] }
 0x1d4   : > { %v2828_v26 = vor.u32 %v2827_v62, %v2823_v38  ;;  %v2847_v24 = vrot.slane %v2845_v25, 5  ;;  %v2851_v34 = vrot.slane %v2849_v37, 4  ;;  %v12559_v50 = vpop.eup %12558  ;;  %v2863_v40 = vshll.u32 %v2676_v52, 16  ;;  %v2249_v25 = vld [vmem:[#allocation2 + $0xb4] sm:$0xf] }
 0x1d5   : > { %v2842_v53 = vor.u32 %v2841_v44, %v2838_v46  ;;  %v2857_v63 = vrot.slane %v2855_v41, 5  ;;  %v2862_v31 = vrot.slane %v2860_v47, 4  ;;  %v11467_v56 = vpack.c.bf16 %v1279_v10, %v1279_v10  ;;  %v12279_v62 = vld [vmem:[#allocation2 + $0xa8] sm:$0xff]  }
 0x1d6   : > { %v1282_v13 = vmul.f32 %v12559_v50, %v13771_v23  ;;  %v2829_v43 = vrot.slane %v2828_v26, 4  ;;  %v2852_v2 = vor.u32 %v2851_v34, %v2847_v24  ;;  %v12561_v14 = vpop.eup %12560  ;;  %v2865_v7 = vrot.slane %v2863_v40, 5  ;;  %v2679_v26 = vld [vmem:[#allocation2 + $0x3c] sm:$0xf] }
 0x1d7   : > { %v2843_v28 = vrot.slane %v2842_v53, 4  ;;  %v2869_v1 = vshll.u32 %v2677_v17, 16  ;;  %v2873_v48 = vshrl.u32 %v2677_v17, 16  ;;  %v1748_v38 = vshrl.u32 %v11467_v56, 16  ;;  %v12278_v36 = vld [vmem:[#allocation2 + $0x9c] sm:$0xff]  }
 0x1d8   : > { %v1751_v49 = vshll.u32 %v11467_v56, 16  ;;  %v11470_v22 = vpack.c.bf16 %v1282_v13, %v1282_v13  ;;  %v1280_v18 = vmul.f32 %v12561_v14, %v13775_v16  ;;  %v2834_v11 = vsel %vm13514_vm8, %v2829_v43, %v2833_v54  ;;  %4583 = vrot.lane.b32.xlu0 %v12278_v36, %s13089_s15  ;;  %v2253_v56 = vld [vmem:[#allocation2 + $0xbc] sm:$0x1]  ;;  %v2682_v13 = vld [vmem:[#allocation2 + $0x48] sm:$0xf] }
 0x1d9   : > { %v2848_v52 = vsel %vm13514_vm8, %v2843_v28, %v2847_v24  ;;  %v2853_v23 = vrot.slane %v2852_v2, 4  ;;  %v2866_v51 = vor.u32 %v2865_v7, %v2862_v31  ;;  %v1750_v19 = vrot.slane %v1748_v38, 7  ;;  %v2260_v24 = vld [vmem:[#allocation2 + $0xc8] sm:$0x1]  ;;  %v2680_v14 = vld [vmem:[#allocation2 + $0x40] sm:$0xf] }
 0x1da   : > { %v1773_v32 = vshrl.u32 %v11470_v22, 16  ;;  %v1776_v59 = vshll.u32 %v11470_v22, 16  ;;  %v11468_v57 = vpack.c.bf16 %v1280_v18, %v1280_v18  ;;  %v10911_v37 = vcombine.low %v2824_v8, %v2834_v11  ;;  %v2681_v22 = vld [vmem:[#allocation2 + $0x44] sm:$0x1]  ;;  %v2683_v18 = vld [vmem:[#allocation2 + $0x4c] sm:$0xf] }
 0x1db   : > { %v2858_v16 = vsel %vm13514_vm8, %v2853_v23, %v2857_v63  ;;  %v2867_v46 = vrot.slane %v2866_v51, 4  ;;  %v2871_v54 = vrot.slane %v2869_v1, 5  ;;  %v1753_v44 = vor.u32 %v1751_v49, %v1750_v19 }
 0x1dc   : > { %v1754_v41 = vrot.slane %v1750_v19, 4  ;;  %v1775_v47 = vrot.slane %v1773_v32, 7  ;;  %v1756_v10 = vshrl.u32 %v11468_v57, 16  ;;  %v1759_v34 = vshll.u32 %v11468_v57, 16  ;;  %3631 = vrot.lane.b32.xlu1 %v10911_v37, %s13089_s15  ;;  %4585 = vrot.lane.b32.xlu0 %v12279_v62, %s13089_s15  ;;  %v2684_v62 = vld [vmem:[#allocation2 + $0x50] sm:$0x1] }
 0x1dd   : > { %v10912_v17 = vcombine.low %v2848_v52, %v2858_v16  ;;  %v2872_v50 = vsel %vm13514_vm8, %v2867_v46, %v2871_v54  ;;  %v2875_v8 = vrot.slane %v2873_v48, 4  ;;  %v2250_v53 = vsel %vm13562_vm10, %v1753_v44, %v2249_v25 }
 0x1de   : > { %v1778_v63 = vor.u32 %v1776_v59, %v1775_v47  ;;  %v1780_v31 = vrot.slane %v1775_v47, 4  ;;  %v1758_v40 = vrot.slane %v1756_v10, 7  ;;  %2251 = vst [vmem:[#allocation2 + $0xb4] sm:$0xf] %v2250_v53  ;;  %v2879_v2 = vshll.u32 %v2678_v29, 16 }
 0x1df   : > { %v2876_v43 = vor.u32 %v2875_v8, %v2871_v54  ;;  %v2884_v28 = vshrl.u32 %v2679_v26, 16  ;;  %v2887_v7 = vshll.u32 %v2679_v26, 16  ;;  %v2893_v51 = vshll.u32 %v2680_v14, 16  ;;  %v2685_v54 = vld [vmem:[#allocation2 + $0x54] sm:$0xf] }
 0x1e0   : > { %v1779_v1 = vsel %vm13569_vm11, %v1771_v33, %v1778_v63  ;;  %v2261_v48 = vsel %vm13310_vm2, %v1780_v31, %v2260_v24  ;;  %v1761_v38 = vor.u32 %v1759_v34, %v1758_v40  ;;  %v1763_v49 = vrot.slane %v1758_v40, 4  ;;  %3633 = vrot.lane.b32.xlu1 %v10912_v17, %s13089_s15  ;;  %v2686_v26 = vld [vmem:[#allocation2 + $0x58] sm:$0xf] }
 0x1e1   : > { %2259 = vst.msk [vmem:[#allocation2 + $0xc4] sm:$0xf] %vm262_vm5, %v1779_v1  ;;  %2262 = vst [vmem:[#allocation2 + $0xc8] sm:$0x1] %v2261_v48  ;;  %v2877_v36 = vrot.slane %v2876_v43, 4  ;;  %v2881_v11 = vrot.slane %v2879_v2, 5 }
 0x1e2   : > { %v2886_v52 = vrot.slane %v2884_v28, 4  ;;  %v2889_v23 = vrot.slane %v2887_v7, 5  ;;  %v1762_v9 = vsel %vm13569_vm11, %v1754_v41, %v1761_v38  ;;  %v2254_v33 = vsel %vm13310_vm2, %v1763_v49, %v2253_v56  ;;  %v2688_v56 = vld [vmem:[#allocation2 + $0x60] sm:$0xf]  ;;  %v2689_v38 = vld [vmem:[#allocation2 + $0x64] sm:$0xf] }
 0x1e3   : > { %v2897_v19 = vshrl.u32 %v2680_v14, 16  ;;  %2252 = vst.msk [vmem:[#allocation2 + $0xb8] sm:$0xf] %vm262_vm5, %v1762_v9  ;;  %2255 = vst [vmem:[#allocation2 + $0xbc] sm:$0x1] %v2254_v33  ;;  %v2882_v32 = vsel %vm13514_vm8, %v2877_v36, %v2881_v11  ;;  %v2903_v57 = vshll.u32 %v2681_v22, 16 }
 0x1e4   : > { %v2890_v59 = vor.u32 %v2889_v23, %v2886_v52  ;;  %v2908_v25 = vshrl.u32 %v2682_v13, 16  ;;  %v10913_v37 = vcombine.low %v2872_v50, %v2882_v32  ;;  %v2895_v16 = vrot.slane %v2893_v51, 5  ;;  %v2687_v50 = vld [vmem:[#allocation2 + $0x5c] sm:$0x1]  ;;  %v2690_v51 = vld [vmem:[#allocation2 + $0x68] sm:$0x1] }
 0x1e5   : > { %v2899_v29 = vrot.slane %v2897_v19, 4  ;;  %v2911_v46 = vshll.u32 %v2682_v13, 16  ;;  %v2905_v41 = vrot.slane %v2903_v57, 5  ;;  %v2917_v10 = vshll.u32 %v2683_v18, 16 }
 0x1e6   : > { %v2891_v44 = vrot.slane %v2890_v59, 4  ;;  %v2910_v47 = vrot.slane %v2908_v25, 4  ;;  %3635 = vrot.lane.b32.xlu1 %v10913_v37, %s13089_s15  ;;  %v2921_v17 = vshrl.u32 %v2683_v18, 16  ;;  %v2927_v8 = vshll.u32 %v2684_v62, 16 }
 0x1e7   : > { %v2900_v24 = vor.u32 %v2899_v29, %v2895_v16  ;;  %v2913_v34 = vrot.slane %v2911_v46, 5  ;;  %v2919_v63 = vrot.slane %v2917_v10, 5  ;;  %v2932_v31 = vshrl.u32 %v2685_v54, 16  ;;  %v2691_v46 = vld [vmem:[#allocation2 + $0x6c] sm:$0xf] }
 0x1e8   : > { %v2896_v53 = vsel %vm13514_vm8, %v2891_v44, %v2895_v16  ;;  %v2935_v40 = vshll.u32 %v2685_v54, 16  ;;  %v2923_v2 = vrot.slane %v2921_v17, 4  ;;  %v2929_v14 = vrot.slane %v2927_v8, 5  ;;  %v12281_v62 = vld [vmem:[#allocation2 + $0xc0] sm:$0xff]   ;;  %v13948_v54 = vpop.f32.mrb[41].mxu0 }
 0x1e9   : > { %v2901_v13 = vrot.slane %v2900_v24, 4  ;;  %v2914_v43 = vor.u32 %v2913_v34, %v2910_v47  ;;  %v2934_v28 = vrot.slane %v2932_v31, 4  ;;  %v2941_v1 = vshll.u32 %v2686_v26, 16  ;;  %v13952_v24 = vpop.f32.mrb[42].mxu0 }
 0x1ea   : > { %v2937_v7 = vrot.slane %v2935_v40, 5  ;;  %v2945_v48 = vshrl.u32 %v2686_v26, 16  ;;  %v2924_v18 = vor.u32 %v2923_v2, %v2919_v63  ;;  %v2951_v36 = vshll.u32 %v2687_v50, 16  ;;  %v12280_v11 = vld [vmem:[#allocation2 + $0xb4] sm:$0xff]   ;;  %v2692_v26 = vld [vmem:[#allocation2 + $0x70] sm:$0xf] }
 0x1eb   : > { %v2906_v49 = vsel %vm13514_vm8, %v2901_v13, %v2905_v41  ;;  %v2915_v22 = vrot.slane %v2914_v43, 4  ;;  %v2943_v9 = vrot.slane %v2941_v1, 5  ;;  %v2956_v57 = vshrl.u32 %v2688_v56, 16  ;;  %4587 = vrot.lane.b32.xlu0 %v12280_v11, %s13089_s15  ;;  %v2693_v40 = vld [vmem:[#allocation2 + $0x74] sm:$0x1] }
 0x1ec   : > { %v10914_v52 = vcombine.low %v2896_v53, %v2906_v49  ;;  %v2938_v23 = vor.u32 %v2937_v7, %v2934_v28  ;;  %v2947_v33 = vrot.slane %v2945_v48, 4  ;;  %v2925_v32 = vrot.slane %v2924_v18, 4  ;;  %v332_v28 = vld [vmem:[#allocation2 + $0xf0] sm:$0x1]  ;;  %v13960_v7 = vpop.f32.mrb[43].mxu0 }
 0x1ed   : > { %v2920_v19 = vsel %vm13514_vm8, %v2915_v22, %v2919_v63  ;;  %v2953_v59 = vrot.slane %v2951_v36, 5  ;;  %v2959_v16 = vshll.u32 %v2688_v56, 16  ;;  %v2965_v29 = vshll.u32 %v2689_v38, 16  ;;  %v2694_v22 = vld [vmem:[#allocation2 + $0x78] sm:$0xf] }
 0x1ee   : > { %3637 = vrot.lane.b32.xlu1 %v10914_v52, %s13089_s15  ;;  %v2939_v25 = vrot.slane %v2938_v23, 4  ;;  %v2948_v37 = vor.u32 %v2947_v33, %v2943_v9  ;;  %v2930_v44 = vsel %vm13514_vm8, %v2925_v32, %v2929_v14  ;;  %v2958_v41 = vrot.slane %v2956_v57, 4  ;;  %v12282_v23 = vld [vmem:[#allocation7 + $0x40] sm:$0xff]   ;;  %v13967_v32 = vld [vmem:[%s17231_s2] ss:$0 sm:$0xff] }
 0x1ef   : > { %v2969_v47 = vshrl.u32 %v2689_v38, 16  ;;  %v2975_v10 = vshll.u32 %v2690_v51, 16  ;;  %v10915_v34 = vcombine.low %v2920_v19, %v2930_v44  ;;  %v2961_v53 = vrot.slane %v2959_v16, 5  ;;  %4589 = vrot.lane.b32.xlu0 %v12281_v62, %s13089_s15  ;;  %v2695_v57 = vld [vmem:[#allocation2 + $0x7c] sm:$0xf]  ;;  %11545 = vmatprep.subr.bf16.mxu1 %v12282_v23 }
 0x1f0   : > { %v2944_v17 = vsel %vm13514_vm8, %v2939_v25, %v2943_v9  ;;  %v2949_v8 = vrot.slane %v2948_v37, 4  ;;  %v2967_v63 = vrot.slane %v2965_v29, 5  ;;  %v2980_v56 = vshrl.u32 %v2691_v46, 16  ;;  %v12283_v9 = vld [vmem:[#allocation7] sm:$0xff]   ;;  %v329_v62 = vld [vmem:[#allocation2 + $0xe4] sm:$0x1] }
 0x1f1   : > { %v2971_v50 = vrot.slane %v2969_v47, 4  ;;  %v2977_v31 = vrot.slane %v2975_v10, 5  ;;  %v2962_v43 = vor.u32 %v2961_v53, %v2958_v41  ;;  %v2983_v2 = vshll.u32 %v2691_v46, 16  ;;  %v2696_v29 = vld [vmem:[#allocation2 + $0x80] sm:$0x1]  ;;  %11546 = vmatpush3.bf16.msra.mxu1 %v12283_v9 }
 0x1f2   : > { %3639 = vrot.lane.b32.xlu1 %v10915_v34, %s13089_s15  ;;  %v2954_v13 = vsel %vm13514_vm8, %v2949_v8, %v2953_v59  ;;  %v2989_v14 = vshll.u32 %v2692_v26, 16  ;;  %v2982_v38 = vrot.slane %v2980_v56, 4  ;;  %v2993_v49 = vshrl.u32 %v2692_v26, 16  ;;  %v430_v10 = vld [vmem:[#allocation2 + $0xf8] sm:$0x1] }
 0x1f3   : > { %v10916_v1 = vcombine.low %v2944_v17, %v2954_v13  ;;  %v2972_v48 = vor.u32 %v2971_v50, %v2967_v63  ;;  %v2963_v18 = vrot.slane %v2962_v43, 4  ;;  %v2985_v36 = vrot.slane %v2983_v2, 5  ;;  %v427_v2 = vld [vmem:[#allocation2 + $0xec] sm:$0x1] }
 0x1f4   : > { %v2991_v11 = vrot.slane %v2989_v14, 5  ;;  %v2999_v52 = vshll.u32 %v2693_v40, 16  ;;  %v2995_v51 = vrot.slane %v2993_v49, 4  ;;  %v333_v19 = vsel %vm13310_vm2, 0, %v332_v28  ;;  %v13984_v14 = vpop.f32.mrb[44].mxu0 }
 0x1f5   : > { %v2973_v33 = vrot.slane %v2972_v48, 4  ;;  %v13971_v59 = vadd.f32 %v13967_v32, %v13687_v42  ;;  %v2968_v25 = vsel %vm13514_vm8, %v2963_v18, %v2967_v63  ;;  %v2986_v37 = vor.u32 %v2985_v36, %v2982_v38  ;;  %334 = vst [vmem:[#allocation2 + $0xf0] sm:$0x1] %v333_v19  ;;  %v2697_v38 = vld [vmem:[#allocation2 + $0x84] sm:$0xf] }
 0x1f6   : > { %3641 = vrot.lane.b32.xlu1 %v10916_v1, %s13089_s15  ;;  %v3001_v16 = vrot.slane %v2999_v52, 5  ;;  %v3004_v46 = vshrl.u32 %v2694_v22, 16  ;;  %v2996_v41 = vor.u32 %v2995_v51, %v2991_v11  ;;  %v3007_v47 = vshll.u32 %v2694_v22, 16 }
 0x1f7   : > { %v2978_v44 = vsel %vm13514_vm8, %v2973_v33, %v2977_v31  ;;  %v965_v42 = vsub.f32 0.0, %v13971_v59  ;;  %v2987_v34 = vrot.slane %v2986_v37, 4  ;;  %v3013_v8 = vshll.u32 %v2695_v57, 16 }
 0x1f8   : > { %v10917_v26 = vcombine.low %v2968_v25, %v2978_v44  ;;  %v3006_v17 = vrot.slane %v3004_v46, 4  ;;  %v2997_v53 = vrot.slane %v2996_v41, 4  ;;  %v3009_v50 = vrot.slane %v3007_v47, 5 }
 0x1f9   : > { %v1063_v63 = vmul.f32 1.442695, %v965_v42  ;;  %v3017_v40 = vshrl.u32 %v2695_v57, 16  ;;  %v2992_v56 = vsel %vm13514_vm8, %v2987_v34, %v2991_v11  ;;  %v3015_v31 = vrot.slane %v3013_v8, 5  ;;  %v2698_v11 = vld [vmem:[#allocation2 + $0x88] sm:$0xf] }
 0x1fa   : > { %3643 = vrot.lane.b32.xlu1 %v10917_v26, %s13089_s15  ;;  %v3023_v13 = vshll.u32 %v2696_v29, 16  ;;  %v330_v43 = vsel %vm13310_vm2, 0, %v329_v62  ;;  %v3002_v28 = vsel %vm13514_vm8, %v2997_v53, %v3001_v16  ;;  %v3010_v1 = vor.u32 %v3009_v50, %v3006_v17  ;;  %v2700_v62 = vld [vmem:[#allocation2 + $0x90] sm:$0xf]  ;;  %v2699_v16 = vld [vmem:[#allocation2 + $0x8c] sm:$0x1] }
 0x1fb   : > { %12562 = vpow2.f32 %v1063_v63  ;;  %v3019_v48 = vrot.slane %v3017_v40, 4  ;;  %331 = vst [vmem:[#allocation2 + $0xe4] sm:$0x1] %v330_v43  ;;  %v10918_v49 = vcombine.low %v2992_v56, %v3002_v28  ;;  %v13990_v18 = vadd.f32 %v13967_v32, %v13694_v39  ;;  %v2701_v34 = vld [vmem:[#allocation2 + $0x94] sm:$0xf] }
 0x1fc   : > { %v3025_v22 = vrot.slane %v3023_v13, 5  ;;  %v431_v36 = vsel %vm13378_vm4, 0, %v430_v10  ;;  %v3011_v52 = vrot.slane %v3010_v1, 4  ;;  %v13996_v9 = vadd.f32 %v13967_v32, %v13696_v61  ;;  %v2702_v63 = vld [vmem:[#allocation2 + $0x98] sm:$0x1] }
 0x1fd   : > { %v3020_v23 = vor.u32 %v3019_v48, %v3015_v31  ;;  %432 = vst [vmem:[#allocation2 + $0xf8] sm:$0x1] %v431_v36  ;;  %v428_v33 = vsel %vm13378_vm4, 0, %v427_v2  ;;  %v963_v51 = vsub.f32 0.0, %v13990_v18  ;;  %v14004_v39 = vadd.f32 %v13967_v32, %v13705_v21  ;;  %v2703_v2 = vld [vmem:[#allocation2 + $0x9c] sm:$0xf] }
 0x1fe   : > { %3645 = vrot.lane.b32.xlu1 %v10918_v49, %s13089_s15  ;;  %429 = vst [vmem:[#allocation2 + $0xec] sm:$0x1] %v428_v33  ;;  %v3028_v19 = vshrl.u32 %v2697_v38, 16  ;;  %v3031_v57 = vshll.u32 %v2697_v38, 16  ;;  %v3016_v25 = vsel %vm13514_vm8, %v3011_v52, %v3015_v31  ;;  %v966_v37 = vsub.f32 0.0, %v13996_v9 }
 0x1ff   : > { %v3021_v61 = vrot.slane %v3020_v23, 4  ;;  %v3037_v29 = vshll.u32 %v2698_v11, 16  ;;  %v1059_v46 = vmul.f32 1.442695, %v963_v51  ;;  %v964_v44 = vsub.f32 0.0, %v14004_v39 }
 0x200   : > { %v3030_v41 = vrot.slane %v3028_v19, 4  ;;  %v3033_v42 = vrot.slane %v3031_v57, 5  ;;  %v1065_v47 = vmul.f32 1.442695, %v966_v37  ;;  %v3041_v26 = vshrl.u32 %v2698_v11, 16 }
 0x201   : > { %v3026_v21 = vsel %vm13514_vm8, %v3021_v61, %v3025_v22  ;;  %v3039_v10 = vrot.slane %v3037_v29, 5  ;;  %12564 = vpow2.f32 %v1059_v46  ;;  %v1061_v8 = vmul.f32 1.442695, %v964_v44  ;;  %v2704_v22 = vld [vmem:[#allocation2 + $0xa0] sm:$0xf] }
 0x202   : > { %v10919_v17 = vcombine.low %v3016_v25, %v3026_v21  ;;  %v3034_v53 = vor.u32 %v3033_v42, %v3030_v41  ;;  %12566 = vpow2.f32 %v1065_v47  ;;  %v3043_v50 = vrot.slane %v3041_v26, 4  ;;  %v2705_v33 = vld [vmem:[#allocation2 + $0xa4] sm:$0x1]  ;;  %v338_v51 = vld [vmem:[#allocation2 + $0x108] sm:$0x1] }
 0x203   : > { %v3047_v40 = vshll.u32 %v2699_v16, 16  ;;  %v3052_v56 = vshrl.u32 %v2700_v62, 16  ;;  %12568 = vpow2.f32 %v1061_v8  ;;  %v3055_v13 = vshll.u32 %v2700_v62, 16  ;;  %v2706_v42 = vld [vmem:[#allocation2 + $0xa8] sm:$0xf] }
 0x204   : > { %3647 = vrot.lane.b32.xlu1 %v10919_v17, %s13089_s15  ;;  %v3035_v31 = vrot.slane %v3034_v53, 4  ;;  %v3061_v43 = vshll.u32 %v2701_v34, 16  ;;  %v3044_v1 = vor.u32 %v3043_v50, %v3039_v10  ;;  %v3065_v49 = vshrl.u32 %v2701_v34, 16 }
 0x205   : > { %v12563_v28 = vpop.eup %12562  ;;  %v3049_v48 = vrot.slane %v3047_v40, 5  ;;  %v3054_v38 = vrot.slane %v3052_v56, 4  ;;  %v3057_v52 = vrot.slane %v3055_v13, 5  ;;  %v3071_v25 = vshll.u32 %v2702_v63, 16 }
 0x206   : > { %v1157_v36 = vadd.f32 1.0, %v12563_v28  ;;  %v3040_v11 = vsel %vm13514_vm8, %v3035_v31, %v3039_v10  ;;  %v3063_v23 = vrot.slane %v3061_v43, 5  ;;  %v3045_v19 = vrot.slane %v3044_v1, 4 }
 0x207   : > { %v3067_v57 = vrot.slane %v3065_v49, 4  ;;  %v3076_v62 = vshrl.u32 %v2703_v2, 16  ;;  %v3058_v61 = vor.u32 %v3057_v52, %v3054_v38  ;;  %v3079_v37 = vshll.u32 %v2703_v2, 16 }
 0x208   : > { %12570 = vrcp.f32 %v1157_v36  ;;  %v3085_v16 = vshll.u32 %v2704_v22, 16  ;;  %v3050_v29 = vsel %vm13514_vm8, %v3045_v19, %v3049_v48  ;;  %v3073_v44 = vrot.slane %v3071_v25, 5 }
 0x209   : > { %v3068_v46 = vor.u32 %v3067_v57, %v3063_v23  ;;  %v3078_v41 = vrot.slane %v3076_v62, 4  ;;  %v10920_v21 = vcombine.low %v3040_v11, %v3050_v29  ;;  %v3059_v47 = vrot.slane %v3058_v61, 4  ;;  %v2707_v11 = vld [vmem:[#allocation2 + $0xac] sm:$0xf]  ;;  %v436_v62 = vld [vmem:[#allocation2 + $0x110] sm:$0x1] }
 0x20a   : > { %v3081_v10 = vrot.slane %v3079_v37, 5  ;;  %v3087_v26 = vrot.slane %v3085_v16, 5  ;;  %v3089_v17 = vshrl.u32 %v2704_v22, 16  ;;  %v3095_v8 = vshll.u32 %v2705_v33, 16 }
 0x20b   : > { %v3069_v34 = vrot.slane %v3068_v46, 4  ;;  %v339_v53 = vsel %vm13310_vm2, 0, %v338_v51  ;;  %v12565_v63 = vpop.eup %12564  ;;  %3649 = vrot.lane.b32.xlu1 %v10920_v21, %s13089_s15  ;;  %v3064_v50 = vsel %vm13514_vm8, %v3059_v47, %v3063_v23  ;;  %v14024_v56 = vadd.f32 %v13967_v32, %v13723_v0  ;;  %v2708_v0 = vld [vmem:[#allocation2 + $0xb0] sm:$0x1]  ;;  %v335_v51 = vld [vmem:[#allocation2 + $0xfc] sm:$0x1] }
 0x20c   : > { %v3082_v40 = vor.u32 %v3081_v10, %v3078_v41  ;;  %340 = vst [vmem:[#allocation2 + $0x108] sm:$0x1] %v339_v53  ;;  %v3100_v31 = vshrl.u32 %v2706_v42, 16  ;;  %v12567_v13 = vpop.eup %12566  ;;  %v1155_v43 = vadd.f32 1.0, %v12565_v63  ;;  %v3091_v28 = vrot.slane %v3089_v17, 4 }
 0x20d   : > { %v3074_v2 = vsel %vm13514_vm8, %v3069_v34, %v3073_v44  ;;  %v3097_v1 = vrot.slane %v3095_v8, 5  ;;  %v12569_v48 = vpop.eup %12568  ;;  %v1158_v38 = vadd.f32 1.0, %v12567_v13  ;;  %v969_v36 = vsub.f32 0.0, %v14024_v56  ;;  %v6640_v34 = vld [vmem:[#allocation2 + $0x18] sm:$0xf] }
 0x20e   : > { %v10921_v49 = vcombine.low %v3064_v50, %v3074_v2  ;;  %v3083_v22 = vrot.slane %v3082_v40, 4  ;;  %12572 = vrcp.f32 %v1155_v43  ;;  %v1156_v52 = vadd.f32 1.0, %v12569_v48 }
 0x20f   : > { %v3092_v23 = vor.u32 %v3091_v28, %v3087_v26  ;;  %v3102_v33 = vrot.slane %v3100_v31, 4  ;;  %12574 = vrcp.f32 %v1158_v38  ;;  %v1071_v57 = vmul.f32 1.442695, %v969_v36 }
 0x210   : > { %3651 = vrot.lane.b32.xlu1 %v10921_v49, %s13089_s15  ;;  %v3088_v19 = vsel %vm13514_vm8, %v3083_v22, %v3087_v26  ;;  %v3103_v25 = vshll.u32 %v2706_v42, 16  ;;  %12576 = vrcp.f32 %v1156_v52  ;;  %v3109_v37 = vshll.u32 %v2707_v11, 16  ;;  %v433_v42 = vld [vmem:[#allocation2 + $0x104] sm:$0x1] }
 0x211   : > { %v3093_v61 = vrot.slane %v3092_v23, 4  ;;  %v3113_v16 = vshrl.u32 %v2707_v11, 16  ;;  %12578 = vpow2.f32 %v1071_v57  ;;  %v3119_v44 = vshll.u32 %v2708_v0, 16 }
 0x212   : > { %v12571_v29 = vpop.eup %12570  ;;  %v3105_v46 = vrot.slane %v3103_v25, 5  ;;  %v336_v41 = vsel %vm13310_vm2, 0, %v335_v51  ;;  %v3111_v10 = vrot.slane %v3109_v37, 5  ;;  %v14039_v63 = vadd.f32 %v13967_v32, %v13745_v3  ;;  %v2270_v51 = vld [vmem:[#allocation2 + $0xf0] sm:$0xf] }
 0x213   : > { %v1285_v21 = vmul.f32 %v12571_v29, %v13971_v59  ;;  %v3098_v47 = vsel %vm13514_vm8, %v3093_v61, %v3097_v1  ;;  %v3115_v26 = vrot.slane %v3113_v16, 4  ;;  %337 = vst [vmem:[#allocation2 + $0xfc] sm:$0x1] %v336_v41  ;;  %v3121_v53 = vrot.slane %v3119_v44, 5  ;;  %v6641_v29 = vld [vmem:[#allocation2 + $0x1c] sm:$0xf] }
 0x214   : > { %v10922_v17 = vcombine.low %v3088_v19, %v3098_v47  ;;  %v3106_v8 = vor.u32 %v3105_v46, %v3102_v33  ;;  %v437_v59 = vsel %vm13378_vm4, 0, %v436_v62  ;;  %v14045_v31 = vadd.f32 %v13967_v32, %v13759_v6  ;;  %v14067_v46 = vpop.f32.mrb[45].mxu0 }
 0x215   : > { %v11473_v50 = vpack.c.bf16 %v1285_v21, %v1285_v21  ;;  %v3116_v40 = vor.u32 %v3115_v26, %v3111_v10  ;;  %v967_v43 = vsub.f32 0.0, %v14039_v63  ;;  %438 = vst [vmem:[#allocation2 + $0x110] sm:$0x1] %v437_v59  ;;  %v434_v2 = vsel %vm13378_vm4, 0, %v433_v42  ;;  %v6642_v42 = vld [vmem:[#allocation2 + $0x20] sm:$0x1] }
 0x216   : > { %3653 = vrot.lane.b32.xlu1 %v10922_v17, %s13089_s15  ;;  %v3107_v13 = vrot.slane %v3106_v8, 4  ;;  %v14053_v3 = vadd.f32 %v13967_v32, %v13777_v20  ;;  %v970_v38 = vsub.f32 0.0, %v14045_v31  ;;  %435 = vst [vmem:[#allocation2 + $0x104] sm:$0x1] %v434_v2  ;;  %v6737_v36 = vshrl.u32 %v6640_v34, 16  ;;  %v14075_v2 = vpop.f32.mrb[46].mxu0 }
 0x217   : > { %v1799_v28 = vshrl.u32 %v11473_v50, 16  ;;  %v1802_v1 = vshll.u32 %v11473_v50, 16  ;;  %v3117_v48 = vrot.slane %v3116_v40, 4  ;;  %v1067_v49 = vmul.f32 1.442695, %v967_v43  ;;  %v12284_v40 = vld [vmem:[#allocation7 + $0x48] sm:$0xff]  }
 0x218   : > { %v3112_v6 = vsel %vm13514_vm8, %v3107_v13, %v3111_v10  ;;  %v968_v22 = vsub.f32 0.0, %v14053_v3  ;;  %v12573_v11 = vpop.eup %12572  ;;  %v1073_v23 = vmul.f32 1.442695, %v970_v38  ;;  %v6740_v0 = vshll.u32 %v6640_v34, 16  ;;  %v14073_v50 = vld [vmem:[#allocation2 + $0xb4] sm:$0xf]  ;;  %11547 = vmatprep.subr.bf16.mxu1 %v12284_v40 }
 0x219   : > { %v14059_v52 = vrot.slane %v1799_v28, 7  ;;  %v3122_v20 = vsel %vm13514_vm8, %v3117_v48, %v3121_v53  ;;  %v12575_v33 = vpop.eup %12574  ;;  %v1283_v19 = vmul.f32 %v12573_v11, %v13990_v18  ;;  %12580 = vpow2.f32 %v1067_v49  ;;  %v12285_v28 = vld [vmem:[#allocation7 + $0x8] sm:$0xff]  }
 0x21a   : > { %v10923_v57 = vcombine.low %v3112_v6, %v3122_v20  ;;  %v1069_v25 = vmul.f32 1.442695, %v968_v22  ;;  %v12577_v62 = vpop.eup %12576  ;;  %v1286_v16 = vmul.f32 %v12575_v33, %v13996_v9  ;;  %12582 = vpow2.f32 %v1073_v23  ;;  %v2274_v48 = vld [vmem:[#allocation2 + $0xf8] sm:$0x1]  ;;  %11548 = vmatpush3.bf16.msra.mxu1 %v12285_v28  ;;  %v14081_v23 = vpop.f32.mrb[47].mxu0 }
 0x21b   : > { %v1804_v61 = vor.u32 %v1802_v1, %v14059_v52  ;;  %v1805_v37 = vrot.slane %v14059_v52, 4  ;;  %v12579_v44 = vpop.eup %12578  ;;  %v11471_v41 = vpack.c.bf16 %v1283_v19, %v1283_v19  ;;  %v1284_v21 = vmul.f32 %v12577_v62, %v14004_v39  ;;  %v2263_v39 = vld [vmem:[#allocation2 + $0xe4] sm:$0xf]  ;;  %v12289_v62 = vld [vmem:[#allocation7 + $0x58] sm:$0xff]  }
 0x21c   : > { %3655 = vrot.lane.b32.xlu1 %v10923_v57, %s13089_s15  ;;  %12584 = vpow2.f32 %v1069_v25  ;;  %v6739_v18 = vrot.slane %v6737_v36, 4  ;;  %v11474_v10 = vpack.c.bf16 %v1286_v16, %v1286_v16  ;;  %v1161_v26 = vadd.f32 1.0, %v12579_v44  ;;  %v12287_v57 = vld [vmem:[#allocation7 + $0x50] sm:$0xff]   ;;  %v2267_v44 = vld [vmem:[#allocation2 + $0xec] sm:$0x1] }
 0x21d   : > { %v2271_v47 = vsel %vm13562_vm10, %v1804_v61, %v2270_v51  ;;  %v6742_v34 = vrot.slane %v6740_v0, 5  ;;  %v1782_v9 = vshrl.u32 %v11471_v41, 16  ;;  %v1785_v17 = vshll.u32 %v11471_v41, 16  ;;  %v12288_v25 = vld [vmem:[#allocation7 + $0x10] sm:$0xff]   ;;  %11549 = vmatprep.subr.bf16.mxu1 %v12287_v57  ;;  %v12293_v57 = vld [vmem:[#allocation7 + $0x20] sm:$0xff]  }
 0x21e   : > { %2272 = vst [vmem:[#allocation2 + $0xf0] sm:$0xf] %v2271_v47  ;;  %v11472_v8 = vpack.c.bf16 %v1284_v21, %v1284_v21  ;;  %v6746_v53 = vshll.u32 %v6641_v29, 16  ;;  %v1807_v59 = vshrl.u32 %v11474_v10, 16  ;;  %v1810_v13 = vshll.u32 %v11474_v10, 16  ;;  %11550 = vmatpush3.bf16.msra.mxu1 %v12288_v25 }
 0x21f   : > { %12586 = vrcp.f32 %v1161_v26  ;;  %v6743_v43 = vor.u32 %v6742_v34, %v6739_v18  ;;  %v1784_v1 = vrot.slane %v1782_v9, 7  ;;  %v6750_v11 = vshrl.u32 %v6641_v29, 16  ;;  %v6643_v34 = vld [vmem:[#allocation2 + $0x24] sm:$0xf]  ;;  %11551 = vmatprep.subr.bf16.mxu1 %v12289_v62 }
 0x220   : > { %v1790_v38 = vshrl.u32 %v11472_v8, 16  ;;  %v1793_v6 = vshll.u32 %v11472_v8, 16  ;;  %v14077_v49 = vrot.slane %v6746_v53, 5  ;;  %v1809_v22 = vrot.slane %v1807_v59, 7  ;;  %v12290_v59 = vld [vmem:[#allocation7 + $0x18] sm:$0xff]  }
 0x221   : > { %v14079_v36 = vrot.slane %v6743_v43, 4  ;;  %v6756_v20 = vshll.u32 %v6642_v42, 16  ;;  %v1787_v0 = vor.u32 %v1785_v17, %v1784_v1  ;;  %v1788_v33 = vrot.slane %v1784_v1, 4  ;;  %v2710_v42 = vld [vmem:[#allocation2 + $0xb8] sm:$0xf]  ;;  %v12292_v1 = vld [vmem:[#allocation7 + $0x60] sm:$0xff]  }
 0x222   : > { %v1792_v51 = vrot.slane %v1790_v38, 7  ;;  %v3124_v19 = vshrl.u32 %v14073_v50, 16  ;;  %v1812_v61 = vor.u32 %v1810_v13, %v1809_v22  ;;  %v1814_v16 = vrot.slane %v1809_v22, 4  ;;  %11552 = vmatpush3.bf16.msra.mxu1 %v12290_v59 }
 0x223   : > { %v6749_v29 = vsel %vm13514_vm8, %v14079_v36, %v14077_v49  ;;  %v6752_v41 = vrot.slane %v6750_v11, 4  ;;  %v12581_v21 = vpop.eup %12580  ;;  %v2264_v18 = vsel %vm13562_vm10, %v1787_v0, %v2263_v39  ;;  %v6758_v26 = vrot.slane %v6756_v20, 5  ;;  %v2711_v39 = vld [vmem:[#allocation2 + $0xbc] sm:$0x1]  ;;  %11553 = vmatprep.subr.bf16.mxu1 %v12292_v1 }
 0x224   : > { %v1795_v47 = vor.u32 %v1793_v6, %v1792_v51  ;;  %v1797_v10 = vrot.slane %v1792_v51, 4  ;;  %v12583_v9 = vpop.eup %12582  ;;  %2265 = vst [vmem:[#allocation2 + $0xe4] sm:$0xf] %v2264_v18  ;;  %v1813_v17 = vsel %vm13569_vm11, %v1805_v37, %v1812_v61  ;;  %v2275_v8 = vsel %vm13310_vm2, %v1814_v16, %v2274_v48  ;;  %v14102_v48 = vpop.f32.mrb[48].mxu0  ;;  %v6644_v51 = vld [vmem:[#allocation2 + $0x28] sm:$0xf] }
 0x225   : > { %v1159_v53 = vadd.f32 1.0, %v12581_v21  ;;  %v6753_v40 = vor.u32 %v6752_v41, %v14077_v49  ;;  %2273 = vst.msk [vmem:[#allocation2 + $0xf4] sm:$0xf] %vm262_vm5, %v1813_v17  ;;  %2276 = vst [vmem:[#allocation2 + $0xf8] sm:$0x1] %v2275_v8  ;;  %v1162_v37 = vadd.f32 1.0, %v12583_v9 }
 0x226   : > { %v12585_v13 = vpop.eup %12584  ;;  %v1796_v43 = vsel %vm13569_vm11, %v1788_v33, %v1795_v47  ;;  %v2268_v52 = vsel %vm13310_vm2, %v1797_v10, %v2267_v44  ;;  %v3126_v28 = vrot.slane %v3124_v19, 4  ;;  %v3127_v49 = vshll.u32 %v14073_v50, 16  ;;  %v6645_v50 = vld [vmem:[#allocation2 + $0x2c] sm:$0x1]  ;;  %v5711_v47 = vld [vmem:[#allocation2 + $0xc] sm:$0xe]  ;;  %11554 = vmatpush3.bf16.msra.mxu1 %v12293_v57 }
 0x227   : > { %2266 = vst.msk [vmem:[#allocation2 + $0xe8] sm:$0xf] %vm262_vm5, %v1796_v43  ;;  %2269 = vst [vmem:[#allocation2 + $0xec] sm:$0x1] %v2268_v52  ;;  %12588 = vrcp.f32 %v1159_v53  ;;  %v1160_v38 = vadd.f32 1.0, %v12585_v13  ;;  %v6754_v6 = vrot.slane %v6753_v40, 4 }
 0x228   : > { %12590 = vrcp.f32 %v1162_v37  ;;  %v3133_v22 = vshll.u32 %v2710_v42, 16  ;;  %v3137_v36 = vshrl.u32 %v2710_v42, 16  ;;  %v3143_v11 = vshll.u32 %v2711_v39, 16  ;;  %v5712_v17 = vld [vmem:[#allocation2 + $0x10] sm:$0xf] }
 0x229   : > { %v12587_v20 = vpop.eup %12586  ;;  %12592 = vrcp.f32 %v1160_v38  ;;  %v6759_v0 = vsel %vm13514_vm8, %v6754_v6, %v6758_v26  ;;  %v3129_v33 = vrot.slane %v3127_v49, 5  ;;  %v6761_v19 = vshrl.u32 %v6643_v34, 16  ;;  %v2284_v13 = vld [vmem:[#allocation2 + $0x108] sm:$0xf] }
 0x22a   : > { %v1289_v25 = vmul.f32 %v12587_v20, %v14024_v56  ;;  %v11165_v62 = vcombine.low %v6749_v29, %v6759_v0  ;;  %v3135_v61 = vrot.slane %v3133_v22, 5  ;;  %v3139_v16 = vrot.slane %v3137_v36, 4 }
 0x22b   : > { %v3130_v44 = vor.u32 %v3129_v33, %v3126_v28  ;;  %v3145_v41 = vrot.slane %v3143_v11, 5  ;;  %v6763_v21 = vrot.slane %v6761_v19, 4  ;;  %v6764_v18 = vshll.u32 %v6643_v34, 16  ;;  %v5713_v28 = vld [vmem:[#allocation2 + $0x14] sm:$0x1] }
 0x22c   : > { %v11477_v10 = vpack.c.bf16 %v1289_v25, %v1289_v25  ;;  %7600 = vrot.lane.b32.xlu0 %v11165_v62, %s13089_s15  ;;  %v3140_v26 = vor.u32 %v3139_v16, %v3135_v61  ;;  %v6770_v42 = vshll.u32 %v6644_v51, 16  ;;  %v6774_v9 = vshrl.u32 %v6644_v51, 16  ;;  %v6646_v62 = vld [vmem:[#allocation2 + $0x30] sm:$0xf] }
 0x22d   : > { %v3131_v8 = vrot.slane %v3130_v44, 4  ;;  %v6766_v53 = vrot.slane %v6764_v18, 5  ;;  %v6780_v56 = vshll.u32 %v6645_v50, 16  ;;  %v11069_v6 = vrot.slane %v5711_v47, 9 }
 0x22e   : > { %v1833_v29 = vshrl.u32 %v11477_v10, 16  ;;  %v1836_v40 = vshll.u32 %v11477_v10, 16  ;;  %v3141_v39 = vrot.slane %v3140_v26, 4  ;;  %v6772_v59 = vrot.slane %v6770_v42, 5  ;;  %v14133_v10 = vpop.f32.mrb[49].mxu0 }
 0x22f   : > { %v3136_v34 = vsel %vm13514_vm8, %v3131_v8, %v3135_v61  ;;  %v6767_v43 = vor.u32 %v6766_v53, %v6763_v21  ;;  %v6776_v52 = vrot.slane %v6774_v9, 4  ;;  %v6782_v37 = vrot.slane %v6780_v56, 5 }
 0x230   : > { %v14112_v1 = vrot.slane %v1833_v29, 7  ;;  %v3146_v38 = vsel %vm13514_vm8, %v3141_v39, %v3145_v41  ;;  %v5905_v0 = vrot.slane %v5712_v17, 5  ;;  %v5908_v25 = vrot.slane %v5713_v28, 5  ;;  %v6647_v29 = vld [vmem:[#allocation2 + $0x34] sm:$0xf] }
 0x231   : > { %v12589_v49 = vpop.eup %12588  ;;  %v10924_v22 = vcombine.low %v3136_v34, %v3146_v38  ;;  %v6768_v36 = vrot.slane %v6767_v43, 4  ;;  %v6777_v11 = vor.u32 %v6776_v52, %v6772_v59  ;;  %v6785_v42 = vshrl.u32 %v6646_v62, 16  ;;  %v2277_v28 = vld [vmem:[#allocation2 + $0xfc] sm:$0xf] }
 0x232   : > { %v12591_v33 = vpop.eup %12590  ;;  %v1838_v51 = vor.u32 %v1836_v40, %v14112_v1  ;;  %v1839_v19 = vrot.slane %v14112_v1, 4  ;;  %v1287_v57 = vmul.f32 %v12589_v49, %v14039_v63  ;;  %v5906_v41 = vsel %vm14117_vm14, %v11069_v6, %v5905_v0 }
 0x233   : > { %v12593_v61 = vpop.eup %12592  ;;  %v1290_v16 = vmul.f32 %v12591_v33, %v14045_v31  ;;  %3657 = vrot.lane.b32.xlu1 %v10924_v22, %s13089_s15  ;;  %v6773_v50 = vsel %vm13514_vm8, %v6768_v36, %v6772_v59  ;;  %v6778_v44 = vrot.slane %v6777_v11, 4  ;;  %v5907_v47 = vrot.slane %v5905_v0, 4  ;;  %v6648_v59 = vld [vmem:[#allocation2 + $0x38] sm:$0x1]  ;;  %v5714_v36 = vld [vmem:[#allocation2 + $0x18] sm:$0xe] }
 0x234   : > { %v2285_v21 = vsel %vm13562_vm10, %v1838_v51, %v2284_v13  ;;  %v11475_v18 = vpack.c.bf16 %v1287_v57, %v1287_v57  ;;  %v1288_v63 = vmul.f32 %v12593_v61, %v14053_v3  ;;  %v6788_v9 = vshll.u32 %v6646_v62, 16  ;;  %v2288_v33 = vld [vmem:[#allocation2 + $0x110] sm:$0x1] }
 0x235   : > { %2286 = vst [vmem:[#allocation2 + $0x108] sm:$0xf] %v2285_v21  ;;  %v11478_v31 = vpack.c.bf16 %v1290_v16, %v1290_v16  ;;  %v6783_v26 = vsel %vm13514_vm8, %v6778_v44, %v6782_v37  ;;  %v5909_v3 = vsel %vm14117_vm14, %v5907_v47, %v5908_v25  ;;  %v6787_v13 = vrot.slane %v6785_v42, 4  ;;  %v5715_v25 = vld [vmem:[#allocation2 + $0x1c] sm:$0xf]  ;;  %v14143_v42 = vpop.f32.mrb[50].mxu0 }
 0x236   : > { %v1816_v17 = vshrl.u32 %v11475_v18, 16  ;;  %v1819_v8 = vshll.u32 %v11475_v18, 16  ;;  %v11476_v53 = vpack.c.bf16 %v1288_v63, %v1288_v63  ;;  %v11166_v56 = vcombine.low %v6773_v50, %v6783_v26  ;;  %v2281_v16 = vld [vmem:[#allocation2 + $0x104] sm:$0x1]  ;;  %v12294_v26 = vld [vmem:[#allocation7 + $0x68] sm:$0xff]  }
 0x237   : > { %v1841_v40 = vshrl.u32 %v11478_v31, 16  ;;  %v1844_v39 = vshll.u32 %v11478_v31, 16  ;;  %v11101_v37 = vcombine.low %v5906_v41, %v5909_v3  ;;  %v6790_v6 = vrot.slane %v6788_v9, 5  ;;  %v5716_v41 = vld [vmem:[#allocation2 + $0x20] sm:$0x1]  ;;  %11555 = vmatprep.subr.bf16.mxu1 %v12294_v26 }
 0x238   : > { %v1818_v34 = vrot.slane %v1816_v17, 7  ;;  %v1824_v43 = vshrl.u32 %v11476_v53, 16  ;;  %v1827_v52 = vshll.u32 %v11476_v53, 16  ;;  %7602 = vrot.lane.b32.xlu0 %v11166_v56, %s13089_s15  ;;  %v6794_v49 = vshll.u32 %v6647_v29, 16  ;;  %v6649_v31 = vld [vmem:[#allocation2 + $0x3c] sm:$0xf] }
 0x239   : > { %v1843_v38 = vrot.slane %v1841_v40, 7  ;;  %v6798_v22 = vshrl.u32 %v6647_v29, 16  ;;  %6223 = vrot.lane.b32.xlu1 %v11101_v37, %s13089_s15  ;;  %v6804_v57 = vshll.u32 %v6648_v59, 16  ;;  %v6791_v50 = vor.u32 %v6790_v6, %v6787_v13  ;;  %v6650_v56 = vld [vmem:[#allocation2 + $0x40] sm:$0xf] }
 0x23a   : > { %v1821_v11 = vor.u32 %v1819_v8, %v1818_v34  ;;  %v1822_v0 = vrot.slane %v1818_v34, 4  ;;  %v1826_v51 = vrot.slane %v1824_v43, 7  ;;  %v6796_v44 = vrot.slane %v6794_v49, 5  ;;  %v6651_v3 = vld [vmem:[#allocation2 + $0x44] sm:$0x1] }
 0x23b   : > { %v1846_v62 = vor.u32 %v1844_v39, %v1843_v38  ;;  %v1848_v61 = vrot.slane %v1843_v38, 4  ;;  %v6800_v47 = vrot.slane %v6798_v22, 4  ;;  %v6792_v8 = vrot.slane %v6791_v50, 4  ;;  %v344_v38 = vld [vmem:[#allocation2 + $0x120] sm:$0x1] }
 0x23c   : > { %v2278_v21 = vsel %vm13562_vm10, %v1821_v11, %v2277_v28  ;;  %v1829_v18 = vor.u32 %v1827_v52, %v1826_v51  ;;  %v1831_v63 = vrot.slane %v1826_v51, 4  ;;  %v6806_v53 = vrot.slane %v6804_v57, 5  ;;  %v5717_v6 = vld [vmem:[#allocation2 + $0x24] sm:$0xe]  ;;  %v5718_v49 = vld [vmem:[#allocation2 + $0x28] sm:$0xf] }
 0x23d   : > { %2279 = vst [vmem:[#allocation2 + $0xfc] sm:$0xf] %v2278_v21  ;;  %v1847_v9 = vsel %vm13569_vm11, %v1839_v19, %v1846_v62  ;;  %v2289_v17 = vsel %vm13310_vm2, %v1848_v61, %v2288_v33  ;;  %v6801_v39 = vor.u32 %v6800_v47, %v6796_v44  ;;  %v11070_v1 = vrot.slane %v5714_v36, 9  ;;  %v5719_v22 = vld [vmem:[#allocation2 + $0x2c] sm:$0x1] }
 0x23e   : > { %2287 = vst.msk [vmem:[#allocation2 + $0x10c] sm:$0xf] %vm262_vm5, %v1847_v9  ;;  %2290 = vst [vmem:[#allocation2 + $0x110] sm:$0x1] %v2289_v17  ;;  %v1830_v29 = vsel %vm13569_vm11, %v1822_v0, %v1829_v18  ;;  %v2282_v40 = vsel %vm13310_vm2, %v1831_v63, %v2281_v16  ;;  %v6797_v19 = vsel %vm13514_vm8, %v6792_v8, %v6796_v44  ;;  %v5912_v59 = vrot.slane %v5715_v25, 5 }
 0x23f   : > { %2280 = vst.msk [vmem:[#allocation2 + $0x100] sm:$0xf] %vm262_vm5, %v1830_v29  ;;  %2283 = vst [vmem:[#allocation2 + $0x104] sm:$0x1] %v2282_v40  ;;  %v5915_v13 = vrot.slane %v5716_v41, 5  ;;  %v6809_v34 = vshrl.u32 %v6649_v31, 16  ;;  %v14180_v40 = vadd.f32 %v13967_v32, %v13948_v54 }
 0x240   : > { %v6802_v43 = vrot.slane %v6801_v39, 4  ;;  %v6812_v52 = vshll.u32 %v6649_v31, 16  ;;  %v6818_v37 = vshll.u32 %v6650_v56, 16  ;;  %v6822_v28 = vshrl.u32 %v6650_v56, 16  ;;  %v341_v41 = vld [vmem:[#allocation2 + $0x114] sm:$0x1] }
 0x241   : > { %v5913_v36 = vsel %vm14117_vm14, %v11070_v1, %v5912_v59  ;;  %v5914_v11 = vrot.slane %v5912_v59, 4  ;;  %v6811_v0 = vrot.slane %v6809_v34, 4  ;;  %v6828_v33 = vshll.u32 %v6651_v3, 16  ;;  %v442_v39 = vld [vmem:[#allocation2 + $0x128] sm:$0x1] }
 0x242   : > { %v6807_v51 = vsel %vm13514_vm8, %v6802_v43, %v6806_v53  ;;  %v6814_v57 = vrot.slane %v6812_v52, 5  ;;  %v6820_v25 = vrot.slane %v6818_v37, 5  ;;  %v6824_v62 = vrot.slane %v6822_v28, 4  ;;  %v6652_v1 = vld [vmem:[#allocation2 + $0x48] sm:$0xf] }
 0x243   : > { %v11167_v61 = vcombine.low %v6797_v19, %v6807_v51  ;;  %v5916_v16 = vsel %vm14117_vm14, %v5914_v11, %v5915_v13  ;;  %v6830_v50 = vrot.slane %v6828_v33, 5  ;;  %v345_v44 = vsel %vm13310_vm2, 0, %v344_v38  ;;  %v6653_v34 = vld [vmem:[#allocation2 + $0x4c] sm:$0xf]  ;;  %v439_v52 = vld [vmem:[#allocation2 + $0x11c] sm:$0x1] }
 0x244   : > { %v14167_v21 = vld [vmem:[#allocation2 + $0xfc] sm:$0xe]  ;;  %v11102_v18 = vcombine.low %v5913_v36, %v5916_v16  ;;  %v6815_v63 = vor.u32 %v6814_v57, %v6811_v0  ;;  %v6825_v47 = vor.u32 %v6824_v62, %v6820_v25  ;;  %346 = vst [vmem:[#allocation2 + $0x120] sm:$0x1] %v345_v44  ;;  %v14171_v31 = vadd.f32 %v13967_v32, %v13884_v5  ;;  %v6654_v37 = vld [vmem:[#allocation2 + $0x50] sm:$0x1] }
 0x245   : > { %17270 = vst [vmem:[#allocation16_spill] sm:$0xff] %v14167_v21  ;;  %7604 = vrot.lane.b32.xlu0 %v11167_v61, %s13089_s15  ;;  %v11071_v9 = vrot.slane %v5717_v6, 9  ;;  %v5919_v17 = vrot.slane %v5718_v49, 5  ;;  %v5922_v8 = vrot.slane %v5719_v22, 5  ;;  %v14184_v5 = vadd.f32 %v13967_v32, %v13952_v24  ;;  %v5720_v22 = vld [vmem:[#allocation2 + $0x30] sm:$0xe] }
 0x246   : > { %v14175_v53 = vld [vmem:[#allocation2 + $0x100] sm:$0xf]  ;;  %6225 = vrot.lane.b32.xlu1 %v11102_v18, %s13089_s15  ;;  %v6816_v56 = vrot.slane %v6815_v63, 4  ;;  %v6826_v29 = vrot.slane %v6825_v47, 4  ;;  %v973_v19 = vsub.f32 0.0, %v14171_v31  ;;  %v342_v24 = vsel %vm13310_vm2, 0, %v341_v41 }
 0x247   : > { %17271 = vst [vmem:[#allocation17_spill] sm:$0xff] %v14175_v53  ;;  %v17238_v3 = vrot.slane %v14175_v53, 5  ;;  %v5920_v59 = vsel %vm14117_vm14, %v11071_v9, %v5919_v17  ;;  %v5921_v13 = vrot.slane %v5919_v17, 4  ;;  %v971_v32 = vsub.f32 0.0, %v14180_v40  ;;  %343 = vst [vmem:[#allocation2 + $0x114] sm:$0x1] %v342_v24 }
 0x248   : > { %v6821_v43 = vsel %vm13514_vm8, %v6816_v56, %v6820_v25  ;;  %v6831_v54 = vsel %vm13514_vm8, %v6826_v29, %v6830_v50  ;;  %v1079_v6 = vmul.f32 1.442695, %v973_v19  ;;  %v443_v0 = vsel %vm13378_vm4, 0, %v442_v39  ;;  %v5721_v51 = vld [vmem:[#allocation2 + $0x34] sm:$0xf]  ;;  %v12295_v57 = vld [vmem:[#allocation7 + $0x28] sm:$0xff]  }
 0x249   : > { %v14199_v28 = vrot.slane %v17238_v3, 4  ;;  %v11168_v38 = vcombine.low %v6821_v43, %v6831_v54  ;;  %v5923_v49 = vsel %vm14117_vm14, %v5921_v13, %v5922_v8  ;;  %v1075_v11 = vmul.f32 1.442695, %v971_v32  ;;  %v14206_v25 = vpop.f32.mrb[51].mxu0  ;;  %444 = vst [vmem:[#allocation2 + $0x128] sm:$0x1] %v443_v0  ;;  %11556 = vmatpush3.bf16.msra.mxu1 %v12295_v57 }
 0x24a   : > { %v11103_v36 = vcombine.low %v5920_v59, %v5923_v49  ;;  %v974_v33 = vsub.f32 0.0, %v14184_v5  ;;  %12594 = vpow2.f32 %v1079_v6  ;;  %v440_v62 = vsel %vm13378_vm4, 0, %v439_v52  ;;  %v14214_v61 = vld [vmem:[%s17231_s2] ss:$0 sm:$0xff]  ;;  %v5722_v44 = vld [vmem:[#allocation2 + $0x38] sm:$0x1] }
 0x24b   : > { %17272 = vst [vmem:[#allocation18_spill] sm:$0xff] %v14199_v28  ;;  %7606 = vrot.lane.b32.xlu0 %v11168_v38, %s13089_s15  ;;  %v14218_v16 = vadd.f32 %v14214_v61, %v13960_v7  ;;  %v6833_v50 = vshrl.u32 %v6652_v1, 16  ;;  %v6655_v41 = vld [vmem:[#allocation2 + $0x54] sm:$0xf]  ;;  %12596 = vpow2.f32 %v1075_v11  ;;  %441 = vst [vmem:[#allocation2 + $0x11c] sm:$0x1] %v440_v62 }
 0x24c   : > { %6227 = vrot.lane.b32.xlu1 %v11103_v36, %s13089_s15  ;;  %v1081_v18 = vmul.f32 1.442695, %v974_v33  ;;  %v6836_v63 = vshll.u32 %v6652_v1, 16  ;;  %v6842_v47 = vshll.u32 %v6653_v34, 16  ;;  %v12297_v9 = vld [vmem:[#allocation7 + $0x70] sm:$0xff]   ;;  %v6846_v56 = vshrl.u32 %v6653_v34, 16 }
 0x24d   : > { %v972_v17 = vsub.f32 0.0, %v14218_v16  ;;  %v6835_v8 = vrot.slane %v6833_v50, 4  ;;  %v6852_v29 = vshll.u32 %v6654_v37, 16  ;;  %v12299_v39 = vld [vmem:[#allocation7 + $0x30] sm:$0xff]   ;;  %v11072_v59 = vrot.slane %v5720_v22, 9  ;;  %11557 = vmatprep.subr.bf16.mxu1 %v12297_v9  ;;  %v12300_v43 = vld [vmem:[#allocation7 + $0x78] sm:$0xff]  }
 0x24e   : > { %12598 = vpow2.f32 %v1081_v18  ;;  %v6838_v7 = vrot.slane %v6836_v63, 5  ;;  %v6844_v19 = vrot.slane %v6842_v47, 5  ;;  %v6656_v13 = vld [vmem:[#allocation2 + $0x58] sm:$0xf]  ;;  %v6848_v24 = vrot.slane %v6846_v56, 4  ;;  %v12301_v52 = vld [vmem:[#allocation7 + $0xc0] sm:$0xff]   ;;  %11558 = vmatpush3.bf16.msra.mxu1 %v12299_v39 }
 0x24f   : > { %v1077_v54 = vmul.f32 1.442695, %v972_v17  ;;  %v6854_v32 = vrot.slane %v6852_v29, 5  ;;  %v5926_v1 = vrot.slane %v5721_v51, 5  ;;  %v5929_v6 = vrot.slane %v5722_v44, 5  ;;  %v12302_v34 = vld [vmem:[#allocation7 + $0x38] sm:$0xff]   ;;  %11559 = vmatprep.subr.bf16.mxu1 %v12300_v43  ;;  %11657 = vmatprep.subr.bf16.mxu0 %v12301_v52 }
 0x250   : > { %v6839_v38 = vor.u32 %v6838_v7, %v6835_v8  ;;  %v6657_v49 = vld [vmem:[#allocation2 + $0x5c] sm:$0x1]  ;;  %v6857_v36 = vshrl.u32 %v6655_v41, 16  ;;  %v6860_v11 = vshll.u32 %v6655_v41, 16  ;;  %v6849_v37 = vor.u32 %v6848_v24, %v6844_v19  ;;  %v12303_v33 = vld [vmem:[#allocation7 + $0x80] sm:$0xff]   ;;  %v14230_v52 = vpop.f32.mrb[52].mxu0 }
 0x251   : > { %12600 = vpow2.f32 %v1077_v54  ;;  %v5927_v22 = vsel %vm14117_vm14, %v11072_v59, %v5926_v1  ;;  %v5928_v0 = vrot.slane %v5926_v1, 4  ;;  %v6866_v50 = vshll.u32 %v6656_v13, 16  ;;  %v5723_v18 = vld [vmem:[#allocation2 + $0x3c] sm:$0xe]  ;;  %v5724_v9 = vld [vmem:[#allocation2 + $0x40] sm:$0xf]  ;;  %11658 = vmatpush3.bf16.msra.mxu0 %v12303_v33 }
 0x252   : > { %v6840_v57 = vrot.slane %v6839_v38, 4  ;;  %v6859_v62 = vrot.slane %v6857_v36, 4  ;;  %v6862_v51 = vrot.slane %v6860_v11, 5  ;;  %v6850_v44 = vrot.slane %v6849_v37, 4  ;;  %v5725_v39 = vld [vmem:[#allocation2 + $0x44] sm:$0x1]  ;;  %11560 = vmatpush3.bf16.msra.mxu1 %v12302_v34 }
 0x253   : > { %v5930_v41 = vsel %vm14117_vm14, %v5928_v0, %v5929_v6  ;;  %v6870_v63 = vshrl.u32 %v6656_v13, 16  ;;  %v6876_v47 = vshll.u32 %v6657_v49, 16  ;;  %v6868_v29 = vrot.slane %v6866_v50, 5  ;;  %v6658_v7 = vld [vmem:[#allocation2 + $0x60] sm:$0xf]  ;;  %v12306_v59 = vld [vmem:[#allocation7 + $0x100] sm:$0xff]  }
 0x254   : > { %v6845_v17 = vsel %vm13514_vm8, %v6840_v57, %v6844_v19  ;;  %v11104_v8 = vcombine.low %v5927_v22, %v5930_v41  ;;  %v6863_v56 = vor.u32 %v6862_v51, %v6859_v62  ;;  %v12595_v43 = vpop.eup %12594  ;;  %v6855_v54 = vsel %vm13514_vm8, %v6850_v44, %v6854_v32  ;;  %12113 = vmatprep.subr.bf16.mxu1 %v12306_v59  ;;  %v6659_v22 = vld [vmem:[#allocation2 + $0x64] sm:$0xf]  ;;  %v6660_v51 = vld [vmem:[#allocation2 + $0x68] sm:$0x1]  ;;  %v5726_v41 = vld [vmem:[#allocation2 + $0x48] sm:$0xe] }
 0x255   : > { %v6872_v24 = vrot.slane %v6870_v63, 4  ;;  %v6878_v1 = vrot.slane %v6876_v47, 5  ;;  %v11073_v13 = vrot.slane %v5723_v18, 9  ;;  %v12597_v38 = vpop.eup %12596  ;;  %v1165_v6 = vadd.f32 1.0, %v12595_v43  ;;  %v5728_v43 = vld [vmem:[#allocation2 + $0x50] sm:$0x1] }
 0x256   : > { %v11169_v49 = vcombine.low %v6845_v17, %v6855_v54  ;;  %6229 = vrot.lane.b32.xlu1 %v11104_v8, %s13089_s15  ;;  %v6864_v19 = vrot.slane %v6863_v56, 4  ;;  %v5933_v36 = vrot.slane %v5724_v9, 5  ;;  %v1163_v11 = vadd.f32 1.0, %v12597_v38  ;;  %v5727_v8 = vld [vmem:[#allocation2 + $0x4c] sm:$0xf]  ;;  %v12310_v28 = vld [vmem:[#allocation2 + $0x30] sm:$0xff]  }
 0x257   : > { %v6873_v34 = vor.u32 %v6872_v24, %v6868_v29  ;;  %v5936_v37 = vrot.slane %v5725_v39, 5  ;;  %v6881_v0 = vshrl.u32 %v6658_v7, 16  ;;  %12602 = vrcp.f32 %v1165_v6  ;;  %v6661_v54 = vld [vmem:[#allocation2 + $0x6c] sm:$0xf]  ;;  %v12313_v21 = vld [vmem:[#allocation2 + $0x3c] sm:$0xff]   ;;  %2636 = vst.msk [vmem:[#allocation3 + $0xa0] sm:$0xff] %vm2631_vm15, %v12310_v28 }
 0x258   : > { %v12599_v33 = vpop.eup %12598  ;;  %7608 = vrot.lane.b32.xlu0 %v11169_v49, %s13089_s15  ;;  %v6869_v32 = vsel %vm13514_vm8, %v6864_v19, %v6868_v29  ;;  %v5934_v57 = vsel %vm14117_vm14, %v11073_v13, %v5933_v36  ;;  %v5935_v62 = vrot.slane %v5933_v36, 4  ;;  %12604 = vrcp.f32 %v1163_v11  ;;  %v6662_v11 = vld [vmem:[#allocation2 + $0x70] sm:$0xf]  ;;  %2637 = vst.msk [vmem:[#allocation3 + $0xc8] sm:$0xff] %vm2631_vm15, %v12313_v21 }
 0x259   : > { %v1166_v50 = vadd.f32 1.0, %v12599_v33  ;;  %v6874_v18 = vrot.slane %v6873_v34, 4  ;;  %v6883_v44 = vrot.slane %v6881_v0, 4  ;;  %v6884_v47 = vshll.u32 %v6658_v7, 16 }
 0x25a   : > { %v5937_v63 = vsel %vm14117_vm14, %v5935_v62, %v5936_v37  ;;  %v6890_v9 = vshll.u32 %v6659_v22, 16  ;;  %v6894_v17 = vshrl.u32 %v6659_v22, 16  ;;  %v6900_v59 = vshll.u32 %v6660_v51, 16  ;;  %v6663_v37 = vld [vmem:[#allocation2 + $0x74] sm:$0x1] }
 0x25b   : > { %v12601_v56 = vpop.eup %12600  ;;  %12606 = vrcp.f32 %v1166_v50  ;;  %v6879_v29 = vsel %vm13514_vm8, %v6874_v18, %v6878_v1  ;;  %v11105_v39 = vcombine.low %v5934_v57, %v5937_v63  ;;  %v6886_v38 = vrot.slane %v6884_v47, 5 }
 0x25c   : > { %v1164_v24 = vadd.f32 1.0, %v12601_v56  ;;  %v11170_v13 = vcombine.low %v6869_v32, %v6879_v29  ;;  %v6892_v6 = vrot.slane %v6890_v9, 5  ;;  %v6896_v49 = vrot.slane %v6894_v17, 4 }
 0x25d   : > { %6231 = vrot.lane.b32.xlu1 %v11105_v39, %s13089_s15  ;;  %v6902_v7 = vrot.slane %v6900_v59, 5  ;;  %v11074_v19 = vrot.slane %v5726_v41, 9  ;;  %v5940_v36 = vrot.slane %v5727_v8, 5  ;;  %v6887_v34 = vor.u32 %v6886_v38, %v6883_v44  ;;  %v5729_v44 = vld [vmem:[#allocation2 + $0x54] sm:$0xe] }
 0x25e   : > { %12608 = vrcp.f32 %v1164_v24  ;;  %7610 = vrot.lane.b32.xlu0 %v11170_v13, %s13089_s15  ;;  %v5943_v1 = vrot.slane %v5728_v43, 5  ;;  %v6905_v22 = vshrl.u32 %v6661_v54, 16  ;;  %v6897_v0 = vor.u32 %v6896_v49, %v6892_v6  ;;  %v5730_v59 = vld [vmem:[#allocation2 + $0x58] sm:$0xf]  ;;  %v5731_v43 = vld [vmem:[#allocation2 + $0x5c] sm:$0x1] }
 0x25f   : > { %v5941_v33 = vsel %vm14117_vm14, %v11074_v19, %v5940_v36  ;;  %v5942_v32 = vrot.slane %v5940_v36, 4  ;;  %v6908_v57 = vshll.u32 %v6661_v54, 16  ;;  %v6888_v62 = vrot.slane %v6887_v34, 4  ;;  %v14253_v19 = vld [vmem:[#allocation2 + $0x78] sm:$0xf] }
 0x260   : > { %v6907_v51 = vrot.slane %v6905_v22, 4  ;;  %v6914_v50 = vshll.u32 %v6662_v11, 16  ;;  %v6918_v18 = vshrl.u32 %v6662_v11, 16  ;;  %v6898_v41 = vrot.slane %v6897_v0, 4 }
 0x261   : > { %v5944_v63 = vsel %vm14117_vm14, %v5942_v32, %v5943_v1  ;;  %v6910_v47 = vrot.slane %v6908_v57, 5  ;;  %v6924_v9 = vshll.u32 %v6663_v37, 16  ;;  %v12603_v17 = vpop.eup %12602  ;;  %v6893_v8 = vsel %vm13514_vm8, %v6888_v62, %v6892_v6  ;;  %v14257_v1 = vpop.f32.mrb[53].mxu0 }
 0x262   : > { %v11106_v56 = vcombine.low %v5941_v33, %v5944_v63  ;;  %v6916_v29 = vrot.slane %v6914_v50, 5  ;;  %v6920_v39 = vrot.slane %v6918_v18, 4  ;;  %v12605_v54 = vpop.eup %12604  ;;  %v1293_v24 = vmul.f32 %v12603_v17, %v14171_v31  ;;  %17273 = vst [vmem:[#allocation19_spill] sm:$0xff] %v14257_v1 }
 0x263   : > { %v6903_v13 = vsel %vm13514_vm8, %v6898_v41, %v6902_v7  ;;  %v6911_v38 = vor.u32 %v6910_v47, %v6907_v51  ;;  %v6926_v49 = vrot.slane %v6924_v9, 5  ;;  %v1291_v36 = vmul.f32 %v12605_v54, %v14180_v40 }
 0x264   : > { %v11171_v11 = vcombine.low %v6893_v8, %v6903_v13  ;;  %6233 = vrot.lane.b32.xlu1 %v11106_v56, %s13089_s15  ;;  %v6921_v6 = vor.u32 %v6920_v39, %v6916_v29  ;;  %v11075_v34 = vrot.slane %v5729_v44, 9  ;;  %v11481_v22 = vpack.c.bf16 %v1293_v24, %v1293_v24  ;;  %v14268_v44 = vpop.permute.xlu1 %4561 }
 0x265   : > { %v12607_v37 = vpop.eup %12606  ;;  %v6912_v0 = vrot.slane %v6911_v38, 4  ;;  %v5947_v31 = vrot.slane %v5730_v59, 5  ;;  %v5950_v33 = vrot.slane %v5731_v43, 5  ;;  %v11479_v32 = vpack.c.bf16 %v1291_v36, %v1291_v36  ;;  %v2298_v59 = vld [vmem:[#allocation2 + $0x120] sm:$0xf] }
 0x266   : > { %v1294_v7 = vmul.f32 %v12607_v37, %v14184_v5  ;;  %7612 = vrot.lane.b32.xlu0 %v11171_v11, %s13089_s15  ;;  %v6922_v57 = vrot.slane %v6921_v6, 4  ;;  %v6929_v40 = vshrl.u32 %v14253_v19, 16  ;;  %v1867_v62 = vshrl.u32 %v11481_v22, 16  ;;  %v2291_v36 = vld [vmem:[#allocation2 + $0x114] sm:$0xf] }
 0x267   : > { %v1870_v51 = vshll.u32 %v11481_v22, 16  ;;  %v6917_v50 = vsel %vm13514_vm8, %v6912_v0, %v6916_v29  ;;  %v5948_v18 = vsel %vm14117_vm14, %v11075_v34, %v5947_v31  ;;  %v1850_v63 = vshrl.u32 %v11479_v32, 16  ;;  %v6665_v6 = vld [vmem:[#allocation2 + $0x7c] sm:$0xf]  ;;  %v14274_v34 = vpop.f32.mrb[54].mxu0 }
 0x268   : > { %v12609_v41 = vpop.eup %12608  ;;  %v1853_v47 = vshll.u32 %v11479_v32, 16  ;;  %v11482_v9 = vpack.c.bf16 %v1294_v7, %v1294_v7  ;;  %v6927_v5 = vsel %vm13514_vm8, %v6922_v57, %v6926_v49  ;;  %v1869_v17 = vrot.slane %v1867_v62, 7  ;;  %17274 = vst [vmem:[#allocation20_spill] sm:$0xff] %v14274_v34  ;;  %v350_v32 = vld [vmem:[#allocation2 + $0x138] sm:$0x1]  ;;  %v14276_v7 = vpop.permute.xlu1 %3629 }
 0x269   : > { %v1292_v8 = vmul.f32 %v12609_v41, %v14218_v16  ;;  %v11172_v56 = vcombine.low %v6917_v50, %v6927_v5  ;;  %v5949_v39 = vrot.slane %v5947_v31, 4  ;;  %v1852_v43 = vrot.slane %v1850_v63, 7  ;;  %v6666_v31 = vld [vmem:[#allocation2 + $0x80] sm:$0x1] }
 0x26a   : > { %v1875_v29 = vshrl.u32 %v11482_v9, 16  ;;  %v1878_v54 = vshll.u32 %v11482_v9, 16  ;;  %v6931_v24 = vrot.slane %v6929_v40, 4  ;;  %v1872_v13 = vor.u32 %v1870_v51, %v1869_v17  ;;  %v2302_v40 = vld [vmem:[#allocation2 + $0x128] sm:$0x1] }
 0x26b   : > { %v1873_v38 = vrot.slane %v1869_v17, 4  ;;  %v11480_v11 = vpack.c.bf16 %v1292_v8, %v1292_v8  ;;  %7614 = vrot.lane.b32.xlu0 %v11172_v56, %s13089_s15  ;;  %v5951_v49 = vsel %vm14117_vm14, %v5949_v39, %v5950_v33  ;;  %v1855_v16 = vor.u32 %v1853_v47, %v1852_v43  ;;  %v5732_v47 = vld [vmem:[#allocation2 + $0x60] sm:$0xe]  ;;  %v5733_v56 = vld [vmem:[#allocation2 + $0x64] sm:$0xf] }
 0x26c   : > { %v1856_v37 = vrot.slane %v1852_v43, 4  ;;  %v1877_v22 = vrot.slane %v1875_v29, 7  ;;  %v11107_v0 = vcombine.low %v5948_v18, %v5951_v49  ;;  %v2299_v57 = vsel %vm13562_vm10, %v1872_v13, %v2298_v59  ;;  %v2295_v59 = vld [vmem:[#allocation2 + $0x11c] sm:$0x1] }
 0x26d   : > { %v1858_v62 = vshrl.u32 %v11480_v11, 16  ;;  %v1861_v51 = vshll.u32 %v11480_v11, 16  ;;  %v6932_v50 = vshll.u32 %v14253_v19, 16  ;;  %2300 = vst [vmem:[#allocation2 + $0x120] sm:$0xf] %v2299_v57  ;;  %v2292_v33 = vsel %vm13562_vm10, %v1855_v16, %v2291_v36 }
 0x26e   : > { %v1880_v41 = vor.u32 %v1878_v54, %v1877_v22  ;;  %v1882_v63 = vrot.slane %v1877_v22, 4  ;;  %6235 = vrot.lane.b32.xlu1 %v11107_v0, %s13089_s15  ;;  %v6938_v18 = vshll.u32 %v6665_v6, 16  ;;  %2293 = vst [vmem:[#allocation2 + $0x114] sm:$0xf] %v2292_v33  ;;  %v6942_v17 = vshrl.u32 %v6665_v6, 16  ;;  %v14290_v54 = vpop.f32.mrb[55].mxu0 }
 0x26f   : > { %v1860_v9 = vrot.slane %v1858_v62, 7  ;;  %v6934_v5 = vrot.slane %v6932_v50, 5  ;;  %v6948_v8 = vshll.u32 %v6666_v31, 16  ;;  %v351_v29 = vsel %vm13310_vm2, 0, %v350_v32  ;;  %17275 = vst [vmem:[#allocation21_spill] sm:$0xff] %v14290_v54  ;;  %v14297_v32 = vpop.permute.xlu1 %3631  ;;  %v12311_v50 = vld [vmem:[#allocation7 + $0xc8] sm:$0xff]  }
 0x270   : > { %v1881_v39 = vsel %vm13569_vm11, %v1873_v38, %v1880_v41  ;;  %v2303_v19 = vsel %vm13310_vm2, %v1882_v63, %v2302_v40  ;;  %v6940_v43 = vrot.slane %v6938_v18, 5  ;;  %v6944_v49 = vrot.slane %v6942_v17, 4  ;;  %352 = vst [vmem:[#allocation2 + $0x138] sm:$0x1] %v351_v29  ;;  %v5734_v6 = vld [vmem:[#allocation2 + $0x68] sm:$0x1]  ;;  %11659 = vmatprep.subr.bf16.mxu0 %v12311_v50 }
 0x271   : > { %2301 = vst.msk [vmem:[#allocation2 + $0x124] sm:$0xf] %vm262_vm5, %v1881_v39  ;;  %2304 = vst [vmem:[#allocation2 + $0x128] sm:$0x1] %v2303_v19  ;;  %v1863_v13 = vor.u32 %v1861_v51, %v1860_v9  ;;  %v1865_v36 = vrot.slane %v1860_v9, 4  ;;  %v6935_v11 = vor.u32 %v6934_v5, %v6931_v24  ;;  %v6950_v38 = vrot.slane %v6948_v8, 5 }
 0x272   : > { %v14295_v16 = vadd.f32 %v14214_v61, %v13984_v14  ;;  %v11076_v22 = vrot.slane %v5732_v47, 9  ;;  %v5954_v0 = vrot.slane %v5733_v56, 5  ;;  %v347_v31 = vld [vmem:[#allocation2 + $0x12c] sm:$0x1]  ;;  %v6945_v62 = vor.u32 %v6944_v49, %v6940_v43  ;;  %v448_v51 = vld [vmem:[#allocation2 + $0x140] sm:$0x1] }
 0x273   : > { %v1864_v57 = vsel %vm13569_vm11, %v1856_v37, %v1863_v13  ;;  %v2296_v40 = vsel %vm13310_vm2, %v1865_v36, %v2295_v59  ;;  %v6936_v24 = vrot.slane %v6935_v11, 4  ;;  %v5957_v63 = vrot.slane %v5734_v6, 5  ;;  %v445_v18 = vld [vmem:[#allocation2 + $0x134] sm:$0x1]  ;;  %v5736_v47 = vld [vmem:[#allocation2 + $0x70] sm:$0xf] }
 0x274   : > { %2294 = vst.msk [vmem:[#allocation2 + $0x118] sm:$0xf] %vm262_vm5, %v1864_v57  ;;  %2297 = vst [vmem:[#allocation2 + $0x11c] sm:$0x1] %v2296_v40  ;;  %v977_v14 = vsub.f32 0.0, %v14295_v16  ;;  %v5955_v33 = vsel %vm14117_vm14, %v11076_v22, %v5954_v0  ;;  %v5956_v41 = vrot.slane %v5954_v0, 4  ;;  %v14313_v8 = vadd.f32 %v14214_v61, %v14067_v46  ;;  %v14330_v22 = vpop.permute.xlu0 %4559  ;;  %v14337_v40 = vpop.permute.xlu1 %3633 }
 0x275   : > { %v12312_v37 = vld [vmem:[#allocation7 + $0x88] sm:$0xff]   ;;  %v6941_v9 = vsel %vm13514_vm8, %v6936_v24, %v6940_v43  ;;  %v6946_v5 = vrot.slane %v6945_v62, 4  ;;  %v348_v17 = vsel %vm13310_vm2, 0, %v347_v31  ;;  %v5735_v56 = vld [vmem:[#allocation2 + $0x6c] sm:$0xe]  ;;  %v449_v29 = vsel %vm13378_vm4, 0, %v448_v51 }
 0x276   : > { %v5737_v39 = vld [vmem:[#allocation2 + $0x74] sm:$0x1]  ;;  %v1087_v19 = vmul.f32 1.442695, %v977_v14  ;;  %v5958_v59 = vsel %vm14117_vm14, %v5956_v41, %v5957_v63  ;;  %349 = vst [vmem:[#allocation2 + $0x12c] sm:$0x1] %v348_v17  ;;  %v14321_v43 = vadd.f32 %v14214_v61, %v14075_v2  ;;  %11660 = vmatpush3.bf16.msra.mxu0 %v12312_v37  ;;  %v14335_v31 = vadd.f32 %v14214_v61, %v14081_v23 }
 0x277   : > { %v14323_v13 = vpop.f32.mrb[56].mxu0  ;;  %v6951_v46 = vsel %vm13514_vm8, %v6946_v5, %v6950_v38  ;;  %v11108_v36 = vcombine.low %v5955_v33, %v5958_v59  ;;  %v975_v11 = vsub.f32 0.0, %v14313_v8  ;;  %450 = vst [vmem:[#allocation2 + $0x140] sm:$0x1] %v449_v29  ;;  %v446_v49 = vsel %vm13378_vm4, 0, %v445_v18  ;;  %v12286_v41 = vld [vmem:[#allocation2 + $0xe4] sm:$0xff]  }
 0x278   : > { %17276 = vst [vmem:[#allocation22_spill] sm:$0xff] %v14323_v13  ;;  %v6667_v6 = vld [vmem:[#allocation2 + $0x84] sm:$0xf]  ;;  %v11173_v0 = vcombine.low %v6941_v9, %v6951_v46  ;;  %12610 = vpow2.f32 %v1087_v19  ;;  %v978_v2 = vsub.f32 0.0, %v14321_v43  ;;  %447 = vst [vmem:[#allocation2 + $0x134] sm:$0x1] %v446_v49  ;;  %v14346_v49 = vpop.permute.xlu0 %3627 }
 0x279   : > { %v6668_v38 = vld [vmem:[#allocation2 + $0x88] sm:$0xf]  ;;  %v6669_v57 = vld [vmem:[#allocation2 + $0x8c] sm:$0x1]  ;;  %6237 = vrot.lane.b32.xlu1 %v11108_v36, %s13089_s15  ;;  %v1083_v24 = vmul.f32 1.442695, %v975_v11 }
 0x27a   : > { %v11077_v62 = vrot.slane %v5735_v56, 9  ;;  %v5961_v51 = vrot.slane %v5736_v47, 5  ;;  %v5964_v50 = vrot.slane %v5737_v39, 5  ;;  %7616 = vrot.lane.b32.xlu0 %v11173_v0, %s13089_s15  ;;  %v1089_v14 = vmul.f32 1.442695, %v978_v2  ;;  %3726 = vst.msk [vmem:[#allocation3 + $0x50] sm:$0xff] %vm3723_vm0, %v14297_v32 }
 0x27b   : > { %v976_v33 = vsub.f32 0.0, %v14335_v31  ;;  %v6953_v63 = vshrl.u32 %v6667_v6, 16  ;;  %v6956_v18 = vshll.u32 %v6667_v6, 16  ;;  %12612 = vpow2.f32 %v1083_v24  ;;  %v2712_v5 = vld [vmem:[#allocation2 + $0xd8] sm:$0xf] }
 0x27c   : > { %v5962_v23 = vsel %vm14117_vm14, %v11077_v62, %v5961_v51  ;;  %v5963_v37 = vrot.slane %v5961_v51, 4  ;;  %v6962_v9 = vshll.u32 %v6668_v38, 16  ;;  %12614 = vpow2.f32 %v1089_v14  ;;  %v2713_v39 = vld [vmem:[#allocation2 + $0xdc] sm:$0xf]  ;;  %v2714_v36 = vld [vmem:[#allocation2 + $0xe0] sm:$0x1]  ;;  %v14349_v62 = vpop.permute.xlu1 %3635 }
 0x27d   : > { %v1085_v17 = vmul.f32 1.442695, %v976_v33  ;;  %v6955_v56 = vrot.slane %v6953_v63, 4  ;;  %v6958_v47 = vrot.slane %v6956_v18, 5  ;;  %v6966_v29 = vshrl.u32 %v6668_v38, 16  ;;  %3728 = vst.msk [vmem:[#allocation3 + $0xa0] sm:$0xff] %vm3723_vm0, %v14349_v62 }
 0x27e   : > { %v5965_v19 = vsel %vm14117_vm14, %v5963_v37, %v5964_v50  ;;  %v6964_v59 = vrot.slane %v6962_v9, 5  ;;  %v6972_v46 = vshll.u32 %v6669_v57, 16  ;;  %v5739_v11 = vld [vmem:[#allocation2 + $0x7c] sm:$0xf]  ;;  %4591 = vrot.lane.b32.xlu0 %v12286_v41, %s13089_s15  ;;  %v3148_v2 = vshrl.u32 %v2712_v5, 16 }
 0x27f   : > { %12616 = vpow2.f32 %v1085_v17  ;;  %v11109_v6 = vcombine.low %v5962_v23, %v5965_v19  ;;  %v6959_v0 = vor.u32 %v6958_v47, %v6955_v56  ;;  %v5738_v24 = vld [vmem:[#allocation2 + $0x78] sm:$0xe]  ;;  %v6968_v51 = vrot.slane %v6966_v29, 4  ;;  %v5740_v63 = vld [vmem:[#allocation2 + $0x80] sm:$0x1] }
 0x280   : > { %v6974_v14 = vrot.slane %v6972_v46, 5  ;;  %v3151_v33 = vshll.u32 %v2712_v5, 16  ;;  %v3157_v50 = vshll.u32 %v2713_v39, 16  ;;  %v3150_v57 = vrot.slane %v3148_v2, 4  ;;  %v6670_v56 = vld [vmem:[#allocation2 + $0x90] sm:$0xf] }
 0x281   : > { %6239 = vrot.lane.b32.xlu1 %v11109_v6, %s13089_s15  ;;  %v6960_v38 = vrot.slane %v6959_v0, 4  ;;  %v3161_v18 = vshrl.u32 %v2713_v39, 16  ;;  %v3167_v37 = vshll.u32 %v2714_v36, 16  ;;  %v6969_v9 = vor.u32 %v6968_v51, %v6964_v59  ;;  %v14354_v0 = vpop.permute.xlu0 %4563 }
 0x282   : > { %v3153_v17 = vrot.slane %v3151_v33, 5  ;;  %v3159_v41 = vrot.slane %v3157_v50, 5  ;;  %v11078_v23 = vrot.slane %v5738_v24, 9  ;;  %v12611_v47 = vpop.eup %12610  ;;  %v5968_v5 = vrot.slane %v5739_v11, 5  ;;  %v6671_v24 = vld [vmem:[#allocation2 + $0x94] sm:$0xf]  ;;  %v14360_v33 = vpop.permute.xlu1 %3637 }
 0x283   : > { %v6965_v19 = vsel %vm13514_vm8, %v6960_v38, %v6964_v59  ;;  %v3163_v29 = vrot.slane %v3161_v18, 4  ;;  %v3169_v46 = vrot.slane %v3167_v37, 5  ;;  %v1169_v26 = vadd.f32 1.0, %v12611_v47  ;;  %v6672_v38 = vld [vmem:[#allocation2 + $0x98] sm:$0x1]  ;;  %3729 = vst.msk [vmem:[#allocation3 + $0xc8] sm:$0xff] %vm3723_vm0, %v14360_v33 }
 0x284   : > { %v6970_v3 = vrot.slane %v6969_v9, 4  ;;  %v3154_v55 = vor.u32 %v3153_v17, %v3150_v57  ;;  %v5971_v6 = vrot.slane %v5740_v63, 5  ;;  %v14358_v36 = vsel %vm14117_vm14, %v11078_v23, %v5968_v5  ;;  %v356_v57 = vld [vmem:[#allocation2 + $0x150] sm:$0x1] }
 0x285   : > { %v3164_v39 = vor.u32 %v3163_v29, %v3159_v41  ;;  %v5970_v2 = vrot.slane %v5968_v5, 4  ;;  %v6977_v51 = vshrl.u32 %v6670_v56, 16  ;;  %v12613_v59 = vpop.eup %12612  ;;  %12618 = vrcp.f32 %v1169_v26  ;;  %v12291_v23 = vld [vmem:[#allocation2 + $0xf0] sm:$0xff]   ;;  %v12298_v29 = vld [vmem:[#allocation2] sm:$0xff]   ;;  %v14379_v34 = vpop.permute.xlu0 %4565 }
 0x286   : > { %v6975_v11 = vsel %vm13514_vm8, %v6970_v3, %v6974_v14  ;;  %v3155_v50 = vrot.slane %v3154_v55, 4  ;;  %v6980_v63 = vshll.u32 %v6670_v56, 16  ;;  %v12615_v18 = vpop.eup %12614  ;;  %v1167_v37 = vadd.f32 1.0, %v12613_v59  ;;  %v12304_v5 = vld [vmem:[#allocation2 + $0xc] sm:$0xff]   ;;  %v12308_v26 = vld [vmem:[#allocation2 + $0x24] sm:$0xff]   ;;  %v12316_v59 = vld [vmem:[#allocation2 + $0x54] sm:$0xff]  }
 0x287   : > { %v11174_v9 = vcombine.low %v6965_v19, %v6975_v11  ;;  %v3165_v17 = vrot.slane %v3164_v39, 4  ;;  %v14366_v47 = vsel %vm14117_vm14, %v5970_v2, %v5971_v6  ;;  %v12315_v3 = vld [vmem:[#allocation2 + $0x48] sm:$0xff]   ;;  %v1170_v55 = vadd.f32 1.0, %v12615_v18  ;;  %v14372_v39 = vld [vmem:[#allocation2 + $0x10] sm:$0xf]  ;;  %v12317_v6 = vld [vmem:[#allocation2 + $0x60] sm:$0xff]  }
 0x288   : > { %v3160_v14 = vsel %vm13514_vm8, %v3155_v50, %v3159_v41  ;;  %v6979_v19 = vrot.slane %v6977_v51, 4  ;;  %v12334_v2 = vld [vmem:[#allocation2 + $0x18] sm:$0xff]   ;;  %12620 = vrcp.f32 %v1167_v37  ;;  %v6982_v18 = vrot.slane %v6980_v63, 5  ;;  %v3759_v41 = vld [vmem:[#allocation2 + $0xc] sm:$0xe]  ;;  %v12339_v51 = vld [vmem:[#allocation2 + $0x24] sm:$0xff]   ;;  %v3640_v63 = vpop.permute.xlu1 %3639 }
 0x289   : > { %v12617_v11 = vpop.eup %12616  ;;  %7618 = vrot.lane.b32.xlu0 %v11174_v9, %s13089_s15  ;;  %v3170_v53 = vsel %vm13514_vm8, %v3165_v17, %v3169_v46  ;;  %v6986_v4 = vshll.u32 %v6671_v24, 16  ;;  %v12320_v50 = vld [vmem:[#allocation2 + $0x6c] sm:$0xff]   ;;  %v12323_v56 = vld [vmem:[#allocation2 + $0x78] sm:$0xff]   ;;  %12622 = vrcp.f32 %v1170_v55  ;;  %v6990_v54 = vshrl.u32 %v6671_v24, 16  ;;  %v14390_v24 = vld [vmem:[#allocation2 + $0xe8] sm:$0xf] }
 0x28a   : > { %v1168_v35 = vadd.f32 1.0, %v12617_v11  ;;  %v10925_v13 = vcombine.low %v3160_v14, %v3170_v53  ;;  %v6983_v37 = vor.u32 %v6982_v18, %v6979_v19  ;;  %v6996_v9 = vshll.u32 %v6672_v38, 16  ;;  %v2715_v53 = vld [vmem:[#allocation2 + $0xe4] sm:$0xf]  ;;  %2632 = vst.msk [vmem:[#allocation3] sm:$0xff] %vm2631_vm15, %v12298_v29  ;;  %2633 = vst.msk [vmem:[#allocation3 + $0x28] sm:$0xff] %vm2631_vm15, %v12304_v5  ;;  %v14435_v29 = vpop.permute.xlu0 %4567 }
 0x28b   : > { %v14381_v1 = vrot.slane %v6986_v4, 5  ;;  %v357_v46 = vsel %vm13310_vm2, 0, %v356_v57  ;;  %v6992_v17 = vrot.slane %v6990_v54, 4  ;;  %v14388_v55 = vadd.f32 %v14214_v61, %v14102_v48  ;;  %2635 = vst.msk [vmem:[#allocation3 + $0x78] sm:$0xff] %vm2631_vm15, %v12308_v26  ;;  %2638 = vst.msk [vmem:[#allocation3 + $0xf0] sm:$0xff] %vm2631_vm15, %v12315_v3 }
 0x28c   : > { %12624 = vrcp.f32 %v1168_v35  ;;  %3659 = vrot.lane.b32.xlu1 %v10925_v13, %s13089_s15  ;;  %358 = vst [vmem:[#allocation2 + $0x150] sm:$0x1] %v357_v46  ;;  %v6984_v4 = vrot.slane %v6983_v37, 4  ;;  %v6998_v38 = vrot.slane %v6996_v9, 5  ;;  %v3960_v57 = vrot.slane %v14372_v39, 5  ;;  %2639 = vst.msk [vmem:[#allocation3 + $0x118] sm:$0xff] %vm2631_vm15, %v12316_v59 }
 0x28d   : > { %4593 = vrot.lane.b32.xlu0 %v12291_v23, %s13089_s15  ;;  %2640 = vst.msk [vmem:[#allocation3 + $0x140] sm:$0xff] %vm2631_vm15, %v12317_v6  ;;  %2641 = vst.msk [vmem:[#allocation3 + $0x168] sm:$0xff] %vm2631_vm15, %v12320_v50  ;;  %v6993_v35 = vor.u32 %v6992_v17, %v14381_v1  ;;  %v981_v58 = vsub.f32 0.0, %v14388_v55  ;;  %v3963_v48 = vrot.slane %v14377_v27, 5  ;;  %v10942_v21 = vrot.slane %v3759_v41, 9  ;;  %v14426_v13 = vpop.f32.mrb[57].mxu0 }
 0x28e   : > { %2642 = vst.msk [vmem:[#allocation3 + $0x190] sm:$0xff] %vm2631_vm15, %v12323_v56  ;;  %6608 = vst.msk [vmem:[#allocation3 + $0x18] sm:$0xff] %vm2631_vm15, %v12334_v2  ;;  %v6989_v27 = vsel %vm13514_vm8, %v6984_v4, %v14381_v1  ;;  %v3962_v28 = vrot.slane %v3960_v57, 4  ;;  %v3175_v54 = vshll.u32 %v2715_v53, 16  ;;  %v3181_v23 = vshll.u32 %v14390_v24, 16 }
 0x28f   : > { %6609 = vst.msk [vmem:[#allocation3 + $0x40] sm:$0xff] %vm2631_vm15, %v12339_v51  ;;  %v12619_v32 = vpop.eup %12618  ;;  %v1095_v62 = vmul.f32 1.442695, %v981_v58  ;;  %v3961_v33 = vsel %vm14117_vm14, %v10942_v21, %v3960_v57  ;;  %v2717_v26 = vld [vmem:[#allocation2 + $0xec] sm:$0x1]  ;;  %v14451_v51 = vadd.f32 %v14214_v61, %v14133_v10  ;;  %v14458_v57 = vpop.permute.xlu0 %4569 }
 0x290   : > { %3724 = vst.msk [vmem:[#allocation3] sm:$0xff] %vm3723_vm0, %v14346_v49  ;;  %3725 = vst.msk [vmem:[#allocation3 + $0x28] sm:$0xff] %vm3723_vm0, %v14276_v7  ;;  %v3172_v7 = vshrl.u32 %v2715_v53, 16  ;;  %v6994_v49 = vrot.slane %v6993_v35, 4  ;;  %v1297_v1 = vmul.f32 %v12619_v32, %v14295_v16  ;;  %v3964_v5 = vsel %vm14117_vm14, %v3962_v28, %v3963_v48  ;;  %v353_v56 = vld [vmem:[#allocation2 + $0x144] sm:$0x1] }
 0x291   : > { %3727 = vst.msk [vmem:[#allocation3 + $0x78] sm:$0xff] %vm3723_vm0, %v14337_v40  ;;  %3730 = vst.msk [vmem:[#allocation3 + $0xf0] sm:$0xff] %vm3723_vm0, %v3640_v63  ;;  %v17277_v40 = vcombine.low %v14358_v36, %v14366_v47  ;;  %v3177_v14 = vrot.slane %v3175_v54, 5  ;;  %12626 = vpow2.f32 %v1095_v62  ;;  %v10974_v47 = vcombine.low %v3961_v33, %v3964_v5  ;;  %v12296_v63 = vld [vmem:[#allocation2 + $0xfc] sm:$0xff]   ;;  %v3757_v61 = vld [vmem:[#allocation2 + $0x4] sm:$0xf] }
 0x292   : > { %v3174_v3 = vrot.slane %v3172_v7, 4  ;;  %v6999_v36 = vsel %vm13514_vm8, %v6994_v49, %v6998_v38  ;;  %v14442_v19 = vrot.slane %v3181_v23, 5  ;;  %v12621_v39 = vpop.eup %12620  ;;  %v11485_v59 = vpack.c.bf16 %v1297_v1, %v1297_v1  ;;  %v3756_v10 = vld [vmem:[#allocation2] sm:$0xe]  ;;  %v12324_v54 = vld [vmem:[#allocation2 + $0x84] sm:$0xff]   ;;  %v12326_v32 = vld [vmem:[#allocation2 + $0x90] sm:$0xff]  }
 0x293   : > { %6241 = vrot.lane.b32.xlu1 %v17277_v40, %s13089_s15  ;;  %v11175_v6 = vcombine.low %v6989_v27, %v6999_v36  ;;  %v3185_v16 = vshrl.u32 %v14390_v24, 16  ;;  %v12623_v11 = vpop.eup %12622  ;;  %v1295_v18 = vmul.f32 %v12621_v39, %v14313_v8  ;;  %4304 = vst.msk [vmem:[#allocation3 + $0x30] sm:$0xff] %vm2631_vm15, %v10974_v47  ;;  %v3191_v41 = vshll.u32 %v2717_v26, 16  ;;  %v14466_v23 = vpop.f32.mrb[58].mxu0  ;;  %2643 = vst.msk [vmem:[#allocation3 + $0x1b8] sm:$0xff] %vm2631_vm15, %v12324_v54  ;;  %v12319_v54 = vld [vmem:[#allocation7 + $0x90] sm:$0xff]  }
 0x294   : > { %v3178_v2 = vor.u32 %v3177_v14, %v3174_v3  ;;  %v354_v50 = vsel %vm13310_vm2, 0, %v353_v56  ;;  %v1901_v37 = vshrl.u32 %v11485_v59, 16  ;;  %v1904_v9 = vshll.u32 %v11485_v59, 16  ;;  %4656 = vst.msk [vmem:[#allocation3 + $0x30] sm:$0xff] %vm3723_vm0, %v14268_v44  ;;  %v2305_v3 = vld [vmem:[#allocation2 + $0x12c] sm:$0xf] }
 0x295   : > { %v1298_v46 = vmul.f32 %v12623_v11, %v14321_v43  ;;  %7620 = vrot.lane.b32.xlu0 %v11175_v6, %s13089_s15  ;;  %355 = vst [vmem:[#allocation2 + $0x144] sm:$0x1] %v354_v50  ;;  %v11483_v53 = vpack.c.bf16 %v1295_v18, %v1295_v18  ;;  %v3187_v24 = vrot.slane %v3185_v16, 4  ;;  %v3193_v4 = vrot.slane %v3191_v41, 5  ;;  %v2312_v43 = vld [vmem:[#allocation2 + $0x138] sm:$0xf]  ;;  %v14472_v11 = vpop.permute.xlu0 %4571 }
 0x296   : > { %v3179_v8 = vrot.slane %v3178_v2, 4  ;;  %v12625_v17 = vpop.eup %12624  ;;  %v979_v38 = vsub.f32 0.0, %v14451_v51  ;;  %v1903_v35 = vrot.slane %v1901_v37, 7  ;;  %2644 = vst.msk [vmem:[#allocation3 + $0x1e0] sm:$0xff] %vm2631_vm15, %v12326_v32  ;;  %v3758_v56 = vld [vmem:[#allocation2 + $0x8] sm:$0x1] }
 0x297   : > { %v11486_v58 = vpack.c.bf16 %v1298_v46, %v1298_v46  ;;  %v1296_v48 = vmul.f32 %v12625_v17, %v14335_v31  ;;  %v1884_v21 = vshrl.u32 %v11483_v53, 16  ;;  %v1887_v27 = vshll.u32 %v11483_v53, 16  ;;  %v2316_v6 = vld [vmem:[#allocation2 + $0x140] sm:$0x1]  ;;  %v3642_v46 = vpop.permute.xlu1 %3641 }
 0x298   : > { %v3184_v44 = vsel %vm13514_vm8, %v3179_v8, %v14442_v19  ;;  %v3188_v28 = vor.u32 %v3187_v24, %v14442_v19  ;;  %v1091_v7 = vmul.f32 1.442695, %v979_v38  ;;  %v1906_v40 = vor.u32 %v1904_v9, %v1903_v35  ;;  %v454_v9 = vld [vmem:[#allocation2 + $0x158] sm:$0x1]  ;;  %v14476_v8 = vpop.f32.mrb[59].mxu0  ;;  %3731 = vst.msk [vmem:[#allocation3 + $0x118] sm:$0xff] %vm3723_vm0, %v3642_v46 }
 0x299   : > { %v1907_v49 = vrot.slane %v1903_v35, 4  ;;  %v1909_v62 = vshrl.u32 %v11486_v58, 16  ;;  %v1912_v33 = vshll.u32 %v11486_v58, 16  ;;  %4595 = vrot.lane.b32.xlu0 %v12296_v63, %s13089_s15  ;;  %v1886_v31 = vrot.slane %v1884_v21, 7  ;;  %v451_v38 = vld [vmem:[#allocation2 + $0x14c] sm:$0x1] }
 0x29a   : > { %v11484_v1 = vpack.c.bf16 %v1296_v48, %v1296_v48  ;;  %v3189_v5 = vrot.slane %v3188_v28, 4  ;;  %12628 = vpow2.f32 %v1091_v7  ;;  %v2313_v26 = vsel %vm13562_vm10, %v1906_v40, %v2312_v43  ;;  %v2309_v35 = vld [vmem:[#allocation2 + $0x134] sm:$0x1]  ;;  %v5742_v58 = vld [vmem:[#allocation2 + $0x88] sm:$0xf]  ;;  %v12318_v48 = vld [vmem:[#allocation7 + $0xd0] sm:$0xff]  }
 0x29b   : > { %v1911_v14 = vrot.slane %v1909_v62, 7  ;;  %v10941_v36 = vrot.slane %v3756_v10, 9  ;;  %v3953_v47 = vrot.slane %v3757_v61, 5  ;;  %v12627_v19 = vpop.eup %12626  ;;  %2314 = vst [vmem:[#allocation2 + $0x138] sm:$0xf] %v2313_v26  ;;  %v1889_v39 = vor.u32 %v1887_v27, %v1886_v31  ;;  %11661 = vmatprep.subr.bf16.mxu0 %v12318_v48 }
 0x29c   : > { %v1890_v59 = vrot.slane %v1886_v31, 4  ;;  %v1892_v2 = vshrl.u32 %v11484_v1, 16  ;;  %v1895_v16 = vshll.u32 %v11484_v1, 16  ;;  %v1173_v50 = vadd.f32 1.0, %v12627_v19  ;;  %v5741_v10 = vld [vmem:[#allocation2 + $0x84] sm:$0xe]  ;;  %v3644_v1 = vpop.permute.xlu1 %3643  ;;  %11662 = vmatpush3.bf16.msra.mxu0 %v12319_v54 }
 0x29d   : > { %v1914_v18 = vor.u32 %v1912_v33, %v1911_v14  ;;  %v1916_v41 = vrot.slane %v1911_v14, 4  ;;  %v3194_v37 = vsel %vm13514_vm8, %v3189_v5, %v3193_v4  ;;  %v2306_v63 = vsel %vm13562_vm10, %v1889_v39, %v2305_v3  ;;  %v5743_v7 = vld [vmem:[#allocation2 + $0x8c] sm:$0x1]  ;;  %v14494_v32 = vld [vmem:[%s17231_s2] ss:$0 sm:$0xff]  ;;  %3732 = vst.msk [vmem:[#allocation3 + $0x140] sm:$0xff] %vm3723_vm0, %v3644_v1 }
 0x29e   : > { %v1894_v17 = vrot.slane %v1892_v2, 7  ;;  %v10926_v53 = vcombine.low %v3184_v44, %v3194_v37  ;;  %v3954_v24 = vsel %vm14117_vm14, %v10941_v36, %v3953_v47  ;;  %2307 = vst [vmem:[#allocation2 + $0x12c] sm:$0xf] %v2306_v63  ;;  %12630 = vrcp.f32 %v1173_v50  ;;  %v6673_v31 = vld [vmem:[#allocation2 + $0x9c] sm:$0xf]  ;;  %v14512_v36 = vpop.permute.xlu0 %4573  ;;  %v14520_v37 = vpop.f32.mrb[60].mxu0 }
 0x29f   : > { %v1915_v4 = vsel %vm13569_vm11, %v1907_v49, %v1914_v18  ;;  %v2317_v61 = vsel %vm13310_vm2, %v1916_v41, %v2316_v6  ;;  %v3955_v43 = vrot.slane %v3953_v47, 4  ;;  %v3956_v27 = vrot.slane %v3758_v56, 5  ;;  %v6674_v14 = vld [vmem:[#allocation2 + $0xa0] sm:$0xf]  ;;  %v6675_v56 = vld [vmem:[#allocation2 + $0xa4] sm:$0x1] }
 0x2a0   : > { %2315 = vst.msk [vmem:[#allocation2 + $0x13c] sm:$0xf] %vm262_vm5, %v1915_v4  ;;  %2318 = vst [vmem:[#allocation2 + $0x140] sm:$0x1] %v2317_v61  ;;  %v1897_v44 = vor.u32 %v1895_v16, %v1894_v17  ;;  %v1899_v21 = vrot.slane %v1894_v17, 4  ;;  %3661 = vrot.lane.b32.xlu1 %v10926_v53, %s13089_s15  ;;  %v455_v28 = vsel %vm13378_vm4, 0, %v454_v9  ;;  %v14498_v40 = vadd.f32 %v14494_v32, %v14143_v42  ;;  %v3646_v53 = vpop.permute.xlu1 %3645 }
 0x2a1   : > { %456 = vst [vmem:[#allocation2 + $0x158] sm:$0x1] %v455_v28  ;;  %v452_v49 = vsel %vm13378_vm4, 0, %v451_v38  ;;  %v14504_v62 = vadd.f32 %v14494_v32, %v14206_v25  ;;  %v11079_v33 = vrot.slane %v5741_v10, 9  ;;  %v3957_v42 = vsel %vm14117_vm14, %v3955_v43, %v3956_v27  ;;  %v2719_v50 = vld [vmem:[#allocation2 + $0xf4] sm:$0xf] }
 0x2a2   : > { %v1898_v5 = vsel %vm13569_vm11, %v1890_v59, %v1897_v44  ;;  %v2310_v26 = vsel %vm13310_vm2, %v1899_v21, %v2309_v35  ;;  %453 = vst [vmem:[#allocation2 + $0x14c] sm:$0x1] %v452_v49  ;;  %v5975_v3 = vrot.slane %v5742_v58, 5  ;;  %v10973_v25 = vcombine.low %v3954_v24, %v3957_v42  ;;  %v2718_v59 = vld [vmem:[#allocation2 + $0xf0] sm:$0xf]  ;;  %3733 = vst.msk [vmem:[#allocation3 + $0x168] sm:$0xff] %vm3723_vm0, %v3646_v53  ;;  %v14528_v28 = vpop.permute.xlu0 %4575 }
 0x2a3   : > { %2308 = vst.msk [vmem:[#allocation2 + $0x130] sm:$0xf] %vm262_vm5, %v1898_v5  ;;  %2311 = vst [vmem:[#allocation2 + $0x134] sm:$0x1] %v2310_v26  ;;  %v982_v47 = vsub.f32 0.0, %v14498_v40  ;;  %v980_v19 = vsub.f32 0.0, %v14504_v62 }
 0x2a4   : > { %v5978_v39 = vrot.slane %v5743_v7, 5  ;;  %v12629_v6 = vpop.eup %12628  ;;  %v5976_v2 = vsel %vm14117_vm14, %v11079_v33, %v5975_v3  ;;  %v5977_v16 = vrot.slane %v5975_v3, 4  ;;  %v7001_v18 = vshrl.u32 %v6673_v31, 16  ;;  %4303 = vst.msk [vmem:[#allocation3 + $0x8] sm:$0xff] %vm2631_vm15, %v10973_v25  ;;  %v3762_v58 = vld [vmem:[#allocation2 + $0x18] sm:$0xe] }
 0x2a5   : > { %v7004_v41 = vshll.u32 %v6673_v31, 16  ;;  %v1171_v9 = vadd.f32 1.0, %v12629_v6  ;;  %v1097_v46 = vmul.f32 1.442695, %v982_v47  ;;  %v1093_v63 = vmul.f32 1.442695, %v980_v19  ;;  %v3648_v31 = vpop.permute.xlu1 %3647 }
 0x2a6   : > { %v7010_v17 = vshll.u32 %v6674_v14, 16  ;;  %4655 = vst.msk [vmem:[#allocation3 + $0x8] sm:$0xff] %vm3723_vm0, %v14330_v22  ;;  %v5979_v24 = vsel %vm14117_vm14, %v5977_v16, %v5978_v39  ;;  %v7003_v38 = vrot.slane %v7001_v18, 4  ;;  %v7014_v4 = vshrl.u32 %v6674_v14, 16  ;;  %v2720_v21 = vld [vmem:[#allocation2 + $0xf8] sm:$0x1] }
 0x2a7   : > { %v7006_v10 = vrot.slane %v7004_v41, 5  ;;  %12632 = vrcp.f32 %v1171_v9  ;;  %v11111_v61 = vcombine.low %v5976_v2, %v5979_v24  ;;  %v7020_v43 = vshll.u32 %v6675_v56, 16  ;;  %v3763_v33 = vld [vmem:[#allocation2 + $0x1c] sm:$0xf]  ;;  %v3764_v3 = vld [vmem:[#allocation2 + $0x20] sm:$0x1] }
 0x2a8   : > { %v7012_v35 = vrot.slane %v7010_v17, 5  ;;  %12634 = vpow2.f32 %v1097_v46  ;;  %v7016_v44 = vrot.slane %v7014_v4, 4  ;;  %v3196_v27 = vshrl.u32 %v2718_v59, 16  ;;  %v12631_v22 = vpop.eup %12630  ;;  %3734 = vst.msk [vmem:[#allocation3 + $0x190] sm:$0xff] %vm3723_vm0, %v3648_v31  ;;  %v5744_v19 = vld [vmem:[#allocation2 + $0x90] sm:$0xe] }
 0x2a9   : > { %v7007_v48 = vor.u32 %v7006_v10, %v7003_v38  ;;  %12636 = vpow2.f32 %v1093_v63  ;;  %6243 = vrot.lane.b32.xlu1 %v11111_v61, %s13089_s15  ;;  %v7022_v7 = vrot.slane %v7020_v43, 5  ;;  %v3199_v54 = vshll.u32 %v2718_v59, 16  ;;  %v14537_v16 = vld [vmem:[#allocation2 + $0x94] sm:$0xf]  ;;  %v12322_v53 = vld [vmem:[#allocation7 + $0x108] sm:$0xff]   ;;  %v14545_v61 = vpop.permute.xlu0 %4577 }
 0x2aa   : > { %v3205_v49 = vshll.u32 %v2719_v50, 16  ;;  %v1301_v1 = vmul.f32 %v12631_v22, %v14388_v55  ;;  %v7017_v26 = vor.u32 %v7016_v44, %v7012_v35  ;;  %v3198_v42 = vrot.slane %v3196_v27, 4  ;;  %v14539_v55 = vld [vmem:[#allocation2 + $0x24] sm:$0xe]  ;;  %v8304_v18 = vld [vmem:[#allocation3] sm:$0xff]  ;;  %v12331_v22 = vld [vmem:[#allocation2 + $0xa8] sm:$0xff]  }
 0x2ab   : > { %v7008_v5 = vrot.slane %v7007_v48, 4  ;;  %v3201_v14 = vrot.slane %v3199_v54, 5  ;;  %v3209_v25 = vshrl.u32 %v2719_v50, 16  ;;  %v3215_v47 = vshll.u32 %v2720_v21, 16  ;;  %v14543_v4 = vld [vmem:[#allocation2 + $0x98] sm:$0x1] }
 0x2ac   : > { %v14533_v56 = vrot.slane %v3205_v49, 5  ;;  %v11489_v39 = vpack.c.bf16 %v1301_v1, %v1301_v1  ;;  %v7018_v6 = vrot.slane %v7017_v26, 4  ;;  %v10943_v2 = vrot.slane %v3762_v58, 9  ;;  %v2326_v43 = vld [vmem:[#allocation2 + $0x150] sm:$0xf]  ;;  %v8310_v27 = vld [vmem:[#allocation3 + $0x30] sm:$0xff] }
 0x2ad   : > { %v7013_v59 = vsel %vm13514_vm8, %v7008_v5, %v7012_v35  ;;  %v3202_v41 = vor.u32 %v3201_v14, %v3198_v42  ;;  %v3211_v9 = vrot.slane %v3209_v25, 4  ;;  %v3217_v46 = vrot.slane %v3215_v47, 5  ;;  %v8305_v17 = vld [vmem:[#allocation3 + $0x8] sm:$0xff]  ;;  %v3766_v31 = vld [vmem:[#allocation2 + $0x28] sm:$0xf]  ;;  %v12949_v5 = vld [vmem:[#allocation7 + $0x100] sm:$0xff]  }
 0x2ae   : > { %v3967_v63 = vrot.slane %v3763_v33, 5  ;;  %v1935_v50 = vshrl.u32 %v11489_v39, 16  ;;  %v1938_v24 = vshll.u32 %v11489_v39, 16  ;;  %v7023_v38 = vsel %vm13514_vm8, %v7018_v6, %v7022_v7  ;;  %8759 = vmatprep.mubr.bf16.mxu1 %v8305_v17  ;;  %v12329_v35 = vld [vmem:[#allocation2 + $0x9c] sm:$0xff]   ;;  %v3767_v1 = vld [vmem:[#allocation2 + $0x2c] sm:$0x1] }
 0x2af   : > { %v3970_v10 = vrot.slane %v3764_v3, 5  ;;  %v11176_v58 = vcombine.low %v7013_v59, %v7023_v38  ;;  %v3203_v48 = vrot.slane %v3202_v41, 4  ;;  %v3212_v44 = vor.u32 %v3211_v9, %v14533_v56  ;;  %8760 = vmatmul.mubr.bf16.vlgmr.msra.gmra.mrb[0].mxu1 %v8304_v18  ;;  %2645 = vst.msk [vmem:[#allocation3 + $0x208] sm:$0xff] %vm2631_vm15, %v12329_v35  ;;  %v12305_v14 = vld [vmem:[#allocation2 + $0x108] sm:$0xff]   ;;  %2646 = vst.msk [vmem:[#allocation3 + $0x230] sm:$0xff] %vm2631_vm15, %v12331_v22 }
 0x2b0   : > { %v3968_v21 = vsel %vm14117_vm14, %v10943_v2, %v3967_v63  ;;  %v14550_v54 = vrot.slane %v1935_v50, 7  ;;  %v3969_v7 = vrot.slane %v3967_v63, 4  ;;  %v11080_v49 = vrot.slane %v5744_v19, 9  ;;  %12114 = vmatpush3.bf16.msra.mxu1 %v12949_v5  ;;  %8767 = vmatprep.mubr.bf16.mxu1 %v8310_v27  ;;  %v6676_v9 = vld [vmem:[#allocation2 + $0xa8] sm:$0xf]  ;;  %v14570_v63 = vpop.f32.mrb[61].mxu0 }
 0x2b1   : > { %v5982_v33 = vrot.slane %v14537_v16, 5  ;;  %v12633_v26 = vpop.eup %12632  ;;  %7622 = vrot.lane.b32.xlu0 %v11176_v58, %s13089_s15  ;;  %v3208_v42 = vsel %vm13514_vm8, %v3203_v48, %v14533_v56  ;;  %v3213_v3 = vrot.slane %v3212_v44, 4  ;;  %v5985_v25 = vrot.slane %v14543_v4, 5  ;;  %12115 = vmatprep.subr.bf16.mxu1 %v12322_v53  ;;  %v6677_v38 = vld [vmem:[#allocation2 + $0xac] sm:$0xf]  ;;  %v14574_v4 = vpop.permute.xlu0 %4579 }
 0x2b2   : > { %v10944_v47 = vrot.slane %v14539_v55, 9  ;;  %v12635_v19 = vpop.eup %12634  ;;  %v1940_v39 = vor.u32 %v1938_v24, %v14550_v54  ;;  %v1941_v59 = vrot.slane %v14550_v54, 4  ;;  %v1299_v6 = vmul.f32 %v12633_v26, %v14451_v51  ;;  %v2721_v26 = vld [vmem:[#allocation2 + $0xfc] sm:$0xf] }
 0x2b3   : > { %v3971_v2 = vsel %vm14117_vm14, %v3969_v7, %v3970_v10  ;;  %v12637_v56 = vpop.eup %12636  ;;  %v1174_v16 = vadd.f32 1.0, %v12635_v19  ;;  %v3218_v18 = vsel %vm13514_vm8, %v3213_v3, %v3217_v46  ;;  %v5983_v55 = vsel %vm14117_vm14, %v11080_v49, %v5982_v33  ;;  %v6678_v10 = vld [vmem:[#allocation2 + $0xb0] sm:$0x1] }
 0x2b4   : > { %v10975_v41 = vcombine.low %v3968_v21, %v3971_v2  ;;  %v2327_v17 = vsel %vm13562_vm10, %v1940_v39, %v2326_v43  ;;  %v11487_v50 = vpack.c.bf16 %v1299_v6, %v1299_v6  ;;  %v1172_v51 = vadd.f32 1.0, %v12637_v56  ;;  %12116 = vmatpush3.bf16.msra.mxu1 %v12322_v53  ;;  %v362_v21 = vld [vmem:[#allocation2 + $0x168] sm:$0x1]  ;;  %v8309_v53 = vld [vmem:[#allocation3 + $0x28] sm:$0xff]  ;;  %v2722_v2 = vld [vmem:[#allocation2 + $0x100] sm:$0xf] }
 0x2b5   : > { %v10927_v24 = vcombine.low %v3208_v42, %v3218_v18  ;;  %2328 = vst [vmem:[#allocation2 + $0x150] sm:$0xf] %v2327_v17  ;;  %12638 = vrcp.f32 %v1174_v16  ;;  %4597 = vrot.lane.b32.xlu0 %v12305_v14, %s13089_s15  ;;  %v5984_v46 = vrot.slane %v5982_v33, 4  ;;  %v3974_v35 = vrot.slane %v3766_v31, 5  ;;  %v2319_v42 = vld [vmem:[#allocation2 + $0x144] sm:$0xf]  ;;  %v14592_v56 = vpop.permute.xlu0 %4581 }
 0x2b6   : > { %4305 = vst.msk [vmem:[#allocation3 + $0x58] sm:$0xff] %vm2631_vm15, %v10975_v41  ;;  %v3977_v58 = vrot.slane %v3767_v1, 5  ;;  %v1918_v48 = vshrl.u32 %v11487_v50, 16  ;;  %v1921_v44 = vshll.u32 %v11487_v50, 16  ;;  %12640 = vrcp.f32 %v1172_v51 }
 0x2b7   : > { %3663 = vrot.lane.b32.xlu1 %v10927_v24, %s13089_s15  ;;  %4657 = vst.msk [vmem:[#allocation3 + $0x58] sm:$0xff] %vm3723_vm0, %v14354_v0  ;;  %v7025_v43 = vshrl.u32 %v6676_v9, 16  ;;  %v5986_v27 = vsel %vm14117_vm14, %v5984_v46, %v5985_v25  ;;  %v3975_v22 = vsel %vm14117_vm14, %v10944_v47, %v3974_v35  ;;  %v3976_v7 = vrot.slane %v3974_v35, 4  ;;  %8768 = vmatmul.mubr.bf16.gmra.mrb[4].mxu1 %v8309_v53 }
 0x2b8   : > { %v7028_v49 = vshll.u32 %v6676_v9, 16  ;;  %v14585_v33 = vrot.slane %v1918_v48, 7  ;;  %v11112_v31 = vcombine.low %v5983_v55, %v5986_v27  ;;  %v7034_v5 = vshll.u32 %v6677_v38, 16  ;;  %v2723_v9 = vld [vmem:[#allocation2 + $0x104] sm:$0x1] }
 0x2b9   : > { %v7027_v1 = vrot.slane %v7025_v43, 4  ;;  %v3978_v0 = vsel %vm14117_vm14, %v3976_v7, %v3977_v58  ;;  %v7038_v14 = vshrl.u32 %v6677_v38, 16  ;;  %v7044_v19 = vshll.u32 %v6678_v10, 16  ;;  %v14603_v38 = vpop.f32.mrb[62].mxu0  ;;  %v12335_v10 = vld [vmem:[#allocation2 + $0xb4] sm:$0xff]   ;;  %v8314_v7 = vld [vmem:[#allocation3 + $0x50] sm:$0xff] }
 0x2ba   : > { %v7030_v3 = vrot.slane %v7028_v49, 5  ;;  %v1923_v25 = vor.u32 %v1921_v44, %v14585_v33  ;;  %v1924_v47 = vrot.slane %v14585_v33, 4  ;;  %v10976_v39 = vcombine.low %v3975_v22, %v3978_v0  ;;  %v359_v44 = vld [vmem:[#allocation2 + $0x15c] sm:$0x1]  ;;  %v3768_v22 = vld [vmem:[#allocation2 + $0x30] sm:$0xe] }
 0x2bb   : > { %6245 = vrot.lane.b32.xlu1 %v11112_v31, %s13089_s15  ;;  %v7036_v6 = vrot.slane %v7034_v5, 5  ;;  %v7040_v18 = vrot.slane %v7038_v14, 4  ;;  %v7046_v41 = vrot.slane %v7044_v19, 5  ;;  %v363_v55 = vsel %vm13310_vm2, 0, %v362_v21  ;;  %2647 = vst.msk [vmem:[#allocation3 + $0x258] sm:$0xff] %vm2631_vm15, %v12335_v10  ;;  %v14612_v19 = vpop.permute.xlu0 %4583  ;;  %v17278_v10 = vld [vmem:[#allocation19_spill] sm:$0xff] }
 0x2bc   : > { %v7031_v16 = vor.u32 %v7030_v3, %v7027_v1  ;;  %v2320_v17 = vsel %vm13562_vm10, %v1923_v25, %v2319_v42  ;;  %4306 = vst.msk [vmem:[#allocation3 + $0x80] sm:$0xff] %vm2631_vm15, %v10976_v39  ;;  %364 = vst [vmem:[#allocation2 + $0x168] sm:$0x1] %v363_v55  ;;  %v14601_v50 = vadd.f32 %v14494_v32, %v14230_v52  ;;  %v3220_v51 = vshrl.u32 %v2721_v26, 16 }
 0x2bd   : > { %v3223_v24 = vshll.u32 %v2721_v26, 16  ;;  %2321 = vst [vmem:[#allocation2 + $0x144] sm:$0xf] %v2320_v17  ;;  %4658 = vst.msk [vmem:[#allocation3 + $0x80] sm:$0xff] %vm3723_vm0, %v14379_v34  ;;  %v7041_v35 = vor.u32 %v7040_v18, %v7036_v6  ;;  %v3229_v58 = vshll.u32 %v2722_v2, 16  ;;  %v3233_v48 = vshrl.u32 %v2722_v2, 16 }
 0x2be   : > { %v7032_v46 = vrot.slane %v7031_v16, 4  ;;  %v8315_v43 = vld [vmem:[#allocation3 + $0x58] sm:$0xff]  ;;  %v985_v21 = vsub.f32 0.0, %v14601_v50  ;;  %v3222_v53 = vrot.slane %v3220_v51, 4  ;;  %v3239_v27 = vshll.u32 %v2723_v9, 16 }
 0x2bf   : > { %v3225_v52 = vrot.slane %v3223_v24, 5  ;;  %8775 = vmatprep.mubr.bf16.mxu1 %v8315_v43  ;;  %v12639_v49 = vpop.eup %12638  ;;  %v7042_v31 = vrot.slane %v7041_v35, 4  ;;  %v3231_v1 = vrot.slane %v3229_v58, 5  ;;  %v3235_v5 = vrot.slane %v3233_v48, 4  ;;  %v3769_v16 = vld [vmem:[#allocation2 + $0x34] sm:$0xf]  ;;  %v3650_v35 = vpop.permute.xlu1 %3649 }
 0x2c0   : > { %v7037_v34 = vsel %vm13514_vm8, %v7032_v46, %v7036_v6  ;;  %8776 = vmatmul.mubr.bf16.gmra.mrb[8].mxu1 %v8314_v7  ;;  %v12641_v26 = vpop.eup %12640  ;;  %v1302_v42 = vmul.f32 %v12639_v49, %v14498_v40  ;;  %v1103_v0 = vmul.f32 1.442695, %v985_v21  ;;  %v3241_v14 = vrot.slane %v3239_v27, 5  ;;  %v3770_v40 = vld [vmem:[#allocation2 + $0x38] sm:$0x1]  ;;  %v14623_v58 = vpop.f32.mrb[63].mxu0 }
 0x2c1   : > { %v3226_v3 = vor.u32 %v3225_v52, %v3222_v53  ;;  %v1300_v25 = vmul.f32 %v12641_v26, %v14504_v62  ;;  %v7047_v39 = vsel %vm13514_vm8, %v7042_v31, %v7046_v41  ;;  %v3236_v2 = vor.u32 %v3235_v5, %v3231_v1  ;;  %v460_v17 = vld [vmem:[#allocation2 + $0x170] sm:$0x1]  ;;  %v457_v41 = vld [vmem:[#allocation2 + $0x164] sm:$0x1]  ;;  %v12309_v53 = vld [vmem:[#allocation2 + $0x114] sm:$0xff]   ;;  %3735 = vst.msk [vmem:[#allocation3 + $0x1b8] sm:$0xff] %vm3723_vm0, %v3650_v35 }
 0x2c2   : > { %v360_v6 = vsel %vm13310_vm2, 0, %v359_v44  ;;  %v11490_v18 = vpack.c.bf16 %v1302_v42, %v1302_v42  ;;  %v11177_v55 = vcombine.low %v7037_v34, %v7047_v39  ;;  %12642 = vpow2.f32 %v1103_v0  ;;  %v2330_v31 = vld [vmem:[#allocation2 + $0x158] sm:$0x1]  ;;  %v8319_v42 = vld [vmem:[#allocation3 + $0x78] sm:$0xff]  ;;  %v14634_v0 = vpop.permute.xlu0 %4585  ;;  %v5748_v35 = vld [vmem:[#allocation2 + $0xa0] sm:$0xf] }
 0x2c3   : > { %v3227_v9 = vrot.slane %v3226_v3, 4  ;;  %361 = vst [vmem:[#allocation2 + $0x15c] sm:$0x1] %v360_v6  ;;  %v11488_v51 = vpack.c.bf16 %v1300_v25, %v1300_v25  ;;  %v3237_v24 = vrot.slane %v3236_v2, 4  ;;  %v14621_v62 = vadd.f32 %v14494_v32, %v17278_v10  ;;  %v3652_v6 = vpop.permute.xlu1 %3651 }
 0x2c4   : > { %v10945_v46 = vrot.slane %v3768_v22, 9  ;;  %v1943_v48 = vshrl.u32 %v11490_v18, 16  ;;  %v1946_v44 = vshll.u32 %v11490_v18, 16  ;;  %7624 = vrot.lane.b32.xlu0 %v11177_v55, %s13089_s15  ;;  %v3981_v21 = vrot.slane %v3769_v16, 5  ;;  %v8320_v52 = vld [vmem:[#allocation3 + $0x80] sm:$0xff]  ;;  %3736 = vst.msk [vmem:[#allocation3 + $0x1e0] sm:$0xff] %vm3723_vm0, %v3652_v6 }
 0x2c5   : > { %v3232_v43 = vsel %vm13514_vm8, %v3227_v9, %v3231_v1  ;;  %v1926_v27 = vshrl.u32 %v11488_v51, 16  ;;  %v1929_v7 = vshll.u32 %v11488_v51, 16  ;;  %v3242_v22 = vsel %vm13514_vm8, %v3237_v24, %v3241_v14  ;;  %8783 = vmatprep.mubr.bf16.mxu1 %v8320_v52  ;;  %v14638_v14 = vld [vmem:[#allocation2 + $0x3c] sm:$0xe]  ;;  %v2323_v55 = vld [vmem:[#allocation2 + $0x14c] sm:$0x1] }
 0x2c6   : > { %v983_v49 = vsub.f32 0.0, %v14621_v62  ;;  %v1945_v34 = vrot.slane %v1943_v48, 7  ;;  %v10928_v5 = vcombine.low %v3232_v43, %v3242_v22  ;;  %v3982_v26 = vsel %vm14117_vm14, %v10945_v46, %v3981_v21  ;;  %v17279_v9 = vld [vmem:[#allocation20_spill] sm:$0xff]  ;;  %v5749_v48 = vld [vmem:[#allocation2 + $0xa4] sm:$0x1] }
 0x2c7   : > { %v3983_v1 = vrot.slane %v3981_v21, 4  ;;  %v1928_v3 = vrot.slane %v1926_v27, 7  ;;  %v3984_v39 = vrot.slane %v3770_v40, 5  ;;  %v461_v2 = vsel %vm13378_vm4, 0, %v460_v17  ;;  %v5747_v17 = vld [vmem:[#allocation2 + $0x9c] sm:$0xe] }
 0x2c8   : > { %v1099_v25 = vmul.f32 1.442695, %v983_v49  ;;  %8784 = vmatmul.mubr.bf16.gmra.mrb[12].mxu1 %v8319_v42  ;;  %v1948_v16 = vor.u32 %v1946_v44, %v1945_v34  ;;  %v1950_v18 = vrot.slane %v1945_v34, 4  ;;  %3665 = vrot.lane.b32.xlu1 %v10928_v5, %s13089_s15  ;;  %462 = vst [vmem:[#allocation2 + $0x170] sm:$0x1] %v461_v2  ;;  %v14643_v51 = vadd.f32 %v14494_v32, %v17279_v9  ;;  %v12327_v44 = vld [vmem:[#allocation7 + $0xd8] sm:$0xff]  }
 0x2c9   : > { %v458_v40 = vsel %vm13378_vm4, 0, %v457_v41  ;;  %4599 = vrot.lane.b32.xlu0 %v12309_v53, %s13089_s15  ;;  %v1931_v24 = vor.u32 %v1929_v7, %v1928_v3  ;;  %v1933_v10 = vrot.slane %v1928_v3, 4  ;;  %v3985_v46 = vsel %vm14117_vm14, %v3983_v1, %v3984_v39  ;;  %v3772_v52 = vld [vmem:[#allocation2 + $0x40] sm:$0xf]  ;;  %v3773_v27 = vld [vmem:[#allocation2 + $0x44] sm:$0x1]  ;;  %v14658_v7 = vpop.permute.xlu0 %4587  ;;  %11663 = vmatprep.subr.bf16.mxu0 %v12327_v44 }
 0x2ca   : > { %12644 = vpow2.f32 %v1099_v25  ;;  %459 = vst [vmem:[#allocation2 + $0x164] sm:$0x1] %v458_v40  ;;  %v1949_v41 = vsel %vm13569_vm11, %v1941_v59, %v1948_v16  ;;  %v2331_v43 = vsel %vm13310_vm2, %v1950_v18, %v2330_v31  ;;  %v10977_v21 = vcombine.low %v3982_v26, %v3985_v46  ;;  %v12328_v22 = vld [vmem:[#allocation7 + $0x98] sm:$0xff]   ;;  %v17280_v49 = vld [vmem:[#allocation21_spill] sm:$0xff]  ;;  %v3654_v26 = vpop.permute.xlu1 %3653  ;;  %v6680_v16 = vld [vmem:[#allocation2 + $0xb8] sm:$0xf] }
 0x2cb   : > { %v986_v53 = vsub.f32 0.0, %v14643_v51  ;;  %2329 = vst.msk [vmem:[#allocation2 + $0x154] sm:$0xf] %vm262_vm5, %v1949_v41  ;;  %2332 = vst [vmem:[#allocation2 + $0x158] sm:$0x1] %v2331_v43  ;;  %v1932_v54 = vsel %vm13569_vm11, %v1924_v47, %v1931_v24  ;;  %v2324_v59 = vsel %vm13310_vm2, %v1933_v10, %v2323_v55  ;;  %v14669_v34 = vadd.f32 %v14494_v32, %v17280_v49  ;;  %v12332_v32 = vld [vmem:[#allocation7 + $0xe0] sm:$0xff]  }
 0x2cc   : > { %v11081_v31 = vrot.slane %v5747_v17, 9  ;;  %v6679_v5 = vld [vmem:[#allocation2 + $0xb4] sm:$0xf]  ;;  %v12643_v1 = vpop.eup %12642  ;;  %2322 = vst.msk [vmem:[#allocation2 + $0x148] sm:$0xf] %vm262_vm5, %v1932_v54  ;;  %v5989_v42 = vrot.slane %v5748_v35, 5  ;;  %11664 = vmatpush3.bf16.msra.mxu0 %v12328_v22 }
 0x2cd   : > { %2325 = vst [vmem:[#allocation2 + $0x14c] sm:$0x1] %v2324_v59  ;;  %4307 = vst.msk [vmem:[#allocation3 + $0xa8] sm:$0xff] %vm2631_vm15, %v10977_v21  ;;  %v1105_v33 = vmul.f32 1.442695, %v986_v53  ;;  %v5992_v47 = vrot.slane %v5749_v48, 5  ;;  %v14680_v40 = vpop.permute.xlu0 %4589  ;;  %11665 = vmatprep.subr.bf16.mxu0 %v12332_v32 }
 0x2ce   : > { %v10946_v3 = vrot.slane %v14638_v14, 9  ;;  %3737 = vst.msk [vmem:[#allocation3 + $0x208] sm:$0xff] %vm3723_vm0, %v3654_v26  ;;  %v1177_v25 = vadd.f32 1.0, %v12643_v1  ;;  %4659 = vst.msk [vmem:[#allocation3 + $0xa8] sm:$0xff] %vm3723_vm0, %v14435_v29  ;;  %v984_v39 = vsub.f32 0.0, %v14669_v34  ;;  %v3988_v2 = vrot.slane %v3772_v52, 5  ;;  %v3656_v46 = vpop.permute.xlu1 %3655 }
 0x2cf   : > { %v3991_v6 = vrot.slane %v3773_v27, 5  ;;  %12646 = vpow2.f32 %v1105_v33  ;;  %v5990_v18 = vsel %vm14117_vm14, %v11081_v31, %v5989_v42  ;;  %v5991_v55 = vrot.slane %v5989_v42, 4  ;;  %v6681_v9 = vld [vmem:[#allocation2 + $0xbc] sm:$0x1]  ;;  %v2724_v10 = vld [vmem:[#allocation2 + $0x108] sm:$0xf] }
 0x2d0   : > { %v7049_v14 = vshrl.u32 %v6679_v5, 16  ;;  %12648 = vrcp.f32 %v1177_v25  ;;  %v1101_v17 = vmul.f32 1.442695, %v984_v39  ;;  %v3989_v29 = vsel %vm14117_vm14, %v10946_v3, %v3988_v2  ;;  %v12333_v35 = vld [vmem:[#allocation7 + $0xa0] sm:$0xff]   ;;  %v2725_v21 = vld [vmem:[#allocation2 + $0x10c] sm:$0xf] }
 0x2d1   : > { %v3990_v24 = vrot.slane %v3988_v2, 4  ;;  %v5993_v48 = vsel %vm14117_vm14, %v5991_v55, %v5992_v47  ;;  %v7052_v41 = vshll.u32 %v6679_v5, 16  ;;  %v7058_v43 = vshll.u32 %v6680_v16, 16  ;;  %3738 = vst.msk [vmem:[#allocation3 + $0x230] sm:$0xff] %vm3723_vm0, %v3656_v46  ;;  %v12337_v53 = vld [vmem:[#allocation7 + $0xe8] sm:$0xff]   ;;  %11666 = vmatpush3.bf16.msra.mxu0 %v12333_v35  ;;  %v7601_v42 = vpop.permute.xlu0 %7600  ;;  %v8324_v46 = vld [vmem:[#allocation3 + $0xa0] sm:$0xff] }
 0x2d2   : > { %v7051_v44 = vrot.slane %v7049_v14, 4  ;;  %12650 = vpow2.f32 %v1101_v17  ;;  %v11113_v52 = vcombine.low %v5990_v18, %v5993_v48  ;;  %v7062_v22 = vshrl.u32 %v6680_v16, 16  ;;  %v12338_v54 = vld [vmem:[#allocation7 + $0xa8] sm:$0xff]   ;;  %v2726_v1 = vld [vmem:[#allocation2 + $0x110] sm:$0x1]  ;;  %11667 = vmatprep.subr.bf16.mxu0 %v12337_v53  ;;  %7696 = vst.msk [vmem:[#allocation3 + $0x18] sm:$0xff] %vm3723_vm0, %v7601_v42  ;;  %v3658_v2 = vpop.permute.xlu1 %3657 }
 0x2d3   : > { %v3992_v27 = vsel %vm14117_vm14, %v3990_v24, %v3991_v6  ;;  %v7054_v49 = vrot.slane %v7052_v41, 5  ;;  %v7060_v31 = vrot.slane %v7058_v43, 5  ;;  %v7068_v26 = vshll.u32 %v6681_v9, 16  ;;  %v3774_v33 = vld [vmem:[#allocation2 + $0x48] sm:$0xe]  ;;  %3739 = vst.msk [vmem:[#allocation3 + $0x258] sm:$0xff] %vm3723_vm0, %v3658_v2 }
 0x2d4   : > { %v10978_v59 = vcombine.low %v3989_v29, %v3992_v27  ;;  %v3775_v5 = vld [vmem:[#allocation2 + $0x4c] sm:$0xf]  ;;  %v12645_v47 = vpop.eup %12644  ;;  %6247 = vrot.lane.b32.xlu1 %v11113_v52, %s13089_s15  ;;  %v7064_v3 = vrot.slane %v7062_v22, 4  ;;  %v3244_v32 = vshrl.u32 %v2724_v10, 16  ;;  %v3247_v25 = vshll.u32 %v2724_v10, 16  ;;  %v12340_v35 = vld [vmem:[#allocation7 + $0xf0] sm:$0xff]  }
 0x2d5   : > { %v3253_v39 = vshll.u32 %v2725_v21, 16  ;;  %v1175_v6 = vadd.f32 1.0, %v12645_v47  ;;  %v7055_v16 = vor.u32 %v7054_v49, %v7051_v44  ;;  %v7070_v18 = vrot.slane %v7068_v26, 5  ;;  %v3776_v9 = vld [vmem:[#allocation2 + $0x50] sm:$0x1]  ;;  %v8325_v14 = vld [vmem:[#allocation3 + $0xa8] sm:$0xff]  ;;  %11668 = vmatpush3.bf16.msra.mxu0 %v12338_v54  ;;  %v7603_v43 = vpop.permute.xlu0 %7602 }
 0x2d6   : > { %4308 = vst.msk [vmem:[#allocation3 + $0xd0] sm:$0xff] %vm2631_vm15, %v10978_v59  ;;  %v3257_v55 = vshrl.u32 %v2725_v21, 16  ;;  %v7065_v17 = vor.u32 %v7064_v3, %v7060_v31  ;;  %v3246_v29 = vrot.slane %v3244_v32, 4  ;;  %v3249_v24 = vrot.slane %v3247_v25, 5  ;;  %8791 = vmatprep.mubr.bf16.mxu1 %v8325_v14  ;;  %v12341_v21 = vld [vmem:[#allocation7 + $0xb0] sm:$0xff]   ;;  %11669 = vmatprep.subr.bf16.mxu0 %v12340_v35  ;;  %v12342_v59 = vld [vmem:[#allocation2 + $0x30] sm:$0xff]  }
 0x2d7   : > { %4660 = vst.msk [vmem:[#allocation3 + $0xd0] sm:$0xff] %vm3723_vm0, %v14458_v57  ;;  %v3255_v10 = vrot.slane %v3253_v39, 5  ;;  %12652 = vrcp.f32 %v1175_v6  ;;  %v7056_v48 = vrot.slane %v7055_v16, 4  ;;  %v3263_v41 = vshll.u32 %v2726_v1, 16  ;;  %8792 = vmatmul.mubr.bf16.gmra.mrb[16].mxu1 %v8324_v46  ;;  %v5750_v57 = vld [vmem:[#allocation2 + $0xa8] sm:$0xe] }
 0x2d8   : > { %v3259_v44 = vrot.slane %v3257_v55, 4  ;;  %v7066_v53 = vrot.slane %v7065_v17, 4  ;;  %v3250_v52 = vor.u32 %v3249_v24, %v3246_v29  ;;  %v10947_v27 = vrot.slane %v3774_v33, 9  ;;  %7697 = vst.msk [vmem:[#allocation3 + $0x40] sm:$0xff] %vm3723_vm0, %v7603_v43  ;;  %v5751_v1 = vld [vmem:[#allocation2 + $0xac] sm:$0xf] }
 0x2d9   : > { %v3995_v22 = vrot.slane %v3775_v5, 5  ;;  %v12647_v49 = vpop.eup %12646  ;;  %v7061_v54 = vsel %vm13514_vm8, %v7056_v48, %v7060_v31  ;;  %v3265_v42 = vrot.slane %v3263_v41, 5  ;;  %v3998_v47 = vrot.slane %v3776_v9, 5  ;;  %11670 = vmatpush3.bf16.msra.mxu0 %v12341_v21  ;;  %6610 = vst.msk [vmem:[#allocation3 + $0x68] sm:$0xff] %vm2631_vm15, %v12342_v59  ;;  %v3777_v16 = vld [vmem:[#allocation2 + $0x54] sm:$0xe]  ;;  %v7605_v9 = vpop.permute.xlu0 %7604 }
 0x2da   : > { %v3260_v26 = vor.u32 %v3259_v44, %v3255_v10  ;;  %v12649_v3 = vpop.eup %12648  ;;  %v1178_v32 = vadd.f32 1.0, %v12647_v49  ;;  %v7071_v25 = vsel %vm13514_vm8, %v7066_v53, %v7070_v18  ;;  %v3251_v33 = vrot.slane %v3250_v52, 4  ;;  %v3778_v55 = vld [vmem:[#allocation2 + $0x58] sm:$0xf]  ;;  %v5752_v17 = vld [vmem:[#allocation2 + $0xb0] sm:$0x1] }
 0x2db   : > { %v3996_v5 = vsel %vm14117_vm14, %v10947_v27, %v3995_v22  ;;  %v1305_v39 = vmul.f32 %v12649_v3, %v14601_v50  ;;  %v11178_v2 = vcombine.low %v7061_v54, %v7071_v25  ;;  %v3997_v6 = vrot.slane %v3995_v22, 4  ;;  %v14706_v46 = vld [vmem:[#allocation2 + $0x5c] sm:$0x1]  ;;  %7698 = vst.msk [vmem:[#allocation3 + $0x68] sm:$0xff] %vm3723_vm0, %v7605_v9  ;;  %v12314_v41 = vld [vmem:[#allocation2 + $0x120] sm:$0xff]   ;;  %v8307_v59 = vld [vmem:[#allocation3 + $0x18] sm:$0xff] }
 0x2dc   : > { %v3261_v31 = vrot.slane %v3260_v26, 4  ;;  %v12651_v14 = vpop.eup %12650  ;;  %12654 = vrcp.f32 %v1178_v32  ;;  %v3256_v18 = vsel %vm13514_vm8, %v3251_v33, %v3255_v10  ;;  %v11082_v29 = vrot.slane %v5750_v57, 9  ;;  %v6682_v43 = vld [vmem:[#allocation2 + $0xc0] sm:$0xf]  ;;  %v6683_v22 = vld [vmem:[#allocation2 + $0xc4] sm:$0xf]  ;;  %8920 = vmatprep.mubr.bf16.mxu0 %v8307_v59 }
 0x2dd   : > { %v5996_v24 = vrot.slane %v5751_v1, 5  ;;  %v11493_v35 = vpack.c.bf16 %v1305_v39, %v1305_v39  ;;  %v1176_v50 = vadd.f32 1.0, %v12651_v14  ;;  %7626 = vrot.lane.b32.xlu0 %v11178_v2, %s13089_s15  ;;  %v3999_v44 = vsel %vm14117_vm14, %v3997_v6, %v3998_v47  ;;  %v8329_v57 = vld [vmem:[#allocation3 + $0xc8] sm:$0xff]  ;;  %v12345_v47 = vld [vmem:[#allocation7 + $0xb8] sm:$0xff]   ;;  %v7607_v3 = vpop.permute.xlu0 %7606 }
 0x2de   : > { %v3266_v48 = vsel %vm13514_vm8, %v3261_v31, %v3265_v42  ;;  %v8330_v10 = vld [vmem:[#allocation3 + $0xd0] sm:$0xff]  ;;  %v10979_v53 = vcombine.low %v3996_v5, %v3999_v44  ;;  %v5999_v26 = vrot.slane %v5752_v17, 5  ;;  %v12344_v42 = vld [vmem:[#allocation7 + $0xf8] sm:$0xff]   ;;  %v10948_v32 = vrot.slane %v3777_v16, 9 }
 0x2df   : > { %v10929_v21 = vcombine.low %v3256_v18, %v3266_v48  ;;  %v5997_v52 = vsel %vm14117_vm14, %v11082_v29, %v5996_v24  ;;  %v5998_v27 = vrot.slane %v5996_v24, 4  ;;  %8799 = vmatprep.mubr.bf16.mxu1 %v8330_v10  ;;  %v1969_v49 = vshrl.u32 %v11493_v35, 16  ;;  %v12346_v1 = vld [vmem:[#allocation2 + $0x3c] sm:$0xff]   ;;  %11671 = vmatprep.subr.bf16.mxu0 %v12344_v42  ;;  %v12348_v44 = vld [vmem:[#allocation2 + $0x48] sm:$0xff]  }
 0x2e0   : > { %v1972_v54 = vshll.u32 %v11493_v35, 16  ;;  %12656 = vrcp.f32 %v1176_v50  ;;  %8800 = vmatmul.mubr.bf16.gmra.mrb[20].mxu1 %v8329_v57  ;;  %4309 = vst.msk [vmem:[#allocation3 + $0xf8] sm:$0xff] %vm2631_vm15, %v10979_v53  ;;  %v4002_v25 = vrot.slane %v3778_v55, 5  ;;  %v4005_v33 = vrot.slane %v14706_v46, 5  ;;  %6611 = vst.msk [vmem:[#allocation3 + $0x90] sm:$0xff] %vm2631_vm15, %v12346_v1  ;;  %v12347_v16 = vld [vmem:[#allocation7 + $0x110] sm:$0xff]   ;;  %11672 = vmatpush3.bf16.msra.mxu0 %v12345_v47 }
 0x2e1   : > { %3667 = vrot.lane.b32.xlu1 %v10929_v21, %s13089_s15  ;;  %v7073_v5 = vshrl.u32 %v6682_v43, 16  ;;  %v12653_v39 = vpop.eup %12652  ;;  %v14719_v2 = vrot.slane %v1969_v49, 7  ;;  %4661 = vst.msk [vmem:[#allocation3 + $0xf8] sm:$0xff] %vm3723_vm0, %v14472_v11  ;;  %4601 = vrot.lane.b32.xlu0 %v12314_v41, %s13089_s15  ;;  %v6000_v31 = vsel %vm14117_vm14, %v5998_v27, %v5999_v26  ;;  %v7076_v6 = vshll.u32 %v6682_v43, 16  ;;  %v2340_v55 = vld [vmem:[#allocation2 + $0x168] sm:$0xf] }
 0x2e2   : > { %v7082_v9 = vshll.u32 %v6683_v22, 16  ;;  %v1303_v14 = vmul.f32 %v12653_v39, %v14621_v62  ;;  %v11114_v18 = vcombine.low %v5997_v52, %v6000_v31  ;;  %v4003_v17 = vsel %vm14117_vm14, %v10948_v32, %v4002_v25  ;;  %v6684_v11 = vld [vmem:[#allocation2 + $0xc8] sm:$0x1]  ;;  %7699 = vst.msk [vmem:[#allocation3 + $0x90] sm:$0xff] %vm3723_vm0, %v7607_v3  ;;  %v368_v48 = vld [vmem:[#allocation2 + $0x180] sm:$0x1]  ;;  %12117 = vmatprep.subr.bf16.mxu1 %v12347_v16 }
 0x2e3   : > { %v4004_v29 = vrot.slane %v4002_v25, 4  ;;  %v1974_v24 = vor.u32 %v1972_v54, %v14719_v2  ;;  %v1975_v46 = vrot.slane %v14719_v2, 4  ;;  %v7075_v35 = vrot.slane %v7073_v5, 4  ;;  %12118 = vmatpush3.bf16.msra.mxu1 %v12347_v16  ;;  %v2727_v57 = vld [vmem:[#allocation2 + $0x114] sm:$0xf]  ;;  %6612 = vst.msk [vmem:[#allocation3 + $0xb8] sm:$0xff] %vm2631_vm15, %v12348_v44 }
 0x2e4   : > { %v7078_v50 = vrot.slane %v7076_v6, 5  ;;  %v11491_v41 = vpack.c.bf16 %v1303_v14, %v1303_v14  ;;  %v7084_v43 = vrot.slane %v7082_v9, 5  ;;  %v7086_v10 = vshrl.u32 %v6683_v22, 16  ;;  %v2728_v47 = vld [vmem:[#allocation2 + $0x118] sm:$0xf]  ;;  %v8334_v16 = vld [vmem:[#allocation3 + $0xf0] sm:$0xff] }
 0x2e5   : > { %6249 = vrot.lane.b32.xlu1 %v11114_v18, %s13089_s15  ;;  %v4006_v62 = vsel %vm14117_vm14, %v4004_v29, %v4005_v33  ;;  %v2341_v21 = vsel %vm13562_vm10, %v1974_v24, %v2340_v55  ;;  %v7092_v27 = vshll.u32 %v6684_v11, 16  ;;  %v369_v42 = vsel %vm13310_vm2, 0, %v368_v48  ;;  %v2333_v22 = vld [vmem:[#allocation2 + $0x15c] sm:$0xf]  ;;  %v14746_v25 = vld [vmem:[%s17231_s2] ss:$0 sm:$0xff] }
 0x2e6   : > { %v10980_v53 = vcombine.low %v4003_v17, %v4006_v62  ;;  %v7079_v52 = vor.u32 %v7078_v50, %v7075_v35  ;;  %v12655_v59 = vpop.eup %12654  ;;  %2342 = vst [vmem:[#allocation2 + $0x168] sm:$0xf] %v2341_v21  ;;  %v1952_v49 = vshrl.u32 %v11491_v41, 16  ;;  %v1955_v54 = vshll.u32 %v11491_v41, 16  ;;  %370 = vst [vmem:[#allocation2 + $0x180] sm:$0x1] %v369_v42 }
 0x2e7   : > { %v7088_v26 = vrot.slane %v7086_v10, 4  ;;  %v1306_v1 = vmul.f32 %v12655_v59, %v14643_v51  ;;  %v7094_v32 = vrot.slane %v7092_v27, 5  ;;  %v17281_v33 = vld [vmem:[#allocation22_spill] sm:$0xff]  ;;  %v3268_v31 = vshrl.u32 %v2727_v57, 16  ;;  %v7609_v27 = vpop.permute.xlu0 %7608 }
 0x2e8   : > { %4310 = vst.msk [vmem:[#allocation3 + $0x120] sm:$0xff] %vm2631_vm15, %v10980_v53  ;;  %v7080_v3 = vrot.slane %v7079_v52, 4  ;;  %v14750_v5 = vadd.f32 %v14746_v25, %v17281_v33  ;;  %v14752_v39 = vrot.slane %v1952_v49, 7  ;;  %v3271_v6 = vshll.u32 %v2727_v57, 16  ;;  %v8335_v9 = vld [vmem:[#allocation3 + $0xf8] sm:$0xff] }
 0x2e9   : > { %4662 = vst.msk [vmem:[#allocation3 + $0x120] sm:$0xff] %vm3723_vm0, %v14512_v36  ;;  %v7089_v51 = vor.u32 %v7088_v26, %v7084_v43  ;;  %v11494_v14 = vpack.c.bf16 %v1306_v1, %v1306_v1  ;;  %v3277_v29 = vshll.u32 %v2728_v47, 16  ;;  %8807 = vmatprep.mubr.bf16.mxu1 %v8335_v9  ;;  %v3270_v41 = vrot.slane %v3268_v31, 4  ;;  %v2729_v21 = vld [vmem:[#allocation2 + $0x11c] sm:$0x1]  ;;  %7700 = vst.msk [vmem:[#allocation3 + $0xb8] sm:$0xff] %vm3723_vm0, %v7609_v27 }
 0x2ea   : > { %v12657_v55 = vpop.eup %12656  ;;  %v7085_v18 = vsel %vm13514_vm8, %v7080_v3, %v7084_v43  ;;  %v989_v17 = vsub.f32 0.0, %v14750_v5  ;;  %v1957_v11 = vor.u32 %v1955_v54, %v14752_v39  ;;  %v1958_v24 = vrot.slane %v14752_v39, 4  ;;  %8808 = vmatmul.mubr.bf16.gmra.mrb[24].mxu1 %v8334_v16  ;;  %v365_v52 = vld [vmem:[#allocation2 + $0x174] sm:$0x1]  ;;  %v3780_v49 = vld [vmem:[#allocation2 + $0x60] sm:$0xe] }
 0x2eb   : > { %v1304_v36 = vmul.f32 %v12657_v55, %v14669_v34  ;;  %v7090_v35 = vrot.slane %v7089_v51, 4  ;;  %v1977_v50 = vshrl.u32 %v11494_v14, 16  ;;  %v1980_v48 = vshll.u32 %v11494_v14, 16  ;;  %v2344_v54 = vld [vmem:[#allocation2 + $0x170] sm:$0x1] }
 0x2ec   : > { %v1111_v44 = vmul.f32 1.442695, %v989_v17  ;;  %v2334_v62 = vsel %vm13562_vm10, %v1957_v11, %v2333_v22  ;;  %v3273_v53 = vrot.slane %v3271_v6, 5  ;;  %v14766_v59 = vrot.slane %v3277_v29, 5  ;;  %v3781_v3 = vld [vmem:[#allocation2 + $0x64] sm:$0xf] }
 0x2ed   : > { %v11492_v43 = vpack.c.bf16 %v1304_v36, %v1304_v36  ;;  %v7095_v10 = vsel %vm13514_vm8, %v7090_v35, %v7094_v32  ;;  %2335 = vst [vmem:[#allocation2 + $0x15c] sm:$0xf] %v2334_v62  ;;  %v1979_v57 = vrot.slane %v1977_v50, 7  ;;  %v3281_v1 = vshrl.u32 %v2728_v47, 16  ;;  %v14769_v32 = vld [vmem:[#allocation2 + $0x68] sm:$0x1] }
 0x2ee   : > { %v11179_v34 = vcombine.low %v7085_v18, %v7095_v10  ;;  %12658 = vpow2.f32 %v1111_v44  ;;  %v3274_v22 = vor.u32 %v3273_v53, %v3270_v41  ;;  %v466_v33 = vld [vmem:[#allocation2 + $0x188] sm:$0x1]  ;;  %v3287_v6 = vshll.u32 %v2729_v21, 16  ;;  %v12321_v16 = vld [vmem:[#allocation2 + $0x12c] sm:$0xff]   ;;  %v463_v29 = vld [vmem:[#allocation2 + $0x17c] sm:$0x1]  ;;  %v7611_v21 = vpop.permute.xlu0 %7610 }
 0x2ef   : > { %v1960_v26 = vshrl.u32 %v11492_v43, 16  ;;  %v1963_v42 = vshll.u32 %v11492_v43, 16  ;;  %v1982_v51 = vor.u32 %v1980_v48, %v1979_v57  ;;  %v1984_v31 = vrot.slane %v1979_v57, 4  ;;  %v2337_v35 = vld [vmem:[#allocation2 + $0x164] sm:$0x1]  ;;  %v8339_v41 = vld [vmem:[#allocation3 + $0x118] sm:$0xff] }
 0x2f0   : > { %7628 = vrot.lane.b32.xlu0 %v11179_v34, %s13089_s15  ;;  %v366_v9 = vsel %vm13310_vm2, 0, %v365_v52  ;;  %v8340_v55 = vld [vmem:[#allocation3 + $0x120] sm:$0xff]  ;;  %v3275_v18 = vrot.slane %v3274_v22, 4  ;;  %v3283_v17 = vrot.slane %v3281_v1, 4  ;;  %v14776_v47 = vadd.f32 %v14746_v25, %v14426_v13  ;;  %v12351_v22 = vld [vmem:[#allocation2 + $0x60] sm:$0xff]  }
 0x2f1   : > { %v1962_v14 = vrot.slane %v1960_v26, 7  ;;  %367 = vst [vmem:[#allocation2 + $0x174] sm:$0x1] %v366_v9  ;;  %8815 = vmatprep.mubr.bf16.mxu1 %v8340_v55  ;;  %v1983_v11 = vsel %vm13569_vm11, %v1975_v46, %v1982_v51  ;;  %v2345_v36 = vsel %vm13310_vm2, %v1984_v31, %v2344_v54  ;;  %v3289_v50 = vrot.slane %v3287_v6, 5  ;;  %v5753_v44 = vld [vmem:[#allocation2 + $0xb4] sm:$0xe] }
 0x2f2   : > { %v10949_v48 = vrot.slane %v3780_v49, 9  ;;  %2343 = vst.msk [vmem:[#allocation2 + $0x16c] sm:$0xf] %vm262_vm5, %v1983_v11  ;;  %2346 = vst [vmem:[#allocation2 + $0x170] sm:$0x1] %v2345_v36  ;;  %v3280_v2 = vsel %vm13514_vm8, %v3275_v18, %v14766_v59  ;;  %v3284_v43 = vor.u32 %v3283_v17, %v14766_v59  ;;  %8816 = vmatmul.mubr.bf16.gmra.mrb[28].mxu1 %v8339_v41  ;;  %v12350_v10 = vld [vmem:[#allocation2 + $0x54] sm:$0xff]  }
 0x2f3   : > { %v1965_v13 = vor.u32 %v1963_v42, %v1962_v14  ;;  %v1967_v62 = vrot.slane %v1962_v14, 4  ;;  %v5754_v46 = vld [vmem:[#allocation2 + $0xb8] sm:$0xf]  ;;  %v987_v53 = vsub.f32 0.0, %v14776_v47  ;;  %v4009_v52 = vrot.slane %v3781_v3, 5  ;;  %6613 = vst.msk [vmem:[#allocation3 + $0xe0] sm:$0xff] %vm2631_vm15, %v12350_v10 }
 0x2f4   : > { %v4012_v27 = vrot.slane %v14769_v32, 5  ;;  %v467_v57 = vsel %vm13378_vm4, 0, %v466_v33  ;;  %4603 = vrot.lane.b32.xlu0 %v12321_v16, %s13089_s15  ;;  %v3285_v49 = vrot.slane %v3284_v43, 4  ;;  %v14802_v54 = vadd.f32 %v14746_v25, %v14466_v23  ;;  %v5755_v26 = vld [vmem:[#allocation2 + $0xbc] sm:$0x1]  ;;  %v14810_v32 = vpop.permute.xlu1 %6223  ;;  %7701 = vst.msk [vmem:[#allocation3 + $0xe0] sm:$0xff] %vm3723_vm0, %v7611_v21 }
 0x2f5   : > { %v1966_v34 = vsel %vm13569_vm11, %v1958_v24, %v1965_v13  ;;  %v2338_v59 = vsel %vm13310_vm2, %v1967_v62, %v2337_v35  ;;  %468 = vst [vmem:[#allocation2 + $0x188] sm:$0x1] %v467_v57  ;;  %v3783_v42 = vld [vmem:[#allocation2 + $0x6c] sm:$0xe]  ;;  %v1107_v39 = vmul.f32 1.442695, %v987_v53  ;;  %v4010_v24 = vsel %vm14117_vm14, %v10949_v48, %v4009_v52 }
 0x2f6   : > { %2336 = vst.msk [vmem:[#allocation2 + $0x160] sm:$0xf] %vm262_vm5, %v1966_v34  ;;  %2339 = vst [vmem:[#allocation2 + $0x164] sm:$0x1] %v2338_v59  ;;  %v4011_v1 = vrot.slane %v4009_v52, 4  ;;  %v464_v3 = vsel %vm13378_vm4, 0, %v463_v29  ;;  %v3290_v23 = vsel %vm13514_vm8, %v3285_v49, %v3289_v50  ;;  %v14818_v51 = vadd.f32 %v14746_v25, %v14476_v8 }
 0x2f7   : > { %v990_v33 = vsub.f32 0.0, %v14802_v54  ;;  %465 = vst [vmem:[#allocation2 + $0x17c] sm:$0x1] %v464_v3  ;;  %v11083_v31 = vrot.slane %v5753_v44, 9  ;;  %6614 = vst.msk [vmem:[#allocation3 + $0x108] sm:$0xff] %vm2631_vm15, %v12351_v22  ;;  %v10930_v9 = vcombine.low %v3280_v2, %v3290_v23  ;;  %12660 = vpow2.f32 %v1107_v39 }
 0x2f8   : > { %v12659_v6 = vpop.eup %12658  ;;  %v4013_v16 = vsel %vm14117_vm14, %v4011_v1, %v4012_v27  ;;  %v6003_v55 = vrot.slane %v5754_v46, 5  ;;  %v3784_v14 = vld [vmem:[#allocation2 + $0x70] sm:$0xf]  ;;  %v3785_v18 = vld [vmem:[#allocation2 + $0x74] sm:$0x1]  ;;  %v988_v36 = vsub.f32 0.0, %v14818_v51  ;;  %v14832_v27 = vpop.permute.xlu1 %6225 }
 0x2f9   : > { %v1181_v17 = vadd.f32 1.0, %v12659_v6  ;;  %v10981_v29 = vcombine.low %v4010_v24, %v4013_v16  ;;  %v1113_v11 = vmul.f32 1.442695, %v990_v33  ;;  %v2730_v35 = vld [vmem:[#allocation2 + $0x120] sm:$0xf]  ;;  %3669 = vrot.lane.b32.xlu1 %v10930_v9, %s13089_s15  ;;  %v6006_v48 = vrot.slane %v5755_v26, 5 }
 0x2fa   : > { %v6004_v8 = vsel %vm14117_vm14, %v11083_v31, %v6003_v55  ;;  %v6005_v50 = vrot.slane %v6003_v55, 4  ;;  %v10950_v44 = vrot.slane %v3783_v42, 9  ;;  %v3786_v41 = vld [vmem:[#allocation2 + $0x78] sm:$0xe]  ;;  %v1109_v13 = vmul.f32 1.442695, %v988_v36  ;;  %v7613_v31 = vpop.permute.xlu0 %7612 }
 0x2fb   : > { %12662 = vrcp.f32 %v1181_v17  ;;  %4311 = vst.msk [vmem:[#allocation3 + $0x148] sm:$0xff] %vm2631_vm15, %v10981_v29  ;;  %v4016_v62 = vrot.slane %v3784_v14, 5  ;;  %v4019_v2 = vrot.slane %v3785_v18, 5  ;;  %v2731_v43 = vld [vmem:[#allocation2 + $0x124] sm:$0xf]  ;;  %v3292_v21 = vshrl.u32 %v2730_v35, 16 }
 0x2fc   : > { %4663 = vst.msk [vmem:[#allocation3 + $0x148] sm:$0xff] %vm3723_vm0, %v14528_v28  ;;  %12664 = vpow2.f32 %v1113_v11  ;;  %v6007_v46 = vsel %vm14117_vm14, %v6005_v50, %v6006_v48  ;;  %v2732_v10 = vld [vmem:[#allocation2 + $0x128] sm:$0x1]  ;;  %v3295_v53 = vshll.u32 %v2730_v35, 16  ;;  %v3787_v52 = vld [vmem:[#allocation2 + $0x7c] sm:$0xf] }
 0x2fd   : > { %12666 = vpow2.f32 %v1109_v13  ;;  %v11115_v57 = vcombine.low %v6004_v8, %v6007_v46  ;;  %v4017_v34 = vsel %vm14117_vm14, %v10950_v44, %v4016_v62  ;;  %v4018_v59 = vrot.slane %v4016_v62, 4  ;;  %v3788_v49 = vld [vmem:[#allocation2 + $0x80] sm:$0x1]  ;;  %v5756_v39 = vld [vmem:[#allocation2 + $0xc0] sm:$0xe]  ;;  %7702 = vst.msk [vmem:[#allocation3 + $0x108] sm:$0xff] %vm3723_vm0, %v7613_v31  ;;  %v14843_v62 = vpop.permute.xlu1 %6227 }
 0x2fe   : > { %v3294_v26 = vrot.slane %v3292_v21, 4  ;;  %v3297_v42 = vrot.slane %v3295_v53, 5  ;;  %v3301_v28 = vshll.u32 %v2731_v43, 16  ;;  %v3305_v22 = vshrl.u32 %v2731_v43, 16  ;;  %v5757_v33 = vld [vmem:[#allocation2 + $0xc4] sm:$0xf] }
 0x2ff   : > { %6251 = vrot.lane.b32.xlu1 %v11115_v57, %s13089_s15  ;;  %v4020_v24 = vsel %vm14117_vm14, %v4018_v59, %v4019_v2  ;;  %v3311_v1 = vshll.u32 %v2732_v10, 16  ;;  %v10951_v3 = vrot.slane %v3786_v41, 9  ;;  %v4023_v23 = vrot.slane %v3787_v52, 5  ;;  %v5758_v14 = vld [vmem:[#allocation2 + $0xc8] sm:$0x1] }
 0x300   : > { %v10982_v6 = vcombine.low %v4017_v34, %v4020_v24  ;;  %v3298_v9 = vor.u32 %v3297_v42, %v3294_v26  ;;  %v3303_v16 = vrot.slane %v3301_v28, 5  ;;  %v3307_v55 = vrot.slane %v3305_v22, 4  ;;  %v3789_v18 = vld [vmem:[#allocation2 + $0x84] sm:$0xe]  ;;  %v3790_v35 = vld [vmem:[#allocation2 + $0x88] sm:$0xf]  ;;  %v7615_v42 = vpop.permute.xlu0 %7614 }
 0x301   : > { %v3313_v17 = vrot.slane %v3311_v1, 5  ;;  %v4024_v29 = vsel %vm14117_vm14, %v10951_v3, %v4023_v23  ;;  %v4025_v11 = vrot.slane %v4023_v23, 4  ;;  %v4026_v36 = vrot.slane %v3788_v49, 5  ;;  %v12661_v8 = vpop.eup %12660  ;;  %v3791_v13 = vld [vmem:[#allocation2 + $0x8c] sm:$0x1]  ;;  %v8344_v49 = vld [vmem:[#allocation3 + $0x140] sm:$0xff] }
 0x302   : > { %4312 = vst.msk [vmem:[#allocation3 + $0x170] sm:$0xff] %vm2631_vm15, %v10982_v6  ;;  %v3299_v50 = vrot.slane %v3298_v9, 4  ;;  %v3308_v48 = vor.u32 %v3307_v55, %v3303_v16  ;;  %v11084_v44 = vrot.slane %v5756_v39, 9  ;;  %v6010_v41 = vrot.slane %v5757_v33, 5  ;;  %v6685_v21 = vld [vmem:[#allocation2 + $0xcc] sm:$0xf] }
 0x303   : > { %v1179_v2 = vadd.f32 1.0, %v12661_v8  ;;  %4664 = vst.msk [vmem:[#allocation3 + $0x170] sm:$0xff] %vm3723_vm0, %v14545_v61  ;;  %v4027_v43 = vsel %vm14117_vm14, %v4025_v11, %v4026_v36  ;;  %v6013_v46 = vrot.slane %v5758_v14, 5  ;;  %v10952_v10 = vrot.slane %v3789_v18, 9  ;;  %v8345_v53 = vld [vmem:[#allocation3 + $0x148] sm:$0xff]  ;;  %v12353_v26 = vld [vmem:[#allocation2 + $0x6c] sm:$0xff]   ;;  %v14865_v8 = vpop.permute.xlu1 %6229 }
 0x304   : > { %v3304_v52 = vsel %vm13514_vm8, %v3299_v50, %v3303_v16  ;;  %v3309_v57 = vrot.slane %v3308_v48, 4  ;;  %v10983_v34 = vcombine.low %v4024_v29, %v4027_v43  ;;  %v6011_v59 = vsel %vm14117_vm14, %v11084_v44, %v6010_v41  ;;  %8823 = vmatprep.mubr.bf16.mxu1 %v8345_v53  ;;  %v6686_v23 = vld [vmem:[#allocation2 + $0xd0] sm:$0xf]  ;;  %6615 = vst.msk [vmem:[#allocation3 + $0x130] sm:$0xff] %vm2631_vm15, %v12353_v26  ;;  %v6687_v14 = vld [vmem:[#allocation2 + $0xd4] sm:$0x1] }
 0x305   : > { %v12663_v61 = vpop.eup %12662  ;;  %12668 = vrcp.f32 %v1179_v2  ;;  %v6012_v28 = vrot.slane %v6010_v41, 4  ;;  %v4030_v22 = vrot.slane %v3790_v35, 5  ;;  %v4033_v39 = vrot.slane %v3791_v13, 5  ;;  %8824 = vmatmul.mubr.bf16.gmra.mrb[32].mxu1 %v8344_v49  ;;  %v374_v18 = vld [vmem:[#allocation2 + $0x198] sm:$0x1]  ;;  %7703 = vst.msk [vmem:[#allocation3 + $0x130] sm:$0xff] %vm3723_vm0, %v7615_v42 }
 0x306   : > { %v12665_v24 = vpop.eup %12664  ;;  %v1309_v1 = vmul.f32 %v12663_v61, %v14750_v5  ;;  %v3314_v3 = vsel %vm13514_vm8, %v3309_v57, %v3313_v17  ;;  %4313 = vst.msk [vmem:[#allocation3 + $0x198] sm:$0xff] %vm2631_vm15, %v10983_v34  ;;  %v7097_v33 = vshrl.u32 %v6685_v21, 16  ;;  %v7100_v31 = vshll.u32 %v6685_v21, 16  ;;  %v2733_v35 = vld [vmem:[#allocation2 + $0x12c] sm:$0xf]  ;;  %v8349_v26 = vld [vmem:[#allocation3 + $0x168] sm:$0xff] }
 0x307   : > { %v12667_v6 = vpop.eup %12666  ;;  %v1182_v9 = vadd.f32 1.0, %v12665_v24  ;;  %v10931_v16 = vcombine.low %v3304_v52, %v3314_v3  ;;  %4665 = vst.msk [vmem:[#allocation3 + $0x198] sm:$0xff] %vm3723_vm0, %v14574_v4  ;;  %v6014_v55 = vsel %vm14117_vm14, %v6012_v28, %v6013_v46  ;;  %v4031_v5 = vsel %vm14117_vm14, %v10952_v10, %v4030_v22  ;;  %v2734_v53 = vld [vmem:[#allocation2 + $0x130] sm:$0xf]  ;;  %v2735_v49 = vld [vmem:[#allocation2 + $0x134] sm:$0x1] }
 0x308   : > { %v11497_v17 = vpack.c.bf16 %v1309_v1, %v1309_v1  ;;  %v1180_v29 = vadd.f32 1.0, %v12667_v6  ;;  %v11116_v11 = vcombine.low %v6011_v59, %v6014_v55  ;;  %v4032_v36 = vrot.slane %v4030_v22, 4  ;;  %v12354_v42 = vld [vmem:[#allocation2 + $0x78] sm:$0xff]   ;;  %v2354_v61 = vld [vmem:[#allocation2 + $0x180] sm:$0xf] }
 0x309   : > { %12670 = vrcp.f32 %v1182_v9  ;;  %3671 = vrot.lane.b32.xlu1 %v10931_v16, %s13089_s15  ;;  %v7099_v4 = vrot.slane %v7097_v33, 4  ;;  %v7102_v50 = vrot.slane %v7100_v31, 5  ;;  %v7106_v48 = vshll.u32 %v6686_v23, 16  ;;  %v14887_v33 = vpop.permute.xlu1 %6231  ;;  %6616 = vst.msk [vmem:[#allocation3 + $0x158] sm:$0xff] %vm2631_vm15, %v12354_v42  ;;  %v3794_v42 = vld [vmem:[#allocation2 + $0x98] sm:$0x1] }
 0x30a   : > { %v2003_v44 = vshrl.u32 %v11497_v17, 16  ;;  %v2006_v41 = vshll.u32 %v11497_v17, 16  ;;  %12672 = vrcp.f32 %v1180_v29  ;;  %v4034_v13 = vsel %vm14117_vm14, %v4032_v36, %v4033_v39  ;;  %v8350_v2 = vld [vmem:[#allocation3 + $0x170] sm:$0xff] }
 0x30b   : > { %v10984_v43 = vcombine.low %v4031_v5, %v4034_v13  ;;  %v7103_v46 = vor.u32 %v7102_v50, %v7099_v4  ;;  %v14870_v10 = vrot.slane %v7106_v48, 5  ;;  %v7110_v21 = vshrl.u32 %v6686_v23, 16  ;;  %8831 = vmatprep.mubr.bf16.mxu1 %v8350_v2  ;;  %v7617_v13 = vpop.permute.xlu0 %7616 }
 0x30c   : > { %v14872_v52 = vrot.slane %v2003_v44, 7  ;;  %v7116_v57 = vshll.u32 %v6687_v14, 16  ;;  %v375_v34 = vsel %vm13310_vm2, 0, %v374_v18  ;;  %v14878_v59 = vadd.f32 %v14746_v25, %v14520_v37  ;;  %v371_v14 = vld [vmem:[#allocation2 + $0x18c] sm:$0x1]  ;;  %7704 = vst.msk [vmem:[#allocation3 + $0x158] sm:$0xff] %vm3723_vm0, %v7617_v13 }
 0x30d   : > { %6253 = vrot.lane.b32.xlu1 %v11116_v11, %s13089_s15  ;;  %4314 = vst.msk [vmem:[#allocation3 + $0x1c0] sm:$0xff] %vm2631_vm15, %v10984_v43  ;;  %v7104_v28 = vrot.slane %v7103_v46, 4  ;;  %v7112_v22 = vrot.slane %v7110_v21, 4  ;;  %376 = vst [vmem:[#allocation2 + $0x198] sm:$0x1] %v375_v34  ;;  %v3316_v39 = vshrl.u32 %v2733_v35, 16  ;;  %8832 = vmatmul.mubr.bf16.gmra.mrb[36].mxu1 %v8349_v26 }
 0x30e   : > { %v3319_v24 = vshll.u32 %v2733_v35, 16  ;;  %v2008_v1 = vor.u32 %v2006_v41, %v14872_v52  ;;  %v2009_v3 = vrot.slane %v14872_v52, 4  ;;  %4666 = vst.msk [vmem:[#allocation3 + $0x1c0] sm:$0xff] %vm3723_vm0, %v14592_v56  ;;  %v7118_v37 = vrot.slane %v7116_v57, 5  ;;  %v8355_v31 = vld [vmem:[#allocation3 + $0x198] sm:$0xff] }
 0x30f   : > { %v993_v23 = vsub.f32 0.0, %v14878_v59  ;;  %v12669_v6 = vpop.eup %12668  ;;  %v7109_v9 = vsel %vm13514_vm8, %v7104_v28, %v14870_v10  ;;  %v7113_v16 = vor.u32 %v7112_v22, %v14870_v10  ;;  %v3318_v55 = vrot.slane %v3316_v39, 4  ;;  %8839 = vmatprep.mubr.bf16.mxu1 %v8355_v31  ;;  %v3793_v41 = vld [vmem:[#allocation2 + $0x94] sm:$0xf]  ;;  %v3792_v21 = vld [vmem:[#allocation2 + $0x90] sm:$0xe] }
 0x310   : > { %v3321_v5 = vrot.slane %v3319_v24, 5  ;;  %v2355_v56 = vsel %vm13562_vm10, %v2008_v1, %v2354_v61  ;;  %v1307_v18 = vmul.f32 %v12669_v6, %v14776_v47  ;;  %v3325_v29 = vshll.u32 %v2734_v53, 16  ;;  %v14903_v61 = vpop.permute.xlu1 %6233  ;;  %v8354_v28 = vld [vmem:[#allocation3 + $0x190] sm:$0xff] }
 0x311   : > { %v1119_v17 = vmul.f32 1.442695, %v993_v23  ;;  %2356 = vst [vmem:[#allocation2 + $0x180] sm:$0xf] %v2355_v56  ;;  %v7114_v11 = vrot.slane %v7113_v16, 4  ;;  %v3329_v35 = vshrl.u32 %v2734_v53, 16  ;;  %v14910_v1 = vadd.f32 %v14746_v25, %v14570_v63 }
 0x312   : > { %v3322_v36 = vor.u32 %v3321_v5, %v3318_v55  ;;  %v3335_v4 = vshll.u32 %v2735_v49, 16  ;;  %v11495_v50 = vpack.c.bf16 %v1307_v18, %v1307_v18  ;;  %v3327_v48 = vrot.slane %v3325_v29, 5  ;;  %v12325_v16 = vld [vmem:[#allocation2 + $0x138] sm:$0xff]  }
 0x313   : > { %12674 = vpow2.f32 %v1119_v17  ;;  %v372_v44 = vsel %vm13310_vm2, 0, %v371_v14  ;;  %v12671_v2 = vpop.eup %12670  ;;  %v7119_v43 = vsel %vm13514_vm8, %v7114_v11, %v7118_v37  ;;  %v3331_v46 = vrot.slane %v3329_v35, 4 }
 0x314   : > { %v3323_v47 = vrot.slane %v3322_v36, 4  ;;  %v3337_v10 = vrot.slane %v3335_v4, 5  ;;  %373 = vst [vmem:[#allocation2 + $0x18c] sm:$0x1] %v372_v44  ;;  %v12673_v53 = vpop.eup %12672  ;;  %v1986_v57 = vshrl.u32 %v11495_v50, 16  ;;  %v1989_v34 = vshll.u32 %v11495_v50, 16 }
 0x315   : > { %v1310_v49 = vmul.f32 %v12671_v2, %v14802_v54  ;;  %v11180_v26 = vcombine.low %v7109_v9, %v7119_v43  ;;  %v1308_v22 = vmul.f32 %v12673_v53, %v14818_v51  ;;  %v3332_v24 = vor.u32 %v3331_v46, %v3327_v48  ;;  %8840 = vmatmul.mubr.bf16.gmra.mrb[40].mxu1 %v8354_v28  ;;  %v8360_v37 = vld [vmem:[#allocation3 + $0x1c0] sm:$0xff]  ;;  %v472_v9 = vld [vmem:[#allocation2 + $0x1a0] sm:$0x1]  ;;  %v14921_v2 = vpop.permute.xlu1 %6235  ;;  %v2358_v43 = vld [vmem:[#allocation2 + $0x188] sm:$0x1] }
 0x316   : > { %v3328_v39 = vsel %vm13514_vm8, %v3323_v47, %v3327_v48  ;;  %v1988_v23 = vrot.slane %v1986_v57, 7  ;;  %v10953_v54 = vrot.slane %v3792_v21, 9  ;;  %v4037_v6 = vrot.slane %v3793_v41, 5  ;;  %8847 = vmatprep.mubr.bf16.mxu1 %v8360_v37  ;;  %v2347_v51 = vld [vmem:[#allocation2 + $0x174] sm:$0xf] }
 0x317   : > { %v11498_v31 = vpack.c.bf16 %v1310_v49, %v1310_v49  ;;  %7630 = vrot.lane.b32.xlu0 %v11180_v26, %s13089_s15  ;;  %v11496_v55 = vpack.c.bf16 %v1308_v22, %v1308_v22  ;;  %v3333_v5 = vrot.slane %v3332_v24, 4  ;;  %v991_v14 = vsub.f32 0.0, %v14910_v1  ;;  %v469_v50 = vld [vmem:[#allocation2 + $0x194] sm:$0x1]  ;;  %v3795_v28 = vld [vmem:[#allocation2 + $0x9c] sm:$0xe] }
 0x318   : > { %v4040_v56 = vrot.slane %v3794_v42, 5  ;;  %v1991_v18 = vor.u32 %v1989_v34, %v1988_v23  ;;  %v1992_v63 = vrot.slane %v1988_v23, 4  ;;  %v4038_v13 = vsel %vm14117_vm14, %v10953_v54, %v4037_v6  ;;  %v2351_v34 = vld [vmem:[#allocation2 + $0x17c] sm:$0x1]  ;;  %v5759_v42 = vld [vmem:[#allocation2 + $0xe4] sm:$0xe] }
 0x319   : > { %v2011_v17 = vshrl.u32 %v11498_v31, 16  ;;  %v2014_v29 = vshll.u32 %v11498_v31, 16  ;;  %v1994_v11 = vshrl.u32 %v11496_v55, 16  ;;  %v1997_v36 = vshll.u32 %v11496_v55, 16  ;;  %v3796_v22 = vld [vmem:[#allocation2 + $0xa0] sm:$0xf] }
 0x31a   : > { %v3338_v35 = vsel %vm13514_vm8, %v3333_v5, %v3337_v10  ;;  %v1115_v4 = vmul.f32 1.442695, %v991_v14  ;;  %v2348_v48 = vsel %vm13562_vm10, %v1991_v18, %v2347_v51  ;;  %v4039_v46 = vrot.slane %v4037_v6, 4  ;;  %v5760_v54 = vld [vmem:[#allocation2 + $0xe8] sm:$0xf] }
 0x31b   : > { %v2013_v44 = vrot.slane %v2011_v17, 7  ;;  %v10932_v41 = vcombine.low %v3328_v39, %v3338_v35  ;;  %4605 = vrot.lane.b32.xlu0 %v12325_v16, %s13089_s15  ;;  %2349 = vst [vmem:[#allocation2 + $0x174] sm:$0xf] %v2348_v48  ;;  %v1996_v47 = vrot.slane %v1994_v11, 7  ;;  %v473_v10 = vsel %vm13378_vm4, 0, %v472_v9  ;;  %v14952_v17 = vpop.permute.xlu1 %6237 }
 0x31c   : > { %12676 = vpow2.f32 %v1115_v4  ;;  %474 = vst [vmem:[#allocation2 + $0x1a0] sm:$0x1] %v473_v10  ;;  %v14928_v49 = vadd.f32 %v14746_v25, %v14603_v38  ;;  %v470_v26 = vsel %vm13378_vm4, 0, %v469_v50  ;;  %v3797_v39 = vld [vmem:[#allocation2 + $0xa4] sm:$0x1]  ;;  %v4041_v31 = vsel %vm14117_vm14, %v4039_v46, %v4040_v56 }
 0x31d   : > { %v12675_v21 = vpop.eup %12674  ;;  %v2016_v53 = vor.u32 %v2014_v29, %v2013_v44  ;;  %v2018_v57 = vrot.slane %v2013_v44, 4  ;;  %3673 = vrot.lane.b32.xlu1 %v10932_v41, %s13089_s15  ;;  %v1999_v24 = vor.u32 %v1997_v36, %v1996_v47  ;;  %v2001_v37 = vrot.slane %v1996_v47, 4  ;;  %471 = vst [vmem:[#allocation2 + $0x194] sm:$0x1] %v470_v26  ;;  %v5761_v6 = vld [vmem:[#allocation2 + $0xec] sm:$0x1] }
 0x31e   : > { %v1185_v23 = vadd.f32 1.0, %v12675_v21  ;;  %v10985_v9 = vcombine.low %v4038_v13, %v4041_v31  ;;  %v994_v16 = vsub.f32 0.0, %v14928_v49  ;;  %v14948_v52 = vadd.f32 %v14746_v25, %v14623_v58  ;;  %v6689_v36 = vld [vmem:[#allocation2 + $0xf4] sm:$0xf]  ;;  %v6690_v13 = vld [vmem:[#allocation2 + $0xf8] sm:$0x1] }
 0x31f   : > { %v2017_v38 = vsel %vm13569_vm11, %v2009_v3, %v2016_v53  ;;  %v2359_v45 = vsel %vm13310_vm2, %v2018_v57, %v2358_v43  ;;  %v2000_v51 = vsel %vm13569_vm11, %v1992_v63, %v1999_v24  ;;  %v2352_v55 = vsel %vm13310_vm2, %v2001_v37, %v2351_v34  ;;  %v6688_v3 = vld [vmem:[#allocation2 + $0xf0] sm:$0xf]  ;;  %v14954_v63 = vpop.permute.xlu0 %4591  ;;  %v2736_v21 = vld [vmem:[#allocation2 + $0x138] sm:$0xf]  ;;  %v8359_v53 = vld [vmem:[#allocation3 + $0x1b8] sm:$0xff] }
 0x320   : > { %2357 = vst.msk [vmem:[#allocation2 + $0x184] sm:$0xf] %vm262_vm5, %v2017_v38  ;;  %2360 = vst [vmem:[#allocation2 + $0x188] sm:$0x1] %v2359_v45  ;;  %12678 = vrcp.f32 %v1185_v23  ;;  %v1121_v5 = vmul.f32 1.442695, %v994_v16  ;;  %8848 = vmatmul.mubr.bf16.gmra.mrb[44].mxu1 %v8359_v53 }
 0x321   : > { %2350 = vst.msk [vmem:[#allocation2 + $0x178] sm:$0xf] %vm262_vm5, %v2000_v51  ;;  %2353 = vst [vmem:[#allocation2 + $0x17c] sm:$0x1] %v2352_v55  ;;  %v11085_v14 = vrot.slane %v5759_v42, 9  ;;  %v6017_v56 = vrot.slane %v5760_v54, 5  ;;  %v14967_v54 = vpop.permute.xlu1 %6239 }
 0x322   : > { %4315 = vst.msk [vmem:[#allocation3 + $0x1e8] sm:$0xff] %vm2631_vm15, %v10985_v9  ;;  %v6020_v18 = vrot.slane %v5761_v6, 5  ;;  %v992_v58 = vsub.f32 0.0, %v14948_v52  ;;  %v10954_v25 = vrot.slane %v3795_v28, 9  ;;  %v4044_v29 = vrot.slane %v3796_v22, 5  ;;  %v12356_v22 = vld [vmem:[#allocation2 + $0x84] sm:$0xff]  }
 0x323   : > { %4667 = vst.msk [vmem:[#allocation3 + $0x1e8] sm:$0xff] %vm3723_vm0, %v14612_v19  ;;  %v4047_v11 = vrot.slane %v3797_v39, 5  ;;  %12680 = vpow2.f32 %v1121_v5  ;;  %v6018_v35 = vsel %vm14117_vm14, %v11085_v14, %v6017_v56  ;;  %v6019_v4 = vrot.slane %v6017_v56, 4  ;;  %v2737_v28 = vld [vmem:[#allocation2 + $0x13c] sm:$0xf]  ;;  %v7619_v6 = vpop.permute.xlu0 %7618 }
 0x324   : > { %v7121_v50 = vshrl.u32 %v6688_v3, 16  ;;  %v1117_v48 = vmul.f32 1.442695, %v992_v58  ;;  %v4045_v44 = vsel %vm14117_vm14, %v10954_v25, %v4044_v29  ;;  %v4046_v41 = vrot.slane %v4044_v29, 4  ;;  %v3798_v31 = vld [vmem:[#allocation2 + $0xa8] sm:$0xe] }
 0x325   : > { %v7124_v43 = vshll.u32 %v6688_v3, 16  ;;  %v6021_v19 = vsel %vm14117_vm14, %v6019_v4, %v6020_v18  ;;  %v7130_v46 = vshll.u32 %v6689_v36, 16  ;;  %v7134_v10 = vshrl.u32 %v6689_v36, 16  ;;  %6617 = vst.msk [vmem:[#allocation3 + $0x180] sm:$0xff] %vm2631_vm15, %v12356_v22  ;;  %v2738_v55 = vld [vmem:[#allocation2 + $0x140] sm:$0x1]  ;;  %v3660_v53 = vpop.permute.xlu1 %3659 }
 0x326   : > { %v7123_v47 = vrot.slane %v7121_v50, 4  ;;  %v12677_v57 = vpop.eup %12676  ;;  %12682 = vpow2.f32 %v1117_v48  ;;  %v11117_v34 = vcombine.low %v6018_v35, %v6021_v19  ;;  %v4048_v26 = vsel %vm14117_vm14, %v4046_v41, %v4047_v11  ;;  %v3799_v14 = vld [vmem:[#allocation2 + $0xac] sm:$0xf]  ;;  %7705 = vst.msk [vmem:[#allocation3 + $0x180] sm:$0xff] %vm3723_vm0, %v7619_v6  ;;  %v12357_v48 = vld [vmem:[#allocation2 + $0xd8] sm:$0xff]  }
 0x327   : > { %v7126_v42 = vrot.slane %v7124_v43, 5  ;;  %v1183_v39 = vadd.f32 1.0, %v12677_v57  ;;  %v10986_v24 = vcombine.low %v4045_v44, %v4048_v26  ;;  %v7132_v37 = vrot.slane %v7130_v46, 5  ;;  %2648 = vst.msk [vmem:[#allocation3 + $0x280] sm:$0xff] %vm2631_vm15, %v12357_v48  ;;  %v12359_v57 = vld [vmem:[#allocation7 + $0x118] sm:$0xff]  }
 0x328   : > { %v7136_v23 = vrot.slane %v7134_v10, 4  ;;  %6255 = vrot.lane.b32.xlu1 %v11117_v34, %s13089_s15  ;;  %v7140_v45 = vshll.u32 %v6690_v13, 16  ;;  %v3340_v9 = vshrl.u32 %v2736_v21, 16  ;;  %v3343_v16 = vshll.u32 %v2736_v21, 16  ;;  %v3800_v10 = vld [vmem:[#allocation2 + $0xb0] sm:$0x1]  ;;  %12119 = vmatprep.subr.bf16.mxu1 %v12359_v57 }
 0x329   : > { %v7127_v38 = vor.u32 %v7126_v42, %v7123_v47  ;;  %12684 = vrcp.f32 %v1183_v39  ;;  %4316 = vst.msk [vmem:[#allocation3 + $0x210] sm:$0xff] %vm2631_vm15, %v10986_v24  ;;  %v3349_v3 = vshll.u32 %v2737_v28, 16  ;;  %v3353_v5 = vshrl.u32 %v2737_v28, 16  ;;  %v5763_v22 = vld [vmem:[#allocation2 + $0xf4] sm:$0xf]  ;;  %12120 = vmatpush3.bf16.msra.mxu1 %v12359_v57 }
 0x32a   : > { %v7137_v51 = vor.u32 %v7136_v23, %v7132_v37  ;;  %v12679_v56 = vpop.eup %12678  ;;  %4668 = vst.msk [vmem:[#allocation3 + $0x210] sm:$0xff] %vm3723_vm0, %v14634_v0  ;;  %v7142_v58 = vrot.slane %v7140_v45, 5  ;;  %v3342_v25 = vrot.slane %v3340_v9, 4  ;;  %v3345_v29 = vrot.slane %v3343_v16, 5  ;;  %v8365_v11 = vld [vmem:[#allocation3 + $0x1e8] sm:$0xff]  ;;  %3740 = vst.msk [vmem:[#allocation3 + $0x280] sm:$0xff] %vm3723_vm0, %v3660_v53 }
 0x32b   : > { %v7128_v18 = vrot.slane %v7127_v38, 4  ;;  %v1313_v36 = vmul.f32 %v12679_v56, %v14878_v59  ;;  %v3351_v4 = vrot.slane %v3349_v3, 5  ;;  %v3355_v50 = vrot.slane %v3353_v5, 4  ;;  %8855 = vmatprep.mubr.bf16.mxu1 %v8365_v11  ;;  %v5762_v59 = vld [vmem:[#allocation2 + $0xf0] sm:$0xe]  ;;  %v12330_v16 = vld [vmem:[#allocation2 + $0x144] sm:$0xff]  }
 0x32c   : > { %v7138_v35 = vrot.slane %v7137_v51, 4  ;;  %v3346_v41 = vor.u32 %v3345_v29, %v3342_v25  ;;  %v3359_v13 = vshll.u32 %v2738_v55, 16  ;;  %v10955_v43 = vrot.slane %v3798_v31, 9  ;;  %v5764_v31 = vld [vmem:[#allocation2 + $0xf8] sm:$0x1] }
 0x32d   : > { %v7133_v44 = vsel %vm13514_vm8, %v7128_v18, %v7132_v37  ;;  %v12681_v19 = vpop.eup %12680  ;;  %v11501_v0 = vpack.c.bf16 %v1313_v36, %v1313_v36  ;;  %v3356_v46 = vor.u32 %v3355_v50, %v3351_v4  ;;  %v4051_v21 = vrot.slane %v3799_v14, 5  ;;  %v3801_v51 = vld [vmem:[#allocation2 + $0xb4] sm:$0xe]  ;;  %v3802_v55 = vld [vmem:[#allocation2 + $0xb8] sm:$0xf] }
 0x32e   : > { %v7143_v47 = vsel %vm13514_vm8, %v7138_v35, %v7142_v58  ;;  %v1186_v34 = vadd.f32 1.0, %v12681_v19  ;;  %v3347_v42 = vrot.slane %v3346_v41, 4  ;;  %v3361_v28 = vrot.slane %v3359_v13, 5  ;;  %v3803_v18 = vld [vmem:[#allocation2 + $0xbc] sm:$0x1]  ;;  %v14991_v58 = vpop.permute.xlu0 %4593 }
 0x32f   : > { %v11181_v26 = vcombine.low %v7133_v44, %v7143_v47  ;;  %v2037_v39 = vshrl.u32 %v11501_v0, 16  ;;  %v2040_v24 = vshll.u32 %v11501_v0, 16  ;;  %v3357_v37 = vrot.slane %v3356_v46, 4  ;;  %v2368_v25 = vld [vmem:[#allocation2 + $0x198] sm:$0xf] }
 0x330   : > { %v4052_v23 = vsel %vm14117_vm14, %v10955_v43, %v4051_v21  ;;  %v12683_v6 = vpop.eup %12682  ;;  %12686 = vrcp.f32 %v1186_v34  ;;  %v3352_v38 = vsel %vm13514_vm8, %v3347_v42, %v3351_v4  ;;  %v4053_v45 = vrot.slane %v4051_v21, 4  ;;  %v6691_v4 = vld [vmem:[#allocation2 + $0xfc] sm:$0xf]  ;;  %v6692_v13 = vld [vmem:[#allocation2 + $0x100] sm:$0xf]  ;;  %v14997_v43 = vpop.permute.xlu1 %6241 }
 0x331   : > { %7632 = vrot.lane.b32.xlu0 %v11181_v26, %s13089_s15  ;;  %v4054_v9 = vrot.slane %v3800_v10, 5  ;;  %v14987_v3 = vrot.slane %v2037_v39, 7  ;;  %v1184_v5 = vadd.f32 1.0, %v12683_v6  ;;  %v3362_v14 = vsel %vm13514_vm8, %v3357_v37, %v3361_v28  ;;  %v8364_v10 = vld [vmem:[#allocation3 + $0x1e0] sm:$0xff]  ;;  %v6693_v57 = vld [vmem:[#allocation2 + $0x104] sm:$0x1] }
 0x332   : > { %v11086_v56 = vrot.slane %v5762_v59, 9  ;;  %v10933_v29 = vcombine.low %v3352_v38, %v3362_v14  ;;  %v6024_v36 = vrot.slane %v5763_v22, 5  ;;  %v6027_v35 = vrot.slane %v5764_v31, 5  ;;  %8856 = vmatmul.mubr.bf16.gmra.mrb[48].mxu1 %v8364_v10  ;;  %v2739_v39 = vld [vmem:[#allocation2 + $0x144] sm:$0xf]  ;;  %v7621_v38 = vpop.permute.xlu0 %7620 }
 0x333   : > { %v4055_v11 = vsel %vm14117_vm14, %v4053_v45, %v4054_v9  ;;  %v12685_v50 = vpop.eup %12684  ;;  %v2042_v48 = vor.u32 %v2040_v24, %v14987_v3  ;;  %v2043_v44 = vrot.slane %v14987_v3, 4  ;;  %12688 = vrcp.f32 %v1184_v5  ;;  %v12360_v24 = vld [vmem:[#allocation2 + $0x90] sm:$0xff]   ;;  %v12361_v45 = vld [vmem:[#allocation2 + $0xe4] sm:$0xff]  }
 0x334   : > { %v10987_v41 = vcombine.low %v4052_v23, %v4055_v11  ;;  %v1311_v19 = vmul.f32 %v12685_v50, %v14910_v1  ;;  %3675 = vrot.lane.b32.xlu1 %v10933_v29, %s13089_s15  ;;  %v6025_v0 = vsel %vm14117_vm14, %v11086_v56, %v6024_v36  ;;  %v6026_v47 = vrot.slane %v6024_v36, 4  ;;  %v8370_v1 = vld [vmem:[#allocation3 + $0x210] sm:$0xff]  ;;  %6618 = vst.msk [vmem:[#allocation3 + $0x1a8] sm:$0xff] %vm2631_vm15, %v12360_v24  ;;  %v2361_v50 = vld [vmem:[#allocation2 + $0x18c] sm:$0xf] }
 0x335   : > { %4607 = vrot.lane.b32.xlu0 %v12330_v16, %s13089_s15  ;;  %v10956_v46 = vrot.slane %v3801_v51, 9  ;;  %v2369_v21 = vsel %vm13562_vm10, %v2042_v48, %v2368_v25  ;;  %v4058_v59 = vrot.slane %v3802_v55, 5  ;;  %v4061_v53 = vrot.slane %v3803_v18, 5  ;;  %8863 = vmatprep.mubr.bf16.mxu1 %v8370_v1  ;;  %7706 = vst.msk [vmem:[#allocation3 + $0x1a8] sm:$0xff] %vm3723_vm0, %v7621_v38  ;;  %v3662_v18 = vpop.permute.xlu1 %3661 }
 0x336   : > { %4317 = vst.msk [vmem:[#allocation3 + $0x238] sm:$0xff] %vm2631_vm15, %v10987_v41  ;;  %v7145_v34 = vshrl.u32 %v6691_v4, 16  ;;  %2370 = vst [vmem:[#allocation2 + $0x198] sm:$0xf] %v2369_v21  ;;  %v11499_v26 = vpack.c.bf16 %v1311_v19, %v1311_v19  ;;  %v6028_v42 = vsel %vm14117_vm14, %v6026_v47, %v6027_v35  ;;  %v7148_v28 = vshll.u32 %v6691_v4, 16 }
 0x337   : > { %4669 = vst.msk [vmem:[#allocation3 + $0x238] sm:$0xff] %vm3723_vm0, %v14658_v7  ;;  %v7154_v22 = vshll.u32 %v6692_v13, 16  ;;  %v11118_v37 = vcombine.low %v6025_v0, %v6028_v42  ;;  %v4059_v23 = vsel %vm14117_vm14, %v10956_v46, %v4058_v59  ;;  %v4060_v31 = vrot.slane %v4058_v59, 4  ;;  %v2740_v35 = vld [vmem:[#allocation2 + $0x148] sm:$0xf] }
 0x338   : > { %v7147_v6 = vrot.slane %v7145_v34, 4  ;;  %v2020_v9 = vshrl.u32 %v11499_v26, 16  ;;  %v2023_v16 = vshll.u32 %v11499_v26, 16  ;;  %v7150_v51 = vrot.slane %v7148_v28, 5  ;;  %2649 = vst.msk [vmem:[#allocation3 + $0x2a8] sm:$0xff] %vm2631_vm15, %v12361_v45 }
 0x339   : > { %v7156_v7 = vrot.slane %v7154_v22, 5  ;;  %6257 = vrot.lane.b32.xlu1 %v11118_v37, %s13089_s15  ;;  %v4062_v55 = vsel %vm14117_vm14, %v4060_v31, %v4061_v53  ;;  %v7158_v5 = vshrl.u32 %v6692_v13, 16  ;;  %v7164_v14 = vshll.u32 %v6693_v57, 16  ;;  %3741 = vst.msk [vmem:[#allocation3 + $0x2a8] sm:$0xff] %vm3723_vm0, %v3662_v18  ;;  %v2741_v19 = vld [vmem:[#allocation2 + $0x14c] sm:$0x1] }
 0x33a   : > { %v3364_v56 = vshrl.u32 %v2739_v39, 16  ;;  %v12687_v25 = vpop.eup %12686  ;;  %v15019_v29 = vrot.slane %v2020_v9, 7  ;;  %v10988_v11 = vcombine.low %v4059_v23, %v4062_v55  ;;  %v7151_v36 = vor.u32 %v7150_v51, %v7147_v6  ;;  %v5765_v59 = vld [vmem:[#allocation2 + $0xfc] sm:$0xe]  ;;  %v5766_v26 = vld [vmem:[#allocation2 + $0x100] sm:$0xf] }
 0x33b   : > { %v3367_v4 = vshll.u32 %v2739_v39, 16  ;;  %v1314_v48 = vmul.f32 %v12687_v25, %v14928_v49  ;;  %v7160_v41 = vrot.slane %v7158_v5, 4  ;;  %v7166_v13 = vrot.slane %v7164_v14, 5  ;;  %v5767_v6 = vld [vmem:[#allocation2 + $0x104] sm:$0x1] }
 0x33c   : > { %v3366_v0 = vrot.slane %v3364_v56, 4  ;;  %v2025_v47 = vor.u32 %v2023_v16, %v15019_v29  ;;  %v2026_v46 = vrot.slane %v15019_v29, 4  ;;  %4318 = vst.msk [vmem:[#allocation3 + $0x260] sm:$0xff] %vm2631_vm15, %v10988_v11  ;;  %v7152_v10 = vrot.slane %v7151_v36, 4  ;;  %v15033_v16 = vpop.permute.xlu0 %4595  ;;  %v4687_v25 = vld [vmem:[#allocation2 + $0xc] sm:$0xf] }
 0x33d   : > { %v3369_v21 = vrot.slane %v3367_v4, 5  ;;  %v12689_v53 = vpop.eup %12688  ;;  %v11502_v57 = vpack.c.bf16 %v1314_v48, %v1314_v48  ;;  %4670 = vst.msk [vmem:[#allocation3 + $0x260] sm:$0xff] %vm3723_vm0, %v14680_v40  ;;  %v7161_v34 = vor.u32 %v7160_v41, %v7156_v7  ;;  %v3373_v49 = vshll.u32 %v2740_v35, 16  ;;  %v15039_v48 = vpop.permute.xlu1 %6243  ;;  %v8369_v41 = vld [vmem:[#allocation3 + $0x208] sm:$0xff] }
 0x33e   : > { %v3377_v1 = vshrl.u32 %v2740_v35, 16  ;;  %v2362_v42 = vsel %vm13562_vm10, %v2025_v47, %v2361_v50  ;;  %v1312_v28 = vmul.f32 %v12689_v53, %v14948_v52  ;;  %v7157_v22 = vsel %vm13514_vm8, %v7152_v10, %v7156_v7  ;;  %v2372_v7 = vld [vmem:[#allocation2 + $0x1a0] sm:$0x1]  ;;  %v4688_v50 = vld [vmem:[#allocation2 + $0x10] sm:$0xf]  ;;  %8864 = vmatmul.mubr.bf16.gmra.mrb[52].mxu1 %v8369_v41 }
 0x33f   : > { %v3370_v39 = vor.u32 %v3369_v21, %v3366_v0  ;;  %2363 = vst [vmem:[#allocation2 + $0x18c] sm:$0xf] %v2362_v42  ;;  %v2045_v24 = vshrl.u32 %v11502_v57, 16  ;;  %v2048_v37 = vshll.u32 %v11502_v57, 16  ;;  %v7162_v23 = vrot.slane %v7161_v34, 4  ;;  %v8375_v21 = vld [vmem:[#allocation3 + $0x238] sm:$0xff] }
 0x340   : > { %v3375_v31 = vrot.slane %v3373_v49, 5  ;;  %v11500_v40 = vpack.c.bf16 %v1312_v28, %v1312_v28  ;;  %v3379_v45 = vrot.slane %v3377_v1, 4  ;;  %v3383_v9 = vshll.u32 %v2741_v19, 16  ;;  %v2365_v57 = vld [vmem:[#allocation2 + $0x194] sm:$0x1]  ;;  %8871 = vmatprep.mubr.bf16.mxu1 %v8375_v21 }
 0x341   : > { %v3371_v38 = vrot.slane %v3370_v39, 4  ;;  %v2047_v12 = vrot.slane %v2045_v24, 7  ;;  %v7167_v52 = vsel %vm13514_vm8, %v7162_v23, %v7166_v13  ;;  %v11087_v51 = vrot.slane %v5765_v59, 9  ;;  %v12336_v13 = vld [vmem:[#allocation2 + $0x150] sm:$0xff]   ;;  %v7623_v39 = vpop.permute.xlu0 %7622  ;;  %v3664_v30 = vpop.permute.xlu1 %3663 }
 0x342   : > { %v6031_v55 = vrot.slane %v5766_v26, 5  ;;  %v2028_v5 = vshrl.u32 %v11500_v40, 16  ;;  %v2031_v14 = vshll.u32 %v11500_v40, 16  ;;  %v11182_v56 = vcombine.low %v7157_v22, %v7167_v52  ;;  %v4689_v49 = vld [vmem:[#allocation2 + $0x14] sm:$0x1] }
 0x343   : > { %v3376_v18 = vsel %vm13514_vm8, %v3371_v38, %v3375_v31  ;;  %v2050_v11 = vor.u32 %v2048_v37, %v2047_v12  ;;  %v2052_v36 = vrot.slane %v2047_v12, 4  ;;  %v3380_v35 = vor.u32 %v3379_v45, %v3375_v31  ;;  %v6694_v22 = vld [vmem:[#allocation2 + $0x108] sm:$0xf]  ;;  %v6695_v31 = vld [vmem:[#allocation2 + $0x10c] sm:$0xf]  ;;  %v12364_v40 = vld [vmem:[#allocation2 + $0xf0] sm:$0xff]  }
 0x344   : > { %v3385_v4 = vrot.slane %v3383_v9, 5  ;;  %v2030_v19 = vrot.slane %v2028_v5, 7  ;;  %7634 = vrot.lane.b32.xlu0 %v11182_v56, %s13089_s15  ;;  %v15044_v0 = vsel %vm14117_vm14, %v11087_v51, %v6031_v55  ;;  %v6033_v47 = vrot.slane %v6031_v55, 4  ;;  %v6696_v52 = vld [vmem:[#allocation2 + $0x110] sm:$0x1]  ;;  %2650 = vst.msk [vmem:[#allocation3 + $0x2d0] sm:$0xff] %vm2631_vm15, %v12364_v40 }
 0x345   : > { %v6034_v10 = vrot.slane %v5767_v6, 5  ;;  %v2051_v59 = vsel %vm13569_vm11, %v2043_v44, %v2050_v11  ;;  %v2373_v53 = vsel %vm13310_vm2, %v2052_v36, %v2372_v7  ;;  %v3381_v34 = vrot.slane %v3380_v35, 4  ;;  %v12363_v6 = vld [vmem:[#allocation2 + $0x9c] sm:$0xff]   ;;  %v2742_v51 = vld [vmem:[#allocation2 + $0x150] sm:$0xf]  ;;  %3742 = vst.msk [vmem:[#allocation3 + $0x2d0] sm:$0xff] %vm3723_vm0, %v3664_v30 }
 0x346   : > { %v4784_v1 = vshrl.u32 %v4687_v25, 16  ;;  %2371 = vst.msk [vmem:[#allocation2 + $0x19c] sm:$0xf] %vm262_vm5, %v2051_v59  ;;  %2374 = vst [vmem:[#allocation2 + $0x1a0] sm:$0x1] %v2373_v53  ;;  %v2033_v26 = vor.u32 %v2031_v14, %v2030_v19  ;;  %v2035_v42 = vrot.slane %v2030_v19, 4 }
 0x347   : > { %v6035_v28 = vsel %vm14117_vm14, %v6033_v47, %v6034_v10  ;;  %v4787_v3 = vshll.u32 %v4687_v25, 16  ;;  %v3386_v44 = vsel %vm13514_vm8, %v3381_v34, %v3385_v4  ;;  %v4793_v23 = vshll.u32 %v4688_v50, 16  ;;  %6619 = vst.msk [vmem:[#allocation3 + $0x1d0] sm:$0xff] %vm2631_vm15, %v12363_v6  ;;  %v2743_v35 = vld [vmem:[#allocation2 + $0x154] sm:$0xf]  ;;  %v12365_v30 = vld [vmem:[#allocation2 + $0xa8] sm:$0xff]  }
 0x348   : > { %v11119_v24 = vcombine.low %v15044_v0, %v6035_v28  ;;  %v4786_v37 = vrot.slane %v4784_v1, 4  ;;  %v2034_v38 = vsel %vm13569_vm11, %v2026_v46, %v2033_v26  ;;  %v2366_v45 = vsel %vm13310_vm2, %v2035_v42, %v2365_v57  ;;  %4609 = vrot.lane.b32.xlu0 %v12336_v13, %s13089_s15  ;;  %7707 = vst.msk [vmem:[#allocation3 + $0x1d0] sm:$0xff] %vm3723_vm0, %v7623_v39  ;;  %v2744_v13 = vld [vmem:[#allocation2 + $0x158] sm:$0x1]  ;;  %v15071_v0 = vpop.permute.xlu0 %4597  ;;  %v8374_v26 = vld [vmem:[#allocation3 + $0x230] sm:$0xff]  ;;  %v15076_v39 = vpop.permute.xlu1 %6245 }
 0x349   : > { %v10934_v9 = vcombine.low %v3376_v18, %v3386_v44  ;;  %v4789_v12 = vrot.slane %v4787_v3, 5  ;;  %2364 = vst.msk [vmem:[#allocation2 + $0x190] sm:$0xf] %vm262_vm5, %v2034_v38  ;;  %2367 = vst [vmem:[#allocation2 + $0x194] sm:$0x1] %v2366_v45  ;;  %v4795_v55 = vrot.slane %v4793_v23, 5  ;;  %8872 = vmatmul.mubr.bf16.gmra.mrb[56].mxu1 %v8374_v26 }
 0x34a   : > { %v4797_v7 = vshrl.u32 %v4688_v50, 16  ;;  %v4803_v5 = vshll.u32 %v4689_v49, 16  ;;  %v7169_v14 = vshrl.u32 %v6694_v22, 16  ;;  %v7172_v29 = vshll.u32 %v6694_v22, 16  ;;  %v4690_v1 = vld [vmem:[#allocation2 + $0x18] sm:$0xf] }
 0x34b   : > { %3677 = vrot.lane.b32.xlu1 %v10934_v9, %s13089_s15  ;;  %v4790_v15 = vor.u32 %v4789_v12, %v4786_v37  ;;  %v7178_v46 = vshll.u32 %v6695_v31, 16  ;;  %v7182_v56 = vshrl.u32 %v6695_v31, 16  ;;  %v7188_v36 = vshll.u32 %v6696_v52, 16  ;;  %v8380_v44 = vld [vmem:[#allocation3 + $0x260] sm:$0xff]  ;;  %v4691_v45 = vld [vmem:[#allocation2 + $0x1c] sm:$0xf] }
 0x34c   : > { %v4799_v18 = vrot.slane %v4797_v7, 4  ;;  %v4805_v25 = vrot.slane %v4803_v5, 5  ;;  %v7171_v11 = vrot.slane %v7169_v14, 4  ;;  %v7174_v50 = vrot.slane %v7172_v29, 5  ;;  %8879 = vmatprep.mubr.bf16.mxu1 %v8380_v44  ;;  %v4692_v9 = vld [vmem:[#allocation2 + $0x20] sm:$0x1] }
 0x34d   : > { %v4791_v4 = vrot.slane %v4790_v15, 4  ;;  %v7180_v41 = vrot.slane %v7178_v46, 5  ;;  %v7184_v19 = vrot.slane %v7182_v56, 4  ;;  %v7190_v10 = vrot.slane %v7188_v36, 5  ;;  %v5768_v5 = vld [vmem:[#allocation2 + $0x108] sm:$0xe]  ;;  %v7625_v15 = vpop.permute.xlu0 %7624 }
 0x34e   : > { %v4800_v47 = vor.u32 %v4799_v18, %v4795_v55  ;;  %v3388_v21 = vshrl.u32 %v2742_v51, 16  ;;  %v3391_v59 = vshll.u32 %v2742_v51, 16  ;;  %v7175_v57 = vor.u32 %v7174_v50, %v7171_v11  ;;  %v5769_v14 = vld [vmem:[#allocation2 + $0x10c] sm:$0xf]  ;;  %v5770_v50 = vld [vmem:[#allocation2 + $0x110] sm:$0x1] }
 0x34f   : > { %6259 = vrot.lane.b32.xlu1 %v11119_v24, %s13089_s15  ;;  %v4796_v53 = vsel %vm13514_vm8, %v4791_v4, %v4795_v55  ;;  %v7185_v34 = vor.u32 %v7184_v19, %v7180_v41  ;;  %v3397_v49 = vshll.u32 %v2743_v35, 16  ;;  %v3401_v22 = vshrl.u32 %v2743_v35, 16  ;;  %6620 = vst.msk [vmem:[#allocation3 + $0x1f8] sm:$0xff] %vm2631_vm15, %v12365_v30  ;;  %v6699_v30 = vld [vmem:[#allocation2 + $0x11c] sm:$0x1] }
 0x350   : > { %v4801_v42 = vrot.slane %v4800_v47, 4  ;;  %v3390_v28 = vrot.slane %v3388_v21, 4  ;;  %v3393_v3 = vrot.slane %v3391_v59, 5  ;;  %v7176_v37 = vrot.slane %v7175_v57, 4  ;;  %v4693_v21 = vld [vmem:[#allocation2 + $0x24] sm:$0xf]  ;;  %v3666_v59 = vpop.permute.xlu1 %3665 }
 0x351   : > { %v7186_v23 = vrot.slane %v7185_v34, 4  ;;  %v3399_v31 = vrot.slane %v3397_v49, 5  ;;  %v3407_v24 = vshll.u32 %v2744_v13, 16  ;;  %v3403_v38 = vrot.slane %v3401_v22, 4  ;;  %v12343_v13 = vld [vmem:[#allocation2 + $0x15c] sm:$0xff]   ;;  %7708 = vst.msk [vmem:[#allocation3 + $0x1f8] sm:$0xff] %vm3723_vm0, %v7625_v15 }
 0x352   : > { %v4806_v6 = vsel %vm13514_vm8, %v4801_v42, %v4805_v25  ;;  %v3394_v40 = vor.u32 %v3393_v3, %v3390_v28  ;;  %v4808_v12 = vshrl.u32 %v4690_v1, 16  ;;  %v7181_v51 = vsel %vm13514_vm8, %v7176_v37, %v7180_v41  ;;  %v12366_v25 = vld [vmem:[#allocation2 + $0xfc] sm:$0xff]   ;;  %v4695_v37 = vld [vmem:[#allocation2 + $0x2c] sm:$0x1] }
 0x353   : > { %v11037_v52 = vcombine.low %v4796_v53, %v4806_v6  ;;  %v7191_v55 = vsel %vm13514_vm8, %v7186_v23, %v7190_v10  ;;  %v3409_v7 = vrot.slane %v3407_v24, 5  ;;  %v3404_v56 = vor.u32 %v3403_v38, %v3399_v31  ;;  %2651 = vst.msk [vmem:[#allocation3 + $0x2f8] sm:$0xff] %vm2631_vm15, %v12366_v25  ;;  %v6697_v38 = vld [vmem:[#allocation2 + $0x114] sm:$0xf]  ;;  %v2745_v25 = vld [vmem:[#allocation2 + $0x15c] sm:$0xf] }
 0x354   : > { %v11183_v29 = vcombine.low %v7181_v51, %v7191_v55  ;;  %v3395_v46 = vrot.slane %v3394_v40, 4  ;;  %v4810_v18 = vrot.slane %v4808_v12, 4  ;;  %v4811_v11 = vshll.u32 %v4690_v1, 16  ;;  %3743 = vst.msk [vmem:[#allocation3 + $0x2f8] sm:$0xff] %vm3723_vm0, %v3666_v59  ;;  %v6698_v51 = vld [vmem:[#allocation2 + $0x118] sm:$0xf] }
 0x355   : > { %5679 = vst.msk [vmem:[#allocation3 + $0x10] sm:$0xff] %vm2631_vm15, %v11037_v52  ;;  %v4817_v36 = vshll.u32 %v4691_v45, 16  ;;  %v4821_v35 = vshrl.u32 %v4691_v45, 16  ;;  %v4827_v4 = vshll.u32 %v4692_v9, 16  ;;  %v3405_v19 = vrot.slane %v3404_v56, 4  ;;  %v8379_v59 = vld [vmem:[#allocation3 + $0x258] sm:$0xff] }
 0x356   : > { %6319 = vst.msk [vmem:[#allocation3 + $0x10] sm:$0xff] %vm3723_vm0, %v14810_v32  ;;  %7636 = vrot.lane.b32.xlu0 %v11183_v29, %s13089_s15  ;;  %v3400_v41 = vsel %vm13514_vm8, %v3395_v46, %v3399_v31  ;;  %v11088_v47 = vrot.slane %v5768_v5, 9  ;;  %v6038_v10 = vrot.slane %v5769_v14, 5  ;;  %v4813_v53 = vrot.slane %v4811_v11, 5  ;;  %v4694_v32 = vld [vmem:[#allocation2 + $0x28] sm:$0xf]  ;;  %8880 = vmatmul.mubr.bf16.gmra.mrb[60].mxu1 %v8379_v59 }
 0x357   : > { %v4819_v57 = vrot.slane %v4817_v36, 5  ;;  %v4823_v34 = vrot.slane %v4821_v35, 4  ;;  %v4829_v49 = vrot.slane %v4827_v4, 5  ;;  %v3410_v1 = vsel %vm13514_vm8, %v3405_v19, %v3409_v7 }
 0x358   : > { %v6039_v26 = vsel %vm14117_vm14, %v11088_v47, %v6038_v10  ;;  %v6040_v42 = vrot.slane %v6038_v10, 4  ;;  %v6041_v28 = vrot.slane %v5770_v50, 5  ;;  %v10935_v3 = vcombine.low %v3400_v41, %v3410_v1  ;;  %v8312_v50 = vld [vmem:[#allocation3 + $0x40] sm:$0xff]  ;;  %v15106_v41 = vpop.permute.xlu0 %4599  ;;  %v15110_v1 = vpop.permute.xlu1 %6247 }
 0x359   : > { %v4814_v22 = vor.u32 %v4813_v53, %v4810_v18  ;;  %v4824_v44 = vor.u32 %v4823_v34, %v4819_v57  ;;  %v4832_v23 = vshrl.u32 %v4693_v21, 16  ;;  %v4835_v24 = vshll.u32 %v4693_v21, 16  ;;  %v4696_v21 = vld [vmem:[#allocation2 + $0x30] sm:$0xf] }
 0x35a   : > { %4611 = vrot.lane.b32.xlu0 %v12343_v13, %s13089_s15  ;;  %v6042_v31 = vsel %vm14117_vm14, %v6040_v42, %v6041_v28  ;;  %v4841_v6 = vshll.u32 %v4694_v32, 16  ;;  %v4845_v40 = vshrl.u32 %v4694_v32, 16  ;;  %3679 = vrot.lane.b32.xlu1 %v10935_v3, %s13089_s15  ;;  %v4851_v14 = vshll.u32 %v4695_v37, 16  ;;  %v2747_v3 = vld [vmem:[#allocation2 + $0x164] sm:$0x1] }
 0x35b   : > { %v4815_v45 = vrot.slane %v4814_v22, 4  ;;  %v4825_v9 = vrot.slane %v4824_v44, 4  ;;  %v11120_v12 = vcombine.low %v6039_v26, %v6042_v31  ;;  %v4834_v52 = vrot.slane %v4832_v23, 4 }
 0x35c   : > { %v4837_v55 = vrot.slane %v4835_v24, 5  ;;  %v4843_v7 = vrot.slane %v4841_v6, 5  ;;  %v4847_v5 = vrot.slane %v4845_v40, 4  ;;  %v7193_v46 = vshrl.u32 %v6697_v38, 16  ;;  %v4697_v24 = vld [vmem:[#allocation2 + $0x34] sm:$0xf] }
 0x35d   : > { %v4820_v15 = vsel %vm13514_vm8, %v4815_v45, %v4819_v57  ;;  %v4830_v29 = vsel %vm13514_vm8, %v4825_v9, %v4829_v49  ;;  %v7196_v56 = vshll.u32 %v6697_v38, 16  ;;  %v8306_v18 = vld [vmem:[#allocation3 + $0x10] sm:$0xff]  ;;  %v4853_v4 = vrot.slane %v4851_v14, 5  ;;  %v4698_v9 = vld [vmem:[#allocation2 + $0x38] sm:$0x1] }
 0x35e   : > { %v11038_v11 = vcombine.low %v4820_v15, %v4830_v29  ;;  %v4838_v36 = vor.u32 %v4837_v55, %v4834_v52  ;;  %v4848_v35 = vor.u32 %v4847_v5, %v4843_v7  ;;  %8921 = vmatmul.mubr.bf16.vlgmr.msra.gmra.mrb[64].mxu0 %v8306_v18  ;;  %6261 = vrot.lane.b32.xlu1 %v11120_v12, %s13089_s15  ;;  %v7195_v19 = vrot.slane %v7193_v46, 4  ;;  %v2746_v49 = vld [vmem:[#allocation2 + $0x160] sm:$0xf]  ;;  %v12367_v55 = vld [vmem:[#allocation7 + $0xc0] sm:$0xff]   ;;  %v7627_v5 = vpop.permute.xlu0 %7626  ;;  %v12369_v46 = vld [vmem:[#allocation2 + $0x108] sm:$0xff]  }
 0x35f   : > { %v7198_v13 = vrot.slane %v7196_v56, 5  ;;  %v7202_v47 = vshll.u32 %v6698_v51, 16  ;;  %v7206_v10 = vshrl.u32 %v6698_v51, 16  ;;  %8928 = vmatprep.mubr.bf16.mxu0 %v8312_v50  ;;  %v7212_v34 = vshll.u32 %v6699_v30, 16  ;;  %v12368_v29 = vld [vmem:[#allocation2 + $0xb4] sm:$0xff]   ;;  %11901 = vmatprep.subr.bf16.mxu0 %v12367_v55  ;;  %v3668_v50 = vpop.permute.xlu1 %3667  ;;  %2652 = vst.msk [vmem:[#allocation3 + $0x320] sm:$0xff] %vm2631_vm15, %v12369_v46 }
 0x360   : > { %5680 = vst.msk [vmem:[#allocation3 + $0x38] sm:$0xff] %vm2631_vm15, %v11038_v11  ;;  %v4839_v53 = vrot.slane %v4838_v36, 4  ;;  %v4849_v57 = vrot.slane %v4848_v35, 4  ;;  %v3412_v32 = vshrl.u32 %v2745_v25, 16  ;;  %v3415_v22 = vshll.u32 %v2745_v25, 16  ;;  %v12370_v56 = vld [vmem:[#allocation7 + $0x80] sm:$0xff]  }
 0x361   : > { %6320 = vst.msk [vmem:[#allocation3 + $0x38] sm:$0xff] %vm3723_vm0, %v14832_v27  ;;  %v7199_v26 = vor.u32 %v7198_v13, %v7195_v19  ;;  %v7204_v42 = vrot.slane %v7202_v47, 5  ;;  %v7208_v28 = vrot.slane %v7206_v10, 4  ;;  %v7214_v23 = vrot.slane %v7212_v34, 5  ;;  %v5771_v35 = vld [vmem:[#allocation2 + $0x114] sm:$0xe]  ;;  %11902 = vmatpush3.bf16.msra.mxu0 %v12370_v56 }
 0x362   : > { %v4844_v44 = vsel %vm13514_vm8, %v4839_v53, %v4843_v7  ;;  %v4854_v37 = vsel %vm13514_vm8, %v4849_v57, %v4853_v4  ;;  %v3414_v31 = vrot.slane %v3412_v32, 4  ;;  %v3417_v45 = vrot.slane %v3415_v22, 5  ;;  %v4699_v4 = vld [vmem:[#allocation2 + $0x3c] sm:$0xf]  ;;  %6621 = vst.msk [vmem:[#allocation3 + $0x220] sm:$0xff] %vm2631_vm15, %v12368_v29 }
 0x363   : > { %v11039_v6 = vcombine.low %v4844_v44, %v4854_v37  ;;  %v7200_v40 = vrot.slane %v7199_v26, 4  ;;  %v7209_v38 = vor.u32 %v7208_v28, %v7204_v42  ;;  %v3421_v27 = vshll.u32 %v2746_v49, 16  ;;  %7709 = vst.msk [vmem:[#allocation3 + $0x220] sm:$0xff] %vm3723_vm0, %v7627_v5  ;;  %3744 = vst.msk [vmem:[#allocation3 + $0x320] sm:$0xff] %vm3723_vm0, %v3668_v50  ;;  %v8317_v22 = vld [vmem:[#allocation3 + $0x68] sm:$0xff] }
 0x364   : > { %v3425_v12 = vshrl.u32 %v2746_v49, 16  ;;  %v3431_v52 = vshll.u32 %v2747_v3, 16  ;;  %v4856_v51 = vshrl.u32 %v4696_v21, 16  ;;  %v3418_v30 = vor.u32 %v3417_v45, %v3414_v31  ;;  %v5773_v49 = vld [vmem:[#allocation2 + $0x11c] sm:$0x1]  ;;  %v12349_v31 = vld [vmem:[#allocation2 + $0x168] sm:$0xff]  }
 0x365   : > { %5681 = vst.msk [vmem:[#allocation3 + $0x60] sm:$0xff] %vm2631_vm15, %v11039_v6  ;;  %v7205_v7 = vsel %vm13514_vm8, %v7200_v40, %v7204_v42  ;;  %v7210_v14 = vrot.slane %v7209_v38, 4  ;;  %v4859_v15 = vshll.u32 %v4696_v21, 16  ;;  %v3423_v18 = vrot.slane %v3421_v27, 5  ;;  %v5772_v21 = vld [vmem:[#allocation2 + $0x118] sm:$0xf]  ;;  %v15132_v6 = vpop.permute.xlu0 %4601 }
 0x366   : > { %6321 = vst.msk [vmem:[#allocation3 + $0x60] sm:$0xff] %vm3723_vm0, %v14843_v62  ;;  %v3427_v25 = vrot.slane %v3425_v12, 4  ;;  %v3433_v11 = vrot.slane %v3431_v52, 5  ;;  %v4858_v36 = vrot.slane %v4856_v51, 4  ;;  %v3419_v13 = vrot.slane %v3418_v30, 4  ;;  %v12371_v62 = vld [vmem:[#allocation7 + $0x40] sm:$0xff]  }
 0x367   : > { %v7215_v19 = vsel %vm13514_vm8, %v7210_v14, %v7214_v23  ;;  %v4861_v47 = vrot.slane %v4859_v15, 5  ;;  %v4865_v10 = vshll.u32 %v4697_v24, 16  ;;  %v4869_v57 = vshrl.u32 %v4697_v24, 16  ;;  %11789 = vmatprep.subr.bf16.mxu1 %v12371_v62  ;;  %v4700_v45 = vld [vmem:[#allocation2 + $0x40] sm:$0xf]  ;;  %v15138_v14 = vpop.permute.xlu1 %6249 }
 0x368   : > { %v11184_v59 = vcombine.low %v7205_v7, %v7215_v19  ;;  %v3428_v53 = vor.u32 %v3427_v25, %v3423_v18  ;;  %v4875_v34 = vshll.u32 %v4698_v9, 16  ;;  %v8311_v32 = vld [vmem:[#allocation3 + $0x38] sm:$0xff]  ;;  %v3424_v26 = vsel %vm13514_vm8, %v3419_v13, %v3423_v18  ;;  %v4701_v5 = vld [vmem:[#allocation2 + $0x44] sm:$0x1]  ;;  %v6700_v7 = vld [vmem:[#allocation2 + $0x120] sm:$0xf] }
 0x369   : > { %v4862_v42 = vor.u32 %v4861_v47, %v4858_v36  ;;  %v4867_v28 = vrot.slane %v4865_v10, 5  ;;  %v11089_v3 = vrot.slane %v5771_v35, 9  ;;  %8929 = vmatmul.mubr.bf16.gmra.mrb[68].mxu0 %v8311_v32  ;;  %v4871_v37 = vrot.slane %v4869_v57, 4  ;;  %v6701_v36 = vld [vmem:[#allocation2 + $0x124] sm:$0xf] }
 0x36a   : > { %7638 = vrot.lane.b32.xlu0 %v11184_v59, %s13089_s15  ;;  %v3429_v44 = vrot.slane %v3428_v53, 4  ;;  %v4877_v23 = vrot.slane %v4875_v34, 5  ;;  %v6045_v24 = vrot.slane %v5772_v21, 5  ;;  %8936 = vmatprep.mubr.bf16.mxu0 %v8317_v22  ;;  %v6048_v38 = vrot.slane %v5773_v49, 5  ;;  %v6702_v19 = vld [vmem:[#allocation2 + $0x128] sm:$0x1]  ;;  %v7629_v34 = vpop.permute.xlu0 %7628 }
 0x36b   : > { %v4863_v40 = vrot.slane %v4862_v42, 4  ;;  %v4880_v9 = vshrl.u32 %v4699_v4, 16  ;;  %v4883_v27 = vshll.u32 %v4699_v4, 16  ;;  %v4872_v52 = vor.u32 %v4871_v37, %v4867_v28  ;;  %v2748_v47 = vld [vmem:[#allocation2 + $0x168] sm:$0xf]  ;;  %v12373_v57 = vld [vmem:[#allocation2 + $0xc0] sm:$0xff]  }
 0x36c   : > { %v3434_v12 = vsel %vm13514_vm8, %v3429_v44, %v3433_v11  ;;  %v6046_v51 = vsel %vm14117_vm14, %v11089_v3, %v6045_v24  ;;  %v6047_v55 = vrot.slane %v6045_v24, 4  ;;  %v4889_v25 = vshll.u32 %v4700_v45, 16  ;;  %v12374_v49 = vld [vmem:[#allocation2 + $0x114] sm:$0xff]   ;;  %v8322_v3 = vld [vmem:[#allocation3 + $0x90] sm:$0xff]  ;;  %v2749_v24 = vld [vmem:[#allocation2 + $0x16c] sm:$0xf] }
 0x36d   : > { %v10936_v30 = vcombine.low %v3424_v26, %v3434_v12  ;;  %v4868_v15 = vsel %vm13514_vm8, %v4863_v40, %v4867_v28  ;;  %v4882_v29 = vrot.slane %v4880_v9, 4  ;;  %v4885_v46 = vrot.slane %v4883_v27, 5  ;;  %v8316_v53 = vld [vmem:[#allocation3 + $0x60] sm:$0xff]  ;;  %6622 = vst.msk [vmem:[#allocation3 + $0x248] sm:$0xff] %vm2631_vm15, %v12373_v57  ;;  %2653 = vst.msk [vmem:[#allocation3 + $0x348] sm:$0xff] %vm2631_vm15, %v12374_v49 }
 0x36e   : > { %v4873_v56 = vrot.slane %v4872_v52, 4  ;;  %4613 = vrot.lane.b32.xlu0 %v12349_v31, %s13089_s15  ;;  %v6049_v18 = vsel %vm14117_vm14, %v6047_v55, %v6048_v38  ;;  %v4893_v11 = vshrl.u32 %v4700_v45, 16  ;;  %v4899_v50 = vshll.u32 %v4701_v5, 16  ;;  %7710 = vst.msk [vmem:[#allocation3 + $0x248] sm:$0xff] %vm3723_vm0, %v7629_v34  ;;  %v2750_v55 = vld [vmem:[#allocation2 + $0x170] sm:$0x1] }
 0x36f   : > { %3681 = vrot.lane.b32.xlu1 %v10936_v30, %s13089_s15  ;;  %v11121_v35 = vcombine.low %v6046_v51, %v6049_v18  ;;  %v4886_v4 = vor.u32 %v4885_v46, %v4882_v29  ;;  %v7217_v13 = vshrl.u32 %v6700_v7, 16  ;;  %v4891_v21 = vrot.slane %v4889_v25, 5  ;;  %v4702_v29 = vld [vmem:[#allocation2 + $0x48] sm:$0xf]  ;;  %v5774_v34 = vld [vmem:[#allocation2 + $0x120] sm:$0xe] }
 0x370   : > { %v4878_v10 = vsel %vm13514_vm8, %v4873_v56, %v4877_v23  ;;  %v4895_v62 = vrot.slane %v4893_v11, 4  ;;  %v7220_v59 = vshll.u32 %v6700_v7, 16  ;;  %v4901_v42 = vrot.slane %v4899_v50, 5  ;;  %v3670_v23 = vpop.permute.xlu1 %3669  ;;  %v4703_v11 = vld [vmem:[#allocation2 + $0x4c] sm:$0xf] }
 0x371   : > { %v11040_v32 = vcombine.low %v4868_v15, %v4878_v10  ;;  %v4887_v26 = vrot.slane %v4886_v4, 4  ;;  %v7219_v28 = vrot.slane %v7217_v13, 4  ;;  %8937 = vmatmul.mubr.bf16.gmra.mrb[72].mxu0 %v8316_v53  ;;  %v7226_v37 = vshll.u32 %v6701_v36, 16  ;;  %3745 = vst.msk [vmem:[#allocation3 + $0x348] sm:$0xff] %vm3723_vm0, %v3670_v23  ;;  %v4704_v50 = vld [vmem:[#allocation2 + $0x50] sm:$0x1] }
 0x372   : > { %v4896_v22 = vor.u32 %v4895_v62, %v4891_v21  ;;  %v7222_v44 = vrot.slane %v7220_v59, 5  ;;  %v7230_v31 = vshrl.u32 %v6701_v36, 16  ;;  %8944 = vmatprep.mubr.bf16.mxu0 %v8322_v3  ;;  %v7236_v38 = vshll.u32 %v6702_v19, 16  ;;  %v5776_v3 = vld [vmem:[#allocation2 + $0x128] sm:$0x1] }
 0x373   : > { %5682 = vst.msk [vmem:[#allocation3 + $0x88] sm:$0xff] %vm2631_vm15, %v11040_v32  ;;  %6263 = vrot.lane.b32.xlu1 %v11121_v35, %s13089_s15  ;;  %v4892_v40 = vsel %vm13514_vm8, %v4887_v26, %v4891_v21  ;;  %v3436_v45 = vshrl.u32 %v2748_v47, 16  ;;  %v3439_v9 = vshll.u32 %v2748_v47, 16  ;;  %v7228_v52 = vrot.slane %v7226_v37, 5  ;;  %v4705_v21 = vld [vmem:[#allocation2 + $0x54] sm:$0xf] }
 0x374   : > { %6322 = vst.msk [vmem:[#allocation3 + $0x88] sm:$0xff] %vm3723_vm0, %v14865_v8  ;;  %v4897_v27 = vrot.slane %v4896_v22, 4  ;;  %v7223_v12 = vor.u32 %v7222_v44, %v7219_v28  ;;  %v7232_v51 = vrot.slane %v7230_v31, 4  ;;  %v7238_v5 = vrot.slane %v7236_v38, 5  ;;  %v5775_v28 = vld [vmem:[#allocation2 + $0x124] sm:$0xf] }
 0x375   : > { %v3438_v7 = vrot.slane %v3436_v45, 4  ;;  %v3441_v30 = vrot.slane %v3439_v9, 5  ;;  %v3445_v15 = vshll.u32 %v2749_v24, 16  ;;  %v3449_v25 = vshrl.u32 %v2749_v24, 16 }
 0x376   : > { %v4902_v46 = vsel %vm13514_vm8, %v4897_v27, %v4901_v42  ;;  %v7224_v56 = vrot.slane %v7223_v12, 4  ;;  %v7233_v18 = vor.u32 %v7232_v51, %v7228_v52  ;;  %v3455_v4 = vshll.u32 %v2750_v55, 16  ;;  %v12352_v27 = vld [vmem:[#allocation2 + $0x174] sm:$0xff]  }
 0x377   : > { %v11041_v36 = vcombine.low %v4892_v40, %v4902_v46  ;;  %v3442_v35 = vor.u32 %v3441_v30, %v3438_v7  ;;  %v3447_v8 = vrot.slane %v3445_v15, 5  ;;  %v3451_v47 = vrot.slane %v3449_v25, 4  ;;  %v4706_v51 = vld [vmem:[#allocation2 + $0x58] sm:$0xf]  ;;  %v4707_v15 = vld [vmem:[#allocation2 + $0x5c] sm:$0x1]  ;;  %v15172_v46 = vpop.permute.xlu1 %6251 }
 0x378   : > { %v7229_v19 = vsel %vm13514_vm8, %v7224_v56, %v7228_v52  ;;  %v7234_v13 = vrot.slane %v7233_v18, 4  ;;  %v4904_v10 = vshrl.u32 %v4702_v29, 16  ;;  %v3457_v59 = vrot.slane %v3455_v4, 5 }
 0x379   : > { %5683 = vst.msk [vmem:[#allocation3 + $0xb0] sm:$0xff] %vm2631_vm15, %v11041_v36  ;;  %v3443_v62 = vrot.slane %v3442_v35, 4  ;;  %v4907_v53 = vshll.u32 %v4702_v29, 16  ;;  %v4913_v57 = vshll.u32 %v4703_v11, 16  ;;  %v3452_v32 = vor.u32 %v3451_v47, %v3447_v8  ;;  %v6703_v36 = vld [vmem:[#allocation2 + $0x12c] sm:$0xf] }
 0x37a   : > { %6323 = vst.msk [vmem:[#allocation3 + $0xb0] sm:$0xff] %vm3723_vm0, %v14887_v33  ;;  %v7239_v49 = vsel %vm13514_vm8, %v7234_v13, %v7238_v5  ;;  %v4906_v26 = vrot.slane %v4904_v10, 4  ;;  %v4917_v42 = vshrl.u32 %v4703_v11, 16  ;;  %v4923_v38 = vshll.u32 %v4704_v50, 16  ;;  %v8327_v33 = vld [vmem:[#allocation3 + $0xb8] sm:$0xff] }
 0x37b   : > { %v11185_v22 = vcombine.low %v7229_v19, %v7239_v49  ;;  %v3448_v44 = vsel %vm13514_vm8, %v3443_v62, %v3447_v8  ;;  %v4909_v37 = vrot.slane %v4907_v53, 5  ;;  %v4915_v31 = vrot.slane %v4913_v57, 5  ;;  %v8321_v24 = vld [vmem:[#allocation3 + $0x88] sm:$0xff]  ;;  %v6704_v19 = vld [vmem:[#allocation2 + $0x130] sm:$0xf] }
 0x37c   : > { %v3453_v23 = vrot.slane %v3452_v32, 4  ;;  %v4919_v40 = vrot.slane %v4917_v42, 4  ;;  %v11090_v45 = vrot.slane %v5774_v34, 9  ;;  %8945 = vmatmul.mubr.bf16.gmra.mrb[76].mxu0 %v8321_v24  ;;  %v6052_v12 = vrot.slane %v5775_v28, 5  ;;  %v6705_v62 = vld [vmem:[#allocation2 + $0x134] sm:$0x1] }
 0x37d   : > { %7640 = vrot.lane.b32.xlu0 %v11185_v22, %s13089_s15  ;;  %v4910_v9 = vor.u32 %v4909_v37, %v4906_v26  ;;  %v6055_v52 = vrot.slane %v5776_v3, 5  ;;  %v4928_v55 = vshrl.u32 %v4705_v21, 16  ;;  %8952 = vmatprep.mubr.bf16.mxu0 %v8327_v33  ;;  %v4925_v30 = vrot.slane %v4923_v38, 5  ;;  %v2751_v32 = vld [vmem:[#allocation2 + $0x174] sm:$0xf]  ;;  %v12378_v26 = vld [vmem:[#allocation2 + $0x120] sm:$0xff]   ;;  %v3672_v33 = vpop.permute.xlu1 %3671 }
 0x37e   : > { %v3458_v5 = vsel %vm13514_vm8, %v3453_v23, %v3457_v59  ;;  %v4920_v7 = vor.u32 %v4919_v40, %v4915_v31  ;;  %v4931_v29 = vshll.u32 %v4705_v21, 16  ;;  %v6053_v25 = vsel %vm14117_vm14, %v11090_v45, %v6052_v12  ;;  %v12377_v59 = vld [vmem:[#allocation7 + $0xc8] sm:$0xff]   ;;  %v4708_v38 = vld [vmem:[#allocation2 + $0x60] sm:$0xf]  ;;  %v8332_v45 = vld [vmem:[#allocation3 + $0xe0] sm:$0xff]  ;;  %2654 = vst.msk [vmem:[#allocation3 + $0x370] sm:$0xff] %vm2631_vm15, %v12378_v26 }
 0x37f   : > { %v10937_v56 = vcombine.low %v3448_v44, %v3458_v5  ;;  %v4911_v18 = vrot.slane %v4910_v9, 4  ;;  %v6054_v11 = vrot.slane %v6052_v12, 4  ;;  %v4930_v8 = vrot.slane %v4928_v55, 4  ;;  %v12379_v42 = vld [vmem:[#allocation7 + $0x88] sm:$0xff]   ;;  %11903 = vmatprep.subr.bf16.mxu0 %v12377_v59  ;;  %3746 = vst.msk [vmem:[#allocation3 + $0x370] sm:$0xff] %vm3723_vm0, %v3672_v33 }
 0x380   : > { %v4921_v35 = vrot.slane %v4920_v7, 4  ;;  %v4933_v4 = vrot.slane %v4931_v29, 5  ;;  %v4937_v50 = vshll.u32 %v4706_v51, 16  ;;  %v4941_v10 = vshrl.u32 %v4706_v51, 16  ;;  %11904 = vmatpush3.bf16.msra.mxu0 %v12379_v42 }
 0x381   : > { %3683 = vrot.lane.b32.xlu1 %v10937_v56, %s13089_s15  ;;  %v4916_v13 = vsel %vm13514_vm8, %v4911_v18, %v4915_v31  ;;  %4615 = vrot.lane.b32.xlu0 %v12352_v27, %s13089_s15  ;;  %v6056_v47 = vsel %vm14117_vm14, %v6054_v11, %v6055_v52  ;;  %v4947_v21 = vshll.u32 %v4707_v15, 16  ;;  %v7241_v44 = vshrl.u32 %v6703_v36, 16  ;;  %v8326_v37 = vld [vmem:[#allocation3 + $0xb0] sm:$0xff]  ;;  %v2752_v52 = vld [vmem:[#allocation2 + $0x178] sm:$0xf] }
 0x382   : > { %v4926_v53 = vsel %vm13514_vm8, %v4921_v35, %v4925_v30  ;;  %v11122_v57 = vcombine.low %v6053_v25, %v6056_v47  ;;  %v4934_v34 = vor.u32 %v4933_v4, %v4930_v8  ;;  %v4939_v49 = vrot.slane %v4937_v50, 5  ;;  %v2753_v15 = vld [vmem:[#allocation2 + $0x17c] sm:$0x1]  ;;  %v4709_v4 = vld [vmem:[#allocation2 + $0x64] sm:$0xf] }
 0x383   : > { %v11042_v28 = vcombine.low %v4916_v13, %v4926_v53  ;;  %v4943_v3 = vrot.slane %v4941_v10, 4  ;;  %v4949_v22 = vrot.slane %v4947_v21, 5  ;;  %v7244_v24 = vshll.u32 %v6703_v36, 16  ;;  %v4710_v13 = vld [vmem:[#allocation2 + $0x68] sm:$0x1] }
 0x384   : > { %v4935_v31 = vrot.slane %v4934_v34, 4  ;;  %v7250_v23 = vshll.u32 %v6704_v19, 16  ;;  %v7254_v40 = vshrl.u32 %v6704_v19, 16  ;;  %8953 = vmatmul.mubr.bf16.gmra.mrb[80].mxu0 %v8326_v37  ;;  %v7243_v27 = vrot.slane %v7241_v44, 4  ;;  %v5777_v53 = vld [vmem:[#allocation2 + $0x12c] sm:$0xe]  ;;  %v15196_v34 = vpop.permute.xlu1 %6253 }
 0x385   : > { %5684 = vst.msk [vmem:[#allocation3 + $0xd8] sm:$0xff] %vm2631_vm15, %v11042_v28  ;;  %6265 = vrot.lane.b32.xlu1 %v11122_v57, %s13089_s15  ;;  %v4944_v9 = vor.u32 %v4943_v3, %v4939_v49  ;;  %v7260_v12 = vshll.u32 %v6705_v62, 16  ;;  %v3460_v51 = vshrl.u32 %v2751_v32, 16  ;;  %8960 = vmatprep.mubr.bf16.mxu0 %v8332_v45  ;;  %v7246_v5 = vrot.slane %v7244_v24, 5  ;;  %v15194_v57 = vpop.permute.xlu0 %4603  ;;  %v5778_v28 = vld [vmem:[#allocation2 + $0x130] sm:$0xf] }
 0x386   : > { %6324 = vst.msk [vmem:[#allocation3 + $0xd8] sm:$0xff] %vm3723_vm0, %v14903_v61  ;;  %v4940_v55 = vsel %vm13514_vm8, %v4935_v31, %v4939_v49  ;;  %v7252_v7 = vrot.slane %v7250_v23, 5  ;;  %v7256_v30 = vrot.slane %v7254_v40, 4  ;;  %v3463_v25 = vshll.u32 %v2751_v32, 16  ;;  %v5779_v31 = vld [vmem:[#allocation2 + $0x134] sm:$0x1] }
 0x387   : > { %v4945_v29 = vrot.slane %v4944_v9, 4  ;;  %v7262_v56 = vrot.slane %v7260_v12, 5  ;;  %v3462_v18 = vrot.slane %v3460_v51, 4  ;;  %v7247_v11 = vor.u32 %v7246_v5, %v7243_v27  ;;  %v3804_v24 = vld [vmem:[#allocation2 + $0xd8] sm:$0xe] }
 0x388   : > { %v7257_v36 = vor.u32 %v7256_v30, %v7252_v7  ;;  %v3469_v35 = vshll.u32 %v2752_v52, 16  ;;  %v3473_v8 = vshrl.u32 %v2752_v52, 16  ;;  %v3465_v50 = vrot.slane %v3463_v25, 5  ;;  %v3805_v9 = vld [vmem:[#allocation2 + $0xdc] sm:$0xf] }
 0x389   : > { %v4950_v61 = vsel %vm13514_vm8, %v4945_v29, %v4949_v22  ;;  %v3479_v19 = vshll.u32 %v2753_v15, 16  ;;  %v4952_v47 = vshrl.u32 %v4708_v38, 16  ;;  %v7248_v21 = vrot.slane %v7247_v11, 4  ;;  %v8337_v12 = vld [vmem:[#allocation3 + $0x108] sm:$0xff]  ;;  %v12355_v29 = vld [vmem:[#allocation2 + $0x180] sm:$0xff]  }
 0x38a   : > { %v11043_v10 = vcombine.low %v4940_v55, %v4950_v61  ;;  %v7258_v62 = vrot.slane %v7257_v36, 4  ;;  %v3471_v59 = vrot.slane %v3469_v35, 5  ;;  %v3466_v49 = vor.u32 %v3465_v50, %v3462_v18  ;;  %v3806_v18 = vld [vmem:[#allocation2 + $0xe0] sm:$0x1] }
 0x38b   : > { %v3475_v32 = vrot.slane %v3473_v8, 4  ;;  %v3481_v26 = vrot.slane %v3479_v19, 5  ;;  %v4954_v42 = vrot.slane %v4952_v47, 4  ;;  %v7253_v3 = vsel %vm13514_vm8, %v7248_v21, %v7252_v7  ;;  %v12382_v7 = vld [vmem:[#allocation2 + $0xcc] sm:$0xff]  }
 0x38c   : > { %5685 = vst.msk [vmem:[#allocation3 + $0x100] sm:$0xff] %vm2631_vm15, %v11043_v10  ;;  %v7263_v22 = vsel %vm13514_vm8, %v7258_v62, %v7262_v56  ;;  %v4955_v44 = vshll.u32 %v4708_v38, 16  ;;  %v4961_v37 = vshll.u32 %v4709_v4, 16  ;;  %v3467_v40 = vrot.slane %v3466_v49, 4  ;;  %v12383_v38 = vld [vmem:[#allocation2 + $0x12c] sm:$0xff]   ;;  %6623 = vst.msk [vmem:[#allocation3 + $0x270] sm:$0xff] %vm2631_vm15, %v12382_v7 }
 0x38d   : > { %6325 = vst.msk [vmem:[#allocation3 + $0x100] sm:$0xff] %vm3723_vm0, %v14921_v2  ;;  %v11186_v23 = vcombine.low %v7253_v3, %v7263_v22  ;;  %v3476_v45 = vor.u32 %v3475_v32, %v3471_v59  ;;  %v4965_v33 = vshrl.u32 %v4709_v4, 16  ;;  %v8331_v27 = vld [vmem:[#allocation3 + $0xd8] sm:$0xff]  ;;  %v4971_v55 = vshll.u32 %v4710_v13, 16  ;;  %v7631_v4 = vpop.permute.xlu0 %7630 }
 0x38e   : > { %v4957_v52 = vrot.slane %v4955_v44, 5  ;;  %v4963_v51 = vrot.slane %v4961_v37, 5  ;;  %v11091_v5 = vrot.slane %v5777_v53, 9  ;;  %8961 = vmatmul.mubr.bf16.gmra.mrb[84].mxu0 %v8331_v27  ;;  %v3472_v30 = vsel %vm13514_vm8, %v3467_v40, %v3471_v59  ;;  %v4711_v8 = vld [vmem:[#allocation2 + $0x6c] sm:$0xf]  ;;  %2655 = vst.msk [vmem:[#allocation3 + $0x398] sm:$0xff] %vm2631_vm15, %v12383_v38 }
 0x38f   : > { %7642 = vrot.lane.b32.xlu0 %v11186_v23, %s13089_s15  ;;  %v3477_v2 = vrot.slane %v3476_v45, 4  ;;  %v4967_v15 = vrot.slane %v4965_v33, 4  ;;  %v6059_v56 = vrot.slane %v5778_v28, 5  ;;  %8968 = vmatprep.mubr.bf16.mxu0 %v8337_v12  ;;  %v4973_v11 = vrot.slane %v4971_v55, 5  ;;  %v3674_v61 = vpop.permute.xlu1 %3673  ;;  %7711 = vst.msk [vmem:[#allocation3 + $0x270] sm:$0xff] %vm3723_vm0, %v7631_v4 }
 0x390   : > { %v4958_v25 = vor.u32 %v4957_v52, %v4954_v42  ;;  %v6062_v36 = vrot.slane %v5779_v31, 5  ;;  %v10957_v35 = vrot.slane %v3804_v24, 9  ;;  %3747 = vst.msk [vmem:[#allocation3 + $0x398] sm:$0xff] %vm3723_vm0, %v3674_v61  ;;  %v4065_v62 = vrot.slane %v3805_v9, 5  ;;  %v4712_v53 = vld [vmem:[#allocation2 + $0x70] sm:$0xf] }
 0x391   : > { %v3482_v50 = vsel %vm13514_vm8, %v3477_v2, %v3481_v26  ;;  %v4968_v19 = vor.u32 %v4967_v15, %v4963_v51  ;;  %v6060_v13 = vsel %vm14117_vm14, %v11091_v5, %v6059_v56  ;;  %v6061_v47 = vrot.slane %v6059_v56, 4  ;;  %v4713_v26 = vld [vmem:[#allocation2 + $0x74] sm:$0x1]  ;;  %v6706_v31 = vld [vmem:[#allocation2 + $0x138] sm:$0xf]  ;;  %v8342_v5 = vld [vmem:[#allocation3 + $0x130] sm:$0xff] }
 0x392   : > { %v10938_v10 = vcombine.low %v3472_v30, %v3482_v50  ;;  %v4959_v21 = vrot.slane %v4958_v25, 4  ;;  %v4068_v59 = vrot.slane %v3806_v18, 5  ;;  %v4976_v42 = vshrl.u32 %v4711_v8, 16  ;;  %v6707_v33 = vld [vmem:[#allocation2 + $0x13c] sm:$0xf] }
 0x393   : > { %v4969_v49 = vrot.slane %v4968_v19, 4  ;;  %4617 = vrot.lane.b32.xlu0 %v12355_v29, %s13089_s15  ;;  %v6063_v32 = vsel %vm14117_vm14, %v6061_v47, %v6062_v36  ;;  %v4979_v28 = vshll.u32 %v4711_v8, 16  ;;  %v4066_v44 = vsel %vm14117_vm14, %v10957_v35, %v4065_v62  ;;  %v6708_v55 = vld [vmem:[#allocation2 + $0x140] sm:$0x1]  ;;  %v2755_v4 = vld [vmem:[#allocation2 + $0x184] sm:$0xf] }
 0x394   : > { %3685 = vrot.lane.b32.xlu1 %v10938_v10, %s13089_s15  ;;  %v4964_v3 = vsel %vm13514_vm8, %v4959_v21, %v4963_v51  ;;  %v11123_v22 = vcombine.low %v6060_v13, %v6063_v32  ;;  %v4067_v37 = vrot.slane %v4065_v62, 4  ;;  %v4978_v23 = vrot.slane %v4976_v42, 4  ;;  %v8336_v9 = vld [vmem:[#allocation3 + $0x100] sm:$0xff]  ;;  %v2754_v15 = vld [vmem:[#allocation2 + $0x180] sm:$0xf] }
 0x395   : > { %v4974_v24 = vsel %vm13514_vm8, %v4969_v49, %v4973_v11  ;;  %v4981_v40 = vrot.slane %v4979_v28, 5  ;;  %v4985_v45 = vshll.u32 %v4712_v53, 16  ;;  %v4989_v52 = vshrl.u32 %v4712_v53, 16  ;;  %v2756_v13 = vld [vmem:[#allocation2 + $0x188] sm:$0x1] }
 0x396   : > { %v11044_v27 = vcombine.low %v4964_v3, %v4974_v24  ;;  %v4069_v12 = vsel %vm14117_vm14, %v4067_v37, %v4068_v59  ;;  %v4995_v51 = vshll.u32 %v4713_v26, 16  ;;  %8969 = vmatmul.mubr.bf16.gmra.mrb[88].mxu0 %v8336_v9  ;;  %v7265_v2 = vshrl.u32 %v6706_v31, 16  ;;  %v5780_v59 = vld [vmem:[#allocation2 + $0x138] sm:$0xe]  ;;  %v5781_v42 = vld [vmem:[#allocation2 + $0x13c] sm:$0xf]  ;;  %v15237_v37 = vpop.permute.xlu0 %4605 }
 0x397   : > { %v10989_v7 = vcombine.low %v4066_v44, %v4069_v12  ;;  %v4982_v38 = vor.u32 %v4981_v40, %v4978_v23  ;;  %v4987_v30 = vrot.slane %v4985_v45, 5  ;;  %8976 = vmatprep.mubr.bf16.mxu0 %v8342_v5  ;;  %v4991_v29 = vrot.slane %v4989_v52, 4  ;;  %v5782_v44 = vld [vmem:[#allocation2 + $0x140] sm:$0x1]  ;;  %v3807_v45 = vld [vmem:[#allocation2 + $0xe4] sm:$0xe] }
 0x398   : > { %5686 = vst.msk [vmem:[#allocation3 + $0x128] sm:$0xff] %vm2631_vm15, %v11044_v27  ;;  %6267 = vrot.lane.b32.xlu1 %v11123_v22, %s13089_s15  ;;  %v4997_v56 = vrot.slane %v4995_v51, 5  ;;  %v7268_v18 = vshll.u32 %v6706_v31, 16  ;;  %v7274_v25 = vshll.u32 %v6707_v33, 16  ;;  %v7267_v36 = vrot.slane %v7265_v2, 4 }
 0x399   : > { %6326 = vst.msk [vmem:[#allocation3 + $0x128] sm:$0xff] %vm3723_vm0, %v14952_v17  ;;  %v4983_v11 = vrot.slane %v4982_v38, 4  ;;  %v7278_v35 = vshrl.u32 %v6707_v33, 16  ;;  %v7284_v8 = vshll.u32 %v6708_v55, 16  ;;  %v4992_v61 = vor.u32 %v4991_v29, %v4987_v30  ;;  %v3808_v52 = vld [vmem:[#allocation2 + $0xe8] sm:$0xf] }
 0x39a   : > { %4319 = vst.msk [vmem:[#allocation3 + $0x288] sm:$0xff] %vm2631_vm15, %v10989_v7  ;;  %v7270_v50 = vrot.slane %v7268_v18, 5  ;;  %v7276_v19 = vrot.slane %v7274_v25, 5  ;;  %v3484_v47 = vshrl.u32 %v2754_v15, 16  ;;  %v3487_v62 = vshll.u32 %v2754_v15, 16  ;;  %v8347_v25 = vld [vmem:[#allocation3 + $0x158] sm:$0xff] }
 0x39b   : > { %4671 = vst.msk [vmem:[#allocation3 + $0x288] sm:$0xff] %vm3723_vm0, %v14954_v63  ;;  %v4988_v10 = vsel %vm13514_vm8, %v4983_v11, %v4987_v30  ;;  %v7280_v21 = vrot.slane %v7278_v35, 4  ;;  %v7286_v17 = vrot.slane %v7284_v8, 5  ;;  %v4993_v53 = vrot.slane %v4992_v61, 4  ;;  %v4714_v51 = vld [vmem:[#allocation2 + $0x78] sm:$0xf]  ;;  %v15246_v11 = vpop.permute.xlu1 %6255 }
 0x39c   : > { %v7271_v49 = vor.u32 %v7270_v50, %v7267_v36  ;;  %v3486_v32 = vrot.slane %v3484_v47, 4  ;;  %v3493_v26 = vshll.u32 %v2755_v4, 16  ;;  %v3489_v3 = vrot.slane %v3487_v62, 5  ;;  %v3809_v30 = vld [vmem:[#allocation2 + $0xec] sm:$0x1]  ;;  %v12386_v36 = vld [vmem:[#allocation2 + $0xf0] sm:$0xff]  }
 0x39d   : > { %v7281_v28 = vor.u32 %v7280_v21, %v7276_v19  ;;  %v3497_v63 = vshrl.u32 %v2755_v4, 16  ;;  %v3503_v22 = vshll.u32 %v2756_v13, 16  ;;  %v4998_v31 = vsel %vm13514_vm8, %v4993_v53, %v4997_v56  ;;  %v12387_v35 = vld [vmem:[#allocation7 + $0xd0] sm:$0xff]   ;;  %v12388_v13 = vld [vmem:[#allocation2 + $0x138] sm:$0xff]   ;;  %6624 = vst.msk [vmem:[#allocation3 + $0x298] sm:$0xff] %vm2631_vm15, %v12386_v36  ;;  %v12358_v53 = vld [vmem:[#allocation2 + $0x18c] sm:$0xff]  }
 0x39e   : > { %v7272_v24 = vrot.slane %v7271_v49, 4  ;;  %v3495_v23 = vrot.slane %v3493_v26, 5  ;;  %v11092_v40 = vrot.slane %v5780_v59, 9  ;;  %v11045_v33 = vcombine.low %v4988_v10, %v4998_v31  ;;  %v12389_v47 = vld [vmem:[#allocation7 + $0x90] sm:$0xff]   ;;  %11905 = vmatprep.subr.bf16.mxu0 %v12387_v35  ;;  %2656 = vst.msk [vmem:[#allocation3 + $0x3c0] sm:$0xff] %vm2631_vm15, %v12388_v13 }
 0x39f   : > { %v7282_v9 = vrot.slane %v7281_v28, 4  ;;  %v3490_v27 = vor.u32 %v3489_v3, %v3486_v32  ;;  %v3499_v12 = vrot.slane %v3497_v63, 4  ;;  %v3505_v5 = vrot.slane %v3503_v22, 5  ;;  %v4716_v62 = vld [vmem:[#allocation2 + $0x80] sm:$0x1]  ;;  %11906 = vmatpush3.bf16.msra.mxu0 %v12389_v47 }
 0x3a0   : > { %v7277_v55 = vsel %vm13514_vm8, %v7272_v24, %v7276_v19  ;;  %v6066_v7 = vrot.slane %v5781_v42, 5  ;;  %v6069_v38 = vrot.slane %v5782_v44, 5  ;;  %v8341_v2 = vld [vmem:[#allocation3 + $0x128] sm:$0xff]  ;;  %5687 = vst.msk [vmem:[#allocation3 + $0x150] sm:$0xff] %vm2631_vm15, %v11045_v33  ;;  %v10958_v18 = vrot.slane %v3807_v45, 9 }
 0x3a1   : > { %v7287_v15 = vsel %vm13514_vm8, %v7282_v9, %v7286_v17  ;;  %v3491_v29 = vrot.slane %v3490_v27, 4  ;;  %v3500_v56 = vor.u32 %v3499_v12, %v3495_v23  ;;  %8977 = vmatmul.mubr.bf16.gmra.mrb[92].mxu0 %v8341_v2  ;;  %6327 = vst.msk [vmem:[#allocation3 + $0x150] sm:$0xff] %vm3723_vm0, %v14967_v54  ;;  %v4072_v50 = vrot.slane %v3808_v52, 5  ;;  %v4715_v19 = vld [vmem:[#allocation2 + $0x7c] sm:$0xf] }
 0x3a2   : > { %v11187_v8 = vcombine.low %v7277_v55, %v7287_v15  ;;  %v15252_v4 = vsel %vm14117_vm14, %v11092_v40, %v6066_v7  ;;  %v6068_v61 = vrot.slane %v6066_v7, 4  ;;  %8984 = vmatprep.mubr.bf16.mxu0 %v8347_v25  ;;  %v4075_v17 = vrot.slane %v3809_v30, 5  ;;  %v6709_v28 = vld [vmem:[#allocation2 + $0x144] sm:$0xf]  ;;  %v6710_v31 = vld [vmem:[#allocation2 + $0x148] sm:$0xf] }
 0x3a3   : > { %v3496_v10 = vsel %vm13514_vm8, %v3491_v29, %v3495_v23  ;;  %v3501_v21 = vrot.slane %v3500_v56, 4  ;;  %v5000_v59 = vshrl.u32 %v4714_v51, 16  ;;  %v7633_v54 = vpop.permute.xlu0 %7632  ;;  %v4073_v32 = vsel %vm14117_vm14, %v10958_v18, %v4072_v50  ;;  %v6711_v33 = vld [vmem:[#allocation2 + $0x14c] sm:$0x1]  ;;  %v2758_v2 = vld [vmem:[#allocation2 + $0x190] sm:$0xf] }
 0x3a4   : > { %7644 = vrot.lane.b32.xlu0 %v11187_v8, %s13089_s15  ;;  %v6070_v49 = vsel %vm14117_vm14, %v6068_v61, %v6069_v38  ;;  %v4074_v26 = vrot.slane %v4072_v50, 4  ;;  %v5003_v42 = vshll.u32 %v4714_v51, 16  ;;  %7712 = vst.msk [vmem:[#allocation3 + $0x298] sm:$0xff] %vm3723_vm0, %v7633_v54  ;;  %v5009_v44 = vshll.u32 %v4715_v19, 16  ;;  %v2757_v51 = vld [vmem:[#allocation2 + $0x18c] sm:$0xf] }
 0x3a5   : > { %v3506_v3 = vsel %vm13514_vm8, %v3501_v21, %v3505_v5  ;;  %v11124_v63 = vcombine.low %v15252_v4, %v6070_v49  ;;  %v5002_v22 = vrot.slane %v5000_v59, 4  ;;  %v5013_v45 = vshrl.u32 %v4715_v19, 16  ;;  %v8352_v61 = vld [vmem:[#allocation3 + $0x180] sm:$0xff]  ;;  %v5783_v59 = vld [vmem:[#allocation2 + $0x144] sm:$0xe]  ;;  %v12392_v54 = vld [vmem:[#allocation2 + $0xfc] sm:$0xff]  }
 0x3a6   : > { %v10939_v24 = vcombine.low %v3496_v10, %v3506_v3  ;;  %v4076_v23 = vsel %vm14117_vm14, %v4074_v26, %v4075_v17  ;;  %v5005_v40 = vrot.slane %v5003_v42, 5  ;;  %v5011_v27 = vrot.slane %v5009_v44, 5  ;;  %v3676_v55 = vpop.permute.xlu1 %3675  ;;  %v2759_v13 = vld [vmem:[#allocation2 + $0x194] sm:$0x1]  ;;  %6625 = vst.msk [vmem:[#allocation3 + $0x2c0] sm:$0xff] %vm2631_vm15, %v12392_v54 }
 0x3a7   : > { %v10990_v9 = vcombine.low %v4073_v32, %v4076_v23  ;;  %v5019_v12 = vshll.u32 %v4716_v62, 16  ;;  %v7289_v52 = vshrl.u32 %v6709_v28, 16  ;;  %v5015_v7 = vrot.slane %v5013_v45, 4  ;;  %3748 = vst.msk [vmem:[#allocation3 + $0x3c0] sm:$0xff] %vm3723_vm0, %v3676_v55  ;;  %v3812_v55 = vld [vmem:[#allocation2 + $0xf8] sm:$0x1] }
 0x3a8   : > { %3687 = vrot.lane.b32.xlu1 %v10939_v24, %s13089_s15  ;;  %4619 = vrot.lane.b32.xlu0 %v12358_v53, %s13089_s15  ;;  %v5006_v5 = vor.u32 %v5005_v40, %v5002_v22  ;;  %v7292_v38 = vshll.u32 %v6709_v28, 16  ;;  %v7298_v30 = vshll.u32 %v6710_v31, 16  ;;  %v7302_v56 = vshrl.u32 %v6710_v31, 16  ;;  %v8346_v25 = vld [vmem:[#allocation3 + $0x150] sm:$0xff]  ;;  %v5784_v28 = vld [vmem:[#allocation2 + $0x148] sm:$0xf] }
 0x3a9   : > { %4320 = vst.msk [vmem:[#allocation3 + $0x2b0] sm:$0xff] %vm2631_vm15, %v10990_v9  ;;  %v5021_v15 = vrot.slane %v5019_v12, 5  ;;  %v7291_v29 = vrot.slane %v7289_v52, 4  ;;  %v7308_v18 = vshll.u32 %v6711_v33, 16  ;;  %v5016_v35 = vor.u32 %v5015_v7, %v5011_v27  ;;  %8985 = vmatmul.mubr.bf16.gmra.mrb[96].mxu0 %v8346_v25  ;;  %v12393_v53 = vld [vmem:[#allocation2 + $0x144] sm:$0xff]  }
 0x3aa   : > { %4672 = vst.msk [vmem:[#allocation3 + $0x2b0] sm:$0xff] %vm3723_vm0, %v14991_v58  ;;  %v5007_v36 = vrot.slane %v5006_v5, 4  ;;  %v7294_v8 = vrot.slane %v7292_v38, 5  ;;  %v7300_v4 = vrot.slane %v7298_v30, 5  ;;  %v7304_v50 = vrot.slane %v7302_v56, 4  ;;  %8992 = vmatprep.mubr.bf16.mxu0 %v8352_v61 }
 0x3ab   : > { %v7310_v19 = vrot.slane %v7308_v18, 5  ;;  %v3508_v47 = vshrl.u32 %v2757_v51, 16  ;;  %v3511_v10 = vshll.u32 %v2757_v51, 16  ;;  %v5017_v17 = vrot.slane %v5016_v35, 4  ;;  %v5785_v31 = vld [vmem:[#allocation2 + $0x14c] sm:$0x1] }
 0x3ac   : > { %6269 = vrot.lane.b32.xlu1 %v11124_v63, %s13089_s15  ;;  %v5012_v21 = vsel %vm13514_vm8, %v5007_v36, %v5011_v27  ;;  %v7295_v62 = vor.u32 %v7294_v8, %v7291_v29  ;;  %v3517_v58 = vshll.u32 %v2758_v2, 16  ;;  %v7305_v49 = vor.u32 %v7304_v50, %v7300_v4  ;;  %2657 = vst.msk [vmem:[#allocation3 + $0x3e8] sm:$0xff] %vm2631_vm15, %v12393_v53  ;;  %v3810_v33 = vld [vmem:[#allocation2 + $0xf0] sm:$0xe]  ;;  %v3811_v9 = vld [vmem:[#allocation2 + $0xf4] sm:$0xf]  ;;  %v15287_v29 = vpop.permute.xlu0 %4607 }
 0x3ad   : > { %v3510_v32 = vrot.slane %v3508_v47, 4  ;;  %v3513_v26 = vrot.slane %v3511_v10, 5  ;;  %v3521_v42 = vshrl.u32 %v2758_v2, 16  ;;  %v5022_v3 = vsel %vm13514_vm8, %v5017_v17, %v5021_v15  ;;  %v4717_v2 = vld [vmem:[#allocation2 + $0x84] sm:$0xf]  ;;  %v12396_v17 = vld [vmem:[#allocation2 + $0x108] sm:$0xff]  }
 0x3ae   : > { %v7296_v22 = vrot.slane %v7295_v62, 4  ;;  %v3519_v44 = vrot.slane %v3517_v58, 5  ;;  %v3527_v63 = vshll.u32 %v2759_v13, 16  ;;  %v11046_v24 = vcombine.low %v5012_v21, %v5022_v3  ;;  %v4718_v15 = vld [vmem:[#allocation2 + $0x88] sm:$0xf]  ;;  %v12362_v13 = vld [vmem:[#allocation2 + $0x198] sm:$0xff]  }
 0x3af   : > { %v7306_v23 = vrot.slane %v7305_v49, 4  ;;  %v3514_v40 = vor.u32 %v3513_v26, %v3510_v32  ;;  %v3523_v45 = vrot.slane %v3521_v42, 4  ;;  %v11093_v52 = vrot.slane %v5783_v59, 9  ;;  %v4719_v35 = vld [vmem:[#allocation2 + $0x8c] sm:$0x1]  ;;  %v12398_v32 = vld [vmem:[#allocation2 + $0x150] sm:$0xff]  }
 0x3b0   : > { %v7301_v27 = vsel %vm13514_vm8, %v7296_v22, %v7300_v4  ;;  %v3529_v12 = vrot.slane %v3527_v63, 5  ;;  %v6073_v51 = vrot.slane %v5784_v28, 5  ;;  %5688 = vst.msk [vmem:[#allocation3 + $0x178] sm:$0xff] %vm2631_vm15, %v11046_v24  ;;  %v6076_v30 = vrot.slane %v5785_v31, 5  ;;  %v6713_v53 = vld [vmem:[#allocation2 + $0x154] sm:$0xf] }
 0x3b1   : > { %v7311_v5 = vsel %vm13514_vm8, %v7306_v23, %v7310_v19  ;;  %v3515_v7 = vrot.slane %v3514_v40, 4  ;;  %v3524_v38 = vor.u32 %v3523_v45, %v3519_v44  ;;  %6328 = vst.msk [vmem:[#allocation3 + $0x178] sm:$0xff] %vm3723_vm0, %v14997_v43  ;;  %v10959_v36 = vrot.slane %v3810_v33, 9  ;;  %v6712_v19 = vld [vmem:[#allocation2 + $0x150] sm:$0xf]  ;;  %v12397_v49 = vld [vmem:[#allocation7 + $0xd8] sm:$0xff]   ;;  %v15310_v45 = vpop.permute.xlu1 %6257 }
 0x3b2   : > { %v11188_v56 = vcombine.low %v7301_v27, %v7311_v5  ;;  %v15293_v18 = vsel %vm14117_vm14, %v11093_v52, %v6073_v51  ;;  %v6075_v25 = vrot.slane %v6073_v51, 4  ;;  %v4079_v61 = vrot.slane %v3811_v9, 5  ;;  %v6714_v22 = vld [vmem:[#allocation2 + $0x158] sm:$0x1]  ;;  %6626 = vst.msk [vmem:[#allocation3 + $0x2e8] sm:$0xff] %vm2631_vm15, %v12396_v17  ;;  %11907 = vmatprep.subr.bf16.mxu0 %v12397_v49  ;;  %2658 = vst.msk [vmem:[#allocation3 + $0x410] sm:$0xff] %vm2631_vm15, %v12398_v32 }
 0x3b3   : > { %v3520_v8 = vsel %vm13514_vm8, %v3515_v7, %v3519_v44  ;;  %v3525_v4 = vrot.slane %v3524_v38, 4  ;;  %v4082_v50 = vrot.slane %v3812_v55, 5  ;;  %v5024_v47 = vshrl.u32 %v4717_v2, 16  ;;  %v12399_v44 = vld [vmem:[#allocation7 + $0x98] sm:$0xff]   ;;  %v5786_v40 = vld [vmem:[#allocation2 + $0x150] sm:$0xe] }
 0x3b4   : > { %7646 = vrot.lane.b32.xlu0 %v11188_v56, %s13089_s15  ;;  %v6077_v43 = vsel %vm14117_vm14, %v6075_v25, %v6076_v30  ;;  %v5027_v10 = vshll.u32 %v4717_v2, 16  ;;  %v5033_v21 = vshll.u32 %v4718_v15, 16  ;;  %v4080_v59 = vsel %vm14117_vm14, %v10959_v36, %v4079_v61  ;;  %v5787_v51 = vld [vmem:[#allocation2 + $0x154] sm:$0xf]  ;;  %v5788_v55 = vld [vmem:[#allocation2 + $0x158] sm:$0x1]  ;;  %11908 = vmatpush3.bf16.msra.mxu0 %v12399_v44 }
 0x3b5   : > { %v3530_v62 = vsel %vm13514_vm8, %v3525_v4, %v3529_v12  ;;  %v11125_v58 = vcombine.low %v15293_v18, %v6077_v43  ;;  %v4081_v54 = vrot.slane %v4079_v61, 4  ;;  %v5026_v42 = vrot.slane %v5024_v47, 4  ;;  %v3813_v2 = vld [vmem:[#allocation2 + $0xfc] sm:$0xe]  ;;  %v4720_v17 = vld [vmem:[#allocation2 + $0x90] sm:$0xf] }
 0x3b6   : > { %v10940_v26 = vcombine.low %v3520_v8, %v3530_v62  ;;  %v5029_v28 = vrot.slane %v5027_v10, 5  ;;  %v15305_v3 = vrot.slane %v5033_v21, 5  ;;  %v5037_v31 = vshrl.u32 %v4718_v15, 16  ;;  %v7635_v33 = vpop.permute.xlu0 %7634  ;;  %v3814_v15 = vld [vmem:[#allocation2 + $0x100] sm:$0xf]  ;;  %v8357_v8 = vld [vmem:[#allocation3 + $0x1a8] sm:$0xff] }
 0x3b7   : > { %v4083_v63 = vsel %vm14117_vm14, %v4081_v54, %v4082_v50  ;;  %v5043_v24 = vshll.u32 %v4719_v35, 16  ;;  %v7313_v23 = vshrl.u32 %v6712_v19, 16  ;;  %v7316_v12 = vshll.u32 %v6712_v19, 16  ;;  %7713 = vst.msk [vmem:[#allocation3 + $0x2c0] sm:$0xff] %vm3723_vm0, %v7635_v33  ;;  %v4722_v49 = vld [vmem:[#allocation2 + $0x98] sm:$0x1] }
 0x3b8   : > { %3689 = vrot.lane.b32.xlu1 %v10940_v26, %s13089_s15  ;;  %4621 = vrot.lane.b32.xlu0 %v12362_v13, %s13089_s15  ;;  %v10991_v9 = vcombine.low %v4080_v59, %v4083_v63  ;;  %v5030_v27 = vor.u32 %v5029_v28, %v5026_v42  ;;  %v7322_v52 = vshll.u32 %v6713_v53, 16  ;;  %v5039_v5 = vrot.slane %v5037_v31, 4  ;;  %v8351_v56 = vld [vmem:[#allocation3 + $0x178] sm:$0xff]  ;;  %v3815_v13 = vld [vmem:[#allocation2 + $0x104] sm:$0x1] }
 0x3b9   : > { %v5045_v7 = vrot.slane %v5043_v24, 5  ;;  %v7315_v38 = vrot.slane %v7313_v23, 4  ;;  %v7326_v30 = vshrl.u32 %v6713_v53, 16  ;;  %v7318_v25 = vrot.slane %v7316_v12, 5  ;;  %8993 = vmatmul.mubr.bf16.gmra.mrb[100].mxu0 %v8351_v56  ;;  %v4721_v53 = vld [vmem:[#allocation2 + $0x94] sm:$0xf] }
 0x3ba   : > { %4321 = vst.msk [vmem:[#allocation3 + $0x2d8] sm:$0xff] %vm2631_vm15, %v10991_v9  ;;  %v5031_v18 = vrot.slane %v5030_v27, 4  ;;  %v7324_v36 = vrot.slane %v7322_v52, 5  ;;  %v7332_v35 = vshll.u32 %v6714_v22, 16  ;;  %v5040_v4 = vor.u32 %v5039_v5, %v15305_v3  ;;  %9000 = vmatprep.mubr.bf16.mxu0 %v8357_v8  ;;  %v5789_v22 = vld [vmem:[#allocation2 + $0x15c] sm:$0xe] }
 0x3bb   : > { %4673 = vst.msk [vmem:[#allocation3 + $0x2d8] sm:$0xff] %vm3723_vm0, %v15033_v16  ;;  %v7328_v61 = vrot.slane %v7326_v30, 4  ;;  %v11094_v50 = vrot.slane %v5786_v40, 9  ;;  %v6080_v19 = vrot.slane %v5787_v51, 5  ;;  %v7319_v47 = vor.u32 %v7318_v25, %v7315_v38  ;;  %v5790_v24 = vld [vmem:[#allocation2 + $0x160] sm:$0xf] }
 0x3bc   : > { %6271 = vrot.lane.b32.xlu1 %v11125_v58, %s13089_s15  ;;  %v5036_v43 = vsel %vm13514_vm8, %v5031_v18, %v15305_v3  ;;  %v7334_v10 = vrot.slane %v7332_v35, 5  ;;  %v6083_v21 = vrot.slane %v5788_v55, 5  ;;  %v5041_v62 = vrot.slane %v5040_v4, 4  ;;  %v12402_v23 = vld [vmem:[#allocation7 + $0xe0] sm:$0xff]   ;;  %v12405_v51 = vld [vmem:[#allocation2 + $0x15c] sm:$0xff]   ;;  %v15339_v35 = vpop.permute.xlu0 %4609 }
 0x3bd   : > { %v7329_v59 = vor.u32 %v7328_v61, %v7324_v36  ;;  %v6081_v16 = vsel %vm14117_vm14, %v11094_v50, %v6080_v19  ;;  %v6082_v54 = vrot.slane %v6080_v19, 4  ;;  %v3678_v32 = vpop.permute.xlu1 %3677  ;;  %v7320_v26 = vrot.slane %v7319_v47, 4  ;;  %v12403_v40 = vld [vmem:[#allocation7 + $0xa0] sm:$0xff]   ;;  %v12406_v55 = vld [vmem:[#allocation7 + $0xe8] sm:$0xff]   ;;  %11909 = vmatprep.subr.bf16.mxu0 %v12402_v23  ;;  %2659 = vst.msk [vmem:[#allocation3 + $0x438] sm:$0xff] %vm2631_vm15, %v12405_v51 }
 0x3be   : > { %v10960_v42 = vrot.slane %v3813_v2, 9  ;;  %v4086_v58 = vrot.slane %v3814_v15, 5  ;;  %v4089_v28 = vrot.slane %v3815_v13, 5  ;;  %3749 = vst.msk [vmem:[#allocation3 + $0x3e8] sm:$0xff] %vm3723_vm0, %v3678_v32  ;;  %v5046_v3 = vsel %vm13514_vm8, %v5041_v62, %v5045_v7  ;;  %v12404_v52 = vld [vmem:[#allocation2 + $0x114] sm:$0xff]   ;;  %11910 = vmatpush3.bf16.msra.mxu0 %v12403_v40 }
 0x3bf   : > { %v7330_v44 = vrot.slane %v7329_v59, 4  ;;  %v6084_v63 = vsel %vm14117_vm14, %v6082_v54, %v6083_v21  ;;  %v5048_v31 = vshrl.u32 %v4720_v17, 16  ;;  %v11047_v33 = vcombine.low %v5036_v43, %v5046_v3  ;;  %v5791_v2 = vld [vmem:[#allocation2 + $0x164] sm:$0x1]  ;;  %6627 = vst.msk [vmem:[#allocation3 + $0x310] sm:$0xff] %vm2631_vm15, %v12404_v52  ;;  %v12407_v8 = vld [vmem:[#allocation7 + $0xa8] sm:$0xff]   ;;  %11911 = vmatprep.subr.bf16.mxu0 %v12406_v55 }
 0x3c0   : > { %v7325_v9 = vsel %vm13514_vm8, %v7320_v26, %v7324_v36  ;;  %v11126_v27 = vcombine.low %v6081_v16, %v6084_v63  ;;  %v4087_v12 = vsel %vm14117_vm14, %v10960_v42, %v4086_v58  ;;  %v4088_v7 = vrot.slane %v4086_v58, 4  ;;  %v6715_v36 = vld [vmem:[#allocation2 + $0x15c] sm:$0xf]  ;;  %v6716_v13 = vld [vmem:[#allocation2 + $0x160] sm:$0xf] }
 0x3c1   : > { %v7335_v5 = vsel %vm13514_vm8, %v7330_v44, %v7334_v10  ;;  %v5050_v38 = vrot.slane %v5048_v31, 4  ;;  %v5051_v30 = vshll.u32 %v4720_v17, 16  ;;  %5689 = vst.msk [vmem:[#allocation3 + $0x1a0] sm:$0xff] %vm2631_vm15, %v11047_v33  ;;  %v5057_v56 = vshll.u32 %v4721_v53, 16  ;;  %v6717_v17 = vld [vmem:[#allocation2 + $0x164] sm:$0x1] }
 0x3c2   : > { %v11189_v15 = vcombine.low %v7325_v9, %v7335_v5  ;;  %6273 = vrot.lane.b32.xlu1 %v11126_v27, %s13089_s15  ;;  %v5061_v18 = vshrl.u32 %v4721_v53, 16  ;;  %v5067_v25 = vshll.u32 %v4722_v49, 16  ;;  %6329 = vst.msk [vmem:[#allocation3 + $0x1a0] sm:$0xff] %vm3723_vm0, %v15039_v48  ;;  %v4090_v4 = vsel %vm14117_vm14, %v4088_v7, %v4089_v28  ;;  %v5792_v54 = vld [vmem:[#allocation2 + $0x168] sm:$0xe]  ;;  %11912 = vmatpush3.bf16.msra.mxu0 %v12407_v8  ;;  %v12410_v52 = vld [vmem:[#allocation7 + $0xf0] sm:$0xff]  }
 0x3c3   : > { %v5053_v61 = vrot.slane %v5051_v30, 5  ;;  %v11095_v50 = vrot.slane %v5789_v22, 9  ;;  %v6087_v19 = vrot.slane %v5790_v24, 5  ;;  %v10992_v43 = vcombine.low %v4087_v12, %v4090_v4  ;;  %v5793_v53 = vld [vmem:[#allocation2 + $0x16c] sm:$0xf]  ;;  %v15355_v24 = vpop.permute.xlu1 %6259  ;;  %v12411_v7 = vld [vmem:[#allocation7 + $0xb0] sm:$0xff]   ;;  %11913 = vmatprep.subr.bf16.mxu0 %v12410_v52 }
 0x3c4   : > { %7648 = vrot.lane.b32.xlu0 %v11189_v15, %s13089_s15  ;;  %v5059_v47 = vrot.slane %v5057_v56, 5  ;;  %v5063_v10 = vrot.slane %v5061_v18, 4  ;;  %v5069_v21 = vrot.slane %v5067_v25, 5  ;;  %v6090_v16 = vrot.slane %v5791_v2, 5  ;;  %v5794_v58 = vld [vmem:[#allocation2 + $0x170] sm:$0x1] }
 0x3c5   : > { %v5054_v62 = vor.u32 %v5053_v61, %v5050_v38  ;;  %v6088_v59 = vsel %vm14117_vm14, %v11095_v50, %v6087_v19  ;;  %v6089_v48 = vrot.slane %v6087_v19, 4  ;;  %4322 = vst.msk [vmem:[#allocation3 + $0x300] sm:$0xff] %vm2631_vm15, %v10992_v43  ;;  %v7337_v32 = vshrl.u32 %v6715_v36, 16  ;;  %v3816_v28 = vld [vmem:[#allocation2 + $0x108] sm:$0xe]  ;;  %v12412_v38 = vld [vmem:[#allocation2 + $0x120] sm:$0xff]  }
 0x3c6   : > { %v5064_v49 = vor.u32 %v5063_v10, %v5059_v47  ;;  %v7340_v26 = vshll.u32 %v6715_v36, 16  ;;  %v7346_v42 = vshll.u32 %v6716_v13, 16  ;;  %4674 = vst.msk [vmem:[#allocation3 + $0x300] sm:$0xff] %vm3723_vm0, %v15071_v0  ;;  %v7350_v44 = vshrl.u32 %v6716_v13, 16  ;;  %v3817_v31 = vld [vmem:[#allocation2 + $0x10c] sm:$0xf]  ;;  %11914 = vmatpush3.bf16.msra.mxu0 %v12411_v7 }
 0x3c7   : > { %v5055_v22 = vrot.slane %v5054_v62, 4  ;;  %v6091_v3 = vsel %vm14117_vm14, %v6089_v48, %v6090_v16  ;;  %v7356_v63 = vshll.u32 %v6717_v17, 16  ;;  %v7339_v33 = vrot.slane %v7337_v32, 4  ;;  %v3818_v27 = vld [vmem:[#allocation2 + $0x110] sm:$0x1]  ;;  %v12413_v36 = vld [vmem:[#allocation2 + $0x168] sm:$0xff]  }
 0x3c8   : > { %v5065_v23 = vrot.slane %v5064_v49, 4  ;;  %v11127_v40 = vcombine.low %v6088_v59, %v6091_v3  ;;  %v7342_v9 = vrot.slane %v7340_v26, 5  ;;  %v7637_v12 = vpop.permute.xlu0 %7636  ;;  %v7348_v0 = vrot.slane %v7346_v42, 5  ;;  %v4723_v18 = vld [vmem:[#allocation2 + $0x9c] sm:$0xf]  ;;  %v8362_v19 = vld [vmem:[#allocation3 + $0x1d0] sm:$0xff] }
 0x3c9   : > { %v5060_v51 = vsel %vm13514_vm8, %v5055_v22, %v5059_v47  ;;  %v7352_v55 = vrot.slane %v7350_v44, 4  ;;  %v7358_v5 = vrot.slane %v7356_v63, 5  ;;  %7714 = vst.msk [vmem:[#allocation3 + $0x2e8] sm:$0xff] %vm3723_vm0, %v7637_v12  ;;  %v11096_v15 = vrot.slane %v5792_v54, 9  ;;  %v8356_v25 = vld [vmem:[#allocation3 + $0x1a0] sm:$0xff]  ;;  %v12415_v17 = vld [vmem:[#allocation7 + $0xb8] sm:$0xff]  }
 0x3ca   : > { %v5070_v30 = vsel %vm13514_vm8, %v5065_v23, %v5069_v21  ;;  %6275 = vrot.lane.b32.xlu1 %v11127_v40, %s13089_s15  ;;  %v7343_v2 = vor.u32 %v7342_v9, %v7339_v33  ;;  %v6094_v56 = vrot.slane %v5793_v53, 5  ;;  %v6097_v61 = vrot.slane %v5794_v58, 5  ;;  %9001 = vmatmul.mubr.bf16.gmra.mrb[104].mxu0 %v8356_v25  ;;  %6628 = vst.msk [vmem:[#allocation3 + $0x338] sm:$0xff] %vm2631_vm15, %v12412_v38  ;;  %v12414_v21 = vld [vmem:[#allocation7 + $0xf8] sm:$0xff]   ;;  %v4724_v48 = vld [vmem:[#allocation2 + $0xa0] sm:$0xf] }
 0x3cb   : > { %v11048_v8 = vcombine.low %v5060_v51, %v5070_v30  ;;  %v7353_v4 = vor.u32 %v7352_v55, %v7348_v0  ;;  %v10961_v50 = vrot.slane %v3816_v28, 9  ;;  %v4093_v10 = vrot.slane %v3817_v31, 5  ;;  %9008 = vmatprep.mubr.bf16.mxu0 %v8362_v19  ;;  %2660 = vst.msk [vmem:[#allocation3 + $0x460] sm:$0xff] %vm2631_vm15, %v12413_v36  ;;  %v4725_v58 = vld [vmem:[#allocation2 + $0xa4] sm:$0x1]  ;;  %11915 = vmatprep.subr.bf16.mxu0 %v12414_v21  ;;  %v12418_v7 = vld [vmem:[#allocation2 + $0x174] sm:$0xff]  }
 0x3cc   : > { %v7344_v13 = vrot.slane %v7343_v2, 4  ;;  %v6095_v43 = vsel %vm14117_vm14, %v11096_v15, %v6094_v56  ;;  %v6096_v47 = vrot.slane %v6094_v56, 4  ;;  %v4096_v59 = vrot.slane %v3818_v27, 5  ;;  %v3680_v53 = vpop.permute.xlu1 %3679  ;;  %v6718_v28 = vld [vmem:[#allocation2 + $0x168] sm:$0xf]  ;;  %11916 = vmatpush3.bf16.msra.mxu0 %v12415_v17  ;;  %2661 = vst.msk [vmem:[#allocation3 + $0x488] sm:$0xff] %vm2631_vm15, %v12418_v7 }
 0x3cd   : > { %5690 = vst.msk [vmem:[#allocation3 + $0x1c8] sm:$0xff] %vm2631_vm15, %v11048_v8  ;;  %v7354_v62 = vrot.slane %v7353_v4, 4  ;;  %v5072_v16 = vshrl.u32 %v4723_v18, 16  ;;  %v5075_v54 = vshll.u32 %v4723_v18, 16  ;;  %v4094_v26 = vsel %vm14117_vm14, %v10961_v50, %v4093_v10  ;;  %v6719_v63 = vld [vmem:[#allocation2 + $0x16c] sm:$0xf] }
 0x3ce   : > { %6330 = vst.msk [vmem:[#allocation3 + $0x1c8] sm:$0xff] %vm3723_vm0, %v15076_v39  ;;  %v7349_v49 = vsel %vm13514_vm8, %v7344_v13, %v7348_v0  ;;  %v6098_v32 = vsel %vm14117_vm14, %v6096_v47, %v6097_v61  ;;  %v4095_v42 = vrot.slane %v4093_v10, 4  ;;  %3750 = vst.msk [vmem:[#allocation3 + $0x410] sm:$0xff] %vm3723_vm0, %v3680_v53  ;;  %v5081_v40 = vshll.u32 %v4724_v48, 16  ;;  %v7728_v9 = vld [vmem:[#allocation2 + $0x18] sm:$0xe] }
 0x3cf   : > { %v7359_v22 = vsel %vm13514_vm8, %v7354_v62, %v7358_v5  ;;  %v11128_v3 = vcombine.low %v6095_v43, %v6098_v32  ;;  %v5074_v39 = vrot.slane %v5072_v16, 4  ;;  %v5077_v44 = vrot.slane %v5075_v54, 5  ;;  %v7729_v27 = vld [vmem:[#allocation2 + $0x1c] sm:$0xf]  ;;  %v6720_v0 = vld [vmem:[#allocation2 + $0x170] sm:$0x1]  ;;  %v15390_v32 = vpop.permute.xlu0 %4611 }
 0x3d0   : > { %v11190_v31 = vcombine.low %v7349_v49, %v7359_v22  ;;  %v4097_v23 = vsel %vm14117_vm14, %v4095_v42, %v4096_v59  ;;  %v5085_v33 = vshrl.u32 %v4724_v48, 16  ;;  %v5091_v51 = vshll.u32 %v4725_v58, 16  ;;  %v12417_v5 = vld [vmem:[#allocation2 + $0x12c] sm:$0xff]   ;;  %v7730_v56 = vld [vmem:[#allocation2 + $0x20] sm:$0x1]  ;;  %v12419_v22 = vld [vmem:[#allocation2 + $0x138] sm:$0xff]  }
 0x3d1   : > { %6277 = vrot.lane.b32.xlu1 %v11128_v3, %s13089_s15  ;;  %v10993_v12 = vcombine.low %v4094_v26, %v4097_v23  ;;  %v5078_v52 = vor.u32 %v5077_v44, %v5074_v39  ;;  %v7361_v55 = vshrl.u32 %v6718_v28, 16  ;;  %v5083_v38 = vrot.slane %v5081_v40, 5  ;;  %v3819_v4 = vld [vmem:[#allocation2 + $0x114] sm:$0xe]  ;;  %6629 = vst.msk [vmem:[#allocation3 + $0x360] sm:$0xff] %vm2631_vm15, %v12417_v5  ;;  %v12420_v3 = vld [vmem:[#allocation2 + $0x180] sm:$0xff]  }
 0x3d2   : > { %7650 = vrot.lane.b32.xlu0 %v11190_v31, %s13089_s15  ;;  %v5087_v30 = vrot.slane %v5085_v33, 4  ;;  %v7364_v2 = vshll.u32 %v6718_v28, 16  ;;  %v7370_v15 = vshll.u32 %v6719_v63, 16  ;;  %v5093_v25 = vrot.slane %v5091_v51, 5  ;;  %v3820_v43 = vld [vmem:[#allocation2 + $0x118] sm:$0xf] }
 0x3d3   : > { %4323 = vst.msk [vmem:[#allocation3 + $0x328] sm:$0xff] %vm2631_vm15, %v10993_v12  ;;  %v5079_v18 = vrot.slane %v5078_v52, 4  ;;  %v7363_v36 = vrot.slane %v7361_v55, 4  ;;  %v7374_v8 = vshrl.u32 %v6719_v63, 16  ;;  %v7380_v13 = vshll.u32 %v6720_v0, 16  ;;  %6630 = vst.msk [vmem:[#allocation3 + $0x388] sm:$0xff] %vm2631_vm15, %v12419_v22 }
 0x3d4   : > { %4675 = vst.msk [vmem:[#allocation3 + $0x328] sm:$0xff] %vm3723_vm0, %v15106_v41  ;;  %v5088_v61 = vor.u32 %v5087_v30, %v5083_v38  ;;  %v7366_v50 = vrot.slane %v7364_v2, 5  ;;  %v7372_v19 = vrot.slane %v7370_v15, 5  ;;  %v11197_v21 = vrot.slane %v7728_v9, 9  ;;  %v3821_v62 = vld [vmem:[#allocation2 + $0x11c] sm:$0x1] }
 0x3d5   : > { %v5084_v47 = vsel %vm13514_vm8, %v5079_v18, %v5083_v38  ;;  %v7376_v10 = vrot.slane %v7374_v8, 4  ;;  %v7922_v17 = vrot.slane %v7729_v27, 5  ;;  %v8361_v59 = vld [vmem:[#allocation3 + $0x1c8] sm:$0xff]  ;;  %v7382_v54 = vrot.slane %v7380_v13, 5  ;;  %v4726_v49 = vld [vmem:[#allocation2 + $0xa8] sm:$0xf]  ;;  %v15407_v18 = vpop.permute.xlu1 %6261 }
 0x3d6   : > { %v5089_v48 = vrot.slane %v5088_v61, 4  ;;  %v7367_v16 = vor.u32 %v7366_v50, %v7363_v36  ;;  %v7925_v53 = vrot.slane %v7730_v56, 5  ;;  %9009 = vmatmul.mubr.bf16.gmra.mrb[108].mxu0 %v8361_v59  ;;  %v8367_v41 = vld [vmem:[#allocation3 + $0x1f8] sm:$0xff]  ;;  %v10962_v28 = vrot.slane %v3819_v4, 9  ;;  %v4728_v27 = vld [vmem:[#allocation2 + $0xb0] sm:$0x1] }
 0x3d7   : > { %v7377_v26 = vor.u32 %v7376_v10, %v7372_v19  ;;  %v7923_v42 = vsel %vm14117_vm14, %v11197_v21, %v7922_v17  ;;  %v7924_v58 = vrot.slane %v7922_v17, 4  ;;  %9016 = vmatprep.mubr.bf16.mxu0 %v8367_v41  ;;  %v4100_v63 = vrot.slane %v3820_v43, 5  ;;  %v4727_v23 = vld [vmem:[#allocation2 + $0xac] sm:$0xf]  ;;  %2662 = vst.msk [vmem:[#allocation3 + $0x4b0] sm:$0xff] %vm2631_vm15, %v12420_v3  ;;  %v17282_v10 = vld [vmem:[#allocation14_spill] sm:$0xff] }
 0x3d8   : > { %v5094_v39 = vsel %vm13514_vm8, %v5089_v48, %v5093_v25  ;;  %v7368_v44 = vrot.slane %v7367_v16, 4  ;;  %v4103_v31 = vrot.slane %v3821_v62, 5  ;;  %v5096_v12 = vshrl.u32 %v4726_v49, 16  ;;  %v7733_v52 = vld [vmem:[#allocation2 + $0x2c] sm:$0x1]  ;;  %v17284_v17 = vld [vmem:[#allocation13_spill] sm:$0xff] }
 0x3d9   : > { %v11049_v40 = vcombine.low %v5084_v47, %v5094_v39  ;;  %v7378_v33 = vrot.slane %v7377_v26, 4  ;;  %v7926_v9 = vsel %vm14117_vm14, %v7924_v58, %v7925_v53  ;;  %v4101_v55 = vsel %vm14117_vm14, %v10962_v28, %v4100_v63  ;;  %v7734_v7 = vld [vmem:[#allocation2 + $0x30] sm:$0xe]  ;;  %v7735_v56 = vld [vmem:[#allocation2 + $0x34] sm:$0xf]  ;;  %v12421_v41 = vld [vmem:[#allocation2 + $0x144] sm:$0xff]  }
 0x3da   : > { %v7373_v51 = vsel %vm13514_vm8, %v7368_v44, %v7372_v19  ;;  %v11229_v0 = vcombine.low %v7923_v42, %v7926_v9  ;;  %v4102_v5 = vrot.slane %v4100_v63, 4  ;;  %v5098_v30 = vrot.slane %v5096_v12, 4  ;;  %v7736_v61 = vld [vmem:[#allocation2 + $0x38] sm:$0x1]  ;;  %v5795_v50 = vld [vmem:[#allocation2 + $0x174] sm:$0xe] }
 0x3db   : > { %5691 = vst.msk [vmem:[#allocation3 + $0x1f0] sm:$0xff] %vm2631_vm15, %v11049_v40  ;;  %v7383_v38 = vsel %vm13514_vm8, %v7378_v33, %v7382_v54  ;;  %v5099_v2 = vshll.u32 %v4726_v49, 16  ;;  %v5105_v15 = vshll.u32 %v4727_v23, 16  ;;  %v5109_v8 = vshrl.u32 %v4727_v23, 16  ;;  %v5796_v59 = vld [vmem:[#allocation2 + $0x178] sm:$0xf] }
 0x3dc   : > { %6331 = vst.msk [vmem:[#allocation3 + $0x1f0] sm:$0xff] %vm3723_vm0, %v15110_v1  ;;  %v11191_v25 = vcombine.low %v7373_v51, %v7383_v38  ;;  %v4104_v36 = vsel %vm14117_vm14, %v4102_v5, %v4103_v31  ;;  %v5115_v4 = vshll.u32 %v4728_v27, 16  ;;  %v7639_v19 = vpop.permute.xlu0 %7638  ;;  %v17283_v21 = vrot.slane %v17282_v10, 5  ;;  %v5797_v48 = vld [vmem:[#allocation2 + $0x17c] sm:$0x1]  ;;  %v15422_v26 = vpop.f32.mrb[0].mxu1 }
 0x3dd   : > { %8272 = vst.msk [vmem:[#allocation3 + $0x20] sm:$0xff] %vm2631_vm15, %v11229_v0  ;;  %v10994_v13 = vcombine.low %v4101_v55, %v4104_v36  ;;  %v5101_v43 = vrot.slane %v5099_v2, 5  ;;  %v5107_v47 = vrot.slane %v5105_v15, 5  ;;  %v17285_v62 = vrot.slane %v17284_v17, 9  ;;  %v6721_v3 = vld [vmem:[#allocation2 + $0x174] sm:$0xf] }
 0x3de   : > { %7715 = vst.msk [vmem:[#allocation3 + $0x310] sm:$0xff] %vm3723_vm0, %v7639_v19  ;;  %7652 = vrot.lane.b32.xlu0 %v11191_v25, %s13089_s15  ;;  %v5111_v16 = vrot.slane %v5109_v8, 4  ;;  %v5117_v54 = vrot.slane %v5115_v4, 5  ;;  %v7932_v53 = vrot.slane %v7733_v52, 5  ;;  %v11199_v49 = vrot.slane %v7734_v7, 9  ;;  %v12422_v39 = vld [vmem:[#allocation2 + $0x18c] sm:$0xff]  }
 0x3df   : > { %v7930_v1 = vsel %vm14117_vm14, %v17285_v62, %v17283_v21  ;;  %4324 = vst.msk [vmem:[#allocation3 + $0x350] sm:$0xff] %vm2631_vm15, %v10994_v13  ;;  %v5102_v42 = vor.u32 %v5101_v43, %v5098_v30  ;;  %v7936_v58 = vrot.slane %v7735_v56, 5  ;;  %v7939_v28 = vrot.slane %v7736_v61, 5  ;;  %v17286_v63 = vld [vmem:[#allocation15_spill] sm:$0xff]  ;;  %v6722_v33 = vld [vmem:[#allocation2 + $0x178] sm:$0xf] }
 0x3e0   : > { %v11097_v22 = vrot.slane %v5795_v50, 9  ;;  %4676 = vst.msk [vmem:[#allocation3 + $0x350] sm:$0xff] %vm3723_vm0, %v15132_v6  ;;  %v5112_v44 = vor.u32 %v5111_v16, %v5107_v47  ;;  %v7933_v31 = vsel %vm14117_vm14, %v17286_v63, %v7932_v53  ;;  %v6101_v23 = vrot.slane %v5796_v59, 5  ;;  %v15431_v9 = vpop.f32.mrb[1].mxu1  ;;  %v6723_v0 = vld [vmem:[#allocation2 + $0x17c] sm:$0x1] }
 0x3e1   : > { %v6104_v40 = vrot.slane %v5797_v48, 5  ;;  %6631 = vst.msk [vmem:[#allocation3 + $0x3b0] sm:$0xff] %vm2631_vm15, %v12421_v41  ;;  %v5103_v27 = vrot.slane %v5102_v42, 4  ;;  %v11230_v12 = vcombine.low %v7930_v1, %v7933_v31  ;;  %v7937_v52 = vsel %vm14117_vm14, %v11199_v49, %v7936_v58  ;;  %v3682_v6 = vpop.permute.xlu1 %3681  ;;  %2663 = vst.msk [vmem:[#allocation3 + $0x4d8] sm:$0xff] %vm2631_vm15, %v12422_v39  ;;  %v15436_v55 = vpop.f32.mrb[2].mxu1  ;;  %v8372_v17 = vld [vmem:[#allocation3 + $0x220] sm:$0xff] }
 0x3e2   : > { %v7938_v51 = vrot.slane %v7936_v58, 4  ;;  %v5113_v5 = vrot.slane %v5112_v44, 4  ;;  %v6102_v7 = vsel %vm14117_vm14, %v11097_v22, %v6101_v23  ;;  %v6103_v38 = vrot.slane %v6101_v23, 4  ;;  %v5798_v2 = vld [vmem:[#allocation2 + $0x180] sm:$0xe]  ;;  %3751 = vst.msk [vmem:[#allocation3 + $0x438] sm:$0xff] %vm3723_vm0, %v3682_v6 }
 0x3e3   : > { %v7385_v30 = vshrl.u32 %v6721_v3, 16  ;;  %v15441_v15 = vpop.f32.mrb[3].mxu1  ;;  %v5108_v25 = vsel %vm13514_vm8, %v5103_v27, %v5107_v47  ;;  %8273 = vst.msk [vmem:[#allocation3 + $0x48] sm:$0xff] %vm2631_vm15, %v11230_v12  ;;  %v7388_v8 = vshll.u32 %v6721_v3, 16  ;;  %v7394_v4 = vshll.u32 %v6722_v33, 16  ;;  %v8366_v50 = vld [vmem:[#allocation3 + $0x1f0] sm:$0xff] }
 0x3e4   : > { %v8308_v56 = vld [vmem:[#allocation3 + $0x20] sm:$0xff]  ;;  %v7940_v36 = vsel %vm14117_vm14, %v7938_v51, %v7939_v28  ;;  %v5799_v61 = vld [vmem:[#allocation2 + $0x184] sm:$0xf]  ;;  %v5118_v19 = vsel %vm13514_vm8, %v5113_v5, %v5117_v54  ;;  %v6105_v43 = vsel %vm14117_vm14, %v6103_v38, %v6104_v40  ;;  %v5800_v47 = vld [vmem:[#allocation2 + $0x188] sm:$0x1]  ;;  %9017 = vmatmul.mubr.bf16.gmra.mrb[112].mxu0 %v8366_v50  ;;  %v7398_v53 = vshrl.u32 %v6722_v33, 16  ;;  %v15469_v38 = vpop.permute.xlu0 %4613 }
 0x3e5   : > { %12121 = vmatprep.mubr.msk.bf16.mxu1 %vm2631_vm15, %v8308_v56  ;;  %v11231_v13 = vcombine.low %v7937_v52, %v7940_v36  ;;  %v7387_v10 = vrot.slane %v7385_v30, 4  ;;  %v4729_v21 = vld [vmem:[#allocation2 + $0xb4] sm:$0xf]  ;;  %v11050_v62 = vcombine.low %v5108_v25, %v5118_v19  ;;  %v11129_v1 = vcombine.low %v6102_v7, %v6105_v43  ;;  %v4730_v16 = vld [vmem:[#allocation2 + $0xb8] sm:$0xf]  ;;  %9024 = vmatprep.mubr.bf16.mxu0 %v8372_v17  ;;  %v15456_v58 = vpop.f32.mrb[4].mxu1 }
 0x3e6   : > { %v7390_v59 = vrot.slane %v7388_v8, 5  ;;  %v15453_v48 = vrot.slane %v7394_v4, 5  ;;  %v7404_v54 = vshll.u32 %v6723_v0, 16  ;;  %v11098_v49 = vrot.slane %v5798_v2, 9  ;;  %v12423_v42 = vld [vmem:[#allocation2 + $0x150] sm:$0xff]   ;;  %v15460_v63 = vpop.f32.mrb[5].mxu1 }
 0x3e7   : > { %8274 = vst.msk [vmem:[#allocation3 + $0x70] sm:$0xff] %vm2631_vm15, %v11231_v13  ;;  %v6108_v41 = vrot.slane %v5799_v61, 5  ;;  %5692 = vst.msk [vmem:[#allocation3 + $0x218] sm:$0xff] %vm2631_vm15, %v11050_v62  ;;  %6279 = vrot.lane.b32.xlu1 %v11129_v1, %s13089_s15  ;;  %v6111_v22 = vrot.slane %v5800_v47, 5  ;;  %v4731_v3 = vld [vmem:[#allocation2 + $0xbc] sm:$0x1] }
 0x3e8   : > { %v7391_v28 = vor.u32 %v7390_v59, %v7387_v10  ;;  %v5120_v39 = vshrl.u32 %v4729_v21, 16  ;;  %v5123_v44 = vshll.u32 %v4729_v21, 16  ;;  %6332 = vst.msk [vmem:[#allocation3 + $0x218] sm:$0xff] %vm3723_vm0, %v15138_v14  ;;  %v12372_v31 = vld [vmem:[#allocation7] sm:$0xff]   ;;  %v7400_v23 = vrot.slane %v7398_v53, 4  ;;  %v12375_v12 = vld [vmem:[#allocation7 + $0x48] sm:$0xff]  }
 0x3e9   : > { %v7406_v40 = vrot.slane %v7404_v54, 5  ;;  %v6109_v33 = vsel %vm14117_vm14, %v11098_v49, %v6108_v41  ;;  %v6110_v27 = vrot.slane %v6108_v41, 4  ;;  %6632 = vst.msk [vmem:[#allocation3 + $0x3d8] sm:$0xff] %vm2631_vm15, %v12423_v42  ;;  %v15467_v52 = vpop.f32.mrb[6].mxu1  ;;  %v5129_v5 = vshll.u32 %v4730_v16, 16  ;;  %v12376_v59 = vld [vmem:[#allocation7 + $0x8] sm:$0xff]  }
 0x3ea   : > { %v7392_v51 = vrot.slane %v7391_v28, 4  ;;  %v5122_v0 = vrot.slane %v5120_v39, 4  ;;  %v5125_v6 = vrot.slane %v5123_v44, 5  ;;  %v6724_v7 = vld [vmem:[#allocation2 + $0x180] sm:$0xf]  ;;  %v8313_v14 = vld [vmem:[#allocation3 + $0x48] sm:$0xff]  ;;  %v7401_v30 = vor.u32 %v7400_v23, %v15453_v48 }
 0x3eb   : > { %v6112_v2 = vsel %vm14117_vm14, %v6110_v27, %v6111_v22  ;;  %v5133_v56 = vshrl.u32 %v4730_v16, 16  ;;  %v5139_v25 = vshll.u32 %v4731_v3, 16  ;;  %v6725_v36 = vld [vmem:[#allocation2 + $0x184] sm:$0xf]  ;;  %v15474_v8 = vpop.f32.mrb[7].mxu1  ;;  %12122 = vmatmul.mubr.msk.bf16.vlgmr.msra.gmra.mrb[64].mxu1 %vm2631_vm15, %v8313_v14  ;;  %v15480_v19 = vrot.slane %v5129_v5, 5  ;;  %v15487_v22 = vpop.permute.xlu1 %6263 }
 0x3ec   : > { %v7397_v4 = vsel %vm13514_vm8, %v7392_v51, %v15453_v48  ;;  %v11130_v61 = vcombine.low %v6109_v33, %v6112_v2  ;;  %v5126_v50 = vor.u32 %v5125_v6, %v5122_v0  ;;  %v6726_v13 = vld [vmem:[#allocation2 + $0x188] sm:$0x1]  ;;  %v15482_v43 = vld [vmem:[#allocation2 + $0x3c] sm:$0xe]  ;;  %11790 = vmatpush3.bf16.msra.mxu1 %v12372_v31  ;;  %v7402_v10 = vrot.slane %v7401_v30, 4  ;;  %v12380_v28 = vld [vmem:[#allocation7 + $0x50] sm:$0xff]  }
 0x3ed   : > { %v5135_v47 = vrot.slane %v5133_v56, 4  ;;  %v5141_v21 = vrot.slane %v5139_v25, 5  ;;  %v7409_v17 = vshrl.u32 %v6724_v7, 16  ;;  %v7738_v62 = vld [vmem:[#allocation2 + $0x40] sm:$0xf]  ;;  %11791 = vmatprep.subr.bf16.mxu1 %v12375_v12  ;;  %v7412_v54 = vshll.u32 %v6724_v7, 16 }
 0x3ee   : > { %v15484_v1 = vld [vmem:[#allocation2 + $0x44] sm:$0x1]  ;;  %v7740_v16 = vld [vmem:[#allocation2 + $0x48] sm:$0xe]  ;;  %6281 = vrot.lane.b32.xlu1 %v11130_v61, %s13089_s15  ;;  %v5127_v48 = vrot.slane %v5126_v50, 4  ;;  %v7418_v49 = vshll.u32 %v6725_v36, 16  ;;  %v7407_v3 = vsel %vm13514_vm8, %v7402_v10, %v7406_v40 }
 0x3ef   : > { %v8318_v53 = vld [vmem:[#allocation3 + $0x70] sm:$0xff]  ;;  %v7422_v41 = vshrl.u32 %v6725_v36, 16  ;;  %v7741_v42 = vld [vmem:[#allocation2 + $0x4c] sm:$0xf]  ;;  %v5136_v39 = vor.u32 %v5135_v47, %v15480_v19  ;;  %v7411_v44 = vrot.slane %v7409_v17, 4  ;;  %v7428_v31 = vshll.u32 %v6726_v13, 16  ;;  %v7641_v7 = vpop.permute.xlu0 %7640 }
 0x3f0   : > { %12125 = vmatprep.mubr.msk.bf16.mxu1 %vm2631_vm15, %v8318_v53  ;;  %v15493_v23 = vld [vmem:[#allocation2 + $0x50] sm:$0x1]  ;;  %v15495_v33 = vpop.f32.mrb[8].mxu1  ;;  %v12425_v27 = vld [vmem:[#allocation2 + $0x15c] sm:$0xff]   ;;  %v11192_v12 = vcombine.low %v7397_v4, %v7407_v3  ;;  %v5132_v51 = vsel %vm13514_vm8, %v5127_v48, %v15480_v19  ;;  %v7414_v0 = vrot.slane %v7412_v54, 5  ;;  %v15500_v6 = vrot.slane %v7418_v49, 5  ;;  %11792 = vmatpush3.bf16.msra.mxu1 %v12376_v59 }
 0x3f1   : > { %v15502_v5 = vld [vmem:[#allocation2 + $0x120] sm:$0xe]  ;;  %v8371_v40 = vld [vmem:[#allocation3 + $0x218] sm:$0xff]  ;;  %v15504_v14 = vpop.f32.mrb[9].mxu1  ;;  %v5137_v30 = vrot.slane %v5136_v39, 4  ;;  %v7424_v2 = vrot.slane %v7422_v41, 4  ;;  %11793 = vmatprep.subr.bf16.mxu1 %v12380_v28 }
 0x3f2   : > { %v7430_v56 = vrot.slane %v7428_v31, 5  ;;  %v11200_v25 = vrot.slane %v15482_v43, 9  ;;  %v3823_v36 = vld [vmem:[#allocation2 + $0x124] sm:$0xf]  ;;  %9025 = vmatmul.mubr.bf16.gmra.mrb[116].mxu0 %v8371_v40  ;;  %7716 = vst.msk [vmem:[#allocation3 + $0x338] sm:$0xff] %vm3723_vm0, %v7641_v7  ;;  %7654 = vrot.lane.b32.xlu0 %v11192_v12, %s13089_s15  ;;  %v7415_v61 = vor.u32 %v7414_v0, %v7411_v44  ;;  %v7943_v50 = vrot.slane %v7738_v62, 5 }
 0x3f3   : > { %v12381_v4 = vld [vmem:[#allocation7 + $0x10] sm:$0xff]   ;;  %6633 = vst.msk [vmem:[#allocation3 + $0x400] sm:$0xff] %vm2631_vm15, %v12425_v27  ;;  %v7946_v19 = vrot.slane %v15484_v1, 5  ;;  %v11201_v13 = vrot.slane %v7740_v16, 9  ;;  %v12384_v10 = vld [vmem:[#allocation7 + $0x58] sm:$0xff]   ;;  %v8377_v47 = vld [vmem:[#allocation3 + $0x248] sm:$0xff]  ;;  %v5142_v43 = vsel %vm13514_vm8, %v5137_v30, %v5141_v21  ;;  %v7425_v59 = vor.u32 %v7424_v2, %v15500_v6  ;;  %v3684_v3 = vpop.permute.xlu1 %3683 }
 0x3f4   : > { %v15511_v17 = vpop.f32.mrb[10].mxu1  ;;  %v7950_v53 = vrot.slane %v7741_v42, 5  ;;  %v7953_v48 = vrot.slane %v15493_v23, 5  ;;  %v3824_v54 = vld [vmem:[#allocation2 + $0x128] sm:$0x1]  ;;  %9032 = vmatprep.mubr.bf16.mxu0 %v8377_v47  ;;  %v11051_v62 = vcombine.low %v5132_v51, %v5142_v43  ;;  %v7416_v1 = vrot.slane %v7415_v61, 4  ;;  %11794 = vmatpush3.bf16.msra.mxu1 %v12381_v4 }
 0x3f5   : > { %v15517_v49 = vpop.f32.mrb[11].mxu1  ;;  %v7944_v16 = vsel %vm14117_vm14, %v11200_v25, %v7943_v50  ;;  %v7945_v41 = vrot.slane %v7943_v50, 4  ;;  %v4732_v28 = vld [vmem:[#allocation2 + $0xc0] sm:$0xf]  ;;  %v7426_v39 = vrot.slane %v7425_v59, 4  ;;  %v10963_v42 = vrot.slane %v15502_v5, 9  ;;  %11795 = vmatprep.subr.bf16.mxu1 %v12384_v10 }
 0x3f6   : > { %v7951_v21 = vsel %vm14117_vm14, %v11201_v13, %v7950_v53  ;;  %v7952_v44 = vrot.slane %v7950_v53, 4  ;;  %v7743_v31 = vld [vmem:[#allocation2 + $0x54] sm:$0xe]  ;;  %v7744_v23 = vld [vmem:[#allocation2 + $0x58] sm:$0xf]  ;;  %v12385_v27 = vld [vmem:[#allocation7 + $0x18] sm:$0xff]   ;;  %v7421_v12 = vsel %vm13514_vm8, %v7416_v1, %v15500_v6 }
 0x3f7   : > { %3752 = vst.msk [vmem:[#allocation3 + $0x460] sm:$0xff] %vm3723_vm0, %v3684_v3  ;;  %v7947_v51 = vsel %vm14117_vm14, %v7945_v41, %v7946_v19  ;;  %v4107_v0 = vrot.slane %v3823_v36, 5  ;;  %v4110_v40 = vrot.slane %v3824_v54, 5  ;;  %v4733_v7 = vld [vmem:[#allocation2 + $0xc4] sm:$0xf]  ;;  %v12390_v5 = vld [vmem:[#allocation7 + $0x60] sm:$0xff]   ;;  %v7431_v30 = vsel %vm13514_vm8, %v7426_v39, %v7430_v56 }
 0x3f8   : > { %5693 = vst.msk [vmem:[#allocation3 + $0x240] sm:$0xff] %vm2631_vm15, %v11051_v62  ;;  %v11232_v2 = vcombine.low %v7944_v16, %v7947_v51  ;;  %v7954_v25 = vsel %vm14117_vm14, %v7952_v44, %v7953_v48  ;;  %v4734_v4 = vld [vmem:[#allocation2 + $0xc8] sm:$0x1]  ;;  %v5144_v6 = vshrl.u32 %v4732_v28, 16  ;;  %v7745_v61 = vld [vmem:[#allocation2 + $0x5c] sm:$0x1]  ;;  %v11193_v36 = vcombine.low %v7421_v12, %v7431_v30  ;;  %11796 = vmatpush3.bf16.msra.mxu1 %v12385_v27 }
 0x3f9   : > { %6333 = vst.msk [vmem:[#allocation3 + $0x240] sm:$0xff] %vm3723_vm0, %v15172_v46  ;;  %v12426_v50 = vld [vmem:[#allocation2 + $0x168] sm:$0xff]   ;;  %v15537_v19 = vpop.f32.mrb[12].mxu1  ;;  %v11233_v13 = vcombine.low %v7951_v21, %v7954_v25  ;;  %v4108_v10 = vsel %vm14117_vm14, %v10963_v42, %v4107_v0  ;;  %v4109_v47 = vrot.slane %v4107_v0, 4  ;;  %v7746_v46 = vld [vmem:[#allocation2 + $0x60] sm:$0xe]  ;;  %11797 = vmatprep.subr.bf16.mxu1 %v12390_v5 }
 0x3fa   : > { %v7747_v43 = vld [vmem:[#allocation2 + $0x64] sm:$0xf]  ;;  %v15541_v59 = vpop.f32.mrb[13].mxu1  ;;  %8275 = vst.msk [vmem:[#allocation3 + $0x98] sm:$0xff] %vm2631_vm15, %v11232_v2  ;;  %v5146_v56 = vrot.slane %v5144_v6, 4  ;;  %v5147_v53 = vshll.u32 %v4732_v28, 16  ;;  %7656 = vrot.lane.b32.xlu0 %v11193_v36, %s13089_s15 }
 0x3fb   : > { %v5153_v48 = vshll.u32 %v4733_v7, 16  ;;  %v5157_v54 = vshrl.u32 %v4733_v7, 16  ;;  %v15544_v62 = vld [vmem:[#allocation2 + $0x68] sm:$0x1]  ;;  %v5801_v1 = vld [vmem:[#allocation2 + $0x18c] sm:$0xe]  ;;  %v4111_v39 = vsel %vm14117_vm14, %v4109_v47, %v4110_v40  ;;  %v15557_v40 = vpop.permute.xlu0 %4615 }
 0x3fc   : > { %v5802_v16 = vld [vmem:[#allocation2 + $0x190] sm:$0xf]  ;;  %6634 = vst.msk [vmem:[#allocation3 + $0x428] sm:$0xff] %vm2631_vm15, %v12426_v50  ;;  %v15547_v3 = vpop.f32.mrb[14].mxu1  ;;  %8276 = vst.msk [vmem:[#allocation3 + $0xc0] sm:$0xff] %vm2631_vm15, %v11233_v13  ;;  %v5163_v28 = vshll.u32 %v4734_v4, 16  ;;  %v10995_v27 = vcombine.low %v4108_v10, %v4111_v39 }
 0x3fd   : > { %v12391_v41 = vld [vmem:[#allocation7 + $0x20] sm:$0xff]   ;;  %v11202_v21 = vrot.slane %v7743_v31, 9  ;;  %v7957_v44 = vrot.slane %v7744_v23, 5  ;;  %v12394_v42 = vld [vmem:[#allocation7 + $0x68] sm:$0xff]   ;;  %v15553_v12 = vpop.f32.mrb[15].mxu1  ;;  %v5149_v51 = vrot.slane %v5147_v53, 5 }
 0x3fe   : > { %v5155_v0 = vrot.slane %v5153_v48, 5  ;;  %v5159_v7 = vrot.slane %v5157_v54, 4  ;;  %v5803_v30 = vld [vmem:[#allocation2 + $0x194] sm:$0x1]  ;;  %v5165_v2 = vrot.slane %v5163_v28, 5  ;;  %v7960_v50 = vrot.slane %v7745_v61, 5  ;;  %11798 = vmatpush3.bf16.msra.mxu1 %v12391_v41 }
 0x3ff   : > { %v7958_v25 = vsel %vm14117_vm14, %v11202_v21, %v7957_v44  ;;  %v7959_v6 = vrot.slane %v7957_v44, 4  ;;  %v6727_v36 = vld [vmem:[#allocation2 + $0x18c] sm:$0xf]  ;;  %4325 = vst.msk [vmem:[#allocation3 + $0x378] sm:$0xff] %vm2631_vm15, %v10995_v27  ;;  %v5150_v31 = vor.u32 %v5149_v51, %v5146_v56  ;;  %v11203_v5 = vrot.slane %v7746_v46, 9  ;;  %v8382_v10 = vld [vmem:[#allocation3 + $0x270] sm:$0xff]  ;;  %11799 = vmatprep.subr.bf16.mxu1 %v12394_v42 }
 0x400   : > { %v5160_v23 = vor.u32 %v5159_v7, %v5155_v0  ;;  %v7964_v4 = vrot.slane %v7747_v43, 5  ;;  %v15560_v13 = vld [vmem:[#allocation2 + $0x190] sm:$0xf]  ;;  %4677 = vst.msk [vmem:[#allocation3 + $0x378] sm:$0xff] %vm3723_vm0, %v15194_v57  ;;  %v7967_v61 = vrot.slane %v15544_v62, 5  ;;  %v11099_v53 = vrot.slane %v5801_v1, 9 }
 0x401   : > { %v7961_v47 = vsel %vm14117_vm14, %v7959_v6, %v7960_v50  ;;  %v6115_v48 = vrot.slane %v5802_v16, 5  ;;  %v12395_v54 = vld [vmem:[#allocation7 + $0x28] sm:$0xff]   ;;  %v8376_v56 = vld [vmem:[#allocation3 + $0x240] sm:$0xff]  ;;  %v5151_v39 = vrot.slane %v5150_v31, 4  ;;  %v12400_v57 = vld [vmem:[#allocation7 + $0x70] sm:$0xff]   ;;  %v15571_v44 = vpop.f32.mrb[16].mxu1 }
 0x402   : > { %v5161_v46 = vrot.slane %v5160_v23, 4  ;;  %v11234_v43 = vcombine.low %v7958_v25, %v7961_v47  ;;  %v7965_v41 = vsel %vm14117_vm14, %v11203_v5, %v7964_v4  ;;  %v6729_v28 = vld [vmem:[#allocation2 + $0x194] sm:$0x1]  ;;  %v15569_v21 = vld [vmem:[#allocation2 + $0x198] sm:$0xe]  ;;  %9033 = vmatmul.mubr.bf16.gmra.mrb[120].mxu0 %v8376_v56  ;;  %v8323_v62 = vld [vmem:[#allocation3 + $0x98] sm:$0xff]  ;;  %v15583_v47 = vpop.permute.xlu1 %6265  ;;  %11800 = vmatpush3.bf16.msra.mxu1 %v12395_v54  ;;  %v7643_v56 = vpop.permute.xlu0 %7642 }
 0x403   : > { %v12427_v27 = vld [vmem:[#allocation2 + $0x174] sm:$0xff]   ;;  %v7966_v1 = vrot.slane %v7964_v4, 4  ;;  %v6116_v16 = vsel %vm14117_vm14, %v11099_v53, %v6115_v48  ;;  %v6117_v42 = vrot.slane %v6115_v48, 4  ;;  %v6118_v51 = vrot.slane %v5803_v30, 5  ;;  %v5805_v7 = vld [vmem:[#allocation2 + $0x19c] sm:$0xf]  ;;  %9040 = vmatprep.mubr.bf16.mxu0 %v8382_v10  ;;  %12126 = vmatmul.mubr.msk.bf16.gmra.mrb[68].mxu1 %vm2631_vm15, %v8323_v62 }
 0x404   : > { %v15575_v25 = vld [vmem:[#allocation2 + $0x1a0] sm:$0x1]  ;;  %v8328_v6 = vld [vmem:[#allocation3 + $0xc0] sm:$0xff]  ;;  %v5156_v50 = vsel %vm13514_vm8, %v5151_v39, %v5155_v0  ;;  %v5166_v31 = vsel %vm13514_vm8, %v5161_v46, %v5165_v2  ;;  %8277 = vst.msk [vmem:[#allocation3 + $0xe8] sm:$0xff] %vm2631_vm15, %v11234_v43  ;;  %v7433_v23 = vshrl.u32 %v6727_v36, 16  ;;  %v7436_v5 = vshll.u32 %v6727_v36, 16  ;;  %11801 = vmatprep.subr.bf16.mxu1 %v12400_v57 }
 0x405   : > { %v3825_v4 = vld [vmem:[#allocation2 + $0x12c] sm:$0xe]  ;;  %v15585_v30 = vpop.f32.mrb[17].mxu1  ;;  %6635 = vst.msk [vmem:[#allocation3 + $0x450] sm:$0xff] %vm2631_vm15, %v12427_v27  ;;  %12129 = vmatprep.mubr.msk.bf16.mxu1 %vm2631_vm15, %v8328_v6  ;;  %v11052_v10 = vcombine.low %v5156_v50, %v5166_v31  ;;  %v7968_v0 = vsel %vm14117_vm14, %v7966_v1, %v7967_v61  ;;  %v6119_v2 = vsel %vm14117_vm14, %v6117_v42, %v6118_v51  ;;  %v7442_v53 = vshll.u32 %v15560_v13, 16  ;;  %v12401_v36 = vld [vmem:[#allocation7 + $0x30] sm:$0xff]  }
 0x406   : > { %v3826_v48 = vld [vmem:[#allocation2 + $0x130] sm:$0xf]  ;;  %v15594_v39 = vpop.f32.mrb[18].mxu1  ;;  %v11235_v46 = vcombine.low %v7965_v41, %v7968_v0  ;;  %v11131_v43 = vcombine.low %v6116_v16, %v6119_v2  ;;  %v7435_v27 = vrot.slane %v7433_v23, 4  ;;  %v7438_v62 = vrot.slane %v7436_v5, 5  ;;  %v12408_v50 = vld [vmem:[#allocation7 + $0x78] sm:$0xff]   ;;  %11802 = vmatpush3.bf16.msra.mxu1 %v12401_v36 }
 0x407   : > { %v3827_v6 = vld [vmem:[#allocation2 + $0x134] sm:$0x1]  ;;  %7717 = vst.msk [vmem:[#allocation3 + $0x360] sm:$0xff] %vm3723_vm0, %v7643_v56  ;;  %v15597_v61 = vpop.f32.mrb[19].mxu1  ;;  %v15600_v1 = vrot.slane %v7442_v53, 5  ;;  %v7446_v54 = vshrl.u32 %v15560_v13, 16  ;;  %11803 = vmatprep.subr.bf16.mxu1 %v12408_v50 }
 0x408   : > { %5694 = vst.msk [vmem:[#allocation3 + $0x268] sm:$0xff] %vm2631_vm15, %v11052_v10  ;;  %v7452_v42 = vshll.u32 %v6729_v28, 16  ;;  %v11100_v51 = vrot.slane %v15569_v21, 9  ;;  %v4735_v41 = vld [vmem:[#allocation2 + $0xe4] sm:$0xf]  ;;  %8278 = vst.msk [vmem:[#allocation3 + $0x110] sm:$0xff] %vm2631_vm15, %v11235_v46  ;;  %6283 = vrot.lane.b32.xlu1 %v11131_v43, %s13089_s15  ;;  %v7439_v57 = vor.u32 %v7438_v62, %v7435_v27  ;;  %v3686_v43 = vpop.permute.xlu1 %3685 }
 0x409   : > { %6334 = vst.msk [vmem:[#allocation3 + $0x268] sm:$0xff] %vm3723_vm0, %v15196_v34  ;;  %v6122_v16 = vrot.slane %v5805_v7, 5  ;;  %v6125_v31 = vrot.slane %v15575_v25, 5  ;;  %v10964_v23 = vrot.slane %v3825_v4, 9  ;;  %v4736_v5 = vld [vmem:[#allocation2 + $0xe8] sm:$0xf] }
 0x40a   : > { %v7448_v10 = vrot.slane %v7446_v54, 4  ;;  %v7454_v0 = vrot.slane %v7452_v42, 5  ;;  %v4114_v13 = vrot.slane %v3826_v48, 5  ;;  %v4117_v28 = vrot.slane %v3827_v6, 5  ;;  %v12409_v21 = vld [vmem:[#allocation7 + $0x38] sm:$0xff]   ;;  %v12416_v46 = vld [vmem:[#allocation7 + $0x100] sm:$0xff]  }
 0x40b   : > { %v7440_v2 = vrot.slane %v7439_v57, 4  ;;  %v6123_v34 = vsel %vm14117_vm14, %v11100_v51, %v6122_v16  ;;  %v6124_v53 = vrot.slane %v6122_v16, 4  ;;  %v5168_v56 = vshrl.u32 %v4735_v41, 16  ;;  %v12428_v7 = vld [vmem:[#allocation2 + $0x180] sm:$0xff]   ;;  %v15611_v27 = vpop.f32.mrb[20].mxu1  ;;  %v8333_v25 = vld [vmem:[#allocation3 + $0xe8] sm:$0xff]  ;;  %11804 = vmatpush3.bf16.msra.mxu1 %v12409_v21 }
 0x40c   : > { %17287 = vst [vmem:[#allocation19_spill] sm:$0xff] %v15611_v27  ;;  %v7449_v4 = vor.u32 %v7448_v10, %v15600_v1  ;;  %v4115_v48 = vsel %vm14117_vm14, %v10964_v23, %v4114_v13  ;;  %v4116_v36 = vrot.slane %v4114_v13, 4  ;;  %v4737_v62 = vld [vmem:[#allocation2 + $0xec] sm:$0x1]  ;;  %v5171_v6 = vshll.u32 %v4735_v41, 16  ;;  %3753 = vst.msk [vmem:[#allocation3 + $0x488] sm:$0xff] %vm3723_vm0, %v3686_v43  ;;  %12130 = vmatmul.mubr.msk.bf16.gmra.mrb[72].mxu1 %vm2631_vm15, %v8333_v25 }
 0x40d   : > { %v15617_v54 = vpop.f32.mrb[21].mxu1  ;;  %v7445_v50 = vsel %vm13514_vm8, %v7440_v2, %v15600_v1  ;;  %v6126_v42 = vsel %vm14117_vm14, %v6124_v53, %v6125_v31  ;;  %v5170_v51 = vrot.slane %v5168_v56, 4  ;;  %v5177_v57 = vshll.u32 %v4736_v5, 16  ;;  %v6730_v16 = vld [vmem:[#allocation2 + $0x198] sm:$0xf]  ;;  %6636 = vst.msk [vmem:[#allocation3 + $0x478] sm:$0xff] %vm2631_vm15, %v12428_v7  ;;  %12153 = vmatprep.subr.bf16.mxu1 %v12416_v46 }
 0x40e   : > { %17288 = vst [vmem:[#allocation20_spill] sm:$0xff] %v15617_v54  ;;  %v15626_v23 = vpop.f32.mrb[22].mxu1  ;;  %v7450_v41 = vrot.slane %v7449_v4, 4  ;;  %v11132_v10 = vcombine.low %v6123_v34, %v6126_v42  ;;  %v4118_v13 = vsel %vm14117_vm14, %v4116_v36, %v4117_v28  ;;  %v5173_v43 = vrot.slane %v5171_v6, 5  ;;  %v6731_v25 = vld [vmem:[#allocation2 + $0x19c] sm:$0xf] }
 0x40f   : > { %17289 = vst [vmem:[#allocation21_spill] sm:$0xff] %v15626_v23  ;;  %v7749_v54 = vld [vmem:[#allocation2 + $0x6c] sm:$0xe]  ;;  %v15630_v1 = vpop.f32.mrb[23].mxu1  ;;  %v10996_v2 = vcombine.low %v4115_v48, %v4118_v13  ;;  %v15632_v31 = vrot.slane %v5177_v57, 5  ;;  %v5181_v53 = vshrl.u32 %v4736_v5, 16 }
 0x410   : > { %17290 = vst [vmem:[#allocation22_spill] sm:$0xff] %v15630_v1  ;;  %v5187_v56 = vshll.u32 %v4737_v62, 16  ;;  %v7750_v27 = vld [vmem:[#allocation2 + $0x70] sm:$0xf]  ;;  %v8338_v7 = vld [vmem:[#allocation3 + $0x110] sm:$0xff]  ;;  %v7455_v34 = vsel %vm13514_vm8, %v7450_v41, %v7454_v0  ;;  %6285 = vrot.lane.b32.xlu1 %v11132_v10, %s13089_s15  ;;  %v5174_v28 = vor.u32 %v5173_v43, %v5170_v51  ;;  %v7457_v36 = vshrl.u32 %v6730_v16, 16 }
 0x411   : > { %v6732_v4 = vld [vmem:[#allocation2 + $0x1a0] sm:$0x1]  ;;  %v7460_v6 = vshll.u32 %v6730_v16, 16  ;;  %v7751_v21 = vld [vmem:[#allocation2 + $0x74] sm:$0x1]  ;;  %v8381_v42 = vld [vmem:[#allocation3 + $0x268] sm:$0xff]  ;;  %12133 = vmatprep.mubr.msk.bf16.mxu1 %vm2631_vm15, %v8338_v7  ;;  %v11194_v48 = vcombine.low %v7445_v50, %v7455_v34 }
 0x412   : > { %4326 = vst.msk [vmem:[#allocation3 + $0x3a0] sm:$0xff] %vm2631_vm15, %v10996_v2  ;;  %v5183_v5 = vrot.slane %v5181_v53, 4  ;;  %v5189_v62 = vrot.slane %v5187_v56, 5  ;;  %v7466_v46 = vshll.u32 %v6731_v25, 16  ;;  %v7752_v57 = vld [vmem:[#allocation2 + $0x78] sm:$0xe]  ;;  %9041 = vmatmul.mubr.bf16.gmra.mrb[124].mxu0 %v8381_v42 }
 0x413   : > { %v9501_v13 = vld [vmem:[#allocation3 + $0x298] sm:$0xff]  ;;  %4678 = vst.msk [vmem:[#allocation3 + $0x3a0] sm:$0xff] %vm3723_vm0, %v15237_v37  ;;  %v5175_v0 = vrot.slane %v5174_v28, 4  ;;  %v7459_v51 = vrot.slane %v7457_v36, 4  ;;  %v7462_v41 = vrot.slane %v7460_v6, 5  ;;  %v7470_v16 = vshrl.u32 %v6731_v25, 16  ;;  %7658 = vrot.lane.b32.xlu0 %v11194_v48, %s13089_s15 }
 0x414   : > { %v7753_v10 = vld [vmem:[#allocation2 + $0x7c] sm:$0xf]  ;;  %10114 = vmatprep.mubr.bf16.mxu0 %v9501_v13  ;;  %v5184_v50 = vor.u32 %v5183_v5, %v15632_v31  ;;  %v7468_v43 = vrot.slane %v7466_v46, 5  ;;  %v7476_v2 = vshll.u32 %v6732_v4, 16  ;;  %v11204_v53 = vrot.slane %v7749_v54, 9  ;;  %v15643_v7 = vpop.f32.mrb[24].mxu1  ;;  %v15648_v5 = vpop.permute.xlu0 %4617 }
 0x415   : > { %v7754_v56 = vld [vmem:[#allocation2 + $0x80] sm:$0x1]  ;;  %17291 = vst [vmem:[#allocation14_spill] sm:$0xff] %v15643_v7  ;;  %v5180_v37 = vsel %vm13514_vm8, %v5175_v0, %v15632_v31  ;;  %v7463_v34 = vor.u32 %v7462_v41, %v7459_v51  ;;  %v7472_v28 = vrot.slane %v7470_v16, 4  ;;  %v7971_v36 = vrot.slane %v7750_v27, 5  ;;  %v15650_v4 = vpop.f32.mrb[25].mxu1 }
 0x416   : > { %v3828_v25 = vld [vmem:[#allocation2 + $0x138] sm:$0xe]  ;;  %v3829_v6 = vld [vmem:[#allocation2 + $0x13c] sm:$0xf]  ;;  %v5185_v42 = vrot.slane %v5184_v50, 4  ;;  %v7478_v13 = vrot.slane %v7476_v2, 5 }
 0x417   : > { %v7974_v48 = vrot.slane %v7751_v21, 5  ;;  %v11205_v1 = vrot.slane %v7752_v57, 9  ;;  %17292 = vst [vmem:[#allocation13_spill] sm:$0xff] %v15650_v4  ;;  %v12430_v54 = vld [vmem:[#allocation2 + $0x18c] sm:$0xff]   ;;  %v7464_v46 = vrot.slane %v7463_v34, 4  ;;  %v7473_v7 = vor.u32 %v7472_v28, %v7468_v43  ;;  %v15654_v51 = vpop.f32.mrb[26].mxu1 }
 0x418   : > { %v7972_v23 = vsel %vm14117_vm14, %v11204_v53, %v7971_v36  ;;  %v7973_v31 = vrot.slane %v7971_v36, 4  ;;  %v3830_v0 = vld [vmem:[#allocation2 + $0x140] sm:$0x1]  ;;  %17293 = vst [vmem:[#allocation15_spill] sm:$0xff] %v15654_v51  ;;  %v5190_v27 = vsel %vm13514_vm8, %v5185_v42, %v5189_v62  ;;  %v7978_v41 = vrot.slane %v7753_v10, 5  ;;  %6637 = vst.msk [vmem:[#allocation3 + $0x4a0] sm:$0xff] %vm2631_vm15, %v12430_v54  ;;  %v15667_v54 = vpop.permute.xlu1 %6267 }
 0x419   : > { %v7981_v21 = vrot.slane %v7754_v56, 5  ;;  %v10965_v57 = vrot.slane %v3828_v25, 9  ;;  %v4738_v16 = vld [vmem:[#allocation2 + $0xf0] sm:$0xf]  ;;  %v15659_v50 = vpop.f32.mrb[27].mxu1  ;;  %v11053_v2 = vcombine.low %v5180_v37, %v5190_v27  ;;  %v7469_v34 = vsel %vm13514_vm8, %v7464_v46, %v7468_v43 }
 0x41a   : > { %17294 = vst [vmem:[#allocation23_spill] sm:$0xff] %v15659_v50  ;;  %v7474_v53 = vrot.slane %v7473_v7, 4  ;;  %v7975_v28 = vsel %vm14117_vm14, %v7973_v31, %v7974_v48  ;;  %v4739_v36 = vld [vmem:[#allocation2 + $0xf4] sm:$0xf]  ;;  %v4740_v51 = vld [vmem:[#allocation2 + $0xf8] sm:$0x1]  ;;  %v7979_v62 = vsel %vm14117_vm14, %v11205_v1, %v7978_v41 }
 0x41b   : > { %v11236_v4 = vcombine.low %v7972_v23, %v7975_v28  ;;  %v7980_v10 = vrot.slane %v7978_v41, 4  ;;  %v4121_v56 = vrot.slane %v3829_v6, 5  ;;  %v7755_v25 = vld [vmem:[#allocation2 + $0x84] sm:$0xe]  ;;  %v7756_v42 = vld [vmem:[#allocation2 + $0x88] sm:$0xf] }
 0x41c   : > { %5695 = vst.msk [vmem:[#allocation3 + $0x290] sm:$0xff] %vm2631_vm15, %v11053_v2  ;;  %v7479_v43 = vsel %vm13514_vm8, %v7474_v53, %v7478_v13  ;;  %v4124_v7 = vrot.slane %v3830_v0, 5  ;;  %v5192_v37 = vshrl.u32 %v4738_v16, 16  ;;  %v5195_v48 = vshll.u32 %v4738_v16, 16  ;;  %v7757_v46 = vld [vmem:[#allocation2 + $0x8c] sm:$0x1]  ;;  %v7645_v13 = vpop.permute.xlu0 %7644 }
 0x41d   : > { %v7758_v31 = vld [vmem:[#allocation2 + $0x90] sm:$0xe]  ;;  %6335 = vst.msk [vmem:[#allocation3 + $0x290] sm:$0xff] %vm3723_vm0, %v15246_v11  ;;  %v11195_v23 = vcombine.low %v7469_v34, %v7479_v43  ;;  %v7982_v1 = vsel %vm14117_vm14, %v7980_v10, %v7981_v21  ;;  %v4122_v6 = vsel %vm14117_vm14, %v10965_v57, %v4121_v56  ;;  %v4123_v27 = vrot.slane %v4121_v56, 4  ;;  %v7759_v41 = vld [vmem:[#allocation2 + $0x94] sm:$0xf] }
 0x41e   : > { %8279 = vst.msk [vmem:[#allocation3 + $0x138] sm:$0xff] %vm2631_vm15, %v11236_v4  ;;  %v12431_v0 = vld [vmem:[#allocation2 + $0x198] sm:$0xff]   ;;  %v15679_v2 = vpop.f32.mrb[28].mxu1  ;;  %v11237_v16 = vcombine.low %v7979_v62, %v7982_v1  ;;  %v5194_v53 = vrot.slane %v5192_v37, 4  ;;  %v5197_v28 = vrot.slane %v5195_v48, 5  ;;  %v5201_v50 = vshll.u32 %v4739_v36, 16 }
 0x41f   : > { %17295 = vst [vmem:[#allocation24_spill] sm:$0xff] %v15679_v2  ;;  %v7760_v11 = vld [vmem:[#allocation2 + $0x98] sm:$0x1]  ;;  %7718 = vst.msk [vmem:[#allocation3 + $0x388] sm:$0xff] %vm3723_vm0, %v7645_v13  ;;  %v15682_v4 = vpop.f32.mrb[29].mxu1  ;;  %7660 = vrot.lane.b32.xlu0 %v11195_v23, %s13089_s15  ;;  %v4125_v21 = vsel %vm14117_vm14, %v4123_v27, %v4124_v7  ;;  %v5205_v57 = vshrl.u32 %v4739_v36, 16 }
 0x420   : > { %17296 = vst [vmem:[#allocation25_spill] sm:$0xff] %v15682_v4  ;;  %v5211_v34 = vshll.u32 %v4740_v51, 16  ;;  %v11206_v10 = vrot.slane %v7755_v25, 9  ;;  %v3831_v56 = vld [vmem:[#allocation2 + $0x144] sm:$0xe]  ;;  %6638 = vst.msk [vmem:[#allocation3 + $0x4c8] sm:$0xff] %vm2631_vm15, %v12431_v0  ;;  %v10997_v43 = vcombine.low %v4122_v6, %v4125_v21  ;;  %v5198_v37 = vor.u32 %v5197_v28, %v5194_v53  ;;  %v3688_v25 = vpop.permute.xlu1 %3687 }
 0x421   : > { %v15688_v62 = vpop.f32.mrb[30].mxu1  ;;  %8280 = vst.msk [vmem:[#allocation3 + $0x160] sm:$0xff] %vm2631_vm15, %v11237_v16  ;;  %v5203_v48 = vrot.slane %v5201_v50, 5  ;;  %v7985_v1 = vrot.slane %v7756_v42, 5  ;;  %v3832_v13 = vld [vmem:[#allocation2 + $0x148] sm:$0xf] }
 0x422   : > { %17297 = vst [vmem:[#allocation26_spill] sm:$0xff] %v15688_v62  ;;  %v15691_v4 = vpop.f32.mrb[31].mxu1  ;;  %v5207_v23 = vrot.slane %v5205_v57, 4  ;;  %v5213_v2 = vrot.slane %v5211_v34, 5  ;;  %v7988_v7 = vrot.slane %v7757_v46, 5  ;;  %v11207_v36 = vrot.slane %v7758_v31, 9  ;;  %v15719_v62 = vpop.permute.xlu0 %4619 }
 0x423   : > { %17298 = vst [vmem:[#allocation27_spill] sm:$0xff] %v15691_v4  ;;  %v3833_v51 = vld [vmem:[#allocation2 + $0x14c] sm:$0x1]  ;;  %4327 = vst.msk [vmem:[#allocation3 + $0x3c8] sm:$0xff] %vm2631_vm15, %v10997_v43  ;;  %v5199_v27 = vrot.slane %v5198_v37, 4  ;;  %v7986_v0 = vsel %vm14117_vm14, %v11206_v10, %v7985_v1  ;;  %v7987_v16 = vrot.slane %v7985_v1, 4 }
 0x424   : > { %v7992_v6 = vrot.slane %v7759_v41, 5  ;;  %v4741_v53 = vld [vmem:[#allocation2 + $0xfc] sm:$0xf]  ;;  %3754 = vst.msk [vmem:[#allocation3 + $0x4b0] sm:$0xff] %vm3723_vm0, %v3688_v25  ;;  %4679 = vst.msk [vmem:[#allocation3 + $0x3c8] sm:$0xff] %vm3723_vm0, %v15287_v29  ;;  %v5208_v50 = vor.u32 %v5207_v23, %v5203_v48  ;;  %v7995_v42 = vrot.slane %v7760_v11, 5 }
 0x425   : > { %v10966_v46 = vrot.slane %v3831_v56, 9  ;;  %v4128_v31 = vrot.slane %v3832_v13, 5  ;;  %v4742_v28 = vld [vmem:[#allocation2 + $0x100] sm:$0xf]  ;;  %v8343_v21 = vld [vmem:[#allocation3 + $0x138] sm:$0xff]  ;;  %v5204_v57 = vsel %vm13514_vm8, %v5199_v27, %v5203_v48  ;;  %v7989_v34 = vsel %vm14117_vm14, %v7987_v16, %v7988_v7  ;;  %v9506_v7 = vld [vmem:[#allocation3 + $0x2c0] sm:$0xff] }
 0x426   : > { %v7993_v41 = vsel %vm14117_vm14, %v11207_v36, %v7992_v6  ;;  %v7994_v10 = vrot.slane %v7992_v6, 4  ;;  %v4743_v43 = vld [vmem:[#allocation2 + $0x104] sm:$0x1]  ;;  %12134 = vmatmul.mubr.msk.bf16.gmra.mrb[76].mxu1 %vm2631_vm15, %v8343_v21  ;;  %v5209_v29 = vrot.slane %v5208_v50, 4  ;;  %v11238_v11 = vcombine.low %v7986_v0, %v7989_v34  ;;  %v7761_v13 = vld [vmem:[#allocation2 + $0x9c] sm:$0xe] }
 0x427   : > { %v9500_v37 = vld [vmem:[#allocation3 + $0x290] sm:$0xff]  ;;  %v4129_v56 = vsel %vm14117_vm14, %v10966_v46, %v4128_v31  ;;  %v4130_v1 = vrot.slane %v4128_v31, 4  ;;  %v15710_v25 = vpop.f32.mrb[32].mxu1  ;;  %v4131_v27 = vrot.slane %v3833_v51, 5  ;;  %v5216_v16 = vshrl.u32 %v4741_v53, 16 }
 0x428   : > { %v7762_v23 = vld [vmem:[#allocation2 + $0xa0] sm:$0xf]  ;;  %v15708_v48 = vld [vmem:[#allocation2 + $0xa4] sm:$0x1]  ;;  %10115 = vmatmul.mubr.bf16.vlgmr.msra.gmra.mrb[128].mxu0 %v9500_v37  ;;  %17299 = vst [vmem:[#allocation28_spill] sm:$0xff] %v15710_v25  ;;  %v7996_v36 = vsel %vm14117_vm14, %v7994_v10, %v7995_v42  ;;  %v5219_v6 = vshll.u32 %v4741_v53, 16  ;;  %v5214_v31 = vsel %vm13514_vm8, %v5209_v29, %v5213_v2 }
 0x429   : > { %v7764_v50 = vld [vmem:[#allocation2 + $0xa8] sm:$0xe]  ;;  %v7765_v0 = vld [vmem:[#allocation2 + $0xac] sm:$0xf]  ;;  %10122 = vmatprep.mubr.bf16.mxu0 %v9506_v7  ;;  %v15714_v21 = vpop.f32.mrb[33].mxu1  ;;  %v8348_v46 = vld [vmem:[#allocation3 + $0x160] sm:$0xff]  ;;  %v11239_v34 = vcombine.low %v7993_v41, %v7996_v36  ;;  %v11054_v53 = vcombine.low %v5204_v57, %v5214_v31  ;;  %v4132_v42 = vsel %vm14117_vm14, %v4130_v1, %v4131_v27 }
 0x42a   : > { %17300 = vst [vmem:[#allocation29_spill] sm:$0xff] %v15714_v21  ;;  %8281 = vst.msk [vmem:[#allocation3 + $0x188] sm:$0xff] %vm2631_vm15, %v11238_v11  ;;  %v5225_v37 = vshll.u32 %v4742_v28, 16  ;;  %v5229_v25 = vshrl.u32 %v4742_v28, 16  ;;  %v7766_v4 = vld [vmem:[#allocation2 + $0xb0] sm:$0x1]  ;;  %12137 = vmatprep.mubr.msk.bf16.mxu1 %vm2631_vm15, %v8348_v46  ;;  %v10998_v41 = vcombine.low %v4129_v56, %v4132_v42 }
 0x42b   : > { %v15721_v51 = vpop.f32.mrb[34].mxu1  ;;  %v5218_v10 = vrot.slane %v5216_v16, 4  ;;  %v5221_v7 = vrot.slane %v5219_v6, 5  ;;  %v3834_v21 = vld [vmem:[#allocation2 + $0x150] sm:$0xe]  ;;  %8282 = vst.msk [vmem:[#allocation3 + $0x1b0] sm:$0xff] %vm2631_vm15, %v11239_v34 }
 0x42c   : > { %17301 = vst [vmem:[#allocation30_spill] sm:$0xff] %v15721_v51  ;;  %v15726_v2 = vpop.f32.mrb[35].mxu1  ;;  %v5227_v28 = vrot.slane %v5225_v37, 5  ;;  %v5231_v29 = vrot.slane %v5229_v25, 4  ;;  %v5235_v11 = vshll.u32 %v4743_v43, 16  ;;  %5696 = vst.msk [vmem:[#allocation3 + $0x2b8] sm:$0xff] %vm2631_vm15, %v11054_v53  ;;  %v15734_v43 = vpop.permute.xlu1 %6269 }
 0x42d   : > { %17302 = vst [vmem:[#allocation31_spill] sm:$0xff] %v15726_v2  ;;  %v3835_v36 = vld [vmem:[#allocation2 + $0x154] sm:$0xf]  ;;  %v5222_v51 = vor.u32 %v5221_v7, %v5218_v10  ;;  %v11208_v46 = vrot.slane %v7761_v13, 9  ;;  %v7999_v57 = vrot.slane %v7762_v23, 5  ;;  %v8002_v31 = vrot.slane %v15708_v48, 5  ;;  %v7647_v10 = vpop.permute.xlu0 %7646 }
 0x42e   : > { %v3836_v1 = vld [vmem:[#allocation2 + $0x158] sm:$0x1]  ;;  %6336 = vst.msk [vmem:[#allocation3 + $0x2b8] sm:$0xff] %vm3723_vm0, %v15310_v45  ;;  %v5232_v27 = vor.u32 %v5231_v29, %v5227_v28  ;;  %v5237_v16 = vrot.slane %v5235_v11, 5  ;;  %v11209_v56 = vrot.slane %v7764_v50, 9  ;;  %v8006_v6 = vrot.slane %v7765_v0, 5 }
 0x42f   : > { %4328 = vst.msk [vmem:[#allocation3 + $0x3f0] sm:$0xff] %vm2631_vm15, %v10998_v41  ;;  %v4744_v25 = vld [vmem:[#allocation2 + $0x108] sm:$0xf]  ;;  %v5223_v13 = vrot.slane %v5222_v51, 4  ;;  %v8000_v23 = vsel %vm14117_vm14, %v11208_v46, %v7999_v57  ;;  %v8001_v48 = vrot.slane %v7999_v57, 4  ;;  %v8009_v34 = vrot.slane %v7766_v4, 5 }
 0x430   : > { %4680 = vst.msk [vmem:[#allocation3 + $0x3f0] sm:$0xff] %vm3723_vm0, %v15339_v35  ;;  %v4745_v37 = vld [vmem:[#allocation2 + $0x10c] sm:$0xf]  ;;  %v5233_v45 = vrot.slane %v5232_v27, 4  ;;  %v8007_v53 = vsel %vm14117_vm14, %v11209_v56, %v8006_v6  ;;  %v8008_v42 = vrot.slane %v8006_v6, 4  ;;  %v10967_v50 = vrot.slane %v3834_v21, 9 }
 0x431   : > { %v4746_v0 = vld [vmem:[#allocation2 + $0x110] sm:$0x1]  ;;  %v15742_v7 = vpop.f32.mrb[36].mxu1  ;;  %v8353_v41 = vld [vmem:[#allocation3 + $0x188] sm:$0xff]  ;;  %v5228_v35 = vsel %vm13514_vm8, %v5223_v13, %v5227_v28  ;;  %v8003_v51 = vsel %vm14117_vm14, %v8001_v48, %v8002_v31  ;;  %v4135_v29 = vrot.slane %v3835_v36, 5  ;;  %v4138_v4 = vrot.slane %v3836_v1, 5 }
 0x432   : > { %17303 = vst [vmem:[#allocation32_spill] sm:$0xff] %v15742_v7  ;;  %v7767_v11 = vld [vmem:[#allocation2 + $0xb4] sm:$0xe]  ;;  %7719 = vst.msk [vmem:[#allocation3 + $0x3b0] sm:$0xff] %vm3723_vm0, %v7647_v10  ;;  %v15749_v46 = vpop.f32.mrb[37].mxu1  ;;  %12138 = vmatmul.mubr.msk.bf16.gmra.mrb[80].mxu1 %vm2631_vm15, %v8353_v41  ;;  %v5238_v21 = vsel %vm13514_vm8, %v5233_v45, %v5237_v16  ;;  %v11240_v57 = vcombine.low %v8000_v23, %v8003_v51  ;;  %v8010_v27 = vsel %vm14117_vm14, %v8008_v42, %v8009_v34  ;;  %v8358_v36 = vld [vmem:[#allocation3 + $0x1b0] sm:$0xff] }
 0x433   : > { %17304 = vst [vmem:[#allocation33_spill] sm:$0xff] %v15749_v46  ;;  %v5240_v28 = vshrl.u32 %v4744_v25, 16  ;;  %v7768_v56 = vld [vmem:[#allocation2 + $0xb8] sm:$0xf]  ;;  %v7769_v6 = vld [vmem:[#allocation2 + $0xbc] sm:$0x1]  ;;  %v11055_v1 = vcombine.low %v5228_v35, %v5238_v21  ;;  %v11241_v13 = vcombine.low %v8007_v53, %v8010_v27  ;;  %v4136_v48 = vsel %vm14117_vm14, %v10967_v50, %v4135_v29  ;;  %12141 = vmatprep.mubr.msk.bf16.mxu1 %vm2631_vm15, %v8358_v36  ;;  %v3690_v35 = vpop.permute.xlu1 %3689 }
 0x434   : > { %v15756_v31 = vpop.f32.mrb[38].mxu1  ;;  %v4137_v10 = vrot.slane %v4135_v29, 4  ;;  %v7770_v41 = vld [vmem:[#allocation2 + $0xc0] sm:$0xe]  ;;  %v7771_v46 = vld [vmem:[#allocation2 + $0xc4] sm:$0xf] }
 0x435   : > { %17305 = vst [vmem:[#allocation34_spill] sm:$0xff] %v15756_v31  ;;  %v15760_v7 = vpop.f32.mrb[39].mxu1  ;;  %8283 = vst.msk [vmem:[#allocation3 + $0x1d8] sm:$0xff] %vm2631_vm15, %v11240_v57  ;;  %v5242_v16 = vrot.slane %v5240_v28, 4  ;;  %v5243_v23 = vshll.u32 %v4744_v25, 16  ;;  %v5249_v34 = vshll.u32 %v4745_v37, 16 }
 0x436   : > { %17306 = vst [vmem:[#allocation35_spill] sm:$0xff] %v15760_v7  ;;  %v5253_v45 = vshrl.u32 %v4745_v37, 16  ;;  %v15764_v42 = vld [vmem:[#allocation2 + $0xc8] sm:$0x1]  ;;  %5697 = vst.msk [vmem:[#allocation3 + $0x2e0] sm:$0xff] %vm2631_vm15, %v11055_v1  ;;  %v4139_v53 = vsel %vm14117_vm14, %v4137_v10, %v4138_v4  ;;  %v5259_v50 = vshll.u32 %v4746_v0, 16 }
 0x437   : > { %8284 = vst.msk [vmem:[#allocation3 + $0x200] sm:$0xff] %vm2631_vm15, %v11241_v13  ;;  %v11210_v51 = vrot.slane %v7767_v11, 9  ;;  %v8013_v29 = vrot.slane %v7768_v56, 5  ;;  %v3837_v21 = vld [vmem:[#allocation2 + $0x15c] sm:$0xe]  ;;  %v9505_v27 = vld [vmem:[#allocation3 + $0x2b8] sm:$0xff]  ;;  %v10999_v25 = vcombine.low %v4136_v48, %v4139_v53 }
 0x438   : > { %3755 = vst.msk [vmem:[#allocation3 + $0x4d8] sm:$0xff] %vm3723_vm0, %v3690_v35  ;;  %6337 = vst.msk [vmem:[#allocation3 + $0x2e0] sm:$0xff] %vm3723_vm0, %v15355_v24  ;;  %v5245_v37 = vrot.slane %v5243_v23, 5  ;;  %v5251_v57 = vrot.slane %v5249_v34, 5  ;;  %v5255_v28 = vrot.slane %v5253_v45, 4  ;;  %10123 = vmatmul.mubr.bf16.gmra.mrb[132].mxu0 %v9505_v27  ;;  %v9511_v1 = vld [vmem:[#allocation3 + $0x2e8] sm:$0xff] }
 0x439   : > { %v3838_v36 = vld [vmem:[#allocation2 + $0x160] sm:$0xf]  ;;  %v5261_v13 = vrot.slane %v5259_v50, 5  ;;  %v8014_v0 = vsel %vm14117_vm14, %v11210_v51, %v8013_v29  ;;  %v8015_v4 = vrot.slane %v8013_v29, 4  ;;  %v8016_v11 = vrot.slane %v7769_v6, 5  ;;  %10130 = vmatprep.mubr.bf16.mxu0 %v9511_v1  ;;  %4329 = vst.msk [vmem:[#allocation3 + $0x418] sm:$0xff] %vm2631_vm15, %v10999_v25 }
 0x43a   : > { %v3839_v56 = vld [vmem:[#allocation2 + $0x164] sm:$0x1]  ;;  %v5246_v10 = vor.u32 %v5245_v37, %v5242_v16  ;;  %v5256_v35 = vor.u32 %v5255_v28, %v5251_v57  ;;  %v11211_v24 = vrot.slane %v7770_v41, 9  ;;  %v8020_v48 = vrot.slane %v7771_v46, 5  ;;  %v4747_v23 = vld [vmem:[#allocation2 + $0x114] sm:$0xf] }
 0x43b   : > { %v15776_v34 = vpop.f32.mrb[40].mxu1  ;;  %4681 = vst.msk [vmem:[#allocation3 + $0x418] sm:$0xff] %vm3723_vm0, %v15390_v32  ;;  %v8017_v45 = vsel %vm14117_vm14, %v8015_v4, %v8016_v11  ;;  %v8023_v53 = vrot.slane %v15764_v42, 5  ;;  %v10968_v6 = vrot.slane %v3837_v21, 9  ;;  %v4142_v50 = vrot.slane %v3838_v36, 5  ;;  %v15789_v32 = vpop.permute.xlu0 %4621  ;;  %v9516_v31 = vld [vmem:[#allocation3 + $0x310] sm:$0xff] }
 0x43c   : > { %17307 = vst [vmem:[#allocation36_spill] sm:$0xff] %v15776_v34  ;;  %v4748_v51 = vld [vmem:[#allocation2 + $0x118] sm:$0xf]  ;;  %v15783_v29 = vpop.f32.mrb[41].mxu1  ;;  %v5247_v16 = vrot.slane %v5246_v10, 4  ;;  %v5257_v27 = vrot.slane %v5256_v35, 4  ;;  %v11242_v41 = vcombine.low %v8014_v0, %v8017_v45  ;;  %v8021_v46 = vsel %vm14117_vm14, %v11211_v24, %v8020_v48 }
 0x43d   : > { %17308 = vst [vmem:[#allocation37_spill] sm:$0xff] %v15783_v29  ;;  %v4749_v25 = vld [vmem:[#allocation2 + $0x11c] sm:$0x1]  ;;  %v15787_v37 = vld [vmem:[#allocation2 + $0xcc] sm:$0xe]  ;;  %v15791_v28 = vpop.f32.mrb[42].mxu1  ;;  %v4143_v21 = vsel %vm14117_vm14, %v10968_v6, %v4142_v50 }
 0x43e   : > { %17309 = vst [vmem:[#allocation38_spill] sm:$0xff] %v15791_v28  ;;  %v8363_v1 = vld [vmem:[#allocation3 + $0x1d8] sm:$0xff]  ;;  %v8022_v42 = vrot.slane %v8020_v48, 4  ;;  %v4144_v36 = vrot.slane %v4142_v50, 4  ;;  %v4145_v4 = vrot.slane %v3839_v56, 5  ;;  %v15795_v10 = vpop.f32.mrb[64].mxu0  ;;  %v5252_v24 = vsel %vm13514_vm8, %v5247_v16, %v5251_v57 }
 0x43f   : > { %v7774_v11 = vld [vmem:[#allocation2 + $0xd0] sm:$0xf]  ;;  %v15797_v0 = vpop.f32.mrb[43].mxu1  ;;  %12142 = vmatmul.mubr.msk.bf16.gmra.mrb[84].mxu1 %vm2631_vm15, %v8363_v1  ;;  %v5262_v45 = vsel %vm13514_vm8, %v5257_v27, %v5261_v13  ;;  %8285 = vst.msk [vmem:[#allocation3 + $0x228] sm:$0xff] %vm2631_vm15, %v11242_v41  ;;  %v5264_v48 = vshrl.u32 %v4747_v23, 16  ;;  %v5267_v6 = vshll.u32 %v4747_v23, 16 }
 0x440   : > { %17310 = vst [vmem:[#allocation39_spill] sm:$0xff] %v15797_v0  ;;  %v8368_v35 = vld [vmem:[#allocation3 + $0x200] sm:$0xff]  ;;  %v15805_v56 = vpop.f32.mrb[65].mxu0  ;;  %v11056_v28 = vcombine.low %v5252_v24, %v5262_v45  ;;  %v8024_v1 = vsel %vm14117_vm14, %v8022_v42, %v8023_v53  ;;  %v4146_v0 = vsel %vm14117_vm14, %v4144_v36, %v4145_v4  ;;  %v5273_v57 = vshll.u32 %v4748_v51, 16  ;;  %v6733_v16 = vld [vmem:[#allocation2 + $0x1a4] sm:$0xf] }
 0x441   : > { %v7775_v50 = vld [vmem:[#allocation2 + $0xd4] sm:$0x1]  ;;  %12145 = vmatprep.mubr.msk.bf16.mxu1 %vm2631_vm15, %v8368_v35  ;;  %v15812_v13 = vpop.f32.mrb[66].mxu0  ;;  %v11243_v27 = vcombine.low %v8021_v46, %v8024_v1  ;;  %v11000_v41 = vcombine.low %v4143_v21, %v4146_v0  ;;  %v5266_v23 = vrot.slane %v5264_v48, 4  ;;  %v5269_v34 = vrot.slane %v5267_v6, 5  ;;  %v7649_v0 = vpop.permute.xlu0 %7648 }
 0x442   : > { %v9510_v29 = vld [vmem:[#allocation3 + $0x2e0] sm:$0xff]  ;;  %17311 = vst [vmem:[#allocation40_spill] sm:$0xff] %v15812_v13  ;;  %v6734_v7 = vld [vmem:[#allocation2 + $0x1a8] sm:$0xf]  ;;  %v15814_v35 = vpop.f32.mrb[67].mxu0  ;;  %5698 = vst.msk [vmem:[#allocation3 + $0x308] sm:$0xff] %vm2631_vm15, %v11056_v28 }
 0x443   : > { %10131 = vmatmul.mubr.bf16.gmra.mrb[136].mxu0 %v9510_v29  ;;  %17312 = vst [vmem:[#allocation41_spill] sm:$0xff] %v15814_v35  ;;  %v15817_v53 = vrot.slane %v5273_v57, 5  ;;  %v5277_v42 = vshrl.u32 %v4748_v51, 16  ;;  %v5283_v36 = vshll.u32 %v4749_v25, 16  ;;  %v11212_v4 = vrot.slane %v15787_v37, 9  ;;  %6338 = vst.msk [vmem:[#allocation3 + $0x308] sm:$0xff] %vm3723_vm0, %v15407_v18 }
 0x444   : > { %v6735_v24 = vld [vmem:[#allocation2 + $0x1ac] sm:$0x1]  ;;  %v15820_v45 = vld [vmem:[#allocation2 + $0x168] sm:$0xe]  ;;  %10138 = vmatprep.mubr.bf16.mxu0 %v9516_v31  ;;  %8286 = vst.msk [vmem:[#allocation3 + $0x250] sm:$0xff] %vm2631_vm15, %v11243_v27  ;;  %4330 = vst.msk [vmem:[#allocation3 + $0x440] sm:$0xff] %vm2631_vm15, %v11000_v41  ;;  %v5270_v29 = vor.u32 %v5269_v34, %v5266_v23 }
 0x445   : > { %v8027_v46 = vrot.slane %v7774_v11, 5  ;;  %v8030_v28 = vrot.slane %v7775_v50, 5  ;;  %v7481_v21 = vshrl.u32 %v6733_v16, 16  ;;  %v15826_v51 = vpop.f32.mrb[44].mxu1  ;;  %v12433_v25 = vld [vmem:[#allocation2 + $0x1a4] sm:$0xff]   ;;  %4682 = vst.msk [vmem:[#allocation3 + $0x440] sm:$0xff] %vm3723_vm0, %v15469_v38 }
 0x446   : > { %17313 = vst [vmem:[#allocation42_spill] sm:$0xff] %v15826_v51  ;;  %v5279_v37 = vrot.slane %v5277_v42, 4  ;;  %v5285_v31 = vrot.slane %v5283_v36, 5  ;;  %v7484_v48 = vshll.u32 %v6733_v16, 16  ;;  %v7490_v6 = vshll.u32 %v6734_v7, 16  ;;  %7720 = vst.msk [vmem:[#allocation3 + $0x3d8] sm:$0xff] %vm3723_vm0, %v7649_v0 }
 0x447   : > { %v3841_v18 = vld [vmem:[#allocation2 + $0x16c] sm:$0xf]  ;;  %v3842_v1 = vld [vmem:[#allocation2 + $0x170] sm:$0x1]  ;;  %v15831_v57 = vpop.f32.mrb[45].mxu1  ;;  %v5271_v34 = vrot.slane %v5270_v29, 4  ;;  %v8028_v11 = vsel %vm14117_vm14, %v11212_v4, %v8027_v46 }
 0x448   : > { %17314 = vst [vmem:[#allocation43_spill] sm:$0xff] %v15831_v57  ;;  %v8029_v50 = vrot.slane %v8027_v46, 4  ;;  %v7483_v27 = vrot.slane %v7481_v21, 4  ;;  %v4750_v41 = vld [vmem:[#allocation2 + $0x120] sm:$0xf]  ;;  %v15835_v23 = vpop.f32.mrb[46].mxu1  ;;  %v5280_v16 = vor.u32 %v5279_v37, %v15817_v53 }
 0x449   : > { %17315 = vst [vmem:[#allocation44_spill] sm:$0xff] %v15835_v23  ;;  %6639 = vst.msk [vmem:[#allocation3 + $0x4f0] sm:$0xff] %vm2631_vm15, %v12433_v25  ;;  %v8373_v38 = vld [vmem:[#allocation3 + $0x228] sm:$0xff]  ;;  %v7486_v42 = vrot.slane %v7484_v48, 5  ;;  %v7492_v36 = vrot.slane %v7490_v6, 5  ;;  %v7494_v51 = vshrl.u32 %v6734_v7, 16  ;;  %v5276_v4 = vsel %vm13514_vm8, %v5271_v34, %v15817_v53 }
 0x44a   : > { %v15839_v0 = vpop.f32.mrb[47].mxu1  ;;  %12146 = vmatmul.mubr.msk.bf16.gmra.mrb[88].mxu1 %vm2631_vm15, %v8373_v38  ;;  %v8031_v29 = vsel %vm14117_vm14, %v8029_v50, %v8030_v28  ;;  %v7500_v46 = vshll.u32 %v6735_v24, 16  ;;  %v10969_v21 = vrot.slane %v15820_v45, 9  ;;  %v4751_v25 = vld [vmem:[#allocation2 + $0x124] sm:$0xf]  ;;  %v5281_v23 = vrot.slane %v5280_v16, 4 }
 0x44b   : > { %17316 = vst [vmem:[#allocation45_spill] sm:$0xff] %v15839_v0  ;;  %v11244_v37 = vcombine.low %v8028_v11, %v8031_v29  ;;  %v7487_v48 = vor.u32 %v7486_v42, %v7483_v27  ;;  %v7496_v6 = vrot.slane %v7494_v51, 4  ;;  %v4752_v7 = vld [vmem:[#allocation2 + $0x128] sm:$0x1]  ;;  %v15848_v57 = vld [vmem:[#allocation2 + $0x174] sm:$0xe] }
 0x44c   : > { %v7502_v0 = vrot.slane %v7500_v46, 5  ;;  %v4149_v38 = vrot.slane %v3841_v18, 5  ;;  %v4152_v35 = vrot.slane %v3842_v1, 5  ;;  %v5288_v13 = vshrl.u32 %v4750_v41, 16  ;;  %v15850_v2 = vpop.f32.mrb[68].mxu0  ;;  %v8378_v53 = vld [vmem:[#allocation3 + $0x250] sm:$0xff] }
 0x44d   : > { %v5286_v24 = vsel %vm13514_vm8, %v5281_v23, %v5285_v31  ;;  %8287 = vst.msk [vmem:[#allocation3 + $0x278] sm:$0xff] %vm2631_vm15, %v11244_v37  ;;  %v7488_v45 = vrot.slane %v7487_v48, 4  ;;  %v7497_v28 = vor.u32 %v7496_v6, %v7492_v36  ;;  %v5291_v34 = vshll.u32 %v4750_v41, 16  ;;  %v3844_v11 = vld [vmem:[#allocation2 + $0x178] sm:$0xf]  ;;  %v15855_v50 = vpop.f32.mrb[69].mxu0  ;;  %12149 = vmatprep.mubr.msk.bf16.mxu1 %vm2631_vm15, %v8378_v53 }
 0x44e   : > { %v9515_v51 = vld [vmem:[#allocation3 + $0x308] sm:$0xff]  ;;  %v11057_v18 = vcombine.low %v5276_v4, %v5286_v24  ;;  %v4150_v1 = vsel %vm14117_vm14, %v10969_v21, %v4149_v38  ;;  %v4151_v27 = vrot.slane %v4149_v38, 4  ;;  %v5290_v16 = vrot.slane %v5288_v13, 4  ;;  %v9521_v31 = vld [vmem:[#allocation3 + $0x338] sm:$0xff]  ;;  %v15860_v23 = vpop.f32.mrb[70].mxu0  ;;  %v15862_v29 = vpop.f32.mrb[48].mxu1 }
 0x44f   : > { %v3845_v42 = vld [vmem:[#allocation2 + $0x17c] sm:$0x1]  ;;  %10139 = vmatmul.mubr.bf16.gmra.mrb[140].mxu0 %v9515_v51  ;;  %17317 = vst [vmem:[#allocation46_spill] sm:$0xff] %v15860_v23  ;;  %17318 = vst [vmem:[#allocation47_spill] sm:$0xff] %v15862_v29  ;;  %v7493_v41 = vsel %vm13514_vm8, %v7488_v45, %v7492_v36  ;;  %v7498_v46 = vrot.slane %v7497_v28, 4  ;;  %v5293_v37 = vrot.slane %v5291_v34, 5 }
 0x450   : > { %v5297_v48 = vshll.u32 %v4751_v25, 16  ;;  %10146 = vmatprep.mubr.bf16.mxu0 %v9521_v31  ;;  %v15866_v4 = vpop.f32.mrb[71].mxu0  ;;  %v15868_v6 = vpop.f32.mrb[49].mxu1  ;;  %5699 = vst.msk [vmem:[#allocation3 + $0x330] sm:$0xff] %vm2631_vm15, %v11057_v18  ;;  %v4153_v13 = vsel %vm14117_vm14, %v4151_v27, %v4152_v35  ;;  %v5301_v21 = vshrl.u32 %v4751_v25, 16  ;;  %v5307_v38 = vshll.u32 %v4752_v7, 16 }
 0x451   : > { %17319 = vst [vmem:[#allocation48_spill] sm:$0xff] %v15866_v4  ;;  %17320 = vst [vmem:[#allocation49_spill] sm:$0xff] %v15868_v6  ;;  %v10970_v53 = vrot.slane %v15848_v57, 9  ;;  %v4753_v24 = vld [vmem:[#allocation2 + $0x12c] sm:$0xf]  ;;  %v15874_v51 = vpop.f32.mrb[50].mxu1  ;;  %v7503_v36 = vsel %vm13514_vm8, %v7498_v46, %v7502_v0  ;;  %v11001_v45 = vcombine.low %v4150_v1, %v4153_v13  ;;  %v5294_v28 = vor.u32 %v5293_v37, %v5290_v16 }
 0x452   : > { %17321 = vst [vmem:[#allocation50_spill] sm:$0xff] %v15874_v51  ;;  %6339 = vst.msk [vmem:[#allocation3 + $0x330] sm:$0xff] %vm3723_vm0, %v15487_v22  ;;  %v5299_v34 = vrot.slane %v5297_v48, 5  ;;  %v4754_v18 = vld [vmem:[#allocation2 + $0x130] sm:$0xf]  ;;  %v15880_v6 = vpop.f32.mrb[51].mxu1  ;;  %v11196_v35 = vcombine.low %v7493_v41, %v7503_v36  ;;  %v7651_v48 = vpop.permute.xlu0 %7650 }
 0x453   : > { %v4755_v31 = vld [vmem:[#allocation2 + $0x134] sm:$0x1]  ;;  %17322 = vst [vmem:[#allocation51_spill] sm:$0xff] %v15880_v6  ;;  %v5303_v25 = vrot.slane %v5301_v21, 4  ;;  %v5309_v7 = vrot.slane %v5307_v38, 5  ;;  %v4156_v57 = vrot.slane %v3844_v11, 5 }
 0x454   : > { %v3846_v27 = vld [vmem:[#allocation2 + $0x180] sm:$0xe]  ;;  %v9499_v29 = vld [vmem:[#allocation3 + $0x288] sm:$0xff]  ;;  %4331 = vst.msk [vmem:[#allocation3 + $0x468] sm:$0xff] %vm2631_vm15, %v11001_v45  ;;  %v5295_v51 = vrot.slane %v5294_v28, 4  ;;  %v4159_v22 = vrot.slane %v3845_v42, 5  ;;  %7662 = vrot.lane.b32.xlu0 %v11196_v35, %s13089_s15 }
 0x455   : > { %v5312_v4 = vshrl.u32 %v4753_v24, 16  ;;  %v5315_v23 = vshll.u32 %v4753_v24, 16  ;;  %v3847_v0 = vld [vmem:[#allocation2 + $0x184] sm:$0xf]  ;;  %v8383_v1 = vld [vmem:[#allocation3 + $0x278] sm:$0xff]  ;;  %4683 = vst.msk [vmem:[#allocation3 + $0x468] sm:$0xff] %vm3723_vm0, %v15557_v40  ;;  %v5304_v16 = vor.u32 %v5303_v25, %v5299_v34  ;;  %v4157_v41 = vsel %vm14117_vm14, %v10970_v53, %v4156_v57 }
 0x456   : > { %v4158_v11 = vrot.slane %v4156_v57, 4  ;;  %v5321_v46 = vshll.u32 %v4754_v18, 16  ;;  %v3848_v37 = vld [vmem:[#allocation2 + $0x188] sm:$0x1]  ;;  %v15888_v13 = vpop.f32.mrb[72].mxu0  ;;  %12150 = vmatmul.mubr.msk.bf16.gmra.mrb[92].mxu1 %vm2631_vm15, %v8383_v1  ;;  %v5300_v42 = vsel %vm13514_vm8, %v5295_v51, %v5299_v34  ;;  %v5325_v24 = vshrl.u32 %v4754_v18, 16 }
 0x457   : > { %v5314_v21 = vrot.slane %v5312_v4, 4  ;;  %v5317_v38 = vrot.slane %v5315_v23, 5  ;;  %v4756_v36 = vld [vmem:[#allocation2 + $0x138] sm:$0xf]  ;;  %7721 = vst.msk [vmem:[#allocation3 + $0x400] sm:$0xff] %vm3723_vm0, %v7651_v48  ;;  %v15894_v40 = vpop.f32.mrb[73].mxu0  ;;  %9953 = vmatprep.mubr.bf16.mxu1 %v9499_v29 }
 0x458   : > { %v5305_v53 = vrot.slane %v5304_v16, 4  ;;  %v4160_v45 = vsel %vm14117_vm14, %v4158_v11, %v4159_v22  ;;  %v5323_v28 = vrot.slane %v5321_v46, 5  ;;  %v5331_v35 = vshll.u32 %v4755_v31, 16  ;;  %v15898_v25 = vpop.f32.mrb[74].mxu0  ;;  %v15900_v57 = vpop.f32.mrb[52].mxu1  ;;  %v17366_v60 = vld [vmem:[#allocation38_spill] sm:$0xff] }
 0x459   : > { %v11002_v51 = vcombine.low %v4157_v41, %v4160_v45  ;;  %v5318_v4 = vor.u32 %v5317_v38, %v5314_v21  ;;  %v5327_v23 = vrot.slane %v5325_v24, 4  ;;  %v10971_v34 = vrot.slane %v3846_v27, 9  ;;  %v4757_v18 = vld [vmem:[#allocation2 + $0x13c] sm:$0xf]  ;;  %v15902_v1 = vpop.f32.mrb[75].mxu0  ;;  %v15904_v48 = vpop.f32.mrb[53].mxu1 }
 0x45a   : > { %17323 = vst [vmem:[#allocation52_spill] sm:$0xff] %v15904_v48  ;;  %v5310_v29 = vsel %vm13514_vm8, %v5305_v53, %v5309_v7  ;;  %v5333_v16 = vrot.slane %v5331_v35, 5  ;;  %v4163_v22 = vrot.slane %v3847_v0, 5  ;;  %v4166_v11 = vrot.slane %v3848_v37, 5  ;;  %v9520_v31 = vld [vmem:[#allocation3 + $0x330] sm:$0xff]  ;;  %v15908_v46 = vpop.f32.mrb[54].mxu1 }
 0x45b   : > { %17324 = vst [vmem:[#allocation53_spill] sm:$0xff] %v15908_v46  ;;  %v11058_v6 = vcombine.low %v5300_v42, %v5310_v29  ;;  %4332 = vst.msk [vmem:[#allocation3 + $0x490] sm:$0xff] %vm2631_vm15, %v11002_v51  ;;  %v5319_v41 = vrot.slane %v5318_v4, 4  ;;  %v5328_v21 = vor.u32 %v5327_v23, %v5323_v28  ;;  %v4758_v27 = vld [vmem:[#allocation2 + $0x140] sm:$0x1]  ;;  %v5336_v38 = vshrl.u32 %v4756_v36, 16  ;;  %10147 = vmatmul.mubr.bf16.gmra.mrb[144].mxu0 %v9520_v31 }
 0x45c   : > { %v9526_v24 = vld [vmem:[#allocation3 + $0x360] sm:$0xff]  ;;  %v15911_v45 = vpop.f32.mrb[55].mxu1  ;;  %4684 = vst.msk [vmem:[#allocation3 + $0x490] sm:$0xff] %vm3723_vm0, %v15648_v5  ;;  %v4164_v7 = vsel %vm14117_vm14, %v10971_v34, %v4163_v22  ;;  %v4165_v0 = vrot.slane %v4163_v22, 4  ;;  %v5339_v37 = vshll.u32 %v4756_v36, 16  ;;  %v5345_v42 = vshll.u32 %v4757_v18, 16 }
 0x45d   : > { %17325 = vst [vmem:[#allocation54_spill] sm:$0xff] %v15911_v45  ;;  %v9498_v48 = vld [vmem:[#allocation3 + $0x280] sm:$0xff]  ;;  %v15920_v53 = vld [vmem:[%s17233_s4] ss:$0 sm:$0xff]  ;;  %v3849_v35 = vld [vmem:[#allocation2 + $0x18c] sm:$0xe]  ;;  %10154 = vmatprep.mubr.bf16.mxu0 %v9526_v24  ;;  %v5324_v51 = vsel %vm13514_vm8, %v5319_v41, %v5323_v28 }
 0x45e   : > { %5700 = vst.msk [vmem:[#allocation3 + $0x358] sm:$0xff] %vm2631_vm15, %v11058_v6  ;;  %v5329_v4 = vrot.slane %v5328_v21, 4  ;;  %v5338_v5 = vrot.slane %v5336_v38, 4  ;;  %v5349_v23 = vshrl.u32 %v4757_v18, 16  ;;  %v3850_v29 = vld [vmem:[#allocation2 + $0x190] sm:$0xf]  ;;  %v4167_v36 = vsel %vm14117_vm14, %v4165_v0, %v4166_v11  ;;  %9954 = vmatmul.mubr.bf16.vlgmr.msra.gmra.mrb[96].mxu1 %v9498_v48 }
 0x45f   : > { %v12424_v34 = vld [vmem:[#allocation7 + $0x108] sm:$0xff]   ;;  %6340 = vst.msk [vmem:[#allocation3 + $0x358] sm:$0xff] %vm3723_vm0, %v15583_v47  ;;  %v5341_v22 = vrot.slane %v5339_v37, 5  ;;  %v15929_v31 = vrot.slane %v5345_v42, 5  ;;  %v5355_v24 = vshll.u32 %v4758_v27, 16  ;;  %v9504_v6 = vld [vmem:[#allocation3 + $0x2b0] sm:$0xff]  ;;  %v11003_v41 = vcombine.low %v4164_v7, %v4167_v36 }
 0x460   : > { %v3851_v45 = vld [vmem:[#allocation2 + $0x194] sm:$0x1]  ;;  %v5334_v28 = vsel %vm13514_vm8, %v5329_v4, %v5333_v16  ;;  %v5351_v18 = vrot.slane %v5349_v23, 4  ;;  %v11563_v21 = vadd.f32 %v15431_v9, %v15422_v26  ;;  %v4759_v38 = vld [vmem:[#allocation2 + $0x144] sm:$0xf]  ;;  %9961 = vmatprep.mubr.bf16.mxu1 %v9504_v6  ;;  %v10972_v42 = vrot.slane %v3849_v35, 9 }
 0x461   : > { %v12951_v47 = vld [vmem:[#allocation7 + $0x100] sm:$0xff]   ;;  %v11059_v11 = vcombine.low %v5324_v51, %v5334_v28  ;;  %v5342_v0 = vor.u32 %v5341_v22, %v5338_v5  ;;  %v5357_v37 = vrot.slane %v5355_v24, 5  ;;  %v4760_v27 = vld [vmem:[#allocation2 + $0x148] sm:$0xf]  ;;  %v15935_v46 = vpop.f32.mrb[56].mxu1  ;;  %4333 = vst.msk [vmem:[#allocation3 + $0x4b8] sm:$0xff] %vm2631_vm15, %v11003_v41  ;;  %v11566_v5 = vadd.f32 %v15441_v15, %v15436_v55 }
 0x462   : > { %12154 = vmatpush3.bf16.msra.mxu1 %v12951_v47  ;;  %17326 = vst [vmem:[#allocation55_spill] sm:$0xff] %v15935_v46  ;;  %v5352_v48 = vor.u32 %v5351_v18, %v15929_v31  ;;  %v15940_v16 = vadd.f32 %v11563_v21, %v15920_v53  ;;  %v4170_v7 = vrot.slane %v3850_v29, 5  ;;  %v4173_v26 = vrot.slane %v3851_v45, 5  ;;  %v4761_v9 = vld [vmem:[#allocation2 + $0x14c] sm:$0x1]  ;;  %v12429_v4 = vld [vmem:[#allocation7 + $0x110] sm:$0xff]   ;;  %v7653_v45 = vpop.permute.xlu0 %7652 }
 0x463   : > { %12155 = vmatprep.subr.bf16.mxu1 %v12424_v34  ;;  %v15942_v23 = vpop.f32.mrb[76].mxu0  ;;  %v15944_v51 = vpop.f32.mrb[57].mxu1  ;;  %5701 = vst.msk [vmem:[#allocation3 + $0x380] sm:$0xff] %vm2631_vm15, %v11059_v11  ;;  %v5343_v35 = vrot.slane %v5342_v0, 4  ;;  %v5360_v36 = vshrl.u32 %v4759_v38, 16  ;;  %v5363_v22 = vshll.u32 %v4759_v38, 16  ;;  %v15966_v38 = vadd.f32 %v11566_v5, %v15920_v53 }
 0x464   : > { %17327 = vst [vmem:[#allocation56_spill] sm:$0xff] %v15940_v16  ;;  %17328 = vst [vmem:[#allocation57_spill] sm:$0xff] %v15944_v51  ;;  %v4762_v29 = vld [vmem:[#allocation2 + $0x150] sm:$0xf]  ;;  %v15951_v24 = vpop.f32.mrb[77].mxu0  ;;  %v5353_v6 = vrot.slane %v5352_v48, 4  ;;  %v4171_v28 = vsel %vm14117_vm14, %v10972_v42, %v4170_v7 }
 0x465   : > { %4685 = vst.msk [vmem:[#allocation3 + $0x4b8] sm:$0xff] %vm3723_vm0, %v15719_v62  ;;  %6341 = vst.msk [vmem:[#allocation3 + $0x380] sm:$0xff] %vm3723_vm0, %v15667_v54  ;;  %v4172_v41 = vrot.slane %v4170_v7, 4  ;;  %v5369_v18 = vshll.u32 %v4760_v27, 16  ;;  %v15958_v62 = vpop.f32.mrb[78].mxu0  ;;  %v15960_v55 = vpop.f32.mrb[58].mxu1  ;;  %v5348_v21 = vsel %vm13514_vm8, %v5343_v35, %v15929_v31 }
 0x466   : > { %7722 = vst.msk [vmem:[#allocation3 + $0x428] sm:$0xff] %vm3723_vm0, %v7653_v45  ;;  %17329 = vst [vmem:[#allocation58_spill] sm:$0xff] %v15960_v55  ;;  %v9503_v15 = vld [vmem:[#allocation3 + $0x2a8] sm:$0xff]  ;;  %v5362_v54 = vrot.slane %v5360_v36, 4  ;;  %v5365_v47 = vrot.slane %v5363_v22, 5  ;;  %12156 = vmatpush3.bf16.msra.mxu1 %v12424_v34  ;;  %v15968_v0 = vpop.f32.mrb[79].mxu0  ;;  %v5358_v48 = vsel %vm13514_vm8, %v5353_v6, %v5357_v37 }
 0x467   : > { %17330 = vst [vmem:[#allocation59_spill] sm:$0xff] %v15966_v38  ;;  %v4763_v11 = vld [vmem:[#allocation2 + $0x154] sm:$0xf]  ;;  %v15970_v42 = vpop.f32.mrb[59].mxu1  ;;  %v4174_v7 = vsel %vm14117_vm14, %v4172_v41, %v4173_v26  ;;  %v15976_v45 = vrot.slane %v5369_v18, 5  ;;  %v5373_v31 = vshrl.u32 %v4760_v27, 16  ;;  %12157 = vmatprep.subr.bf16.mxu1 %v12429_v4  ;;  %v11060_v38 = vcombine.low %v5348_v21, %v5358_v48  ;;  %9962 = vmatmul.mubr.bf16.gmra.mrb[100].mxu1 %v9503_v15  ;;  %v6272_v48 = vpop.permute.xlu1 %6271 }
 0x468   : > { %17331 = vst [vmem:[#allocation60_spill] sm:$0xff] %v15970_v42  ;;  %v4764_v35 = vld [vmem:[#allocation2 + $0x158] sm:$0x1]  ;;  %v9525_v5 = vld [vmem:[#allocation3 + $0x358] sm:$0xff]  ;;  %v11004_v34 = vcombine.low %v4171_v28, %v4174_v7  ;;  %v5366_v16 = vor.u32 %v5365_v47, %v5362_v54  ;;  %v5379_v55 = vshll.u32 %v4761_v9, 16  ;;  %v5384_v6 = vshrl.u32 %v4762_v29, 16 }
 0x469   : > { %v12432_v36 = vld [vmem:[#allocation7 + $0x118] sm:$0xff]   ;;  %v4765_v51 = vld [vmem:[#allocation2 + $0x15c] sm:$0xf]  ;;  %10155 = vmatmul.mubr.bf16.gmra.mrb[148].mxu0 %v9525_v5  ;;  %v5375_v37 = vrot.slane %v5373_v31, 4  ;;  %v5387_v46 = vshll.u32 %v4762_v29, 16  ;;  %v5393_v26 = vshll.u32 %v4763_v11, 16  ;;  %v11572_v31 = vadd.f32 %v15474_v8, %v15467_v52 }
 0x46a   : > { %v9509_v22 = vld [vmem:[#allocation3 + $0x2d8] sm:$0xff]  ;;  %v9531_v42 = vld [vmem:[#allocation3 + $0x388] sm:$0xff]  ;;  %v15978_v41 = vld [vmem:[#allocation2 + $0x160] sm:$0xf]  ;;  %5702 = vst.msk [vmem:[#allocation3 + $0x3a8] sm:$0xff] %vm2631_vm15, %v11060_v38  ;;  %v5367_v27 = vrot.slane %v5366_v16, 4  ;;  %12158 = vmatpush3.bf16.msra.mxu1 %v12429_v4 }
 0x46b   : > { %10162 = vmatprep.mubr.bf16.mxu0 %v9531_v42  ;;  %9969 = vmatprep.mubr.bf16.mxu1 %v9509_v22  ;;  %4334 = vst.msk [vmem:[#allocation3 + $0x4e0] sm:$0xff] %vm2631_vm15, %v11004_v34  ;;  %v5381_v28 = vrot.slane %v5379_v55, 5  ;;  %v5397_v18 = vshrl.u32 %v4763_v11, 16  ;;  %v5403_v9 = vshll.u32 %v4764_v35, 16  ;;  %v15982_v21 = vpop.f32.mrb[60].mxu1  ;;  %v5376_v29 = vor.u32 %v5375_v37, %v15976_v45  ;;  %v15989_v47 = vpop.f32.mrb[80].mxu0 }
 0x46c   : > { %6342 = vst.msk [vmem:[#allocation3 + $0x3a8] sm:$0xff] %vm3723_vm0, %v15734_v43  ;;  %4686 = vst.msk [vmem:[#allocation3 + $0x4e0] sm:$0xff] %vm3723_vm0, %v15789_v32  ;;  %v5386_v15 = vrot.slane %v5384_v6, 4  ;;  %v5389_v54 = vrot.slane %v5387_v46, 5  ;;  %v5395_v38 = vrot.slane %v5393_v26, 5  ;;  %12159 = vmatprep.subr.bf16.mxu1 %v12432_v36  ;;  %v15991_v16 = vpop.f32.mrb[61].mxu1  ;;  %v5372_v4 = vsel %vm13514_vm8, %v5367_v27, %v15976_v45 }
 0x46d   : > { %v5399_v55 = vrot.slane %v5397_v18, 4  ;;  %v5405_v11 = vrot.slane %v5403_v9, 5  ;;  %v11569_v43 = vadd.f32 %v15460_v63, %v15456_v58  ;;  %v15998_v32 = vpop.f32.mrb[81].mxu0  ;;  %v16000_v42 = vpop.f32.mrb[62].mxu1  ;;  %v5377_v46 = vrot.slane %v5376_v29, 4  ;;  %v9530_v9 = vld [vmem:[#allocation3 + $0x380] sm:$0xff] }
 0x46e   : > { %v5390_v7 = vor.u32 %v5389_v54, %v5386_v15  ;;  %v5408_v35 = vshrl.u32 %v4765_v51, 16  ;;  %v16004_v5 = vpop.f32.mrb[82].mxu0  ;;  %v4767_v34 = vld [vmem:[#allocation2 + $0x164] sm:$0x1]  ;;  %v5411_v37 = vshll.u32 %v4765_v51, 16  ;;  %v5417_v58 = vshll.u32 %v15978_v41, 16  ;;  %12160 = vmatpush3.bf16.msra.mxu1 %v12432_v36 }
 0x46f   : > { %v5400_v22 = vor.u32 %v5399_v55, %v5395_v38  ;;  %v16007_v45 = vadd.f32 %v11569_v43, %v15920_v53  ;;  %v16010_v63 = vpop.f32.mrb[83].mxu0  ;;  %v16012_v6 = vpop.f32.mrb[63].mxu1  ;;  %v5382_v26 = vsel %vm13514_vm8, %v5377_v46, %v5381_v28  ;;  %v16017_v8 = vadd.f32 %v11572_v31, %v15920_v53  ;;  %v4768_v18 = vld [vmem:[#allocation2 + $0x168] sm:$0xf]  ;;  %v9508_v29 = vld [vmem:[#allocation3 + $0x2d0] sm:$0xff]  ;;  %v9514_v43 = vld [vmem:[#allocation3 + $0x300] sm:$0xff] }
 0x470   : > { %v5391_v52 = vrot.slane %v5390_v7, 4  ;;  %v5410_v27 = vrot.slane %v5408_v35, 4  ;;  %v11061_v15 = vcombine.low %v5372_v4, %v5382_v26  ;;  %v5413_v54 = vrot.slane %v5411_v37, 5  ;;  %v9536_v36 = vld [vmem:[#allocation3 + $0x3b0] sm:$0xff]  ;;  %9970 = vmatmul.mubr.bf16.gmra.mrb[104].mxu1 %v9508_v29  ;;  %v4769_v37 = vld [vmem:[#allocation2 + $0x16c] sm:$0xf] }
 0x471   : > { %v5401_v51 = vrot.slane %v5400_v22, 4  ;;  %v16019_v55 = vrot.slane %v5417_v58, 5  ;;  %10163 = vmatmul.mubr.bf16.gmra.mrb[152].mxu0 %v9530_v9  ;;  %v5421_v46 = vshrl.u32 %v15978_v41, 16  ;;  %v5427_v7 = vshll.u32 %v4767_v34, 16  ;;  %9977 = vmatprep.mubr.bf16.mxu1 %v9514_v43  ;;  %v4770_v58 = vld [vmem:[#allocation2 + $0x170] sm:$0x1]  ;;  %v6274_v34 = vpop.permute.xlu1 %6273 }
 0x472   : > { %v5396_v28 = vsel %vm13514_vm8, %v5391_v52, %v5395_v38  ;;  %v11575_v31 = vadd.f32 %v15504_v14, %v15495_v33  ;;  %10170 = vmatprep.mubr.bf16.mxu0 %v9536_v36  ;;  %5703 = vst.msk [vmem:[#allocation3 + $0x3d0] sm:$0xff] %vm2631_vm15, %v11061_v15  ;;  %v5414_v35 = vor.u32 %v5413_v54, %v5410_v27  ;;  %v5432_v38 = vshrl.u32 %v4768_v18, 16  ;;  %v4771_v15 = vld [vmem:[#allocation2 + $0x174] sm:$0xf]  ;;  %s11504_s15 = sshll.u32 %s13144_s22, 13  ;;  %s10695_s22 = scalar_lea.sflag [#allocation6], %s13262_s23 }
 0x473   : > { %v5406_v4 = vsel %vm13514_vm8, %v5401_v51, %v5405_v11  ;;  %v11578_v22 = vadd.f32 %v15517_v49, %v15511_v17  ;;  %6343 = vst.msk [vmem:[#allocation3 + $0x3d0] sm:$0xff] %vm3723_vm0, %v6272_v48  ;;  %v5423_v26 = vrot.slane %v5421_v46, 4  ;;  %v5429_v33 = vrot.slane %v5427_v7, 5  ;;  %v16040_v51 = vpop.f32.mrb[84].mxu0  ;;  %s17180_s28 = scalar_lea.hbm %s17234_s5, %s11504_s15 }
 0x474   : > { %v11062_v41 = vcombine.low %v5396_v28, %v5406_v4  ;;  %v16033_v14 = vadd.f32 %v11575_v31, %v15920_v53  ;;  %v5415_v52 = vrot.slane %v5414_v35, 4  ;;  %v5434_v11 = vrot.slane %v5432_v38, 4  ;;  %v4772_v28 = vld [vmem:[#allocation2 + $0x178] sm:$0xf]  ;;  %v16050_v46 = vpop.f32.mrb[85].mxu0  ;;  %v9513_v38 = vld [vmem:[#allocation3 + $0x2f8] sm:$0xff] }
 0x475   : > { %v16036_v9 = vadd.f32 %v11578_v22, %v15920_v53  ;;  %v5435_v27 = vshll.u32 %v4768_v18, 16  ;;  %v5424_v17 = vor.u32 %v5423_v26, %v16019_v55  ;;  %v5441_v49 = vshll.u32 %v4769_v37, 16  ;;  %v7655_v22 = vpop.permute.xlu0 %7654 }
 0x476   : > { %5704 = vst.msk [vmem:[#allocation3 + $0x3f8] sm:$0xff] %vm2631_vm15, %v11062_v41  ;;  %v5445_v29 = vshrl.u32 %v4769_v37, 16  ;;  %v5451_v48 = vshll.u32 %v4770_v58, 16  ;;  %v5420_v54 = vsel %vm13514_vm8, %v5415_v52, %v16019_v55  ;;  %v11581_v18 = vadd.f32 %v15541_v59, %v15537_v19  ;;  %v9535_v37 = vld [vmem:[#allocation3 + $0x3a8] sm:$0xff]  ;;  %v16052_v58 = vpop.f32.mrb[86].mxu0  ;;  %v6276_v55 = vpop.permute.xlu1 %6275 }
 0x477   : > { %17332 = vst [vmem:[#allocation61_spill] sm:$0xff] %v16036_v9  ;;  %6344 = vst.msk [vmem:[#allocation3 + $0x3f8] sm:$0xff] %vm3723_vm0, %v6274_v34  ;;  %v5437_v36 = vrot.slane %v5435_v27, 5  ;;  %v11584_v43 = vadd.f32 %v15553_v12, %v15547_v3  ;;  %v5425_v7 = vrot.slane %v5424_v17, 4  ;;  %v5443_v31 = vrot.slane %v5441_v49, 5  ;;  %v9541_v12 = vld [vmem:[#allocation3 + $0x3d8] sm:$0xff] }
 0x478   : > { %v5447_v4 = vrot.slane %v5445_v29, 4  ;;  %v5453_v35 = vrot.slane %v5451_v48, 5  ;;  %v16055_v34 = vadd.f32 %v11581_v18, %v15920_v53  ;;  %v4773_v59 = vld [vmem:[#allocation2 + $0x17c] sm:$0x1]  ;;  %v5456_v3 = vshrl.u32 %v4771_v15, 16  ;;  %7723 = vst.msk [vmem:[#allocation3 + $0x450] sm:$0xff] %vm3723_vm0, %v7655_v22  ;;  %9978 = vmatmul.mubr.bf16.gmra.mrb[108].mxu1 %v9513_v38 }
 0x479   : > { %v5438_v41 = vor.u32 %v5437_v36, %v5434_v11  ;;  %v16058_v19 = vadd.f32 %v11584_v43, %v15920_v53  ;;  %10171 = vmatmul.mubr.bf16.gmra.mrb[156].mxu0 %v9535_v37  ;;  %v16061_v26 = vpop.f32.mrb[87].mxu0  ;;  %v9519_v52 = vld [vmem:[#allocation3 + $0x328] sm:$0xff]  ;;  %v5430_v27 = vsel %vm13514_vm8, %v5425_v7, %v5429_v33  ;;  %v5459_v17 = vshll.u32 %v4771_v15, 16  ;;  %v4774_v43 = vld [vmem:[#allocation2 + $0x180] sm:$0xf] }
 0x47a   : > { %v5448_v11 = vor.u32 %v5447_v4, %v5443_v31  ;;  %v5465_v49 = vshll.u32 %v4772_v28, 16  ;;  %10178 = vmatprep.mubr.bf16.mxu0 %v9541_v12  ;;  %9985 = vmatprep.mubr.bf16.mxu1 %v9519_v52  ;;  %v11063_v29 = vcombine.low %v5420_v54, %v5430_v27  ;;  %v5458_v36 = vrot.slane %v5456_v3, 4  ;;  %v4775_v7 = vld [vmem:[#allocation2 + $0x184] sm:$0xf]  ;;  %v16075_v12 = vpop.f32.mrb[88].mxu0  ;;  %v6278_v52 = vpop.permute.xlu1 %6277 }
 0x47b   : > { %17333 = vst [vmem:[#allocation62_spill] sm:$0xff] %v16058_v19  ;;  %v5439_v48 = vrot.slane %v5438_v41, 4  ;;  %v5469_v18 = vshrl.u32 %v4772_v28, 16  ;;  %v5461_v37 = vrot.slane %v5459_v17, 5  ;;  %v5475_v19 = vshll.u32 %v4773_v59, 16  ;;  %v7657_v17 = vpop.permute.xlu0 %7656 }
 0x47c   : > { %v5449_v22 = vrot.slane %v5448_v11, 4  ;;  %v5467_v9 = vrot.slane %v5465_v49, 5  ;;  %5705 = vst.msk [vmem:[#allocation3 + $0x420] sm:$0xff] %vm2631_vm15, %v11063_v29  ;;  %v11587_v15 = vadd.f32 %v15585_v30, %v15571_v44  ;;  %v11590_v54 = vadd.f32 %v15597_v61, %v15594_v39  ;;  %v4776_v59 = vld [vmem:[#allocation2 + $0x188] sm:$0x1]  ;;  %v16083_v61 = vpop.f32.mrb[89].mxu0 }
 0x47d   : > { %v5444_v38 = vsel %vm13514_vm8, %v5439_v48, %v5443_v31  ;;  %v5471_v33 = vrot.slane %v5469_v18, 4  ;;  %6345 = vst.msk [vmem:[#allocation3 + $0x420] sm:$0xff] %vm3723_vm0, %v6276_v55  ;;  %v5462_v4 = vor.u32 %v5461_v37, %v5458_v36  ;;  %v5477_v41 = vrot.slane %v5475_v19, 5  ;;  %v4777_v39 = vld [vmem:[#allocation2 + $0x18c] sm:$0xf]  ;;  %v9540_v49 = vld [vmem:[#allocation3 + $0x3d0] sm:$0xff] }
 0x47e   : > { %v5454_v28 = vsel %vm13514_vm8, %v5449_v22, %v5453_v35  ;;  %v5480_v3 = vshrl.u32 %v4774_v43, 16  ;;  %v16078_v44 = vadd.f32 %v11587_v15, %v15920_v53  ;;  %v16081_v30 = vadd.f32 %v11590_v54, %v15920_v53  ;;  %v16085_v29 = vpop.f32.mrb[90].mxu0  ;;  %v9518_v48 = vld [vmem:[#allocation3 + $0x320] sm:$0xff]  ;;  %7724 = vst.msk [vmem:[#allocation3 + $0x478] sm:$0xff] %vm3723_vm0, %v7657_v17  ;;  %v17336_v37 = vld [vmem:[#allocation19_spill] sm:$0xff] }
 0x47f   : > { %v11064_v31 = vcombine.low %v5444_v38, %v5454_v28  ;;  %v5472_v27 = vor.u32 %v5471_v33, %v5467_v9  ;;  %v5463_v55 = vrot.slane %v5462_v4, 4  ;;  %v5483_v11 = vshll.u32 %v4774_v43, 16  ;;  %v17337_v38 = vld [vmem:[#allocation20_spill] sm:$0xff]  ;;  %v9546_v15 = vld [vmem:[#allocation3 + $0x400] sm:$0xff]  ;;  %v16091_v54 = vpop.f32.mrb[91].mxu0  ;;  %v9524_v43 = vld [vmem:[#allocation3 + $0x350] sm:$0xff] }
 0x480   : > { %17334 = vst [vmem:[#allocation63_spill] sm:$0xff] %v16078_v44  ;;  %17335 = vst [vmem:[#allocation64_spill] sm:$0xff] %v16081_v30  ;;  %v5482_v35 = vrot.slane %v5480_v3, 4  ;;  %v5489_v19 = vshll.u32 %v4775_v7, 16  ;;  %v5493_v18 = vshrl.u32 %v4775_v7, 16  ;;  %v5499_v22 = vshll.u32 %v4776_v59, 16  ;;  %9986 = vmatmul.mubr.bf16.gmra.mrb[112].mxu1 %v9518_v48  ;;  %v6280_v30 = vpop.permute.xlu1 %6279 }
 0x481   : > { %5706 = vst.msk [vmem:[#allocation3 + $0x448] sm:$0xff] %vm2631_vm15, %v11064_v31  ;;  %v5473_v36 = vrot.slane %v5472_v27, 4  ;;  %v11593_v33 = vadd.f32 %v17337_v38, %v17336_v37  ;;  %10179 = vmatmul.mubr.bf16.gmra.mrb[160].mxu0 %v9540_v49  ;;  %v5468_v28 = vsel %vm13514_vm8, %v5463_v55, %v5467_v9  ;;  %v5485_v4 = vrot.slane %v5483_v11, 5  ;;  %v17338_v7 = vld [vmem:[#allocation21_spill] sm:$0xff]  ;;  %v17339_v59 = vld [vmem:[#allocation22_spill] sm:$0xff]  ;;  %9993 = vmatprep.mubr.bf16.mxu1 %v9524_v43 }
 0x482   : > { %6346 = vst.msk [vmem:[#allocation3 + $0x448] sm:$0xff] %vm3723_vm0, %v6278_v52  ;;  %v5491_v3 = vrot.slane %v5489_v19, 5  ;;  %v11596_v31 = vadd.f32 %v17339_v59, %v17338_v7  ;;  %10186 = vmatprep.mubr.bf16.mxu0 %v9546_v15  ;;  %v4778_v27 = vld [vmem:[#allocation2 + $0x190] sm:$0xf]  ;;  %v5495_v49 = vrot.slane %v5493_v18, 4  ;;  %v5501_v37 = vrot.slane %v5499_v22, 5 }
 0x483   : > { %v5478_v17 = vsel %vm13514_vm8, %v5473_v36, %v5477_v41  ;;  %v16101_v48 = vadd.f32 %v11593_v33, %v15920_v53  ;;  %v4779_v52 = vld [vmem:[#allocation2 + $0x194] sm:$0x1]  ;;  %v5486_v9 = vor.u32 %v5485_v4, %v5482_v35  ;;  %v5504_v11 = vshrl.u32 %v4777_v39, 16  ;;  %v17342_v22 = vld [vmem:[#allocation14_spill] sm:$0xff] }
 0x484   : > { %v11065_v38 = vcombine.low %v5468_v28, %v5478_v17  ;;  %v16104_v55 = vadd.f32 %v11596_v31, %v15920_v53  ;;  %v5496_v19 = vor.u32 %v5495_v49, %v5491_v3  ;;  %v5507_v15 = vshll.u32 %v4777_v39, 16  ;;  %v17343_v33 = vld [vmem:[#allocation13_spill] sm:$0xff]  ;;  %v4780_v44 = vld [vmem:[#allocation2 + $0x198] sm:$0xf]  ;;  %v4781_v17 = vld [vmem:[#allocation2 + $0x19c] sm:$0xf] }
 0x485   : > { %17340 = vst [vmem:[#allocation19_spill] sm:$0xff] %v16101_v48  ;;  %v5513_v7 = vshll.u32 %v4778_v27, 16  ;;  %v5517_v43 = vshrl.u32 %v4778_v27, 16  ;;  %v5487_v41 = vrot.slane %v5486_v9, 4  ;;  %v5506_v36 = vrot.slane %v5504_v11, 4  ;;  %v9545_v11 = vld [vmem:[#allocation3 + $0x3f8] sm:$0xff] }
 0x486   : > { %17341 = vst [vmem:[#allocation20_spill] sm:$0xff] %v16104_v55  ;;  %5707 = vst.msk [vmem:[#allocation3 + $0x470] sm:$0xff] %vm2631_vm15, %v11065_v38  ;;  %v5523_v18 = vshll.u32 %v4779_v52, 16  ;;  %v11599_v59 = vadd.f32 %v17343_v33, %v17342_v22  ;;  %v5497_v35 = vrot.slane %v5496_v19, 4  ;;  %v5509_v28 = vrot.slane %v5507_v15, 5  ;;  %v17345_v38 = vld [vmem:[#allocation15_spill] sm:$0xff] }
 0x487   : > { %6347 = vst.msk [vmem:[#allocation3 + $0x470] sm:$0xff] %vm3723_vm0, %v6280_v30  ;;  %v5515_v4 = vrot.slane %v5513_v7, 5  ;;  %v5519_v31 = vrot.slane %v5517_v43, 4  ;;  %v5492_v39 = vsel %vm13514_vm8, %v5487_v41, %v5491_v3  ;;  %v17346_v52 = vld [vmem:[#allocation23_spill] sm:$0xff]  ;;  %v9523_v22 = vld [vmem:[#allocation3 + $0x348] sm:$0xff]  ;;  %v5528_v43 = vshrl.u32 %v4780_v44, 16 }
 0x488   : > { %v5525_v27 = vrot.slane %v5523_v18, 5  ;;  %v16113_v49 = vadd.f32 %v11599_v59, %v15920_v53  ;;  %v11602_v9 = vadd.f32 %v17346_v52, %v17345_v38  ;;  %v5502_v30 = vsel %vm13514_vm8, %v5497_v35, %v5501_v37  ;;  %v4782_v7 = vld [vmem:[#allocation2 + $0x1a0] sm:$0x1]  ;;  %v9551_v33 = vld [vmem:[#allocation3 + $0x428] sm:$0xff]  ;;  %v16119_v55 = vpop.f32.mrb[92].mxu0  ;;  %9994 = vmatmul.mubr.bf16.gmra.mrb[116].mxu1 %v9523_v22  ;;  %v9529_v3 = vld [vmem:[#allocation3 + $0x378] sm:$0xff]  ;;  %v6282_v18 = vpop.permute.xlu1 %6281 }
 0x489   : > { %v5510_v19 = vor.u32 %v5509_v28, %v5506_v36  ;;  %v5520_v15 = vor.u32 %v5519_v31, %v5515_v4  ;;  %10187 = vmatmul.mubr.bf16.gmra.mrb[164].mxu0 %v9545_v11  ;;  %v11066_v41 = vcombine.low %v5492_v39, %v5502_v30  ;;  %v5531_v38 = vshll.u32 %v4780_v44, 16  ;;  %10001 = vmatprep.mubr.bf16.mxu1 %v9529_v3  ;;  %v17348_v30 = vld [vmem:[#allocation24_spill] sm:$0xff] }
 0x48a   : > { %17344 = vst [vmem:[#allocation21_spill] sm:$0xff] %v16113_v49  ;;  %v16122_v59 = vadd.f32 %v11602_v9, %v15920_v53  ;;  %v5537_v52 = vshll.u32 %v4781_v17, 16  ;;  %10194 = vmatprep.mubr.bf16.mxu0 %v9551_v33  ;;  %v16124_v49 = vpop.f32.mrb[93].mxu0  ;;  %v5530_v35 = vrot.slane %v5528_v43, 4  ;;  %v5541_v28 = vshrl.u32 %v4781_v17, 16  ;;  %v17349_v9 = vld [vmem:[#allocation25_spill] sm:$0xff] }
 0x48b   : > { %v5511_v37 = vrot.slane %v5510_v19, 4  ;;  %v5521_v36 = vrot.slane %v5520_v15, 4  ;;  %v16126_v31 = vpop.f32.mrb[94].mxu0  ;;  %5708 = vst.msk [vmem:[#allocation3 + $0x498] sm:$0xff] %vm2631_vm15, %v11066_v41  ;;  %v5533_v11 = vrot.slane %v5531_v38, 5  ;;  %v5547_v22 = vshll.u32 %v4782_v7, 16 }
 0x48c   : > { %17347 = vst [vmem:[#allocation22_spill] sm:$0xff] %v16122_v59  ;;  %v5539_v39 = vrot.slane %v5537_v52, 5  ;;  %v11605_v59 = vadd.f32 %v17349_v9, %v17348_v30  ;;  %v16131_v44 = vpop.f32.mrb[95].mxu0  ;;  %6348 = vst.msk [vmem:[#allocation3 + $0x498] sm:$0xff] %vm3723_vm0, %v6282_v18  ;;  %v5543_v15 = vrot.slane %v5541_v28, 4  ;;  %v17350_v43 = vld [vmem:[#allocation26_spill] sm:$0xff]  ;;  %v6284_v38 = vpop.permute.xlu1 %6283 }
 0x48d   : > { %v5516_v19 = vsel %vm13514_vm8, %v5511_v37, %v5515_v4  ;;  %v5526_v17 = vsel %vm13514_vm8, %v5521_v36, %v5525_v27  ;;  %v17351_v33 = vld [vmem:[#allocation27_spill] sm:$0xff]  ;;  %v5534_v7 = vor.u32 %v5533_v11, %v5530_v35  ;;  %v5549_v52 = vrot.slane %v5547_v22, 5  ;;  %v17352_v48 = vld [vmem:[#allocation28_spill] sm:$0xff]  ;;  %v17353_v4 = vld [vmem:[#allocation29_spill] sm:$0xff] }
 0x48e   : > { %v11608_v3 = vadd.f32 %v17351_v33, %v17350_v43  ;;  %v11067_v41 = vcombine.low %v5516_v19, %v5526_v17  ;;  %v16141_v30 = vadd.f32 %v11605_v59, %v15920_v53  ;;  %v5544_v9 = vor.u32 %v5543_v15, %v5539_v39  ;;  %v16152_v36 = vld [vmem:[#allocation2 + $0xf0] sm:$0xe]  ;;  %v17354_v11 = vld [vmem:[#allocation30_spill] sm:$0xff]  ;;  %v17355_v59 = vld [vmem:[#allocation31_spill] sm:$0xff] }
 0x48f   : > { %v11611_v37 = vadd.f32 %v17353_v4, %v17352_v48  ;;  %v16150_v27 = vadd.f32 %v15805_v56, %v15795_v10  ;;  %v5535_v35 = vrot.slane %v5534_v7, 4  ;;  %v9550_v28 = vld [vmem:[#allocation3 + $0x420] sm:$0xff]  ;;  %v11614_v22 = vadd.f32 %v17355_v59, %v17354_v11  ;;  %v17356_v19 = vld [vmem:[#allocation40_spill] sm:$0xff]  ;;  %v9556_v56 = vld [vmem:[#allocation3 + $0x450] sm:$0xff] }
 0x490   : > { %v16144_v18 = vadd.f32 %v11608_v3, %v15920_v53  ;;  %5709 = vst.msk [vmem:[#allocation3 + $0x4c0] sm:$0xff] %vm2631_vm15, %v11067_v41  ;;  %v17357_v17 = vld [vmem:[#allocation41_spill] sm:$0xff]  ;;  %v17358_v43 = vld [vmem:[#allocation32_spill] sm:$0xff]  ;;  %v9528_v3 = vld [vmem:[#allocation3 + $0x370] sm:$0xff]  ;;  %v5545_v10 = vrot.slane %v5544_v9, 4  ;;  %v16169_v7 = vadd.f32 %v15855_v50, %v15850_v2 }
 0x491   : > { %v16159_v15 = vadd.f32 %v17357_v17, %v17356_v19  ;;  %v17359_v33 = vld [vmem:[#allocation33_spill] sm:$0xff]  ;;  %6349 = vst.msk [vmem:[#allocation3 + $0x4c0] sm:$0xff] %vm3723_vm0, %v6284_v38  ;;  %10195 = vmatmul.mubr.bf16.gmra.mrb[168].mxu0 %v9550_v28  ;;  %v16165_v41 = vadd.f32 %v11611_v37, %v15920_v53  ;;  %v17360_v4 = vld [vmem:[#allocation34_spill] sm:$0xff]  ;;  %v17361_v11 = vld [vmem:[#allocation35_spill] sm:$0xff]  ;;  %10002 = vmatmul.mubr.bf16.gmra.mrb[120].mxu1 %v9528_v3  ;;  %v11213_v37 = vrot.slane %v16152_v36, 9  ;;  %v16182_v28 = vpop.f32.mrb[96].mxu0  ;;  %v6286_v36 = vpop.permute.xlu1 %6285 }
 0x492   : > { %v11617_v48 = vadd.f32 %v17359_v33, %v17358_v43  ;;  %v11620_v59 = vadd.f32 %v17361_v11, %v17360_v4  ;;  %v9534_v19 = vld [vmem:[#allocation3 + $0x3a0] sm:$0xff]  ;;  %v5540_v17 = vsel %vm13514_vm8, %v5535_v35, %v5539_v39  ;;  %10202 = vmatprep.mubr.bf16.mxu0 %v9556_v56  ;;  %v16176_v38 = vadd.f32 %v11614_v22, %v15920_v53  ;;  %v17362_v43 = vld [vmem:[#allocation46_spill] sm:$0xff]  ;;  %v17363_v39 = vld [vmem:[#allocation48_spill] sm:$0xff] }
 0x493   : > { %10009 = vmatprep.mubr.bf16.mxu1 %v9534_v19  ;;  %v5550_v2 = vsel %vm13514_vm8, %v5545_v10, %v5549_v52  ;;  %v16191_v35 = vadd.f32 %v17363_v39, %v17362_v43  ;;  %v17364_v22 = vld [vmem:[#allocation36_spill] sm:$0xff]  ;;  %v17365_v33 = vld [vmem:[#allocation37_spill] sm:$0xff]  ;;  %v16199_v4 = vadd.f32 %v15894_v40, %v15888_v13  ;;  %v17367_v52 = vld [vmem:[#allocation39_spill] sm:$0xff]  ;;  %v16205_v11 = vadd.f32 %v15902_v1, %v15898_v25  ;;  %v7659_v19 = vpop.permute.xlu0 %7658 }
 0x494   : > { %v16179_v9 = vadd.f32 %v11617_v48, %v15920_v53  ;;  %v16187_v50 = vadd.f32 %v11620_v59, %v15920_v53  ;;  %v11623_v3 = vadd.f32 %v17365_v33, %v17364_v22  ;;  %v16195_v48 = vpop.f32.mrb[97].mxu0  ;;  %v11068_v56 = vcombine.low %v5540_v17, %v5550_v2  ;;  %v17368_v39 = vld [vmem:[#allocation42_spill] sm:$0xff]  ;;  %v17369_v17 = vld [vmem:[#allocation43_spill] sm:$0xff]  ;;  %v17370_v40 = vld [vmem:[#allocation44_spill] sm:$0xff]  ;;  %7725 = vst.msk [vmem:[#allocation3 + $0x4a0] sm:$0xff] %vm3723_vm0, %v7659_v19 }
 0x495   : > { %v11626_v10 = vadd.f32 %v17367_v52, %v17366_v60  ;;  %v16207_v59 = vpop.f32.mrb[98].mxu0  ;;  %v11629_v2 = vadd.f32 %v17369_v17, %v17368_v39  ;;  %v16216_v13 = vadd.f32 %v15951_v24, %v15942_v23  ;;  %v17371_v22 = vld [vmem:[#allocation45_spill] sm:$0xff]  ;;  %v7778_v52 = vld [vmem:[#allocation2 + $0xf8] sm:$0x1]  ;;  %v17373_v23 = vld [vmem:[#allocation47_spill] sm:$0xff]  ;;  %v16235_v17 = vadd.f32 %v15998_v32, %v15989_v47 }
 0x496   : > { %v16210_v43 = vadd.f32 %v11623_v3, %v15920_v53  ;;  %v11632_v33 = vadd.f32 %v17371_v22, %v17370_v40  ;;  %v7777_v60 = vld [vmem:[#allocation2 + $0xf4] sm:$0xf]  ;;  %v16220_v25 = vpop.f32.mrb[99].mxu0  ;;  %5710 = vst.msk [vmem:[#allocation3 + $0x4e8] sm:$0xff] %vm2631_vm15, %v11068_v56  ;;  %v16229_v3 = vadd.f32 %v15968_v0, %v15958_v62  ;;  %v7781_v40 = vld [vmem:[#allocation2 + $0x104] sm:$0x1]  ;;  %v16248_v0 = vadd.f32 %v16010_v63, %v16004_v5 }
 0x497   : > { %v16225_v1 = vadd.f32 %v11626_v10, %v15920_v53  ;;  %v17374_v24 = vld [vmem:[#allocation49_spill] sm:$0xff]  ;;  %6350 = vst.msk [vmem:[#allocation3 + $0x4e8] sm:$0xff] %vm3723_vm0, %v6286_v36  ;;  %v16239_v19 = vadd.f32 %v11629_v2, %v15920_v53  ;;  %v17377_v10 = vld [vmem:[#allocation50_spill] sm:$0xff]  ;;  %v17378_v22 = vld [vmem:[#allocation51_spill] sm:$0xff]  ;;  %v8034_v32 = vrot.slane %v7777_v60, 5  ;;  %v8037_v36 = vrot.slane %v7778_v52, 5 }
 0x498   : > { %v11635_v39 = vadd.f32 %v17374_v24, %v17373_v23  ;;  %v16242_v56 = vadd.f32 %v11632_v33, %v15920_v53  ;;  %v11638_v62 = vadd.f32 %v17378_v22, %v17377_v10  ;;  %v7783_v23 = vld [vmem:[#allocation2 + $0x10c] sm:$0xf]  ;;  %v9555_v24 = vld [vmem:[#allocation3 + $0x448] sm:$0xff]  ;;  %v16260_v5 = vadd.f32 %v16050_v46, %v16040_v51  ;;  %v17382_v63 = vld [vmem:[#allocation53_spill] sm:$0xff] }
 0x499   : > { %17372 = vst [vmem:[#allocation14_spill] sm:$0xff] %v16225_v1  ;;  %17375 = vst [vmem:[#allocation13_spill] sm:$0xff] %v16239_v19  ;;  %v17380_v2 = vld [vmem:[#allocation52_spill] sm:$0xff]  ;;  %10203 = vmatmul.mubr.bf16.gmra.mrb[172].mxu0 %v9555_v24  ;;  %v17383_v22 = vld [vmem:[#allocation54_spill] sm:$0xff]  ;;  %v16266_v60 = vadd.f32 %v16061_v26, %v16052_v58  ;;  %v8035_v24 = vsel %vm14117_vm14, %v11213_v37, %v8034_v32  ;;  %v8044_v26 = vrot.slane %v7781_v40, 5 }
 0x49a   : > { %17376 = vst [vmem:[#allocation15_spill] sm:$0xff] %v16242_v56  ;;  %v16251_v47 = vadd.f32 %v11635_v39, %v15920_v53  ;;  %v11641_v19 = vadd.f32 %v17380_v2, %v15900_v57  ;;  %v7782_v1 = vld [vmem:[#allocation2 + $0x108] sm:$0xe]  ;;  %v16256_v10 = vadd.f32 %v11638_v62, %v15920_v53  ;;  %v11644_v39 = vadd.f32 %v17383_v22, %v17382_v63  ;;  %v7784_v52 = vld [vmem:[#allocation2 + $0x110] sm:$0x1]  ;;  %v9539_v57 = vld [vmem:[#allocation3 + $0x3c8] sm:$0xff] }
 0x49b   : > { %v9533_v33 = vld [vmem:[#allocation3 + $0x398] sm:$0xff]  ;;  %v8036_v62 = vrot.slane %v8034_v32, 4  ;;  %v17385_v51 = vld [vmem:[#allocation17_spill] sm:$0xff]  ;;  %v7786_v22 = vld [vmem:[#allocation2 + $0x118] sm:$0xf] }
 0x49c   : > { %17379 = vst [vmem:[#allocation23_spill] sm:$0xff] %v16251_v47  ;;  %v9561_v56 = vld [vmem:[#allocation3 + $0x478] sm:$0xff]  ;;  %17381 = vst [vmem:[#allocation24_spill] sm:$0xff] %v16256_v10  ;;  %10010 = vmatmul.mubr.bf16.gmra.mrb[124].mxu1 %v9533_v33  ;;  %v16271_v2 = vadd.f32 %v11641_v19, %v15920_v53  ;;  %v17386_v46 = vrot.slane %v17385_v51, 5  ;;  %v16280_v58 = vadd.f32 %v11644_v39, %v15920_v53  ;;  %v8048_v33 = vrot.slane %v7783_v23, 5  ;;  %v17390_v32 = vld [vmem:[#allocation55_spill] sm:$0xff] }
 0x49d   : > { %10210 = vmatprep.mubr.bf16.mxu0 %v9561_v56  ;;  %v17387_v10 = vld [vmem:[#allocation16_spill] sm:$0xff]  ;;  %10017 = vmatprep.mubr.bf16.mxu1 %v9539_v57  ;;  %v11215_v56 = vrot.slane %v7782_v1, 9  ;;  %v8038_v37 = vsel %vm14117_vm14, %v8036_v62, %v8037_v36  ;;  %v8051_v19 = vrot.slane %v7784_v52, 5  ;;  %v7787_v57 = vld [vmem:[#allocation2 + $0x11c] sm:$0x1] }
 0x49e   : > { %17384 = vst [vmem:[#allocation25_spill] sm:$0xff] %v16271_v2  ;;  %v17388_v47 = vrot.slane %v17387_v10, 9  ;;  %17389 = vst [vmem:[#allocation26_spill] sm:$0xff] %v16280_v58  ;;  %v17391_v2 = vld [vmem:[#allocation57_spill] sm:$0xff]  ;;  %v16288_v10 = vadd.f32 %v16083_v61, %v16075_v12  ;;  %v17392_v39 = vld [vmem:[#allocation18_spill] sm:$0xff]  ;;  %v8050_v23 = vrot.slane %v8048_v33, 4  ;;  %v7661_v58 = vpop.permute.xlu0 %7660 }
 0x49f   : > { %v11647_v51 = vadd.f32 %v17391_v2, %v17390_v32  ;;  %v8045_v1 = vsel %vm14117_vm14, %v17392_v39, %v8044_v26  ;;  %v8049_v40 = vsel %vm14117_vm14, %v11215_v56, %v8048_v33  ;;  %v7788_v36 = vld [vmem:[#allocation2 + $0x120] sm:$0xe]  ;;  %v7789_v52 = vld [vmem:[#allocation2 + $0x124] sm:$0xf]  ;;  %v17394_v32 = vld [vmem:[#allocation58_spill] sm:$0xff]  ;;  %v8055_v33 = vrot.slane %v7786_v22, 5 }
 0x4a0   : > { %v8042_v63 = vsel %vm14117_vm14, %v17388_v47, %v17386_v46  ;;  %v7785_v47 = vld [vmem:[#allocation2 + $0x114] sm:$0xe]  ;;  %v11245_v46 = vcombine.low %v8035_v24, %v8038_v37  ;;  %v17395_v12 = vld [vmem:[#allocation60_spill] sm:$0xff]  ;;  %v16302_v24 = vadd.f32 %v16091_v54, %v16085_v29  ;;  %v8052_v26 = vsel %vm14117_vm14, %v8050_v23, %v8051_v19  ;;  %v7792_v39 = vld [vmem:[#allocation2 + $0x130] sm:$0xf]  ;;  %7726 = vst.msk [vmem:[#allocation3 + $0x4c8] sm:$0xff] %vm3723_vm0, %v7661_v58 }
 0x4a1   : > { %v11246_v62 = vcombine.low %v8042_v63, %v8045_v1  ;;  %v16296_v2 = vadd.f32 %v11647_v51, %v15920_v53  ;;  %v11650_v61 = vadd.f32 %v17395_v12, %v17394_v32  ;;  %v7790_v37 = vld [vmem:[#allocation2 + $0x128] sm:$0x1]  ;;  %v11216_v56 = vrot.slane %v7785_v47, 9  ;;  %v9538_v51 = vld [vmem:[#allocation3 + $0x3c0] sm:$0xff]  ;;  %v9560_v1 = vld [vmem:[#allocation3 + $0x470] sm:$0xff] }
 0x4a2   : > { %8288 = vst.msk [vmem:[#allocation3 + $0x2a0] sm:$0xff] %vm2631_vm15, %v11245_v46  ;;  %v8058_v63 = vrot.slane %v7787_v57, 5  ;;  %v11247_v32 = vcombine.low %v8049_v40, %v8052_v26  ;;  %v11217_v54 = vrot.slane %v7788_v36, 9  ;;  %v8062_v12 = vrot.slane %v7789_v52, 5  ;;  %v7791_v46 = vld [vmem:[#allocation2 + $0x12c] sm:$0xe]  ;;  %10211 = vmatmul.mubr.bf16.gmra.mrb[176].mxu0 %v9560_v1 }
 0x4a3   : > { %17393 = vst [vmem:[#allocation27_spill] sm:$0xff] %v16296_v2  ;;  %8289 = vst.msk [vmem:[#allocation3 + $0x2c8] sm:$0xff] %vm2631_vm15, %v11246_v62  ;;  %v16310_v29 = vadd.f32 %v11650_v61, %v15920_v53  ;;  %v9544_v2 = vld [vmem:[#allocation3 + $0x3f0] sm:$0xff]  ;;  %v9566_v19 = vld [vmem:[#allocation3 + $0x4a0] sm:$0xff]  ;;  %v8056_v22 = vsel %vm14117_vm14, %v11216_v56, %v8055_v33  ;;  %v8057_v47 = vrot.slane %v8055_v33, 4  ;;  %v8065_v57 = vrot.slane %v7790_v37, 5 }
 0x4a4   : > { %v11653_v58 = vadd.f32 %v15991_v16, %v15982_v21  ;;  %v7795_v23 = vld [vmem:[#allocation2 + $0x13c] sm:$0xf]  ;;  %10018 = vmatmul.mubr.bf16.gmra.mrb[128].mxu1 %v9538_v51  ;;  %10218 = vmatprep.mubr.bf16.mxu0 %v9566_v19  ;;  %8290 = vst.msk [vmem:[#allocation3 + $0x2f0] sm:$0xff] %vm2631_vm15, %v11247_v32  ;;  %v8063_v40 = vsel %vm14117_vm14, %v11217_v54, %v8062_v12  ;;  %v8064_v36 = vrot.slane %v8062_v12, 4  ;;  %v7793_v61 = vld [vmem:[#allocation2 + $0x134] sm:$0x1] }
 0x4a5   : > { %v16321_v52 = vadd.f32 %v16124_v49, %v16119_v55  ;;  %v11656_v62 = vadd.f32 %v16012_v6, %v16000_v42  ;;  %v7794_v37 = vld [vmem:[#allocation2 + $0x138] sm:$0xe]  ;;  %v16325_v26 = vpop.f32.mrb[100].mxu0  ;;  %10025 = vmatprep.mubr.bf16.mxu1 %v9544_v2  ;;  %v8059_v21 = vsel %vm14117_vm14, %v8057_v47, %v8058_v63  ;;  %v16334_v56 = vadd.f32 %v16131_v44, %v16126_v31  ;;  %v7796_v49 = vld [vmem:[#allocation2 + $0x140] sm:$0x1] }
 0x4a6   : > { %v16330_v16 = vadd.f32 %v11653_v58, %v15920_v53  ;;  %v11218_v55 = vrot.slane %v7791_v46, 9  ;;  %v11728_v33 = vpop.f32.mrb[101].mxu0  ;;  %v11248_v51 = vcombine.low %v8056_v22, %v8059_v21  ;;  %v8066_v42 = vsel %vm14117_vm14, %v8064_v36, %v8065_v57  ;;  %v7798_v19 = vld [vmem:[#allocation2 + $0x148] sm:$0xf]  ;;  %v17397_v21 = vld [vmem:[#allocation59_spill] sm:$0xff] }
 0x4a7   : > { %v16339_v6 = vadd.f32 %v11656_v62, %v15920_v53  ;;  %v8069_v2 = vrot.slane %v7792_v39, 5  ;;  %v11730_v1 = vpop.f32.mrb[102].mxu0  ;;  %v11249_v63 = vcombine.low %v8063_v40, %v8066_v42  ;;  %v8072_v32 = vrot.slane %v7793_v61, 5  ;;  %v7797_v53 = vld [vmem:[#allocation2 + $0x144] sm:$0xe] }
 0x4a8   : > { %v11219_v54 = vrot.slane %v7794_v37, 9  ;;  %v8076_v12 = vrot.slane %v7795_v23, 5  ;;  %v11731_v47 = vpop.f32.mrb[103].mxu0  ;;  %8291 = vst.msk [vmem:[#allocation3 + $0x318] sm:$0xff] %vm2631_vm15, %v11248_v51  ;;  %v8079_v46 = vrot.slane %v7796_v49, 5  ;;  %v16346_v22 = vadd.f32 %v16169_v7, %v16007_v45  ;;  %v17396_v23 = vld [vmem:[#allocation56_spill] sm:$0xff] }
 0x4a9   : > { %v8070_v31 = vsel %vm14117_vm14, %v11218_v55, %v8069_v2  ;;  %v8071_v44 = vrot.slane %v8069_v2, 4  ;;  %v7799_v39 = vld [vmem:[#allocation2 + $0x14c] sm:$0x1]  ;;  %8292 = vst.msk [vmem:[#allocation3 + $0x340] sm:$0xff] %vm2631_vm15, %v11249_v63  ;;  %v16353_v40 = vadd.f32 %v16150_v27, %v17396_v23  ;;  %v16357_v36 = vadd.f32 %v16195_v48, %v16182_v28  ;;  %v7800_v62 = vld [vmem:[#allocation2 + $0x150] sm:$0xe] }
 0x4aa   : > { %v8077_v57 = vsel %vm14117_vm14, %v11219_v54, %v8076_v12  ;;  %v8078_v58 = vrot.slane %v8076_v12, 4  ;;  %v7801_v61 = vld [vmem:[#allocation2 + $0x154] sm:$0xf]  ;;  %v9565_v45 = vld [vmem:[#allocation3 + $0x498] sm:$0xff]  ;;  %v16363_v37 = vadd.f32 %v16191_v35, %v16017_v8  ;;  %v16367_v55 = vadd.f32 %v16159_v15, %v17397_v21  ;;  %v7802_v28 = vld [vmem:[#allocation2 + $0x158] sm:$0x1] }
 0x4ab   : > { %v8073_v7 = vsel %vm14117_vm14, %v8071_v44, %v8072_v32  ;;  %v16371_v27 = vadd.f32 %v16220_v25, %v16207_v59  ;;  %v9543_v48 = vld [vmem:[#allocation3 + $0x3e8] sm:$0xff]  ;;  %10219 = vmatmul.mubr.bf16.gmra.mrb[180].mxu0 %v9565_v45  ;;  %v11220_v2 = vrot.slane %v7797_v53, 9  ;;  %v8083_v63 = vrot.slane %v7798_v19, 5  ;;  %v9549_v8 = vld [vmem:[#allocation3 + $0x418] sm:$0xff]  ;;  %v7804_v12 = vld [vmem:[#allocation2 + $0x160] sm:$0xf] }
 0x4ac   : > { %v9571_v49 = vld [vmem:[#allocation3 + $0x4c8] sm:$0xff]  ;;  %v11250_v51 = vcombine.low %v8070_v31, %v8073_v7  ;;  %v8080_v42 = vsel %vm14117_vm14, %v8078_v58, %v8079_v46  ;;  %10026 = vmatmul.mubr.bf16.gmra.mrb[132].mxu1 %v9543_v48  ;;  %v8086_v15 = vrot.slane %v7799_v39, 5  ;;  %v11221_v32 = vrot.slane %v7800_v62, 9  ;;  %v7805_v46 = vld [vmem:[#allocation2 + $0x164] sm:$0x1]  ;;  %v17399_v45 = vld [vmem:[#allocation61_spill] sm:$0xff] }
 0x4ad   : > { %10226 = vmatprep.mubr.bf16.mxu0 %v9571_v49  ;;  %v11251_v35 = vcombine.low %v8077_v57, %v8080_v42  ;;  %v8090_v54 = vrot.slane %v7801_v61, 5  ;;  %10033 = vmatprep.mubr.bf16.mxu1 %v9549_v8  ;;  %v8084_v59 = vsel %vm14117_vm14, %v11220_v2, %v8083_v63  ;;  %v8085_v25 = vrot.slane %v8083_v63, 4  ;;  %v7803_v19 = vld [vmem:[#allocation2 + $0x15c] sm:$0xe]  ;;  %v7806_v23 = vld [vmem:[#allocation2 + $0x168] sm:$0xe] }
 0x4ae   : > { %8293 = vst.msk [vmem:[#allocation3 + $0x368] sm:$0xff] %vm2631_vm15, %v11250_v51  ;;  %v8093_v31 = vrot.slane %v7802_v28, 5  ;;  %v16380_v44 = vadd.f32 %v16216_v13, %v16055_v34  ;;  %v16387_v57 = vadd.f32 %v16199_v4, %v16033_v14  ;;  %v16390_v58 = vadd.f32 %v11728_v33, %v16325_v26  ;;  %v7807_v62 = vld [vmem:[#allocation2 + $0x16c] sm:$0xf]  ;;  %v17398_v13 = vld [vmem:[#allocation62_spill] sm:$0xff]  ;;  %v9570_v8 = vld [vmem:[#allocation3 + $0x4c0] sm:$0xff] }
 0x4af   : > { %8294 = vst.msk [vmem:[#allocation3 + $0x390] sm:$0xff] %vm2631_vm15, %v11251_v35  ;;  %v8091_v53 = vsel %vm14117_vm14, %v11221_v32, %v8090_v54  ;;  %v8092_v39 = vrot.slane %v8090_v54, 4  ;;  %v8087_v34 = vsel %vm14117_vm14, %v8085_v25, %v8086_v15  ;;  %v16396_v61 = vadd.f32 %v16229_v3, %v17398_v13  ;;  %v7808_v14 = vld [vmem:[#allocation2 + $0x170] sm:$0x1]  ;;  %v7809_v48 = vld [vmem:[#allocation2 + $0x174] sm:$0xe] }
 0x4b0   : > { %v16400_v7 = vadd.f32 %v16205_v11, %v17399_v45  ;;  %v16402_v21 = vadd.f32 %v11731_v47, %v11730_v1  ;;  %v11252_v4 = vcombine.low %v8084_v59, %v8087_v34  ;;  %v11222_v33 = vrot.slane %v7803_v19, 9  ;;  %v7810_v49 = vld [vmem:[#allocation2 + $0x178] sm:$0xf]  ;;  %v7811_v63 = vld [vmem:[#allocation2 + $0x17c] sm:$0x1]  ;;  %v17400_v35 = vld [vmem:[#allocation19_spill] sm:$0xff] }
 0x4b1   : > { %v8094_v26 = vsel %vm14117_vm14, %v8092_v39, %v8093_v31  ;;  %v8097_v28 = vrot.slane %v7804_v12, 5  ;;  %v8100_v42 = vrot.slane %v7805_v46, 5  ;;  %v11223_v2 = vrot.slane %v7806_v23, 9  ;;  %v7812_v32 = vld [vmem:[#allocation2 + $0x180] sm:$0xe]  ;;  %v17402_v19 = vld [vmem:[#allocation20_spill] sm:$0xff] }
 0x4b2   : > { %v11253_v51 = vcombine.low %v8091_v53, %v8094_v26  ;;  %v8104_v3 = vrot.slane %v7807_v62, 5  ;;  %8295 = vst.msk [vmem:[#allocation3 + $0x3b8] sm:$0xff] %vm2631_vm15, %v11252_v4  ;;  %v8107_v47 = vrot.slane %v7808_v14, 5  ;;  %v16411_v15 = vadd.f32 %v16260_v5, %v17400_v35  ;;  %v9548_v54 = vld [vmem:[#allocation3 + $0x410] sm:$0xff]  ;;  %v9554_v5 = vld [vmem:[#allocation3 + $0x440] sm:$0xff]  ;;  %v17403_v23 = vld [vmem:[#allocation64_spill] sm:$0xff] }
 0x4b3   : > { %v8098_v11 = vsel %vm14117_vm14, %v11222_v33, %v8097_v28  ;;  %v8099_v1 = vrot.slane %v8097_v28, 4  ;;  %10227 = vmatmul.mubr.bf16.gmra.mrb[184].mxu0 %v9570_v8  ;;  %v17401_v25 = vld [vmem:[#allocation63_spill] sm:$0xff]  ;;  %v16422_v46 = vadd.f32 %v16266_v60, %v17402_v19  ;;  %v16428_v62 = vadd.f32 %v16248_v0, %v17403_v23  ;;  %v7814_v45 = vld [vmem:[#allocation2 + $0x188] sm:$0x1]  ;;  %v11733_v60 = vpop.f32.mrb[104].mxu0 }
 0x4b4   : > { %8296 = vst.msk [vmem:[#allocation3 + $0x3e0] sm:$0xff] %vm2631_vm15, %v11253_v51  ;;  %v8105_v12 = vsel %vm14117_vm14, %v11223_v2, %v8104_v3  ;;  %v8106_v59 = vrot.slane %v8104_v3, 4  ;;  %v16418_v31 = vadd.f32 %v16235_v17, %v17401_v25  ;;  %v7813_v53 = vld [vmem:[#allocation2 + $0x184] sm:$0xf]  ;;  %10034 = vmatmul.mubr.bf16.gmra.mrb[136].mxu1 %v9548_v54  ;;  %v11224_v34 = vrot.slane %v7809_v48, 9  ;;  %v11734_v51 = vpop.f32.mrb[105].mxu0 }
 0x4b5   : > { %v8101_v39 = vsel %vm14117_vm14, %v8099_v1, %v8100_v42  ;;  %v8111_v13 = vrot.slane %v7810_v49, 5  ;;  %10041 = vmatprep.mubr.bf16.mxu1 %v9554_v5  ;;  %v8114_v4 = vrot.slane %v7811_v63, 5  ;;  %v11225_v26 = vrot.slane %v7812_v32, 9  ;;  %v7816_v33 = vld [vmem:[#allocation2 + $0x190] sm:$0xf]  ;;  %v11736_v49 = vpop.f32.mrb[106].mxu0 }
 0x4b6   : > { %v11254_v17 = vcombine.low %v8098_v11, %v8101_v39  ;;  %v8108_v14 = vsel %vm14117_vm14, %v8106_v59, %v8107_v47  ;;  %v8118_v0 = vrot.slane %v7813_v53, 5  ;;  %v7815_v3 = vld [vmem:[#allocation2 + $0x18c] sm:$0xe]  ;;  %v11735_v48 = vadd.f32 %v11734_v51, %v11733_v60  ;;  %v17404_v63 = vld [vmem:[#allocation21_spill] sm:$0xff]  ;;  %v7818_v35 = vld [vmem:[#allocation2 + $0x198] sm:$0xe] }
 0x4b7   : > { %v11255_v28 = vcombine.low %v8105_v12, %v8108_v14  ;;  %v8112_v42 = vsel %vm14117_vm14, %v11224_v34, %v8111_v13  ;;  %v8113_v2 = vrot.slane %v8111_v13, 4  ;;  %v8121_v8 = vrot.slane %v7814_v45, 5  ;;  %v7817_v47 = vld [vmem:[#allocation2 + $0x194] sm:$0x1]  ;;  %v11737_v32 = vpop.f32.mrb[107].mxu0  ;;  %v17405_v53 = vld [vmem:[#allocation22_spill] sm:$0xff] }
 0x4b8   : > { %8297 = vst.msk [vmem:[#allocation3 + $0x408] sm:$0xff] %vm2631_vm15, %v11254_v17  ;;  %v16437_v11 = vadd.f32 %v16321_v52, %v16141_v30  ;;  %v16441_v1 = vadd.f32 %v16288_v10, %v17404_v63  ;;  %v8119_v12 = vsel %vm14117_vm14, %v11225_v26, %v8118_v0  ;;  %v8120_v59 = vrot.slane %v8118_v0, 4  ;;  %v7819_v52 = vld [vmem:[#allocation2 + $0x19c] sm:$0xf]  ;;  %v7820_v25 = vld [vmem:[#allocation2 + $0x1a0] sm:$0x1] }
 0x4b9   : > { %8298 = vst.msk [vmem:[#allocation3 + $0x430] sm:$0xff] %vm2631_vm15, %v11255_v28  ;;  %v8115_v54 = vsel %vm14117_vm14, %v8113_v2, %v8114_v4  ;;  %v16450_v30 = vadd.f32 %v16334_v56, %v16144_v18  ;;  %v11738_v10 = vadd.f32 %v11737_v32, %v11736_v49  ;;  %v16454_v5 = vadd.f32 %v16302_v24, %v17405_v53  ;;  %v9553_v17 = vld [vmem:[#allocation3 + $0x438] sm:$0xff]  ;;  %v9559_v24 = vld [vmem:[#allocation3 + $0x468] sm:$0xff]  ;;  %v7821_v51 = vld [vmem:[#allocation2 + $0x1a4] sm:$0xe]  ;;  %v11739_v63 = vpop.f32.mrb[108].mxu0 }
 0x4ba   : > { %v11256_v19 = vcombine.low %v8112_v42, %v8115_v54  ;;  %v11226_v39 = vrot.slane %v7815_v3, 9  ;;  %v8122_v23 = vsel %vm14117_vm14, %v8120_v59, %v8121_v8  ;;  %v8125_v34 = vrot.slane %v7816_v33, 5  ;;  %v7822_v42 = vld [vmem:[#allocation2 + $0x1a8] sm:$0xf]  ;;  %v7823_v0 = vld [vmem:[#allocation2 + $0x1ac] sm:$0x1] }
 0x4bb   : > { %v8128_v13 = vrot.slane %v7817_v47, 5  ;;  %v11227_v45 = vrot.slane %v7818_v35, 9  ;;  %v11257_v18 = vcombine.low %v8119_v12, %v8122_v23  ;;  %v8132_v56 = vrot.slane %v7819_v52, 5  ;;  %v11740_v35 = vpop.f32.mrb[109].mxu0  ;;  %v17406_v32 = vld [vmem:[#allocation14_spill] sm:$0xff] }
 0x4bc   : > { %8299 = vst.msk [vmem:[#allocation3 + $0x458] sm:$0xff] %vm2631_vm15, %v11256_v19  ;;  %v8135_v14 = vrot.slane %v7820_v25, 5  ;;  %v16461_v60 = vadd.f32 %v16390_v58, %v16179_v9  ;;  %10042 = vmatmul.mubr.bf16.gmra.mrb[140].mxu1 %v9553_v17  ;;  %v8126_v4 = vsel %vm14117_vm14, %v11226_v39, %v8125_v34  ;;  %v8127_v26 = vrot.slane %v8125_v34, 4  ;;  %v11742_v59 = vpop.f32.mrb[110].mxu0  ;;  %v9564_v19 = vld [vmem:[#allocation3 + $0x490] sm:$0xff]  ;;  %v17407_v39 = vld [vmem:[#allocation13_spill] sm:$0xff] }
 0x4bd   : > { %v16467_v33 = vadd.f32 %v16357_v36, %v16165_v41  ;;  %v16471_v28 = vadd.f32 %v16402_v21, %v16187_v50  ;;  %10049 = vmatprep.mubr.bf16.mxu1 %v9559_v24  ;;  %8300 = vst.msk [vmem:[#allocation3 + $0x480] sm:$0xff] %vm2631_vm15, %v11257_v18  ;;  %v8133_v9 = vsel %vm14117_vm14, %v11227_v45, %v8132_v56  ;;  %v8134_v58 = vrot.slane %v8132_v56, 4  ;;  %v11743_v52 = vpop.f32.mrb[111].mxu0  ;;  %v9569_v45 = vld [vmem:[#allocation3 + $0x4b8] sm:$0xff] }
 0x4be   : > { %v16478_v2 = vadd.f32 %v16371_v27, %v16176_v38  ;;  %v11228_v41 = vrot.slane %v7821_v51, 9  ;;  %v8129_v36 = vsel %vm14117_vm14, %v8127_v26, %v8128_v13  ;;  %v8139_v50 = vrot.slane %v7822_v42, 5  ;;  %v9563_v13 = vld [vmem:[#allocation3 + $0x488] sm:$0xff]  ;;  %v11745_v17 = vpop.f32.mrb[112].mxu0  ;;  %v17409_v26 = vld [vmem:[#allocation23_spill] sm:$0xff] }
 0x4bf   : > { %v8142_v21 = vrot.slane %v7823_v0, 5  ;;  %v11258_v3 = vcombine.low %v8126_v4, %v8129_v36  ;;  %v8136_v49 = vsel %vm14117_vm14, %v8134_v58, %v8135_v14  ;;  %v16485_v8 = vadd.f32 %v11735_v48, %v16210_v43  ;;  %v9558_v48 = vld [vmem:[#allocation3 + $0x460] sm:$0xff]  ;;  %v11746_v18 = vpop.f32.mrb[113].mxu0  ;;  %v9568_v42 = vld [vmem:[#allocation3 + $0x4b0] sm:$0xff]  ;;  %v17410_v58 = vld [vmem:[#allocation24_spill] sm:$0xff]  ;;  %v12123_v36 = vpop.f32.mrb[64].mxu1 }
 0x4c0   : > { %v11259_v47 = vcombine.low %v8133_v9, %v8136_v49  ;;  %v8140_v38 = vsel %vm14117_vm14, %v11228_v41, %v8139_v50  ;;  %v8141_v27 = vrot.slane %v8139_v50, 4  ;;  %v16491_v54 = vadd.f32 %v11738_v10, %v17406_v32  ;;  %v17408_v10 = vld [vmem:[#allocation15_spill] sm:$0xff]  ;;  %v11748_v14 = vpop.f32.mrb[114].mxu0  ;;  %v9574_v9 = vld [vmem:[#allocation3 + $0x4e0] sm:$0xff]  ;;  %v9575_v50 = vld [vmem:[#allocation3 + $0x4e8] sm:$0xff] }
 0x4c1   : > { %8301 = vst.msk [vmem:[#allocation3 + $0x4a8] sm:$0xff] %vm2631_vm15, %v11258_v3  ;;  %v11741_v12 = vadd.f32 %v11740_v35, %v11739_v63  ;;  %v11744_v53 = vadd.f32 %v11743_v52, %v11742_v59  ;;  %v11747_v56 = vadd.f32 %v11746_v18, %v11745_v17  ;;  %v11749_v24 = vpop.f32.mrb[115].mxu0  ;;  %v9083_v3 = vpop.f32.mrb[65].mxu1  ;;  %v9507_v18 = vld [vmem:[#allocation3 + $0x2c8] sm:$0xff] }
 0x4c2   : > { %8302 = vst.msk [vmem:[#allocation3 + $0x4d0] sm:$0xff] %vm2631_vm15, %v11259_v47  ;;  %v8143_v43 = vsel %vm14117_vm14, %v8141_v27, %v8142_v21  ;;  %v11750_v4 = vadd.f32 %v11749_v24, %v11748_v14  ;;  %v16511_v21 = vadd.f32 %v12123_v36, %v16346_v22  ;;  %v16514_v49 = vadd.f32 %v9083_v3, %v16353_v40  ;;  %v12124_v63 = vpop.f32.mrb[66].mxu1 }
 0x4c3   : > { %v11260_v25 = vcombine.low %v8140_v38, %v8143_v43  ;;  %v16497_v23 = vadd.f32 %v11741_v12, %v17407_v39  ;;  %v16501_v34 = vadd.f32 %v11744_v53, %v17408_v10  ;;  %v16505_v51 = vadd.f32 %v11747_v56, %v17409_v26  ;;  %v9086_v27 = vpop.f32.mrb[67].mxu1  ;;  %v9573_v43 = vld [vmem:[#allocation3 + $0x4d8] sm:$0xff]  ;;  %v9512_v56 = vld [vmem:[#allocation3 + $0x2f0] sm:$0xff] }
 0x4c4   : > { %10050 = vmatmul.mubr.bf16.gmra.mrb[144].mxu1 %v9558_v48  ;;  %v16508_v0 = vadd.f32 %v11750_v4, %v17410_v58  ;;  %v9212_v47 = vsub.f32 0.0, %v16511_v21  ;;  %v16518_v38 = vadd.f32 %v12124_v63, %v16363_v37  ;;  %v9210_v35 = vsub.f32 0.0, %v16514_v49 }
 0x4c5   : > { %10057 = vmatprep.mubr.bf16.mxu1 %v9564_v19  ;;  %8303 = vst.msk [vmem:[#allocation3 + $0x4f8] sm:$0xff] %vm2631_vm15, %v11260_v25  ;;  %v16522_v32 = vadd.f32 %v9086_v27, %v16367_v55  ;;  %v11751_v59 = vpop.f32.mrb[116].mxu0  ;;  %v9502_v25 = vld [vmem:[#allocation3 + $0x2a0] sm:$0xff]  ;;  %v9517_v27 = vld [vmem:[#allocation3 + $0x318] sm:$0xff] }
 0x4c6   : > { %v7663_v20 = vpop.permute.xlu0 %7662  ;;  %v9246_v12 = vmul.f32 1.442695, %v9212_v47  ;;  %v9213_v22 = vsub.f32 0.0, %v16518_v38  ;;  %v9242_v48 = vmul.f32 1.442695, %v9210_v35  ;;  %v11752_v52 = vpop.f32.mrb[117].mxu0 }
 0x4c7   : > { %7727 = vst.msk [vmem:[#allocation3 + $0x4f0] sm:$0xff] %vm3723_vm0, %v7663_v20  ;;  %v9211_v40 = vsub.f32 0.0, %v16522_v32  ;;  %v11753_v19 = vadd.f32 %v11752_v52, %v11751_v59  ;;  %v11754_v53 = vpop.f32.mrb[118].mxu0  ;;  %v17412_v20 = vld [vmem:[#allocation26_spill] sm:$0xff]  ;;  %v9522_v59 = vld [vmem:[#allocation3 + $0x340] sm:$0xff]  ;;  %v17413_v52 = vld [vmem:[#allocation27_spill] sm:$0xff] }
 0x4c8   : > { %12690 = vpow2.f32 %v9246_v12  ;;  %v9248_v37 = vmul.f32 1.442695, %v9213_v22  ;;  %v11755_v39 = vpop.f32.mrb[119].mxu0 }
 0x4c9   : > { %12692 = vpow2.f32 %v9242_v48  ;;  %v9244_v55 = vmul.f32 1.442695, %v9211_v40  ;;  %v11756_v10 = vadd.f32 %v11755_v39, %v11754_v53 }
 0x4ca   : > { %12694 = vpow2.f32 %v9248_v37 }
 0x4cb   : > { %12696 = vpow2.f32 %v9244_v55  ;;  %v16531_v17 = vadd.f32 %v11756_v10, %v17412_v20 }
 0x4cc   : > { %10058 = vmatmul.mubr.bf16.gmra.mrb[148].mxu1 %v9563_v13  ;;  %v17411_v13 = vld [vmem:[#allocation25_spill] sm:$0xff] }
 0x4cd   : > { %10065 = vmatprep.mubr.bf16.mxu1 %v9569_v45  ;;  %v16528_v45 = vadd.f32 %v11753_v19, %v17411_v13 }
 0x4ce   : > { %v9576_v41 = vld [vmem:[#allocation3 + $0x4f0] sm:$0xff] }
 0x4cf   : > { %10234 = vmatprep.mubr.bf16.mxu0 %v9576_v41 }
 0x4d0   : > { %10235 = vmatmul.mubr.bf16.gmra.mrb[188].mxu0 %v9575_v50 }
 0x4d2   : > { %v12691_v14 = vpop.eup %12690 }
 0x4d3   : > { %v12693_v24 = vpop.eup %12692  ;;  %v9308_v4 = vadd.f32 1.0, %v12691_v14 }
 0x4d4   : > { %10066 = vmatmul.mubr.bf16.gmra.mrb[152].mxu1 %v9568_v42  ;;  %v12695_v26 = vpop.eup %12694  ;;  %v9306_v42 = vadd.f32 1.0, %v12693_v24  ;;  %v9527_v24 = vld [vmem:[#allocation3 + $0x368] sm:$0xff] }
 0x4d5   : > { %10073 = vmatprep.mubr.bf16.mxu1 %v9574_v9  ;;  %v11757_v9 = vpop.f32.mrb[120].mxu0  ;;  %v12697_v58 = vpop.eup %12696  ;;  %12698 = vrcp.f32 %v9308_v4  ;;  %v9309_v41 = vadd.f32 1.0, %v12695_v26 }
 0x4d6   : > { %v11758_v36 = vpop.f32.mrb[121].mxu0  ;;  %12700 = vrcp.f32 %v9306_v42  ;;  %v9307_v50 = vadd.f32 1.0, %v12697_v58  ;;  %v12127_v3 = vpop.f32.mrb[68].mxu1  ;;  %v9532_v42 = vld [vmem:[#allocation3 + $0x390] sm:$0xff]  ;;  %v9402_v58 = vld [vmem:[%s13268_s12] sm:$0xff] }
 0x4d7   : > { %v11759_v63 = vadd.f32 %v11758_v36, %v11757_v9  ;;  %v11760_v47 = vpop.f32.mrb[122].mxu0  ;;  %12702 = vrcp.f32 %v9309_v41  ;;  %v16536_v35 = vadd.f32 %v12127_v3, %v16380_v44  ;;  %v9099_v12 = vpop.f32.mrb[69].mxu1  ;;  %v9405_v3 = vld [vmem:[%s13268_s12 + $0x18] sm:$0xff] }
 0x4d8   : > { %v11761_v22 = vpop.f32.mrb[123].mxu0  ;;  %12704 = vrcp.f32 %v9307_v50  ;;  %v12128_v48 = vpop.f32.mrb[70].mxu1 }
 0x4d9   : > { %v11762_v40 = vadd.f32 %v11761_v22, %v11760_v47  ;;  %v9216_v37 = vsub.f32 0.0, %v16536_v35  ;;  %v16548_v44 = vadd.f32 %v12128_v48, %v16396_v61  ;;  %v9102_v19 = vpop.f32.mrb[71].mxu1 }
 0x4da   : > { %v16552_v55 = vadd.f32 %v9102_v19, %v16400_v7  ;;  %v9404_v7 = vld [vmem:[%s13268_s12 + $0x10] sm:$0xff] }
 0x4db   : > { %v9254_v39 = vmul.f32 1.442695, %v9216_v37  ;;  %v9217_v10 = vsub.f32 0.0, %v16548_v44 }
 0x4dc   : > { %10074 = vmatmul.mubr.bf16.gmra.mrb[156].mxu1 %v9573_v43  ;;  %v16540_v43 = vadd.f32 %v9099_v12, %v16387_v57  ;;  %v16555_v57 = vadd.f32 %v11762_v40, %v16310_v29  ;;  %v9215_v20 = vsub.f32 0.0, %v16552_v55 }
 0x4dd   : > { %12161 = vmatprep.mubr.msk.bf16.mxu1 %vm2631_vm15, %v9502_v25  ;;  %v16543_v25 = vadd.f32 %v11759_v63, %v17413_v52  ;;  %12706 = vpow2.f32 %v9254_v39  ;;  %v9256_v61 = vmul.f32 1.442695, %v9217_v10 }
 0x4de   : > { %v9214_v53 = vsub.f32 0.0, %v16540_v43 }
 0x4df   : > { %v12699_v14 = vpop.eup %12698 }
 0x4e0   : > { %v9250_v13 = vmul.f32 1.442695, %v9214_v53  ;;  %v12701_v26 = vpop.eup %12700  ;;  %v9372_v9 = vmul.f32 %v12699_v14, %v16511_v21 }
 0x4e1   : > { %v12703_v50 = vpop.eup %12702 }
 0x4e2   : > { %12708 = vpow2.f32 %v9250_v13  ;;  %v12705_v21 = vpop.eup %12704  ;;  %v9436_v12 = vadd.f32 %v9404_v7, %v9372_v9  ;;  %v9373_v22 = vmul.f32 %v12703_v50, %v16518_v38 }
 0x4e3   : > { %12710 = vpow2.f32 %v9256_v61  ;;  %v9371_v52 = vmul.f32 %v12705_v21, %v16522_v32 }
 0x4e4   : > { %12162 = vmatmul.mubr.msk.bf16.vlgmr.msra.gmra.mrb[160].mxu1 %vm2631_vm15, %v9507_v18  ;;  %v9252_v18 = vmul.f32 1.442695, %v9215_v20  ;;  %9468 = vst [vmem:[%s16586_s7 + $0x10] sm:$0xff] %v9436_v12  ;;  %v9437_v38 = vadd.f32 %v9405_v3, %v9373_v22  ;;  %v9547_v3 = vld [vmem:[#allocation3 + $0x408] sm:$0xff] }
 0x4e5   : > { %12165 = vmatprep.mubr.msk.bf16.mxu1 %vm2631_vm15, %v9512_v56  ;;  %v12131_v56 = vpop.f32.mrb[72].mxu1  ;;  %v11763_v40 = vpop.f32.mrb[124].mxu0 }
 0x4e6   : > { %v16561_v29 = vadd.f32 %v12131_v56, %v16411_v15  ;;  %v9115_v4 = vpop.f32.mrb[73].mxu1  ;;  %12712 = vpow2.f32 %v9252_v18  ;;  %v9370_v15 = vmul.f32 %v12701_v26, %v16514_v49  ;;  %9469 = vst [vmem:[%s16586_s7 + $0x18] sm:$0xff] %v9437_v38  ;;  %v9406_v38 = vld [vmem:[%s13268_s12 + $0x20] sm:$0xff] }
 0x4e7   : > { %v16567_v41 = vadd.f32 %v9115_v4, %v16418_v31  ;;  %v12132_v36 = vpop.f32.mrb[74].mxu1  ;;  %v9403_v31 = vld [vmem:[%s13268_s12 + $0x8] sm:$0xff]  ;;  %v12707_v14 = vpop.eup %12706  ;;  %v9542_v4 = vld [vmem:[#allocation3 + $0x3e0] sm:$0xff] }
 0x4e8   : > { %v9220_v63 = vsub.f32 0.0, %v16561_v29  ;;  %v16574_v47 = vadd.f32 %v12132_v36, %v16422_v46  ;;  %v9434_v49 = vadd.f32 %v9402_v58, %v9370_v15  ;;  %v11764_v46 = vpop.f32.mrb[125].mxu0  ;;  %v9435_v32 = vadd.f32 %v9403_v31, %v9371_v52 }
 0x4e9   : > { %v11765_v39 = vadd.f32 %v11764_v46, %v11763_v40  ;;  %v11766_v10 = vpop.f32.mrb[126].mxu0  ;;  %v9312_v26 = vadd.f32 1.0, %v12707_v14 }
 0x4ea   : > { %v9262_v37 = vmul.f32 1.442695, %v9220_v63  ;;  %v9221_v19 = vsub.f32 0.0, %v16574_v47  ;;  %9466 = vst [vmem:[%s16586_s7] sm:$0xff] %v9434_v49  ;;  %v11767_v20 = vpop.f32.mrb[127].mxu0  ;;  %9467 = vst [vmem:[%s16586_s7 + $0x8] sm:$0xff] %v9435_v32  ;;  %v9408_v49 = vld [vmem:[%s13268_s12 + $0x30] sm:$0xff] }
 0x4eb   : > { %v16593_v18 = vadd.f32 %v11765_v39, %v16330_v16  ;;  %v11768_v56 = vadd.f32 %v11767_v20, %v11766_v10 }
 0x4ec   : > { %12166 = vmatmul.mubr.msk.bf16.gmra.mrb[164].mxu1 %vm2631_vm15, %v9517_v27  ;;  %v9118_v27 = vpop.f32.mrb[75].mxu1  ;;  %12714 = vpow2.f32 %v9262_v37  ;;  %v9264_v13 = vmul.f32 1.442695, %v9221_v19  ;;  %v12709_v7 = vpop.eup %12708 }
 0x4ed   : > { %12169 = vmatprep.mubr.msk.bf16.mxu1 %vm2631_vm15, %v9522_v59  ;;  %v9218_v59 = vsub.f32 0.0, %v16567_v41  ;;  %v16580_v48 = vadd.f32 %v9118_v27, %v16428_v62  ;;  %v12711_v9 = vpop.eup %12710  ;;  %v9310_v58 = vadd.f32 1.0, %v12709_v7  ;;  %v9552_v27 = vld [vmem:[#allocation3 + $0x430] sm:$0xff] }
 0x4ee   : > { %v9313_v36 = vadd.f32 1.0, %v12711_v9 }
 0x4ef   : > { %v9258_v53 = vmul.f32 1.442695, %v9218_v59  ;;  %v9219_v62 = vsub.f32 0.0, %v16580_v48 }
 0x4f0   : > { %v12713_v16 = vpop.eup %12712 }
 0x4f1   : > { %12716 = vpow2.f32 %v9258_v53  ;;  %v9260_v61 = vmul.f32 1.442695, %v9219_v62  ;;  %v9311_v50 = vadd.f32 1.0, %v12713_v16 }
 0x4f2   : > { %12718 = vpow2.f32 %v9264_v13  ;;  %v9409_v13 = vld [vmem:[%s13268_s12 + $0x38] sm:$0xff] }
 0x4f3   : > { %12720 = vpow2.f32 %v9260_v61 }
 0x4f4   : > { %12170 = vmatmul.mubr.msk.bf16.gmra.mrb[168].mxu1 %vm2631_vm15, %v9527_v24  ;;  %v9537_v24 = vld [vmem:[#allocation3 + $0x3b8] sm:$0xff]  ;;  %12722 = vrcp.f32 %v9312_v26 }
 0x4f5   : > { %12173 = vmatprep.mubr.msk.bf16.mxu1 %vm2631_vm15, %v9532_v42  ;;  %v16598_v42 = vadd.f32 %v11768_v56, %v16339_v6  ;;  %12724 = vrcp.f32 %v9310_v58 }
 0x4f6   : > { %12726 = vrcp.f32 %v9313_v36  ;;  %v12715_v15 = vpop.eup %12714  ;;  %v9562_v36 = vld [vmem:[#allocation3 + $0x480] sm:$0xff] }
 0x4f7   : > { %12728 = vrcp.f32 %v9311_v50  ;;  %v9316_v6 = vadd.f32 1.0, %v12715_v15 }
 0x4f9   : > { %12730 = vrcp.f32 %v9316_v6  ;;  %v12135_v52 = vpop.f32.mrb[76].mxu1 }
 0x4fa   : > { %v16607_v53 = vadd.f32 %v12135_v52, %v16437_v11  ;;  %v9131_v62 = vpop.f32.mrb[77].mxu1  ;;  %v9407_v11 = vld [vmem:[%s13268_s12 + $0x28] sm:$0xff] }
 0x4fb   : > { %v12717_v63 = vpop.eup %12716  ;;  %v11917_v37 = vpop.f32.mrb[128].mxu0  ;;  %v16612_v20 = vadd.f32 %v9131_v62, %v16441_v1 }
 0x4fc   : > { %12174 = vmatmul.mubr.msk.bf16.gmra.mrb[172].mxu1 %vm2631_vm15, %v9537_v24  ;;  %v12719_v21 = vpop.eup %12718  ;;  %v9314_v12 = vadd.f32 1.0, %v12717_v63  ;;  %v11918_v39 = vpop.f32.mrb[129].mxu0  ;;  %v9224_v26 = vsub.f32 0.0, %v16607_v53 }
 0x4fd   : > { %12177 = vmatprep.mubr.msk.bf16.mxu1 %vm2631_vm15, %v9542_v4  ;;  %v12721_v22 = vpop.eup %12720  ;;  %v9317_v31 = vadd.f32 1.0, %v12719_v21  ;;  %v12136_v61 = vpop.f32.mrb[78].mxu1  ;;  %v16614_v56 = vadd.f32 %v11918_v39, %v11917_v37  ;;  %v9557_v4 = vld [vmem:[#allocation3 + $0x458] sm:$0xff]  ;;  %v9222_v50 = vsub.f32 0.0, %v16612_v20  ;;  %v9411_v39 = vld [vmem:[%s13268_s12 + $0x48] sm:$0xff] }
 0x4fe   : > { %12732 = vrcp.f32 %v9314_v12  ;;  %v9315_v59 = vadd.f32 1.0, %v12721_v22  ;;  %v12723_v40 = vpop.eup %12722  ;;  %v11920_v14 = vpop.f32.mrb[130].mxu0  ;;  %v9412_v12 = vld [vmem:[%s13268_s12 + $0x50] sm:$0xff]  ;;  %v9413_v37 = vld [vmem:[%s13268_s12 + $0x58] sm:$0xff] }
 0x4ff   : > { %12734 = vrcp.f32 %v9317_v31  ;;  %v12725_v19 = vpop.eup %12724  ;;  %v9376_v46 = vmul.f32 %v12723_v40, %v16536_v35  ;;  %v9134_v9 = vpop.f32.mrb[79].mxu1  ;;  %v9410_v40 = vld [vmem:[%s13268_s12 + $0x40] sm:$0xff] }
 0x500   : > { %12736 = vrcp.f32 %v9315_v59  ;;  %v12727_v10 = vpop.eup %12726  ;;  %v9374_v32 = vmul.f32 %v12725_v19, %v16540_v43  ;;  %v16620_v43 = vadd.f32 %v12136_v61, %v16450_v30  ;;  %v11921_v1 = vpop.f32.mrb[131].mxu0  ;;  %v9270_v30 = vmul.f32 1.442695, %v9224_v26 }
 0x501   : > { %v12729_v35 = vpop.eup %12728  ;;  %v9440_v24 = vadd.f32 %v9408_v49, %v9376_v46  ;;  %v9377_v7 = vmul.f32 %v12727_v10, %v16548_v44  ;;  %v16626_v44 = vadd.f32 %v9134_v9, %v16454_v5  ;;  %v16631_v63 = vadd.f32 %v11921_v1, %v11920_v14  ;;  %v9567_v10 = vld [vmem:[#allocation3 + $0x4a8] sm:$0xff] }
 0x502   : > { %v9438_v58 = vadd.f32 %v9406_v38, %v9374_v32  ;;  %v9375_v16 = vmul.f32 %v12729_v35, %v16552_v55  ;;  %12738 = vpow2.f32 %v9270_v30  ;;  %v9577_v30 = vld [vmem:[#allocation3 + $0x4f8] sm:$0xff] }
 0x503   : > { %9472 = vst [vmem:[%s16586_s7 + $0x30] sm:$0xff] %v9440_v24  ;;  %v9441_v15 = vadd.f32 %v9409_v13, %v9377_v7  ;;  %v9223_v6 = vsub.f32 0.0, %v16626_v44  ;;  %v12731_v21 = vpop.eup %12730 }
 0x504   : > { %12178 = vmatmul.mubr.msk.bf16.gmra.mrb[176].mxu1 %vm2631_vm15, %v9547_v3  ;;  %v9225_v3 = vsub.f32 0.0, %v16620_v43  ;;  %9470 = vst [vmem:[%s16586_s7 + $0x20] sm:$0xff] %v9438_v58  ;;  %v9439_v55 = vadd.f32 %v9407_v11, %v9375_v16  ;;  %v9380_v59 = vmul.f32 %v12731_v21, %v16561_v29 }
 0x505   : > { %12181 = vmatprep.mubr.msk.bf16.mxu1 %vm2631_vm15, %v9552_v27  ;;  %v9266_v27 = vmul.f32 1.442695, %v9222_v50  ;;  %9473 = vst [vmem:[%s16586_s7 + $0x38] sm:$0xff] %v9441_v15  ;;  %v9268_v22 = vmul.f32 1.442695, %v9223_v6  ;;  %v12139_v19 = vpop.f32.mrb[80].mxu1 }
 0x506   : > { %v9272_v5 = vmul.f32 1.442695, %v9225_v3  ;;  %9471 = vst [vmem:[%s16586_s7 + $0x28] sm:$0xff] %v9439_v55  ;;  %v9444_v38 = vadd.f32 %v9412_v12, %v9380_v59  ;;  %v16645_v32 = vadd.f32 %v12139_v19, %v16461_v60  ;;  %v9147_v29 = vpop.f32.mrb[81].mxu1 }
 0x507   : > { %12740 = vpow2.f32 %v9266_v27  ;;  %v16650_v14 = vadd.f32 %v9147_v29, %v16467_v33  ;;  %v12140_v35 = vpop.f32.mrb[82].mxu1 }
 0x508   : > { %v12733_v31 = vpop.eup %12732  ;;  %12742 = vpow2.f32 %v9272_v5  ;;  %9476 = vst [vmem:[%s16586_s7 + $0x50] sm:$0xff] %v9444_v38  ;;  %v9228_v60 = vsub.f32 0.0, %v16645_v32  ;;  %v16656_v24 = vadd.f32 %v12140_v35, %v16471_v28  ;;  %v9150_v7 = vpop.f32.mrb[83].mxu1 }
 0x509   : > { %v12735_v49 = vpop.eup %12734  ;;  %v9378_v52 = vmul.f32 %v12733_v31, %v16567_v41  ;;  %12744 = vpow2.f32 %v9268_v22  ;;  %v9572_v41 = vld [vmem:[#allocation3 + $0x4d0] sm:$0xff]  ;;  %v9226_v11 = vsub.f32 0.0, %v16650_v14 }
 0x50a   : > { %v12737_v46 = vpop.eup %12736  ;;  %v9381_v62 = vmul.f32 %v12735_v49, %v16574_v47  ;;  %v9278_v26 = vmul.f32 1.442695, %v9228_v60  ;;  %v9229_v9 = vsub.f32 0.0, %v16656_v24 }
 0x50b   : > { %v9442_v13 = vadd.f32 %v9410_v40, %v9378_v52  ;;  %v9379_v61 = vmul.f32 %v12737_v46, %v16580_v48  ;;  %v11923_v33 = vpop.f32.mrb[132].mxu0  ;;  %v9274_v58 = vmul.f32 1.442695, %v9226_v11 }
 0x50c   : > { %12182 = vmatmul.mubr.msk.bf16.gmra.mrb[180].mxu1 %vm2631_vm15, %v9557_v4  ;;  %v9445_v47 = vadd.f32 %v9413_v37, %v9381_v62  ;;  %v16661_v4 = vadd.f32 %v9150_v7, %v16478_v2  ;;  %v11924_v1 = vpop.f32.mrb[133].mxu0  ;;  %v12739_v50 = vpop.eup %12738  ;;  %12746 = vpow2.f32 %v9278_v26  ;;  %v9280_v15 = vmul.f32 1.442695, %v9229_v9 }
 0x50d   : > { %12185 = vmatprep.mubr.msk.bf16.mxu1 %vm2631_vm15, %v9562_v36  ;;  %9474 = vst [vmem:[%s16586_s7 + $0x40] sm:$0xff] %v9442_v13  ;;  %v9443_v48 = vadd.f32 %v9411_v39, %v9379_v61  ;;  %v16667_v28 = vadd.f32 %v11924_v1, %v11923_v33  ;;  %v11926_v36 = vpop.f32.mrb[134].mxu0  ;;  %v9320_v55 = vadd.f32 1.0, %v12739_v50  ;;  %12748 = vpow2.f32 %v9274_v58 }
 0x50e   : > { %9477 = vst [vmem:[%s16586_s7 + $0x58] sm:$0xff] %v9445_v47  ;;  %v9227_v16 = vsub.f32 0.0, %v16661_v4  ;;  %v11927_v3 = vpop.f32.mrb[135].mxu0  ;;  %12750 = vpow2.f32 %v9280_v15 }
 0x50f   : > { %9475 = vst [vmem:[%s16586_s7 + $0x48] sm:$0xff] %v9443_v48  ;;  %v16669_v27 = vadd.f32 %v11927_v3, %v11926_v36  ;;  %12752 = vrcp.f32 %v9320_v55  ;;  %v9416_v36 = vld [vmem:[%s13268_s12 + $0x70] sm:$0xff]  ;;  %v9414_v55 = vld [vmem:[%s13268_s12 + $0x60] sm:$0xff] }
 0x510   : > { %v9276_v22 = vmul.f32 1.442695, %v9227_v16 }
 0x511   : > { %v12741_v2 = vpop.eup %12740 }
 0x512   : > { %v12743_v6 = vpop.eup %12742  ;;  %v9318_v5 = vadd.f32 1.0, %v12741_v2  ;;  %v12143_v31 = vpop.f32.mrb[84].mxu1 }
 0x513   : > { %v12745_v21 = vpop.eup %12744  ;;  %v9321_v12 = vadd.f32 1.0, %v12743_v6  ;;  %v16673_v40 = vadd.f32 %v12143_v31, %v16497_v23  ;;  %v9163_v49 = vpop.f32.mrb[85].mxu1 }
 0x514   : > { %12186 = vmatmul.mubr.msk.bf16.gmra.mrb[184].mxu1 %vm2631_vm15, %v9567_v10  ;;  %12754 = vrcp.f32 %v9318_v5  ;;  %v9319_v59 = vadd.f32 1.0, %v12745_v21  ;;  %v16676_v52 = vadd.f32 %v9163_v49, %v16485_v8  ;;  %v12144_v37 = vpop.f32.mrb[86].mxu1 }
 0x515   : > { %12189 = vmatprep.mubr.msk.bf16.mxu1 %vm2631_vm15, %v9572_v41  ;;  %12756 = vrcp.f32 %v9321_v12  ;;  %v9232_v46 = vsub.f32 0.0, %v16673_v40  ;;  %v16680_v38 = vadd.f32 %v12144_v37, %v16501_v34  ;;  %v9166_v62 = vpop.f32.mrb[87].mxu1 }
 0x516   : > { %v11929_v19 = vpop.f32.mrb[136].mxu0  ;;  %12758 = vrcp.f32 %v9319_v59  ;;  %v9230_v10 = vsub.f32 0.0, %v16676_v52  ;;  %v16684_v23 = vadd.f32 %v9166_v62, %v16491_v54  ;;  %v12747_v60 = vpop.eup %12746 }
 0x517   : > { %v11930_v39 = vpop.f32.mrb[137].mxu0  ;;  %12760 = vpow2.f32 %v9276_v22  ;;  %v9286_v13 = vmul.f32 1.442695, %v9232_v46  ;;  %v9233_v61 = vsub.f32 0.0, %v16680_v38  ;;  %v12749_v48 = vpop.eup %12748  ;;  %v9324_v11 = vadd.f32 1.0, %v12747_v60  ;;  %v9417_v22 = vld [vmem:[%s13268_s12 + $0x78] sm:$0xff] }
 0x518   : > { %v16686_v29 = vadd.f32 %v11930_v39, %v11929_v19  ;;  %v11932_v8 = vpop.f32.mrb[138].mxu0  ;;  %v9282_v35 = vmul.f32 1.442695, %v9230_v10  ;;  %v9231_v47 = vsub.f32 0.0, %v16684_v23  ;;  %v12751_v33 = vpop.eup %12750  ;;  %v9322_v26 = vadd.f32 1.0, %v12749_v48  ;;  %v9415_v19 = vld [vmem:[%s13268_s12 + $0x68] sm:$0xff] }
 0x519   : > { %v11933_v41 = vpop.f32.mrb[139].mxu0  ;;  %12762 = vpow2.f32 %v9286_v13  ;;  %v9288_v7 = vmul.f32 1.442695, %v9233_v61  ;;  %v12753_v16 = vpop.eup %12752  ;;  %v9325_v50 = vadd.f32 1.0, %v12751_v33 }
 0x51a   : > { %v16690_v34 = vadd.f32 %v11933_v41, %v11932_v8  ;;  %12764 = vpow2.f32 %v9282_v35  ;;  %v9284_v9 = vmul.f32 1.442695, %v9231_v47  ;;  %v9384_v2 = vmul.f32 %v12753_v16, %v16607_v53  ;;  %v9420_v16 = vld [vmem:[%s13268_s12 + $0x90] sm:$0xff] }
 0x51b   : > { %12766 = vpow2.f32 %v9288_v7 }
 0x51c   : > { %12190 = vmatmul.mubr.msk.bf16.gmra.mrb[188].mxu1 %vm2631_vm15, %v9577_v30  ;;  %12768 = vrcp.f32 %v9324_v11  ;;  %v9448_v49 = vadd.f32 %v9416_v36, %v9384_v2 }
 0x51d   : > { %v12147_v54 = vpop.f32.mrb[88].mxu1  ;;  %12770 = vrcp.f32 %v9322_v26 }
 0x51e   : > { %v16693_v1 = vadd.f32 %v12147_v54, %v16528_v45  ;;  %v9179_v58 = vpop.f32.mrb[89].mxu1  ;;  %v12755_v3 = vpop.eup %12754  ;;  %12772 = vrcp.f32 %v9325_v50  ;;  %9480 = vst [vmem:[%s16586_s7 + $0x70] sm:$0xff] %v9448_v49 }
 0x51f   : > { %v16697_v15 = vadd.f32 %v9179_v58, %v16505_v51  ;;  %v12148_v30 = vpop.f32.mrb[90].mxu1  ;;  %v12757_v21 = vpop.eup %12756  ;;  %v9382_v12 = vmul.f32 %v12755_v3, %v16612_v20  ;;  %12774 = vpow2.f32 %v9284_v9 }
 0x520   : > { %v9236_v6 = vsub.f32 0.0, %v16693_v1  ;;  %v16703_v45 = vadd.f32 %v12148_v30, %v16531_v17  ;;  %v9182_v5 = vpop.f32.mrb[91].mxu1  ;;  %v12759_v59 = vpop.eup %12758  ;;  %v9385_v37 = vmul.f32 %v12757_v21, %v16620_v43 }
 0x521   : > { %v9234_v51 = vsub.f32 0.0, %v16697_v15  ;;  %v16709_v31 = vadd.f32 %v9182_v5, %v16508_v0  ;;  %v12761_v62 = vpop.eup %12760  ;;  %v9446_v20 = vadd.f32 %v9414_v55, %v9382_v12  ;;  %v9383_v39 = vmul.f32 %v12759_v59, %v16626_v44  ;;  %v9418_v55 = vld [vmem:[%s13268_s12 + $0x80] sm:$0xff] }
 0x522   : > { %v11935_v53 = vpop.f32.mrb[140].mxu0  ;;  %v9294_v17 = vmul.f32 1.442695, %v9236_v6  ;;  %v9237_v8 = vsub.f32 0.0, %v16703_v45  ;;  %v9449_v13 = vadd.f32 %v9417_v22, %v9385_v37  ;;  %v9323_v61 = vadd.f32 1.0, %v12761_v62  ;;  %v9421_v22 = vld [vmem:[%s13268_s12 + $0x98] sm:$0xff] }
 0x523   : > { %v11936_v46 = vpop.f32.mrb[141].mxu0  ;;  %v9290_v10 = vmul.f32 1.442695, %v9234_v51  ;;  %v9235_v43 = vsub.f32 0.0, %v16709_v31  ;;  %9478 = vst [vmem:[%s16586_s7 + $0x60] sm:$0xff] %v9446_v20  ;;  %v9447_v35 = vadd.f32 %v9415_v19, %v9383_v39  ;;  %v12763_v44 = vpop.eup %12762 }
 0x524   : > { %v11938_v0 = vpop.f32.mrb[142].mxu0  ;;  %12776 = vpow2.f32 %v9294_v17  ;;  %v9296_v47 = vmul.f32 1.442695, %v9237_v8  ;;  %v16718_v60 = vadd.f32 %v11936_v46, %v11935_v53  ;;  %9481 = vst [vmem:[%s16586_s7 + $0x78] sm:$0xff] %v9449_v13  ;;  %v12765_v11 = vpop.eup %12764  ;;  %v9328_v54 = vadd.f32 1.0, %v12763_v44 }
 0x525   : > { %v11939_v41 = vpop.f32.mrb[143].mxu0  ;;  %12778 = vpow2.f32 %v9290_v10  ;;  %v9292_v7 = vmul.f32 1.442695, %v9235_v43  ;;  %9479 = vst [vmem:[%s16586_s7 + $0x68] sm:$0xff] %v9447_v35  ;;  %v12767_v33 = vpop.eup %12766  ;;  %v9326_v26 = vadd.f32 1.0, %v12765_v11 }
 0x526   : > { %12780 = vrcp.f32 %v9323_v61  ;;  %v16721_v48 = vadd.f32 %v11939_v41, %v11938_v0  ;;  %v12769_v58 = vpop.eup %12768  ;;  %v9329_v36 = vadd.f32 1.0, %v12767_v33  ;;  %v9419_v41 = vld [vmem:[%s13268_s12 + $0x88] sm:$0xff] }
 0x527   : > { %12782 = vpow2.f32 %v9296_v47  ;;  %v12771_v3 = vpop.eup %12770  ;;  %v9388_v2 = vmul.f32 %v12769_v58, %v16645_v32 }
 0x528   : > { %12784 = vpow2.f32 %v9292_v7  ;;  %v12773_v21 = vpop.eup %12772  ;;  %v9386_v12 = vmul.f32 %v12771_v3, %v16650_v14  ;;  %v9424_v3 = vld [vmem:[%s13268_s12 + $0xb0] sm:$0xff] }
 0x529   : > { %v12151_v9 = vpop.f32.mrb[92].mxu1  ;;  %12786 = vrcp.f32 %v9328_v54  ;;  %v12775_v59 = vpop.eup %12774  ;;  %v9452_v32 = vadd.f32 %v9420_v16, %v9388_v2  ;;  %v9389_v49 = vmul.f32 %v12773_v21, %v16656_v24 }
 0x52a   : > { %v9195_v50 = vpop.f32.mrb[93].mxu1  ;;  %v16726_v30 = vadd.f32 %v12151_v9, %v16593_v18  ;;  %12788 = vrcp.f32 %v9326_v26  ;;  %v9450_v19 = vadd.f32 %v9418_v55, %v9386_v12  ;;  %v9327_v17 = vadd.f32 1.0, %v12775_v59  ;;  %v9422_v12 = vld [vmem:[%s13268_s12 + $0xa0] sm:$0xff]  ;;  %v9425_v59 = vld [vmem:[%s13268_s12 + $0xb8] sm:$0xff] }
 0x52b   : > { %v16731_v6 = vadd.f32 %v9195_v50, %v16543_v25  ;;  %v12152_v5 = vpop.f32.mrb[94].mxu1  ;;  %12790 = vrcp.f32 %v9329_v36  ;;  %9484 = vst [vmem:[%s16586_s7 + $0x90] sm:$0xff] %v9452_v32 }
 0x52c   : > { %v9240_v51 = vsub.f32 0.0, %v16726_v30  ;;  %v9198_v53 = vpop.f32.mrb[95].mxu1  ;;  %v16737_v18 = vadd.f32 %v12152_v5, %v16598_v42  ;;  %v9453_v42 = vadd.f32 %v9421_v22, %v9389_v49  ;;  %9482 = vst [vmem:[%s16586_s7 + $0x80] sm:$0xff] %v9450_v19  ;;  %12792 = vrcp.f32 %v9327_v17 }
 0x52d   : > { %v9238_v25 = vsub.f32 0.0, %v16731_v6  ;;  %v16742_v37 = vadd.f32 %v9198_v53, %v16555_v57 }
 0x52e   : > { %v11941_v14 = vpop.f32.mrb[144].mxu0  ;;  %v12777_v62 = vpop.eup %12776  ;;  %v9302_v0 = vmul.f32 1.442695, %v9240_v51  ;;  %v9241_v13 = vsub.f32 0.0, %v16737_v18  ;;  %9485 = vst [vmem:[%s16586_s7 + $0x98] sm:$0xff] %v9453_v42 }
 0x52f   : > { %v11942_v46 = vpop.f32.mrb[145].mxu0  ;;  %v9298_v20 = vmul.f32 1.442695, %v9238_v25  ;;  %v9239_v39 = vsub.f32 0.0, %v16742_v37  ;;  %v12779_v8 = vpop.eup %12778  ;;  %v9332_v57 = vadd.f32 1.0, %v12777_v62  ;;  %v9423_v62 = vld [vmem:[%s13268_s12 + $0xa8] sm:$0xff] }
 0x530   : > { %v16746_v10 = vadd.f32 %v11942_v46, %v11941_v14  ;;  %v11944_v24 = vpop.f32.mrb[146].mxu0  ;;  %v12781_v43 = vpop.eup %12780  ;;  %v9330_v35 = vadd.f32 1.0, %v12779_v8  ;;  %v9304_v55 = vmul.f32 1.442695, %v9241_v13  ;;  %v9428_v13 = vld [vmem:[%s13268_s12 + $0xd0] sm:$0xff] }
 0x531   : > { %v11945_v61 = vpop.f32.mrb[147].mxu0  ;;  %12794 = vpow2.f32 %v9298_v20  ;;  %v11805_v47 = vpop.f32.mrb[96].mxu1  ;;  %v9387_v11 = vmul.f32 %v12781_v43, %v16661_v4  ;;  %v9300_v9 = vmul.f32 1.442695, %v9239_v39  ;;  %v16777_v43 = vld [vmem:[%s17233_s4] ss:$0 sm:$0xff] }
 0x532   : > { %v16752_v44 = vadd.f32 %v11945_v61, %v11944_v24  ;;  %v12783_v7 = vpop.eup %12782  ;;  %12796 = vrcp.f32 %v9332_v57  ;;  %v11806_v54 = vpop.f32.mrb[97].mxu1 }
 0x533   : > { %v12785_v33 = vpop.eup %12784  ;;  %12798 = vrcp.f32 %v9330_v35  ;;  %v9333_v26 = vadd.f32 1.0, %v12783_v7  ;;  %v16755_v58 = vadd.f32 %v11806_v54, %v11805_v47  ;;  %v11808_v16 = vpop.f32.mrb[98].mxu1  ;;  %v9451_v50 = vadd.f32 %v9419_v41, %v9387_v11  ;;  %v9426_v11 = vld [vmem:[%s13268_s12 + $0xc0] sm:$0xff] }
 0x534   : > { %v12787_v36 = vpop.eup %12786  ;;  %v9331_v2 = vadd.f32 1.0, %v12785_v33  ;;  %12800 = vpow2.f32 %v9302_v0  ;;  %v11809_v5 = vpop.f32.mrb[99].mxu1 }
 0x535   : > { %v12789_v4 = vpop.eup %12788  ;;  %v9392_v21 = vmul.f32 %v12787_v36, %v16673_v40  ;;  %12802 = vrcp.f32 %v9333_v26  ;;  %v16760_v22 = vadd.f32 %v11809_v5, %v11808_v16  ;;  %9483 = vst [vmem:[%s16586_s7 + $0x88] sm:$0xff] %v9451_v50  ;;  %v9429_v50 = vld [vmem:[%s13268_s12 + $0xd8] sm:$0xff] }
 0x536   : > { %v12791_v51 = vpop.eup %12790  ;;  %v9390_v53 = vmul.f32 %v12789_v4, %v16676_v52  ;;  %12804 = vrcp.f32 %v9331_v2  ;;  %v9427_v4 = vld [vmem:[%s13268_s12 + $0xc8] sm:$0xff] }
 0x537   : > { %v9456_v32 = vadd.f32 %v9424_v3, %v9392_v21  ;;  %v9393_v49 = vmul.f32 %v12791_v51, %v16680_v38  ;;  %12806 = vpow2.f32 %v9300_v9  ;;  %v12793_v46 = vpop.eup %12792 }
 0x538   : > { %v9454_v25 = vadd.f32 %v9422_v12, %v9390_v53  ;;  %12808 = vpow2.f32 %v9304_v55  ;;  %v9391_v38 = vmul.f32 %v12793_v46, %v16684_v23 }
 0x539   : > { %9488 = vst [vmem:[%s16586_s7 + $0xb0] sm:$0xff] %v9456_v32  ;;  %v9457_v14 = vadd.f32 %v9425_v59, %v9393_v49 }
 0x53a   : > { %v11811_v19 = vpop.f32.mrb[100].mxu1  ;;  %9486 = vst [vmem:[%s16586_s7 + $0xa0] sm:$0xff] %v9454_v25  ;;  %v9455_v7 = vadd.f32 %v9423_v62, %v9391_v38 }
 0x53b   : > { %v11812_v42 = vpop.f32.mrb[101].mxu1  ;;  %v12795_v39 = vpop.eup %12794  ;;  %9489 = vst [vmem:[%s16586_s7 + $0xb8] sm:$0xff] %v9457_v14 }
 0x53c   : > { %v11947_v40 = vpop.f32.mrb[148].mxu0  ;;  %v11813_v24 = vadd.f32 %v11812_v42, %v11811_v19  ;;  %v11814_v8 = vpop.f32.mrb[102].mxu1  ;;  %v9334_v61 = vadd.f32 1.0, %v12795_v39  ;;  %9487 = vst [vmem:[%s16586_s7 + $0xa8] sm:$0xff] %v9455_v7  ;;  %v9430_v39 = vld [vmem:[%s13268_s12 + $0xe0] sm:$0xff]  ;;  %v9432_v7 = vld [vmem:[%s13268_s12 + $0xf0] sm:$0xff] }
 0x53d   : > { %v11948_v17 = vpop.f32.mrb[149].mxu0  ;;  %v12797_v0 = vpop.eup %12796 }
 0x53e   : > { %v16769_v52 = vadd.f32 %v11948_v17, %v11947_v40  ;;  %v11950_v20 = vpop.f32.mrb[150].mxu0  ;;  %v11815_v41 = vpop.f32.mrb[103].mxu1  ;;  %v9396_v23 = vmul.f32 %v12797_v0, %v16693_v1  ;;  %v9964_v54 = vadd.f32 %v11813_v24, %v16777_v43  ;;  %12810 = vrcp.f32 %v9334_v61 }
 0x53f   : > { %v11951_v57 = vpop.f32.mrb[151].mxu0  ;;  %v12799_v47 = vpop.eup %12798  ;;  %v16784_v33 = vadd.f32 %v11815_v41, %v11814_v8 }
 0x540   : > { %v16779_v35 = vadd.f32 %v11951_v57, %v11950_v20  ;;  %v12801_v26 = vpop.eup %12800  ;;  %v9394_v9 = vmul.f32 %v12799_v47, %v16697_v15  ;;  %v9460_v36 = vadd.f32 %v9428_v13, %v9396_v23  ;;  %v16790_v2 = vadd.f32 %v16667_v28, %v9964_v54 }
 0x541   : > { %v12803_v16 = vpop.eup %12802  ;;  %v9336_v3 = vadd.f32 1.0, %v12801_v26 }
 0x542   : > { %v12805_v1 = vpop.eup %12804  ;;  %v9458_v55 = vadd.f32 %v9426_v11, %v9394_v9  ;;  %v9397_v5 = vmul.f32 %v12803_v16, %v16703_v45  ;;  %9492 = vst [vmem:[%s16586_s7 + $0xd0] sm:$0xff] %v9460_v36 }
 0x543   : > { %v12807_v12 = vpop.eup %12806  ;;  %v9395_v15 = vmul.f32 %v12805_v1, %v16709_v31  ;;  %12812 = vrcp.f32 %v9336_v3  ;;  %v11817_v51 = vpop.f32.mrb[104].mxu1  ;;  %v9431_v3 = vld [vmem:[%s13268_s12 + $0xe8] sm:$0xff] }
 0x544   : > { %v11953_v21 = vpop.f32.mrb[152].mxu0  ;;  %v12809_v59 = vpop.eup %12808  ;;  %9490 = vst [vmem:[%s16586_s7 + $0xc0] sm:$0xff] %v9458_v55  ;;  %v9461_v32 = vadd.f32 %v9429_v50, %v9397_v5  ;;  %v9335_v28 = vadd.f32 1.0, %v12807_v12  ;;  %v9433_v5 = vld [vmem:[%s13268_s12 + $0xf8] sm:$0xff] }
 0x545   : > { %v11954_v53 = vpop.f32.mrb[153].mxu0  ;;  %v11818_v49 = vpop.f32.mrb[105].mxu1  ;;  %v9459_v40 = vadd.f32 %v9427_v4, %v9395_v15  ;;  %v9337_v14 = vadd.f32 1.0, %v12809_v59  ;;  %v9967_v15 = vadd.f32 %v16784_v33, %v16777_v43 }
 0x546   : > { %v16797_v25 = vadd.f32 %v11954_v53, %v11953_v21  ;;  %v11956_v45 = vpop.f32.mrb[154].mxu0  ;;  %v11819_v19 = vadd.f32 %v11818_v49, %v11817_v51  ;;  %v11820_v17 = vpop.f32.mrb[106].mxu1  ;;  %9493 = vst [vmem:[%s16586_s7 + $0xd8] sm:$0xff] %v9461_v32  ;;  %12814 = vrcp.f32 %v9335_v28  ;;  %v9956_v21 = vadd.f32 %v16755_v58, %v16777_v43 }
 0x547   : > { %v11957_v46 = vpop.f32.mrb[155].mxu0  ;;  %v11821_v31 = vpop.f32.mrb[107].mxu1  ;;  %9491 = vst [vmem:[%s16586_s7 + $0xc8] sm:$0xff] %v9459_v40  ;;  %12816 = vrcp.f32 %v9337_v14  ;;  %v9959_v32 = vadd.f32 %v16760_v22, %v16777_v43  ;;  %v16834_v22 = vadd.f32 %v16669_v27, %v9967_v15 }
 0x548   : > { %v16800_v62 = vadd.f32 %v11957_v46, %v11956_v45  ;;  %v11822_v42 = vadd.f32 %v11821_v31, %v11820_v17  ;;  %v12811_v20 = vpop.eup %12810  ;;  %v16831_v33 = vadd.f32 %v16614_v56, %v9956_v21 }
 0x549   : > { %v9398_v24 = vmul.f32 %v12811_v20, %v16731_v6  ;;  %v16837_v31 = vadd.f32 %v16631_v63, %v9959_v32 }
 0x54a   : > { %v9975_v56 = vadd.f32 %v11822_v42, %v16777_v43 }
 0x54b   : > { %v11823_v8 = vpop.f32.mrb[108].mxu1  ;;  %v9462_v47 = vadd.f32 %v9430_v39, %v9398_v24  ;;  %v9972_v39 = vadd.f32 %v11819_v19, %v16777_v43 }
 0x54c   : > { %v11959_v38 = vpop.f32.mrb[156].mxu0  ;;  %v11824_v0 = vpop.f32.mrb[109].mxu1  ;;  %v16857_v42 = vadd.f32 %v16690_v34, %v9975_v56 }
 0x54d   : > { %v11960_v57 = vpop.f32.mrb[157].mxu0  ;;  %v12813_v41 = vpop.eup %12812  ;;  %v11825_v23 = vadd.f32 %v11824_v0, %v11823_v8  ;;  %9494 = vst [vmem:[%s16586_s7 + $0xe0] sm:$0xff] %v9462_v47 }
 0x54e   : > { %v16805_v13 = vadd.f32 %v11960_v57, %v11959_v38  ;;  %v11962_v61 = vpop.f32.mrb[158].mxu0  ;;  %v11826_v11 = vpop.f32.mrb[110].mxu1  ;;  %v9400_v26 = vmul.f32 %v12813_v41, %v16726_v30 }
 0x54f   : > { %v11963_v54 = vpop.f32.mrb[159].mxu0  ;;  %v11827_v9 = vpop.f32.mrb[111].mxu1 }
 0x550   : > { %v16809_v16 = vadd.f32 %v11963_v54, %v11962_v61  ;;  %v11828_v6 = vadd.f32 %v11827_v9, %v11826_v11  ;;  %v12815_v36 = vpop.eup %12814  ;;  %v9464_v50 = vadd.f32 %v9432_v7, %v9400_v26 }
 0x551   : > { %v12817_v1 = vpop.eup %12816  ;;  %v9399_v55 = vmul.f32 %v12815_v36, %v16742_v37 }
 0x552   : > { %9496 = vst [vmem:[%s16586_s7 + $0xf0] sm:$0xff] %v9464_v50  ;;  %v9401_v4 = vmul.f32 %v12817_v1, %v16737_v18  ;;  %v9980_v18 = vadd.f32 %v11825_v23, %v16777_v43  ;;  %v9983_v24 = vadd.f32 %v11828_v6, %v16777_v43 }
 0x553   : > { %v9463_v12 = vadd.f32 %v9431_v3, %v9399_v55  ;;  %v11829_v51 = vpop.f32.mrb[112].mxu1 }
 0x554   : > { %v11965_v30 = vpop.f32.mrb[160].mxu0  ;;  %v9465_v59 = vadd.f32 %v9433_v5, %v9401_v4  ;;  %v11830_v37 = vpop.f32.mrb[113].mxu1  ;;  %v16840_v20 = vadd.f32 %v16718_v60, %v9980_v18  ;;  %v16850_v60 = vadd.f32 %v16686_v29, %v9972_v39  ;;  %v16854_v54 = vadd.f32 %v16721_v48, %v9983_v24 }
 0x555   : > { %v11966_v53 = vpop.f32.mrb[161].mxu0  ;;  %9495 = vst [vmem:[%s16586_s7 + $0xe8] sm:$0xff] %v9463_v12  ;;  %v11831_v58 = vadd.f32 %v11830_v37, %v11829_v51  ;;  %v11832_v45 = vpop.f32.mrb[114].mxu1 }
 0x556   : > { %v16823_v28 = vadd.f32 %v11966_v53, %v11965_v30  ;;  %v11968_v49 = vpop.f32.mrb[162].mxu0  ;;  %9497 = vst [vmem:[%s16586_s7 + $0xf8] sm:$0xff] %v9465_v59  ;;  %v11833_v14 = vpop.f32.mrb[115].mxu1 }
 0x557   : > { %v11969_v40 = vpop.f32.mrb[163].mxu0  ;;  %v11834_v46 = vadd.f32 %v11833_v14, %v11832_v45  ;;  %v9988_v6 = vadd.f32 %v11831_v58, %v16777_v43 }
 0x558   : > { %v16828_v17 = vadd.f32 %v11969_v40, %v11968_v49 }
 0x559   : > { %v9991_v48 = vadd.f32 %v11834_v46, %v16777_v43  ;;  %v16870_v12 = vadd.f32 %v16746_v10, %v9988_v6 }
 0x55b   : > { %v11835_v8 = vpop.f32.mrb[116].mxu1  ;;  %v16876_v51 = vadd.f32 %v16752_v44, %v9991_v48 }
 0x55c   : > { %v11971_v38 = vpop.f32.mrb[164].mxu0  ;;  %v11836_v0 = vpop.f32.mrb[117].mxu1 }
 0x55d   : > { %v11972_v57 = vpop.f32.mrb[165].mxu0  ;;  %v11837_v41 = vadd.f32 %v11836_v0, %v11835_v8  ;;  %v11838_v47 = vpop.f32.mrb[118].mxu1 }
 0x55e   : > { %v16845_v61 = vadd.f32 %v11972_v57, %v11971_v38  ;;  %v11974_v27 = vpop.f32.mrb[166].mxu0  ;;  %v11839_v7 = vpop.f32.mrb[119].mxu1 }
 0x55f   : > { %v11975_v63 = vpop.f32.mrb[167].mxu0  ;;  %v9996_v19 = vadd.f32 %v11837_v41, %v16777_v43  ;;  %v11840_v11 = vadd.f32 %v11839_v7, %v11838_v47 }
 0x560   : > { %v16847_v23 = vadd.f32 %v11975_v63, %v11974_v27 }
 0x561   : > { %v16860_v26 = vadd.f32 %v16769_v52, %v9996_v19  ;;  %v9999_v29 = vadd.f32 %v11840_v11, %v16777_v43 }
 0x563   : > { %v16873_v15 = vadd.f32 %v16779_v35, %v9999_v29 }
 0x564   : > { %v11977_v9 = vpop.f32.mrb[168].mxu0  ;;  %v11841_v36 = vpop.f32.mrb[120].mxu1 }
 0x565   : > { %v11978_v50 = vpop.f32.mrb[169].mxu0  ;;  %v11842_v3 = vpop.f32.mrb[121].mxu1 }
 0x566   : > { %v16864_v1 = vadd.f32 %v11978_v50, %v11977_v9  ;;  %v11980_v55 = vpop.f32.mrb[170].mxu0  ;;  %v11843_v5 = vadd.f32 %v11842_v3, %v11841_v36  ;;  %v11844_v4 = vpop.f32.mrb[122].mxu1 }
 0x567   : > { %v11981_v34 = vpop.f32.mrb[171].mxu0  ;;  %v11845_v21 = vpop.f32.mrb[123].mxu1 }
 0x568   : > { %v16867_v30 = vadd.f32 %v11981_v34, %v11980_v55  ;;  %v11846_v52 = vadd.f32 %v11845_v21, %v11844_v4  ;;  %v10004_v59 = vadd.f32 %v11843_v5, %v16777_v43 }
 0x56a   : > { %v10007_v45 = vadd.f32 %v11846_v52, %v16777_v43  ;;  %v16886_v38 = vadd.f32 %v16797_v25, %v10004_v59 }
 0x56c   : > { %v11983_v53 = vpop.f32.mrb[172].mxu0  ;;  %v16893_v57 = vadd.f32 %v16800_v62, %v10007_v45 }
 0x56d   : > { %v11984_v37 = vpop.f32.mrb[173].mxu0 }
 0x56e   : > { %v16879_v18 = vadd.f32 %v11984_v37, %v11983_v53  ;;  %v11986_v58 = vpop.f32.mrb[174].mxu0 }
 0x56f   : > { %v11847_v32 = vpop.f32.mrb[124].mxu1  ;;  %v11987_v14 = vpop.f32.mrb[175].mxu0 }
 0x570   : > { %v11848_v49 = vpop.f32.mrb[125].mxu1  ;;  %v16882_v35 = vadd.f32 %v11987_v14, %v11986_v58 }
 0x571   : > { %v11849_v40 = vadd.f32 %v11848_v49, %v11847_v32  ;;  %v11850_v10 = vpop.f32.mrb[126].mxu1 }
 0x572   : > { %v11851_v46 = vpop.f32.mrb[127].mxu1 }
 0x573   : > { %v10012_v44 = vadd.f32 %v11849_v40, %v16777_v43  ;;  %v11852_v39 = vadd.f32 %v11851_v46, %v11850_v10 }
 0x575   : > { %v10015_v24 = vadd.f32 %v11852_v39, %v16777_v43  ;;  %v16890_v8 = vadd.f32 %v16805_v13, %v10012_v44  ;;  %v11989_v56 = vpop.f32.mrb[176].mxu0 }
 0x576   : > { %v11990_v27 = vpop.f32.mrb[177].mxu0 }
 0x577   : > { %v11853_v0 = vpop.f32.mrb[128].mxu1  ;;  %v16896_v41 = vadd.f32 %v16809_v16, %v10015_v24  ;;  %v11991_v63 = vadd.f32 %v11990_v27, %v11989_v56  ;;  %v11992_v7 = vpop.f32.mrb[178].mxu0 }
 0x578   : > { %v11854_v47 = vpop.f32.mrb[129].mxu1  ;;  %v11993_v11 = vpop.f32.mrb[179].mxu0 }
 0x579   : > { %v11855_v19 = vadd.f32 %v11854_v47, %v11853_v0  ;;  %v11856_v25 = vpop.f32.mrb[130].mxu1  ;;  %v11994_v6 = vadd.f32 %v11993_v11, %v11992_v7 }
 0x57a   : > { %v11857_v9 = vpop.f32.mrb[131].mxu1 }
 0x57b   : > { %v10020_v13 = vadd.f32 %v11855_v19, %v16777_v43  ;;  %v11858_v36 = vadd.f32 %v11857_v9, %v11856_v25 }
 0x57d   : > { %v10023_v62 = vadd.f32 %v11858_v36, %v16777_v43  ;;  %v16901_v50 = vadd.f32 %v16823_v28, %v10020_v13 }
 0x57e   : > { %v11995_v29 = vpop.f32.mrb[180].mxu0 }
 0x57f   : > { %v11859_v3 = vpop.f32.mrb[132].mxu1  ;;  %v11996_v16 = vpop.f32.mrb[181].mxu0  ;;  %v16904_v55 = vadd.f32 %v16828_v17, %v10023_v62 }
 0x580   : > { %v11860_v48 = vpop.f32.mrb[133].mxu1  ;;  %v11997_v5 = vadd.f32 %v11996_v16, %v11995_v29  ;;  %v11998_v4 = vpop.f32.mrb[182].mxu0 }
 0x581   : > { %v11861_v34 = vadd.f32 %v11860_v48, %v11859_v3  ;;  %v11862_v21 = vpop.f32.mrb[134].mxu1  ;;  %v11999_v52 = vpop.f32.mrb[183].mxu0 }
 0x582   : > { %v11863_v53 = vpop.f32.mrb[135].mxu1  ;;  %v12000_v59 = vadd.f32 %v11999_v52, %v11998_v4 }
 0x583   : > { %v10028_v32 = vadd.f32 %v11861_v34, %v16777_v43  ;;  %v11864_v37 = vadd.f32 %v11863_v53, %v11862_v21 }
 0x585   : > { %v10031_v28 = vadd.f32 %v11864_v37, %v16777_v43  ;;  %v16909_v49 = vadd.f32 %v16845_v61, %v10028_v32 }
 0x586   : > { %v12001_v58 = vpop.f32.mrb[184].mxu0 }
 0x587   : > { %v11865_v45 = vpop.f32.mrb[136].mxu1  ;;  %v12002_v17 = vpop.f32.mrb[185].mxu0  ;;  %v16912_v40 = vadd.f32 %v16847_v23, %v10031_v28 }
 0x588   : > { %v11866_v10 = vpop.f32.mrb[137].mxu1  ;;  %v12003_v14 = vadd.f32 %v12002_v17, %v12001_v58  ;;  %v12004_v46 = vpop.f32.mrb[186].mxu0 }
 0x589   : > { %v11867_v44 = vadd.f32 %v11866_v10, %v11865_v45  ;;  %v11868_v39 = vpop.f32.mrb[138].mxu1  ;;  %v12005_v24 = vpop.f32.mrb[187].mxu0 }
 0x58a   : > { %v11869_v56 = vpop.f32.mrb[139].mxu1  ;;  %v12006_v0 = vadd.f32 %v12005_v24, %v12004_v46 }
 0x58b   : > { %v10036_v27 = vadd.f32 %v11867_v44, %v16777_v43  ;;  %v11870_v47 = vadd.f32 %v11869_v56, %v11868_v39 }
 0x58d   : > { %v10039_v61 = vadd.f32 %v11870_v47, %v16777_v43  ;;  %v16917_v7 = vadd.f32 %v16864_v1, %v10036_v27 }
 0x58f   : > { %v11871_v19 = vpop.f32.mrb[140].mxu1  ;;  %v16920_v23 = vadd.f32 %v16867_v30, %v10039_v61 }
 0x590   : > { %v11872_v25 = vpop.f32.mrb[141].mxu1 }
 0x591   : > { %v11873_v11 = vadd.f32 %v11872_v25, %v11871_v19  ;;  %v11874_v9 = vpop.f32.mrb[142].mxu1 }
 0x592   : > { %v11875_v13 = vpop.f32.mrb[143].mxu1 }
 0x593   : > { %v10044_v36 = vadd.f32 %v11873_v11, %v16777_v43  ;;  %v11876_v62 = vadd.f32 %v11875_v13, %v11874_v9 }
 0x595   : > { %v10047_v29 = vadd.f32 %v11876_v62, %v16777_v43  ;;  %v16925_v3 = vadd.f32 %v16879_v18, %v10044_v36 }
 0x597   : > { %v11877_v16 = vpop.f32.mrb[144].mxu1  ;;  %v16928_v1 = vadd.f32 %v16882_v35, %v10047_v29 }
 0x598   : > { %v11878_v48 = vpop.f32.mrb[145].mxu1 }
 0x599   : > { %v11879_v4 = vadd.f32 %v11878_v48, %v11877_v16  ;;  %v11880_v30 = vpop.f32.mrb[146].mxu1 }
 0x59a   : > { %v11881_v34 = vpop.f32.mrb[147].mxu1 }
 0x59b   : > { %v10052_v21 = vadd.f32 %v11879_v4, %v16777_v43  ;;  %v11882_v52 = vadd.f32 %v11881_v34, %v11880_v30 }
 0x59d   : > { %v10055_v53 = vadd.f32 %v11882_v52, %v16777_v43  ;;  %v16932_v32 = vadd.f32 %v11991_v63, %v10052_v21 }
 0x59f   : > { %v11883_v37 = vpop.f32.mrb[148].mxu1  ;;  %v16934_v28 = vadd.f32 %v11994_v6, %v10055_v53 }
 0x5a0   : > { %v11884_v18 = vpop.f32.mrb[149].mxu1 }
 0x5a1   : > { %v11885_v58 = vadd.f32 %v11884_v18, %v11883_v37  ;;  %v11886_v45 = vpop.f32.mrb[150].mxu1 }
 0x5a2   : > { %v11887_v17 = vpop.f32.mrb[151].mxu1 }
 0x5a3   : > { %v10060_v35 = vadd.f32 %v11885_v58, %v16777_v43  ;;  %v11888_v10 = vadd.f32 %v11887_v17, %v11886_v45  ;;  %v12007_v6 = vpop.f32.mrb[188].mxu0 }
 0x5a4   : > { %v12008_v25 = vpop.f32.mrb[189].mxu0 }
 0x5a5   : > { %v10063_v46 = vadd.f32 %v11888_v10, %v16777_v43  ;;  %v16938_v44 = vadd.f32 %v11997_v5, %v10060_v35  ;;  %v12009_v11 = vadd.f32 %v12008_v25, %v12007_v6  ;;  %v12010_v9 = vpop.f32.mrb[190].mxu0 }
 0x5a6   : > { %v12011_v36 = vpop.f32.mrb[191].mxu0 }
 0x5a7   : > { %v11889_v39 = vpop.f32.mrb[152].mxu1  ;;  %v16940_v24 = vadd.f32 %v12000_v59, %v10063_v46  ;;  %v12012_v5 = vadd.f32 %v12011_v36, %v12010_v9 }
 0x5a8   : > { %v11890_v56 = vpop.f32.mrb[153].mxu1 }
 0x5a9   : > { %v11891_v63 = vadd.f32 %v11890_v56, %v11889_v39  ;;  %v11892_v27 = vpop.f32.mrb[154].mxu1 }
 0x5aa   : > { %v11893_v47 = vpop.f32.mrb[155].mxu1 }
 0x5ab   : > { %v10068_v61 = vadd.f32 %v11891_v63, %v16777_v43  ;;  %v11894_v19 = vadd.f32 %v11893_v47, %v11892_v27 }
 0x5ad   : > { %v10071_v13 = vadd.f32 %v11894_v19, %v16777_v43  ;;  %v16944_v62 = vadd.f32 %v12003_v14, %v10068_v61 }
 0x5af   : > { %v11895_v29 = vpop.f32.mrb[156].mxu1  ;;  %v16946_v59 = vadd.f32 %v12006_v0, %v10071_v13 }
 0x5b0   : > { %v11896_v16 = vpop.f32.mrb[157].mxu1 }
 0x5b1   : > { %v11897_v48 = vadd.f32 %v11896_v16, %v11895_v29  ;;  %v11898_v4 = vpop.f32.mrb[158].mxu1 }
 0x5b2   : > { %v11899_v30 = vpop.f32.mrb[159].mxu1 }
 0x5b3   : > { %v10076_v34 = vadd.f32 %v11897_v48, %v16777_v43  ;;  %v11900_v21 = vadd.f32 %v11899_v30, %v11898_v4 }
 0x5b5   : > { %v10079_v52 = vadd.f32 %v11900_v21, %v16777_v43  ;;  %v16950_v53 = vadd.f32 %v12009_v11, %v10076_v34 }
 0x5b7   : > { %v12163_v37 = vpop.f32.mrb[160].mxu1  ;;  %v16952_v18 = vadd.f32 %v12012_v5, %v10079_v52 }
 0x5b8   : > { %v16955_v14 = vadd.f32 %v12163_v37, %v16790_v2  ;;  %v10277_v58 = vpop.f32.mrb[161].mxu1 }
 0x5b9   : > { %v16958_v0 = vadd.f32 %v10277_v58, %v16831_v33  ;;  %v12164_v45 = vpop.f32.mrb[162].mxu1 }
 0x5ba   : > { %v10406_v17 = vsub.f32 0.0, %v16955_v14  ;;  %v16962_v35 = vadd.f32 %v12164_v45, %v16834_v22  ;;  %v10280_v10 = vpop.f32.mrb[163].mxu1 }
 0x5bb   : > { %v10404_v43 = vsub.f32 0.0, %v16958_v0  ;;  %v16966_v46 = vadd.f32 %v10280_v10, %v16837_v31 }
 0x5bc   : > { %v10440_v39 = vmul.f32 1.442695, %v10406_v17  ;;  %v10407_v2 = vsub.f32 0.0, %v16962_v35 }
 0x5bd   : > { %v10436_v56 = vmul.f32 1.442695, %v10404_v43  ;;  %v10405_v63 = vsub.f32 0.0, %v16966_v46 }
 0x5be   : > { %12818 = vpow2.f32 %v10440_v39  ;;  %v10442_v33 = vmul.f32 1.442695, %v10407_v2 }
 0x5bf   : > { %12820 = vpow2.f32 %v10436_v56  ;;  %v10438_v27 = vmul.f32 1.442695, %v10405_v63  ;;  %v12167_v47 = vpop.f32.mrb[164].mxu1 }
 0x5c0   : > { %12822 = vpow2.f32 %v10442_v33  ;;  %v16971_v22 = vadd.f32 %v12167_v47, %v16840_v20  ;;  %v10293_v6 = vpop.f32.mrb[165].mxu1 }
 0x5c1   : > { %12824 = vpow2.f32 %v10438_v27  ;;  %v16974_v31 = vadd.f32 %v10293_v6, %v16850_v60  ;;  %v12168_v61 = vpop.f32.mrb[166].mxu1 }
 0x5c2   : > { %v10410_v19 = vsub.f32 0.0, %v16971_v22  ;;  %v16978_v25 = vadd.f32 %v12168_v61, %v16854_v54  ;;  %v10296_v11 = vpop.f32.mrb[167].mxu1 }
 0x5c3   : > { %v10408_v9 = vsub.f32 0.0, %v16974_v31  ;;  %v16982_v13 = vadd.f32 %v10296_v11, %v16857_v42 }
 0x5c4   : > { %v10448_v36 = vmul.f32 1.442695, %v10410_v19  ;;  %v10411_v20 = vsub.f32 0.0, %v16978_v25 }
 0x5c5   : > { %v10444_v5 = vmul.f32 1.442695, %v10408_v9  ;;  %v10409_v29 = vsub.f32 0.0, %v16982_v13 }
 0x5c6   : > { %12826 = vpow2.f32 %v10448_v36  ;;  %v10450_v60 = vmul.f32 1.442695, %v10411_v20 }
 0x5c7   : > { %12828 = vpow2.f32 %v10444_v5  ;;  %v10446_v16 = vmul.f32 1.442695, %v10409_v29  ;;  %v12171_v48 = vpop.f32.mrb[168].mxu1 }
 0x5c8   : > { %v12819_v4 = vpop.eup %12818  ;;  %12830 = vpow2.f32 %v10450_v60  ;;  %v16987_v54 = vadd.f32 %v12171_v48, %v16860_v26  ;;  %v10309_v30 = vpop.f32.mrb[169].mxu1 }
 0x5c9   : > { %v12821_v34 = vpop.eup %12820  ;;  %v10502_v42 = vadd.f32 1.0, %v12819_v4  ;;  %12832 = vpow2.f32 %v10446_v16  ;;  %v16990_v21 = vadd.f32 %v10309_v30, %v16870_v12  ;;  %v12172_v52 = vpop.f32.mrb[170].mxu1 }
 0x5ca   : > { %v12823_v37 = vpop.eup %12822  ;;  %v10500_v58 = vadd.f32 1.0, %v12821_v34  ;;  %v10414_v45 = vsub.f32 0.0, %v16987_v54  ;;  %v16994_v17 = vadd.f32 %v12172_v52, %v16873_v15  ;;  %v10312_v10 = vpop.f32.mrb[171].mxu1 }
 0x5cb   : > { %v12825_v43 = vpop.eup %12824  ;;  %12834 = vrcp.f32 %v10502_v42  ;;  %v10503_v26 = vadd.f32 1.0, %v12823_v37  ;;  %v10412_v39 = vsub.f32 0.0, %v16990_v21  ;;  %v16998_v2 = vadd.f32 %v10312_v10, %v16876_v51 }
 0x5cc   : > { %12836 = vrcp.f32 %v10500_v58  ;;  %v10501_v12 = vadd.f32 1.0, %v12825_v43  ;;  %v10456_v56 = vmul.f32 1.442695, %v10414_v45  ;;  %v10415_v63 = vsub.f32 0.0, %v16994_v17  ;;  %v11369_v58 = vld [vmem:[%s13268_s12 + $0x110] sm:$0xff] }
 0x5cd   : > { %12838 = vrcp.f32 %v10503_v26  ;;  %v10452_v33 = vmul.f32 1.442695, %v10412_v39  ;;  %v10413_v27 = vsub.f32 0.0, %v16998_v2  ;;  %v11367_v26 = vld [vmem:[%s13268_s12 + $0x100] sm:$0xff] }
 0x5ce   : > { %12840 = vrcp.f32 %v10501_v12  ;;  %v10458_v15 = vmul.f32 1.442695, %v10415_v63 }
 0x5cf   : > { %12842 = vpow2.f32 %v10456_v56  ;;  %v10454_v47 = vmul.f32 1.442695, %v10413_v27  ;;  %v12175_v6 = vpop.f32.mrb[172].mxu1  ;;  %v11370_v56 = vld [vmem:[%s13268_s12 + $0x118] sm:$0xff] }
 0x5d0   : > { %v12827_v61 = vpop.eup %12826  ;;  %12844 = vpow2.f32 %v10452_v33  ;;  %v17003_v19 = vadd.f32 %v12175_v6, %v16890_v8  ;;  %v10325_v51 = vpop.f32.mrb[173].mxu1  ;;  %v11368_v6 = vld [vmem:[%s13268_s12 + $0x108] sm:$0xff] }
 0x5d1   : > { %v12829_v11 = vpop.eup %12828  ;;  %v10506_v9 = vadd.f32 1.0, %v12827_v61  ;;  %12846 = vpow2.f32 %v10458_v15  ;;  %v17006_v36 = vadd.f32 %v10325_v51, %v16886_v38  ;;  %v12176_v20 = vpop.f32.mrb[174].mxu1 }
 0x5d2   : > { %v12831_v5 = vpop.eup %12830  ;;  %v10504_v29 = vadd.f32 1.0, %v12829_v11  ;;  %12848 = vpow2.f32 %v10454_v47  ;;  %v10418_v60 = vsub.f32 0.0, %v17003_v19  ;;  %v17010_v16 = vadd.f32 %v12176_v20, %v16896_v41  ;;  %v10328_v48 = vpop.f32.mrb[175].mxu1 }
 0x5d3   : > { %v12833_v8 = vpop.eup %12832  ;;  %12850 = vrcp.f32 %v10506_v9  ;;  %v10507_v4 = vadd.f32 1.0, %v12831_v5  ;;  %v10416_v30 = vsub.f32 0.0, %v17006_v36  ;;  %v17014_v38 = vadd.f32 %v10328_v48, %v16893_v57 }
 0x5d4   : > { %12852 = vrcp.f32 %v10504_v29  ;;  %v10505_v34 = vadd.f32 1.0, %v12833_v8  ;;  %v10464_v42 = vmul.f32 1.442695, %v10418_v60  ;;  %v10419_v52 = vsub.f32 0.0, %v17010_v16 }
 0x5d5   : > { %v12835_v37 = vpop.eup %12834  ;;  %12854 = vrcp.f32 %v10507_v4  ;;  %v10460_v41 = vmul.f32 1.442695, %v10416_v30  ;;  %v10417_v45 = vsub.f32 0.0, %v17014_v38 }
 0x5d6   : > { %v12837_v10 = vpop.eup %12836  ;;  %v10566_v43 = vmul.f32 %v12835_v37, %v16955_v14  ;;  %12856 = vrcp.f32 %v10505_v34  ;;  %v10466_v57 = vmul.f32 1.442695, %v10419_v52 }
 0x5d7   : > { %v12839_v39 = vpop.eup %12838  ;;  %v10564_v12 = vmul.f32 %v12837_v10, %v16958_v0  ;;  %12858 = vpow2.f32 %v10464_v42  ;;  %v10462_v63 = vmul.f32 1.442695, %v10417_v45  ;;  %v12179_v33 = vpop.f32.mrb[176].mxu1 }
 0x5d8   : > { %v12841_v27 = vpop.eup %12840  ;;  %v10631_v15 = vadd.f32 %v11369_v58, %v10566_v43  ;;  %v10567_v47 = vmul.f32 %v12839_v39, %v16962_v35  ;;  %12860 = vpow2.f32 %v10460_v41  ;;  %v17026_v61 = vadd.f32 %v12179_v33, %v16909_v49  ;;  %v10341_v14 = vpop.f32.mrb[177].mxu1  ;;  %v11373_v58 = vld [vmem:[%s13268_s12 + $0x130] sm:$0xff] }
 0x5d9   : > { %v12843_v51 = vpop.eup %12842  ;;  %v10629_v11 = vadd.f32 %v11367_v26, %v10564_v12  ;;  %v10565_v0 = vmul.f32 %v12841_v27, %v16966_v46  ;;  %12862 = vpow2.f32 %v10466_v57  ;;  %v17030_v9 = vadd.f32 %v10341_v14, %v16901_v50  ;;  %v12180_v20 = vpop.f32.mrb[178].mxu1  ;;  %v11371_v26 = vld [vmem:[%s13268_s12 + $0x120] sm:$0xff]  ;;  %v11374_v12 = vld [vmem:[%s13268_s12 + $0x138] sm:$0xff] }
 0x5da   : > { %v12845_v5 = vpop.eup %12844  ;;  %11401 = vst [vmem:[%s16586_s7 + $0x110] sm:$0xff] %v10631_v15  ;;  %v10632_v35 = vadd.f32 %v11370_v56, %v10567_v47  ;;  %v10510_v29 = vadd.f32 1.0, %v12843_v51  ;;  %12864 = vpow2.f32 %v10462_v63  ;;  %v10422_v49 = vsub.f32 0.0, %v17026_v61  ;;  %v10344_v60 = vpop.f32.mrb[179].mxu1  ;;  %v11372_v47 = vld [vmem:[%s13268_s12 + $0x128] sm:$0xff] }
 0x5db   : > { %v12847_v48 = vpop.eup %12846  ;;  %11399 = vst [vmem:[%s16586_s7 + $0x100] sm:$0xff] %v10629_v11  ;;  %v10630_v8 = vadd.f32 %v11368_v6, %v10565_v0  ;;  %v10508_v46 = vadd.f32 1.0, %v12845_v5  ;;  %v10420_v4 = vsub.f32 0.0, %v17030_v9  ;;  %v17037_v50 = vadd.f32 %v12180_v20, %v16912_v40 }
 0x5dc   : > { %v12849_v30 = vpop.eup %12848  ;;  %11402 = vst [vmem:[%s16586_s7 + $0x118] sm:$0xff] %v10632_v35  ;;  %12866 = vrcp.f32 %v10510_v29  ;;  %v10511_v34 = vadd.f32 1.0, %v12847_v48  ;;  %v10472_v42 = vmul.f32 1.442695, %v10422_v49  ;;  %v17041_v52 = vadd.f32 %v10344_v60, %v16904_v55 }
 0x5dd   : > { %v12851_v37 = vpop.eup %12850  ;;  %11400 = vst [vmem:[%s16586_s7 + $0x108] sm:$0xff] %v10630_v8  ;;  %12868 = vrcp.f32 %v10508_v46  ;;  %v10509_v41 = vadd.f32 1.0, %v12849_v30  ;;  %v10468_v45 = vmul.f32 1.442695, %v10420_v4  ;;  %v10423_v40 = vsub.f32 0.0, %v17037_v50 }
 0x5de   : > { %v12853_v10 = vpop.eup %12852  ;;  %v10570_v43 = vmul.f32 %v12851_v37, %v16971_v22  ;;  %12870 = vrcp.f32 %v10511_v34  ;;  %v10421_v57 = vsub.f32 0.0, %v17041_v52  ;;  %v11377_v37 = vld [vmem:[%s13268_s12 + $0x150] sm:$0xff] }
 0x5df   : > { %v12855_v39 = vpop.eup %12854  ;;  %v10568_v55 = vmul.f32 %v12853_v10, %v16974_v31  ;;  %12872 = vrcp.f32 %v10509_v41  ;;  %v10474_v56 = vmul.f32 1.442695, %v10423_v40  ;;  %v12183_v63 = vpop.f32.mrb[180].mxu1 }
 0x5e0   : > { %v12857_v33 = vpop.eup %12856  ;;  %v10635_v27 = vadd.f32 %v11373_v58, %v10570_v43  ;;  %v10571_v15 = vmul.f32 %v12855_v39, %v16978_v25  ;;  %12874 = vpow2.f32 %v10472_v42  ;;  %v10470_v6 = vmul.f32 1.442695, %v10421_v57  ;;  %v10357_v22 = vpop.f32.mrb[181].mxu1 }
 0x5e1   : > { %v12859_v14 = vpop.eup %12858  ;;  %v10633_v51 = vadd.f32 %v11371_v26, %v10568_v55  ;;  %v10569_v11 = vmul.f32 %v12857_v33, %v16982_v13  ;;  %12876 = vpow2.f32 %v10468_v45  ;;  %v17055_v31 = vadd.f32 %v12183_v63, %v16925_v3  ;;  %v12184_v0 = vpop.f32.mrb[182].mxu1  ;;  %v11376_v33 = vld [vmem:[%s13268_s12 + $0x148] sm:$0xff] }
 0x5e2   : > { %v12861_v20 = vpop.eup %12860  ;;  %11405 = vst [vmem:[%s16586_s7 + $0x130] sm:$0xff] %v10635_v27  ;;  %v10636_v5 = vadd.f32 %v11374_v12, %v10571_v15  ;;  %v10514_v35 = vadd.f32 1.0, %v12859_v14  ;;  %12878 = vpow2.f32 %v10474_v56  ;;  %v17059_v25 = vadd.f32 %v10357_v22, %v16917_v7  ;;  %v10360_v29 = vpop.f32.mrb[183].mxu1 }
 0x5e3   : > { %v12863_v49 = vpop.eup %12862  ;;  %11403 = vst [vmem:[%s16586_s7 + $0x120] sm:$0xff] %v10633_v51  ;;  %v10634_v60 = vadd.f32 %v11372_v47, %v10569_v11  ;;  %v10512_v13 = vadd.f32 1.0, %v12861_v20  ;;  %12880 = vpow2.f32 %v10470_v6  ;;  %v10426_v3 = vsub.f32 0.0, %v17055_v31 }
 0x5e4   : > { %v12865_v48 = vpop.eup %12864  ;;  %11406 = vst [vmem:[%s16586_s7 + $0x138] sm:$0xff] %v10636_v5  ;;  %12882 = vrcp.f32 %v10514_v35  ;;  %v10515_v8 = vadd.f32 1.0, %v12863_v49  ;;  %v10424_v46 = vsub.f32 0.0, %v17059_v25  ;;  %v17066_v4 = vadd.f32 %v12184_v0, %v16928_v1  ;;  %v11375_v1 = vld [vmem:[%s13268_s12 + $0x140] sm:$0xff] }
 0x5e5   : > { %11404 = vst [vmem:[%s16586_s7 + $0x128] sm:$0xff] %v10634_v60  ;;  %12884 = vrcp.f32 %v10512_v13  ;;  %v10513_v7 = vadd.f32 1.0, %v12865_v48  ;;  %v10480_v30 = vmul.f32 1.442695, %v10426_v3  ;;  %v17070_v34 = vadd.f32 %v10360_v29, %v16920_v23  ;;  %v11378_v23 = vld [vmem:[%s13268_s12 + $0x158] sm:$0xff]  ;;  %v11381_v3 = vld [vmem:[%s13268_s12 + $0x170] sm:$0xff] }
 0x5e6   : > { %v12867_v42 = vpop.eup %12866  ;;  %12886 = vrcp.f32 %v10515_v8  ;;  %v10476_v58 = vmul.f32 1.442695, %v10424_v46  ;;  %v10427_v41 = vsub.f32 0.0, %v17066_v4 }
 0x5e7   : > { %v12869_v45 = vpop.eup %12868  ;;  %v10574_v40 = vmul.f32 %v12867_v42, %v16987_v54  ;;  %12888 = vrcp.f32 %v10513_v7  ;;  %v10425_v10 = vsub.f32 0.0, %v17070_v34  ;;  %v12187_v43 = vpop.f32.mrb[184].mxu1  ;;  %v11379_v7 = vld [vmem:[%s13268_s12 + $0x160] sm:$0xff] }
 0x5e8   : > { %v12871_v26 = vpop.eup %12870  ;;  %v10572_v57 = vmul.f32 %v12869_v45, %v16990_v21  ;;  %12890 = vpow2.f32 %v10480_v30  ;;  %v10482_v39 = vmul.f32 1.442695, %v10427_v41  ;;  %v17080_v55 = vadd.f32 %v12187_v43, %v16938_v44  ;;  %v10373_v12 = vpop.f32.mrb[185].mxu1  ;;  %v11382_v41 = vld [vmem:[%s13268_s12 + $0x178] sm:$0xff] }
 0x5e9   : > { %v12873_v56 = vpop.eup %12872  ;;  %v10639_v63 = vadd.f32 %v11377_v37, %v10574_v40  ;;  %v10575_v54 = vmul.f32 %v12871_v26, %v16994_v17  ;;  %12892 = vpow2.f32 %v10476_v58  ;;  %v10478_v27 = vmul.f32 1.442695, %v10425_v10  ;;  %v12188_v15 = vpop.f32.mrb[186].mxu1  ;;  %v11380_v26 = vld [vmem:[%s13268_s12 + $0x168] sm:$0xff] }
 0x5ea   : > { %v12875_v47 = vpop.eup %12874  ;;  %v10637_v6 = vadd.f32 %v11375_v1, %v10572_v57  ;;  %v10573_v21 = vmul.f32 %v12873_v56, %v16998_v2  ;;  %12894 = vpow2.f32 %v10482_v39  ;;  %v10430_v44 = vsub.f32 0.0, %v17080_v55  ;;  %v10376_v22 = vpop.f32.mrb[187].mxu1 }
 0x5eb   : > { %v12877_v14 = vpop.eup %12876  ;;  %11409 = vst [vmem:[%s16586_s7 + $0x150] sm:$0xff] %v10639_v63  ;;  %v10640_v51 = vadd.f32 %v11378_v23, %v10575_v54  ;;  %v10518_v11 = vadd.f32 1.0, %v12875_v47  ;;  %12896 = vpow2.f32 %v10478_v27  ;;  %v17088_v17 = vadd.f32 %v10373_v12, %v16932_v32 }
 0x5ec   : > { %v12879_v0 = vpop.eup %12878  ;;  %11407 = vst [vmem:[%s16586_s7 + $0x140] sm:$0xff] %v10637_v6  ;;  %v10638_v20 = vadd.f32 %v11376_v33, %v10573_v21  ;;  %v10516_v5 = vadd.f32 1.0, %v12877_v14  ;;  %v10488_v2 = vmul.f32 1.442695, %v10430_v44  ;;  %v17092_v35 = vadd.f32 %v12188_v15, %v16940_v24 }
 0x5ed   : > { %v12881_v29 = vpop.eup %12880  ;;  %11410 = vst [vmem:[%s16586_s7 + $0x158] sm:$0xff] %v10640_v51  ;;  %12898 = vrcp.f32 %v10518_v11  ;;  %v10519_v49 = vadd.f32 1.0, %v12879_v0  ;;  %v10428_v60 = vsub.f32 0.0, %v17088_v17  ;;  %v17097_v13 = vadd.f32 %v10376_v22, %v16934_v28  ;;  %v11385_v11 = vld [vmem:[%s13268_s12 + $0x190] sm:$0xff] }
 0x5ee   : > { %v12883_v32 = vpop.eup %12882  ;;  %11408 = vst [vmem:[%s16586_s7 + $0x148] sm:$0xff] %v10638_v20  ;;  %12900 = vrcp.f32 %v10516_v5  ;;  %v10517_v48 = vadd.f32 1.0, %v12881_v29  ;;  %v10431_v8 = vsub.f32 0.0, %v17092_v35  ;;  %v11383_v29 = vld [vmem:[%s13268_s12 + $0x180] sm:$0xff] }
 0x5ef   : > { %v12885_v46 = vpop.eup %12884  ;;  %v10578_v24 = vmul.f32 %v12883_v32, %v17003_v19  ;;  %12902 = vrcp.f32 %v10519_v49  ;;  %v10484_v30 = vmul.f32 1.442695, %v10428_v60  ;;  %v10429_v42 = vsub.f32 0.0, %v17097_v13  ;;  %v12191_v37 = vpop.f32.mrb[188].mxu1 }
 0x5f0   : > { %v12887_v28 = vpop.eup %12886  ;;  %v10576_v58 = vmul.f32 %v12885_v46, %v17006_v36  ;;  %12904 = vrcp.f32 %v10517_v48  ;;  %v10490_v45 = vmul.f32 1.442695, %v10431_v8  ;;  %v17108_v40 = vadd.f32 %v12191_v37, %v16950_v53  ;;  %v10389_v1 = vpop.f32.mrb[189].mxu1  ;;  %v11384_v46 = vld [vmem:[%s13268_s12 + $0x188] sm:$0xff] }
 0x5f1   : > { %v12889_v10 = vpop.eup %12888  ;;  %v10643_v19 = vadd.f32 %v11381_v3, %v10578_v24  ;;  %v10579_v43 = vmul.f32 %v12887_v28, %v17010_v16  ;;  %12906 = vpow2.f32 %v10488_v2  ;;  %v10486_v57 = vmul.f32 1.442695, %v10429_v42  ;;  %v12192_v23 = vpop.f32.mrb[190].mxu1 }
 0x5f2   : > { %v12891_v39 = vpop.eup %12890  ;;  %v10641_v12 = vadd.f32 %v11379_v7, %v10576_v58  ;;  %v10577_v36 = vmul.f32 %v12889_v10, %v17014_v38  ;;  %12908 = vpow2.f32 %v10484_v30  ;;  %v10434_v53 = vsub.f32 0.0, %v17108_v40  ;;  %v10392_v56 = vpop.f32.mrb[191].mxu1 }
 0x5f3   : > { %v12893_v63 = vpop.eup %12892  ;;  %11413 = vst [vmem:[%s16586_s7 + $0x170] sm:$0xff] %v10643_v19  ;;  %v10644_v54 = vadd.f32 %v11382_v41, %v10579_v43  ;;  %v10522_v33 = vadd.f32 1.0, %v12891_v39  ;;  %12910 = vpow2.f32 %v10490_v45  ;;  %v17116_v16 = vadd.f32 %v10389_v1, %v16944_v62  ;;  %v11390_v39 = vld [vmem:[%s13268_s12 + $0x1b8] sm:$0xff] }
 0x5f4   : > { %v12895_v27 = vpop.eup %12894  ;;  %11411 = vst [vmem:[%s16586_s7 + $0x160] sm:$0xff] %v10641_v12  ;;  %v10642_v15 = vadd.f32 %v11380_v26, %v10577_v36  ;;  %v10520_v47 = vadd.f32 1.0, %v12893_v63  ;;  %12912 = vpow2.f32 %v10486_v57  ;;  %v10496_v38 = vmul.f32 1.442695, %v10434_v53  ;;  %v11387_v26 = vld [vmem:[%s13268_s12 + $0x1a0] sm:$0xff] }
 0x5f5   : > { %v12897_v6 = vpop.eup %12896  ;;  %11414 = vst [vmem:[%s16586_s7 + $0x178] sm:$0xff] %v10644_v54  ;;  %12914 = vrcp.f32 %v10522_v33  ;;  %v10523_v21 = vadd.f32 1.0, %v12895_v27  ;;  %v10432_v44 = vsub.f32 0.0, %v17116_v16  ;;  %v17122_v22 = vadd.f32 %v12192_v23, %v16952_v18 }
 0x5f6   : > { %11412 = vst [vmem:[%s16586_s7 + $0x168] sm:$0xff] %v10642_v15  ;;  %12916 = vrcp.f32 %v10520_v47  ;;  %v10521_v62 = vadd.f32 1.0, %v12897_v6  ;;  %v17126_v14 = vadd.f32 %v10392_v56, %v16946_v59  ;;  %v11386_v59 = vld [vmem:[%s13268_s12 + $0x198] sm:$0xff]  ;;  %v11388_v56 = vld [vmem:[%s13268_s12 + $0x1a8] sm:$0xff] }
 0x5f7   : > { %v12899_v51 = vpop.eup %12898  ;;  %12918 = vrcp.f32 %v10523_v21  ;;  %v10492_v0 = vmul.f32 1.442695, %v10432_v44  ;;  %v10435_v20 = vsub.f32 0.0, %v17122_v22  ;;  %v11393_v44 = vld [vmem:[%s13268_s12 + $0x1d0] sm:$0xff] }
 0x5f8   : > { %v12901_v5 = vpop.eup %12900  ;;  %v10582_v2 = vmul.f32 %v12899_v51, %v17026_v61  ;;  %12920 = vrcp.f32 %v10521_v62  ;;  %v10433_v18 = vsub.f32 0.0, %v17126_v14 }
 0x5f9   : > { %v12903_v49 = vpop.eup %12902  ;;  %v10580_v60 = vmul.f32 %v12901_v5, %v17030_v9  ;;  %12922 = vpow2.f32 %v10496_v38  ;;  %v10498_v32 = vmul.f32 1.442695, %v10435_v20  ;;  %v11394_v5 = vld [vmem:[%s13268_s12 + $0x1d8] sm:$0xff] }
 0x5fa   : > { %v12905_v3 = vpop.eup %12904  ;;  %v10647_v48 = vadd.f32 %v11385_v11, %v10582_v2  ;;  %v10583_v8 = vmul.f32 %v12903_v49, %v17037_v50  ;;  %12924 = vpow2.f32 %v10492_v0  ;;  %v10494_v61 = vmul.f32 1.442695, %v10433_v18  ;;  %v11391_v11 = vld [vmem:[%s13268_s12 + $0x1c0] sm:$0xff]  ;;  %v11392_v49 = vld [vmem:[%s13268_s12 + $0x1c8] sm:$0xff] }
 0x5fb   : > { %v12907_v24 = vpop.eup %12906  ;;  %v10645_v7 = vadd.f32 %v11383_v29, %v10580_v60  ;;  %v10581_v30 = vmul.f32 %v12905_v3, %v17041_v52  ;;  %12926 = vpow2.f32 %v10498_v32  ;;  %v11389_v52 = vld [vmem:[%s13268_s12 + $0x1b0] sm:$0xff] }
 0x5fc   : > { %v12909_v9 = vpop.eup %12908  ;;  %11417 = vst [vmem:[%s16586_s7 + $0x190] sm:$0xff] %v10647_v48  ;;  %v10648_v42 = vadd.f32 %v11386_v59, %v10583_v8  ;;  %v10526_v37 = vadd.f32 1.0, %v12907_v24  ;;  %12928 = vpow2.f32 %v10494_v61  ;;  %v11397_v3 = vld [vmem:[%s13268_s12 + $0x1f0] sm:$0xff]  ;;  %v11395_v8 = vld [vmem:[%s13268_s12 + $0x1e0] sm:$0xff] }
 0x5fd   : > { %v12911_v28 = vpop.eup %12910  ;;  %11415 = vst [vmem:[%s16586_s7 + $0x180] sm:$0xff] %v10645_v7  ;;  %v10646_v50 = vadd.f32 %v11384_v46, %v10581_v30  ;;  %v10524_v58 = vadd.f32 1.0, %v12909_v9  ;;  %v11396_v9 = vld [vmem:[%s13268_s12 + $0x1e8] sm:$0xff] }
 0x5fe   : > { %v12913_v41 = vpop.eup %12912  ;;  %11418 = vst [vmem:[%s16586_s7 + $0x198] sm:$0xff] %v10648_v42  ;;  %12930 = vrcp.f32 %v10526_v37  ;;  %v10527_v45 = vadd.f32 1.0, %v12911_v28 }
 0x5ff   : > { %v12915_v1 = vpop.eup %12914  ;;  %11416 = vst [vmem:[%s16586_s7 + $0x188] sm:$0xff] %v10646_v50  ;;  %12932 = vrcp.f32 %v10524_v58  ;;  %v10525_v10 = vadd.f32 1.0, %v12913_v41 }
 0x600   : > { %v12917_v19 = vpop.eup %12916  ;;  %v10586_v43 = vmul.f32 %v12915_v1, %v17055_v31  ;;  %12934 = vrcp.f32 %v10527_v45 }
 0x601   : > { %v12919_v57 = vpop.eup %12918  ;;  %v10584_v23 = vmul.f32 %v12917_v19, %v17059_v25  ;;  %12936 = vrcp.f32 %v10525_v10 }
 0x602   : > { %v12921_v12 = vpop.eup %12920  ;;  %v10651_v36 = vadd.f32 %v11389_v52, %v10586_v43  ;;  %v10587_v53 = vmul.f32 %v12919_v57, %v17066_v4 }
 0x603   : > { %v12923_v63 = vpop.eup %12922  ;;  %v10649_v54 = vadd.f32 %v11387_v26, %v10584_v23  ;;  %v10585_v33 = vmul.f32 %v12921_v12, %v17070_v34 }
 0x604   : > { %v12925_v31 = vpop.eup %12924  ;;  %11421 = vst [vmem:[%s16586_s7 + $0x1b0] sm:$0xff] %v10651_v36  ;;  %v10652_v27 = vadd.f32 %v11390_v39, %v10587_v53  ;;  %v10530_v15 = vadd.f32 1.0, %v12923_v63 }
 0x605   : > { %v12927_v47 = vpop.eup %12926  ;;  %11419 = vst [vmem:[%s16586_s7 + $0x1a0] sm:$0xff] %v10649_v54  ;;  %v10650_v25 = vadd.f32 %v11388_v56, %v10585_v33  ;;  %v10528_v38 = vadd.f32 1.0, %v12925_v31 }
 0x606   : > { %v12929_v6 = vpop.eup %12928  ;;  %11422 = vst [vmem:[%s16586_s7 + $0x1b8] sm:$0xff] %v10652_v27  ;;  %12938 = vrcp.f32 %v10530_v15  ;;  %v10531_v4 = vadd.f32 1.0, %v12927_v47 }
 0x607   : > { %11420 = vst [vmem:[%s16586_s7 + $0x1a8] sm:$0xff] %v10650_v25  ;;  %12940 = vrcp.f32 %v10528_v38  ;;  %v10529_v21 = vadd.f32 1.0, %v12929_v6 }
 0x608   : > { %v12931_v34 = vpop.eup %12930  ;;  %12942 = vrcp.f32 %v10531_v4 }
 0x609   : > { %v12933_v62 = vpop.eup %12932  ;;  %v10590_v51 = vmul.f32 %v12931_v34, %v17080_v55  ;;  %12944 = vrcp.f32 %v10529_v21 }
 0x60a   : > { %v12935_v0 = vpop.eup %12934  ;;  %v10588_v20 = vmul.f32 %v12933_v62, %v17088_v17 }
 0x60b   : > { %v12937_v2 = vpop.eup %12936  ;;  %v10655_v29 = vadd.f32 %v11393_v44, %v10590_v51  ;;  %v10591_v18 = vmul.f32 %v12935_v0, %v17092_v35 }
 0x60c   : > { %v10653_v60 = vadd.f32 %v11391_v11, %v10588_v20  ;;  %v10589_v55 = vmul.f32 %v12937_v2, %v17097_v13  ;;  %v11398_v13 = vld [vmem:[%s13268_s12 + $0x1f8] sm:$0xff]  ;;  %s13010_s12 = scalar_lea.vmem %s17182_s10, 8192 }
 0x60d   : > { %11425 = vst [vmem:[%s16586_s7 + $0x1d0] sm:$0xff] %v10655_v29  ;;  %v10656_v59 = vadd.f32 %v11394_v5, %v10591_v18  ;;  %p13011_p4 = scmp.ne.s32.totalorder %s17182_s10, %s13010_s12  ;;  %p13018_p13 = scmp.lt.s32.totalorder %s13016_s11, %s13010_s12 }
 0x60e   : > { %11423 = vst [vmem:[%s16586_s7 + $0x1c0] sm:$0xff] %v10653_v60  ;;  %v10654_v32 = vadd.f32 %v11392_v49, %v10589_v55 }
 0x60f   : > { %11426 = vst [vmem:[%s16586_s7 + $0x1d8] sm:$0xff] %v10656_v59  ;;  %p13012_p6 = pnand %p13011_p4, %p13214_p12  ;;  %p13019_p3 = por %p13018_p13, %p13017_p10 }
 0x610   : > { %v12939_v17 = vpop.eup %12938  ;;  %11424 = vst [vmem:[%s16586_s7 + $0x1c8] sm:$0xff] %v10654_v32 }
 0x611   : > { %v12941_v48 = vpop.eup %12940  ;;  %v10594_v35 = vmul.f32 %v12939_v17, %v17108_v40  ;;  %p13013_p8 = pneg %p13012_p6 }
 0x612   : > { %v12943_v46 = vpop.eup %12942  ;;  %v10592_v61 = vmul.f32 %v12941_v48, %v17116_v16 }
 0x613   : > { %v12945_v24 = vpop.eup %12944  ;;  %v10659_v7 = vadd.f32 %v11397_v3, %v10594_v35  ;;  %v10595_v30 = vmul.f32 %v12943_v46, %v17122_v22  ;;  %p13020_p7 = pnand %p13019_p3, %p13013_p8 }
 0x614   : > { %v10657_v42 = vadd.f32 %v11395_v8, %v10592_v61  ;;  %v10593_v40 = vmul.f32 %v12945_v24, %v17126_v14 }
 0x615   : > { %11429 = vst [vmem:[%s16586_s7 + $0x1f0] sm:$0xff] %v10659_v7  ;;  %v10660_v37 = vadd.f32 %v11398_v13, %v10595_v30 }
 0x616   : > { %11427 = vst [vmem:[%s16586_s7 + $0x1e0] sm:$0xff] %v10657_v42  ;;  %v10658_v16 = vadd.f32 %v11396_v9, %v10593_v40 }
 0x617   : > { %11430 = vst [vmem:[%s16586_s7 + $0x1f8] sm:$0xff] %v10660_v37 }
 0x618   : > { %11428 = vst [vmem:[%s16586_s7 + $0x1e8] sm:$0xff] %v10658_v16 }
 0x619   : > { %13023 = shalt.err (!%p13020_p7)
}
 0x61a   : > { %s13024_s26 = scalar_lea.hbm %s17180_s28, 8192  ;;  %s13028_s7 = scalar_lea.hbm %s17234_s5, 16384 }
 0x61b   : > { %p13025_p9 = scmp.ne.s32.totalorder %s17180_s28, %s13024_s26  ;;  %p13029_p5 = scmp.lt.u32.totalorder %s17180_s28, %s17234_s5 }
 0x61c   : > { %p13030_p11 = scmp.lt.u32.totalorder %s13028_s7, %s13024_s26  ;;  %p13032_p4 = scmp.lt.u32.totalorder %s13024_s26, %s17180_s28 }
 0x61d   : > { %p13026_p2 = pnand %p13025_p9, %p13214_p12 }
 0x61e   : > { %p13031_p1 = por %p13030_p11, %p13029_p5 }
 0x61f   : > { %p13027_p0 = pneg %p13026_p2 }
 0x620   : > { %p13033_p6 = por %p13032_p4, %p13031_p1 }
 0x622   : > { %p13034_p8 = pnand %p13033_p6, %p13027_p0 }
 0x624   : > { %13037 = shalt.err (!%p13034_p8)
}
 0x625   : > { %s13091_s15 = smov 128   ;;  %s13092_s29 = smov 8  }
 0x626   : > { %12199 = dma.vmem_to_hbm [thread:$0]  (%p13214_p12), %s17182_s10, 8192, %s17180_s28, %s10695_s22, %s13091_s15, %s13091_s15, %s13092_s29  }
 0x627 PF: > { %s10724_s13 = sand.u32 1, %s13068_s18   ;;  %p17414_p10 = scmp.ne.s32.totalorder %s17245_s25, 0 }
 0x628   : > { %p17415_p13 = scmp.ge.s32.totalorder %s13080_s21, 2  ;;  %s10725_s12 = scalar_lea.sflag [#allocation6], %s10724_s13 }
 0x62a   : > { %p12210_p3 = pnand %p17415_p13, %p17414_p10 }
 0x62c   : > { %13063 = dma.done.wait (!%p12210_p3), %s10725_s12, 8192  }
 0x62d   : > { %13065 = vsyncadd (!%p12210_p3), %s10725_s12, 4294959104  ;;  %p19_p7 = scmp.ge.s32.totalorder %s13179_s30, 4   ;;  %s17416_s18 = smov %s13072_s19 }
 0x62e   : > { %s17417_s19 = smov %s13076_s20  ;;  %s17418_s20 = smov %s13210_s8 }
 0x62f   : > { %s17419_s21 = smov %s13179_s30  ;;  %21 = sbr.rel (!%p19_p7) target bundleno = 6 (0x6), region = 94 }
 0x636   :  { %10730 = vsyncpa [#allocation5], 1 }
 0x637   :  { %10732 = vsyncpa [#allocation5 + $0x1], 1 }
 0x638   :  { %10733 = vsyncpa [#allocation8], 1 }
 0x639   :  { %10734 = vsyncpa [#allocation6], 1 }
 0x63a   :  { %10736 = vsyncpa [#allocation6 + $0x1], 1 }

</bundles_post_ra>
